<compile_context>
chip_gen: v7x
topology: tpu7x:2x2x1
jax: 0.10.0
libtpu: 0.0.40
codegen_flags: <defaults>
</compile_context>

<pallas_src>
import functools

import jax
import jax.numpy as jnp
from jax.experimental import pallas as pl
from jax.experimental.pallas import tpu as pltpu


def _round_up(x, m):
    return ((x + m - 1) // m) * m


# ----------------------------------------------------------------------------
# Pallas tiled matmul + bias + activation (MXU hot path)
#   grid = (M tiles, N tiles, K tiles); K is the reduction axis (last,
#   "arbitrary"); bf16 operands, f32 accumulation in VMEM scratch, output
#   (bf16 by default, f32 where numerics matter) written only on the last K step.
# ----------------------------------------------------------------------------
def _matmul_kernel(a_ref, b_ref, bias_ref, o_ref, acc_ref, *, activation):
    k = pl.program_id(2)
    d = jnp.dot(a_ref[...], b_ref[...], preferred_element_type=jnp.float32)

    @pl.when(k == 0)
    def _():
        acc_ref[...] = d                      # no zero-init + add on step 0

    @pl.when(k > 0)
    def _():
        acc_ref[...] += d

    @pl.when(k == pl.num_programs(2) - 1)
    def _():
        r = acc_ref[...] + bias_ref[...]      # f32 epilogue
        if activation == "relu":
            r = jnp.maximum(r, 0.0)
        elif activation == "sigmoid":
            r = jax.nn.sigmoid(r)             # exact; stays in [0, 1]
        o_ref[...] = r.astype(o_ref.dtype)


def matmul_bias_act(a, b, bias, activation="none", out_dtype=jnp.bfloat16):
    """out = act(a @ b + bias); a:(M,K) b:(K,N) bias:(N,)."""
    M, K = a.shape
    _, N = b.shape

    # bf16 MXU operands; cast BEFORE padding so any pad copy is half-width.
    a = a.astype(jnp.bfloat16)
    b = b.astype(jnp.bfloat16)

    M8 = _round_up(M, 8)
    bm = min(M8, 512)
    if M8 > 8:
        # keep >=2 M tiles so v7x's second TensorCore gets work on the
        # "parallel" axis (harmless on v5e/v6e).
        bm = min(bm, max(8, _round_up(M8 // 2, 8)))
    M_pad = _round_up(M8, bm)

    K128 = _round_up(K, 128)
    bk = min(K128, 2048)                      # fewer K grid steps
    K_pad = _round_up(K128, bk)

    N128 = _round_up(N, 128)
    bn = min(N128, 512)
    N_pad = _round_up(N128, bn)

    if (M_pad, K_pad) != (M, K):
        a = jnp.pad(a, ((0, M_pad - M), (0, K_pad - K)))
    if (K_pad, N_pad) != (K, N):
        b = jnp.pad(b, ((0, K_pad - K), (0, N_pad - N)))
    bias_p = bias.astype(jnp.float32).reshape(1, -1)
    if N_pad != N:
        bias_p = jnp.pad(bias_p, ((0, 0), (0, N_pad - N)))

    grid = (M_pad // bm, N_pad // bn, K_pad // bk)

    out = pl.pallas_call(
        functools.partial(_matmul_kernel, activation=activation),
        out_shape=jax.ShapeDtypeStruct((M_pad, N_pad), out_dtype),
        grid_spec=pltpu.PrefetchScalarGridSpec(
            num_scalar_prefetch=0,
            grid=grid,
            in_specs=[
                pl.BlockSpec((bm, bk), lambda i, j, k: (i, k)),
                pl.BlockSpec((bk, bn), lambda i, j, k: (k, j)),
                pl.BlockSpec((1, bn), lambda i, j, k: (0, j)),
            ],
            out_specs=pl.BlockSpec((bm, bn), lambda i, j, k: (i, j)),
            scratch_shapes=[pltpu.VMEM((bm, bn), jnp.float32)],
        ),
        compiler_params=pltpu.CompilerParams(
            dimension_semantics=("parallel", "parallel", "arbitrary"),
            vmem_limit_bytes=32 * 1024 * 1024),
    )(a, b, bias_p)

    if (M_pad, N_pad) != (M, N):
        out = out[:M, :N]
    return out


# ----------------------------------------------------------------------------
# Conv / ConvTranspose via im2col (glue) + Pallas matmul (hot path)
# ----------------------------------------------------------------------------
def _im2col(x_nhwc, k, stride):
    """x already padded. Returns (N*Ho*Wo, k*k*C) with (kh, kw, c) column order."""
    N, H, W, C = x_nhwc.shape
    Ho = (H - k) // stride + 1
    Wo = (W - k) // stride + 1
    taps = []
    for kh in range(k):
        for kw in range(k):
            taps.append(x_nhwc[:, kh:kh + stride * Ho:stride,
                               kw:kw + stride * Wo:stride, :])
    p = jnp.stack(taps, axis=3)               # (N, Ho, Wo, k*k, C)
    return p.reshape(N * Ho * Wo, k * k * C), (N, Ho, Wo)


def conv2d(x_nhwc, w_oihw, bias, stride, pad, activation,
           out_dtype=jnp.bfloat16):
    # TODO(synk): fold im2col into the Pallas matmul (tap index on the reduction
    # grid + strided-window A reads) to remove the k*k HBM expansion per layer.
    C_out, C_in, k, _ = w_oihw.shape
    x = x_nhwc.astype(jnp.bfloat16)           # no-op after the first layer
    xp = jnp.pad(x, ((0, 0), (pad, pad), (pad, pad), (0, 0)))
    cols, (N, Ho, Wo) = _im2col(xp, k, stride)
    w_mat = jnp.transpose(w_oihw, (2, 3, 1, 0)).reshape(k * k * C_in, C_out)
    out = matmul_bias_act(cols, w_mat, bias, activation, out_dtype=out_dtype)
    return out.reshape(N, Ho, Wo, C_out)


def conv_transpose2d(x_nhwc, w_iohw, bias, activation,
                     out_dtype=jnp.bfloat16, combined=None):
    """ConvTranspose2d(kernel=4, stride=2, padding=1) via sub-pixel (phase)
    decomposition.  Output pixel (2*qy+py, 2*qx+px) sums input
    xp[qy+py+ty, qx+px+tx] * w[:, :, 3-py-2*ty, 3-px-2*tx], ty,tx in {0,1}
    (xp = input padded by 1).  Two lowering modes:
      * per-phase: four stride-1 2x2 convs (used when Cout is large),
      * combined: one matmul over the shared 3x3 tap footprint with a
        (9*Cin, 4*Cout) weight (used when 4*Cout <= 128, i.e. the final layer,
        to avoid 4x lane-padding waste and 4 launches).
    Output is assembled with a single lane-dense pixel-shuffle."""
    C_in, C_out, k, _ = w_iohw.shape
    assert k == 4
    N, H, W, _ = x_nhwc.shape
    if combined is None:
        combined = (4 * C_out <= 128)

    x = x_nhwc.astype(jnp.bfloat16)           # no-op after the first layer
    xp = jnp.pad(x, ((0, 0), (1, 1), (1, 1), (0, 0)))

    if combined:
        # A over the shared 3x3 footprint, W zero-filled for unused taps/phase.
        taps = [xp[:, dy:dy + H, dx:dx + W, :]
                for dy in range(3) for dx in range(3)]
        a = jnp.stack(taps, axis=3).reshape(N * H * W, 9 * C_in)
        w_comb = jnp.zeros((3, 3, C_in, 2, 2, C_out), w_iohw.dtype)
        for py in range(2):
            for px in range(2):
                for ty in range(2):
                    for tx in range(2):
                        w_comb = w_comb.at[py + ty, px + tx, :, py, px, :].set(
                            w_iohw[:, :, 3 - py - 2 * ty, 3 - px - 2 * tx])
        w_mat = w_comb.reshape(9 * C_in, 4 * C_out)
        b_comb = jnp.tile(bias, 4)
        y = matmul_bias_act(a, w_mat, b_comb, activation, out_dtype=out_dtype)
        y = y.reshape(N, H, W, 2, 2, C_out)               # [..., py, px, c]
    else:
        phases = []
        for py in range(2):
            for px in range(2):
                taps = [xp[:, py + ty:py + ty + H, px + tx:px + tx + W, :]
                        for ty in range(2) for tx in range(2)]
                a = jnp.stack(taps, axis=3).reshape(N * H * W, 4 * C_in)
                w_sub = jnp.stack(
                    [jnp.stack([w_iohw[:, :, 3 - py - 2 * ty, 3 - px - 2 * tx]
                                for tx in range(2)], axis=0)
                     for ty in range(2)], axis=0)         # (ty, tx, Cin, Cout)
                w_mat = w_sub.reshape(4 * C_in, C_out)
                yp = matmul_bias_act(a, w_mat, bias, activation,
                                     out_dtype=out_dtype)
                phases.append(yp.reshape(N, H, W, C_out))
        y = jnp.stack(phases, axis=3).reshape(N, H, W, 2, 2, C_out)

    # pixel-shuffle: one lane-dense transpose instead of 4 stride-2 scatters.
    return y.transpose(0, 1, 3, 2, 4, 5).reshape(N, 2 * H, 2 * W, C_out)


# ----------------------------------------------------------------------------
# VAE forward
# ----------------------------------------------------------------------------
def init_params(key, image_size, latent_dim):
    hs = image_size // 16
    flat = 512 * hs * hs
    params = {}
    ks = jax.random.split(key, 16)
    ki = iter(ks)

    def w(shape, fan_in):
        return (jax.random.normal(next(ki), shape, jnp.float32)
                / jnp.sqrt(float(fan_in)))

    # encoder convs: weight (C_out, C_in, 4, 4)
    enc = [(3, 64), (64, 128), (128, 256), (256, 512)]
    for i, (ci, co) in enumerate(enc, 1):
        params[f"enc{i}_w"] = w((co, ci, 4, 4), ci * 16)
        params[f"enc{i}_b"] = jnp.zeros((co,), jnp.float32)

    params["fc_mu_w"] = w((flat, latent_dim), flat)
    params["fc_mu_b"] = jnp.zeros((latent_dim,), jnp.float32)
    params["fc_logvar_w"] = w((flat, latent_dim), flat)
    params["fc_logvar_b"] = jnp.zeros((latent_dim,), jnp.float32)

    params["dec_fc_w"] = w((latent_dim, flat), latent_dim)
    params["dec_fc_b"] = jnp.zeros((flat,), jnp.float32)

    # decoder transposed convs: weight (C_in, C_out, 4, 4)
    dec = [(512, 256), (256, 128), (128, 64), (64, 3)]
    for i, (ci, co) in enumerate(dec, 1):
        params[f"dec{i}_w"] = w((ci, co, 4, 4), ci * 16)
        params[f"dec{i}_b"] = jnp.zeros((co,), jnp.float32)
    return params


def vae_forward(params, x_nchw, eps, image_size, latent_dim):
    hs = image_size // 16
    B = x_nchw.shape[0]

    # ----- encode -----
    h = jnp.transpose(x_nchw, (0, 2, 3, 1))                    # NCHW -> NHWC
    for i in range(1, 5):
        h = conv2d(h, params[f"enc{i}_w"], params[f"enc{i}_b"], 2, 1, "relu")
    # flatten in PyTorch (C,H,W) order
    h_flat = jnp.transpose(h, (0, 3, 1, 2)).reshape(B, -1)

    # fused fc_mu + fc_logvar (single matmul, shared A read), f32 output
    w_ml = jnp.concatenate([params["fc_mu_w"], params["fc_logvar_w"]], axis=1)
    b_ml = jnp.concatenate([params["fc_mu_b"], params["fc_logvar_b"]], axis=0)
    ml = matmul_bias_act(h_flat, w_ml, b_ml, "none", out_dtype=jnp.float32)
    mu, logvar = ml[:, :latent_dim], ml[:, latent_dim:]

    # ----- reparameterize (plain jnp: tiny elementwise op, fuses in XLA) -----
    z = mu + eps * jnp.exp(0.5 * logvar)

    # ----- decode -----
    d = matmul_bias_act(z, params["dec_fc_w"], params["dec_fc_b"], "relu")
    d = d.reshape(B, 512, hs, hs)                              # PyTorch view order
    d = jnp.transpose(d, (0, 2, 3, 1))                         # NCHW -> NHWC
    d = conv_transpose2d(d, params["dec1_w"], params["dec1_b"], "relu")
    d = conv_transpose2d(d, params["dec2_w"], params["dec2_b"], "relu")
    d = conv_transpose2d(d, params["dec3_w"], params["dec3_b"], "relu")
    d = conv_transpose2d(d, params["dec4_w"], params["dec4_b"], "sigmoid",
                         out_dtype=jnp.float32)
    x_recon = jnp.transpose(d, (0, 3, 1, 2))                   # NHWC -> NCHW
    return x_recon, mu, logvar


if __name__ == "__main__":
    # small shapes consistent with the module: image_size divisible by 16
    IMAGE_SIZE = 32
    LATENT_DIM = 16
    BATCH = 2

    key = jax.random.PRNGKey(0)
    k_param, k_x, k_eps = jax.random.split(key, 3)

    params = init_params(k_param, IMAGE_SIZE, LATENT_DIM)
    x = jax.random.uniform(k_x, (BATCH, 3, IMAGE_SIZE, IMAGE_SIZE), jnp.float32)
    eps = jax.random.normal(k_eps, (BATCH, LATENT_DIM), jnp.float32)

    fwd = jax.jit(functools.partial(vae_forward, image_size=IMAGE_SIZE,
                                    latent_dim=LATENT_DIM))
    x_recon, mu, logvar = fwd(params, x, eps)
    jax.block_until_ready((x_recon, mu, logvar))

    assert x_recon.shape == (BATCH, 3, IMAGE_SIZE, IMAGE_SIZE)
    assert mu.shape == (BATCH, LATENT_DIM) and logvar.shape == (BATCH, LATENT_DIM)
    assert bool(jnp.all(jnp.isfinite(x_recon)))
    assert bool(jnp.all((x_recon >= 0.0) & (x_recon <= 1.0)))

    # internal consistency: new combined-phase deconv path vs the per-phase path
    xt = jax.random.normal(jax.random.PRNGKey(1), (2, 8, 8, 64), jnp.float32)
    y_comb = conv_transpose2d(xt, params["dec4_w"], params["dec4_b"], "sigmoid",
                              out_dtype=jnp.float32, combined=True)
    y_phase = conv_transpose2d(xt, params["dec4_w"], params["dec4_b"], "sigmoid",
                               out_dtype=jnp.float32, combined=False)
    assert float(jnp.max(jnp.abs(y_comb - y_phase))) < 1e-2

    print("KERNEL_OK")
</pallas_src>

<mosaic_0001>
module attributes {stable_mosaic.version = 11 : i64} {
  func.func @_matmul_kernel(%arg0: i32, %arg1: i32, %arg2: i32, %arg3: memref<256x128xbf16, #tpu.memory_space<vmem>>, %arg4: memref<128x128xbf16, #tpu.memory_space<vmem>>, %arg5: memref<1x128xf32, #tpu.memory_space<vmem>>, %arg6: memref<256x128xbf16, #tpu.memory_space<vmem>>, %arg7: memref<256x128xf32, #tpu.memory_space<vmem>>) attributes {dimension_semantics = [#tpu.dimension_semantics<parallel>, #tpu.dimension_semantics<parallel>, #tpu.dimension_semantics<arbitrary>], iteration_bounds = array<i64: 2, 1, 1>, scalar_prefetch = 0 : i64, scratch_operands = 1 : i64, tpu.core_type = #tpu.core_type<tc>, window_params = [{transform_indices = @transform_0, window_bounds = array<i64: 256, 128>}, {transform_indices = @transform_1, window_bounds = array<i64: 128, 128>}, {transform_indices = @transform_2, window_bounds = array<i64: 1, 128>}, {transform_indices = @transform_3, window_bounds = array<i64: 256, 128>}]} {
    %c0 = arith.constant 0 : index
    %c0_0 = arith.constant 0 : index
    %0 = vector.load %arg3[%c0, %c0_0] : memref<256x128xbf16, #tpu.memory_space<vmem>>, vector<256x128xbf16>
    %c0_1 = arith.constant 0 : index
    %c0_2 = arith.constant 0 : index
    %1 = vector.load %arg4[%c0_1, %c0_2] : memref<128x128xbf16, #tpu.memory_space<vmem>>, vector<128x128xbf16>
    %cst = arith.constant dense<0.000000e+00> : vector<256x128xf32>
    %2 = tpu.matmul %0, %1, %cst {dimension_numbers = #tpu.dot_dimension_numbers<[1], [0], [0], [1], [0, 0, 1, 1], [], []>} : vector<256x128xbf16>, vector<128x128xbf16>, vector<256x128xf32> -> vector<256x128xf32>
    %c0_i32 = arith.constant 0 : i32
    %3 = arith.cmpi eq, %arg2, %c0_i32 : i32
    %4 = arith.extui %3 : i1 to i32
    %c0_i32_3 = arith.constant 0 : i32
    %5 = arith.cmpi ne, %4, %c0_i32_3 : i32
    scf.if %5 {
      %c0_8 = arith.constant 0 : index
      %c0_9 = arith.constant 0 : index
      %12 = vector.load %arg7[%c0_8, %c0_9] : memref<256x128xf32, #tpu.memory_space<vmem>>, vector<256x128xf32>
      tpu.vector_store %arg7[%c0_8, %c0_9], %2 {strides = array<i32>} : memref<256x128xf32, #tpu.memory_space<vmem>>, vector<256x128xf32>,
    } else {
    }
    %c0_i32_4 = arith.constant 0 : i32
    %6 = arith.cmpi sgt, %arg2, %c0_i32_4 : i32
    %7 = arith.extui %6 : i1 to i32
    %c0_i32_5 = arith.constant 0 : i32
    %8 = arith.cmpi ne, %7, %c0_i32_5 : i32
    scf.if %8 {
      %c0_8 = arith.constant 0 : index
      %c0_9 = arith.constant 0 : index
      %12 = vector.load %arg7[%c0_8, %c0_9] : memref<256x128xf32, #tpu.memory_space<vmem>>, vector<256x128xf32>
      %13 = arith.addf %12, %2 : vector<256x128xf32>
      %c0_10 = arith.constant 0 : index
      %c0_11 = arith.constant 0 : index
      %14 = vector.load %arg7[%c0_10, %c0_11] : memref<256x128xf32, #tpu.memory_space<vmem>>, vector<256x128xf32>
      tpu.vector_store %arg7[%c0_10, %c0_11], %13 {strides = array<i32>} : memref<256x128xf32, #tpu.memory_space<vmem>>, vector<256x128xf32>,
    } else {
    }
    %c0_i32_6 = arith.constant 0 : i32
    %9 = arith.cmpi eq, %arg2, %c0_i32_6 : i32
    %10 = arith.extui %9 : i1 to i32
    %c0_i32_7 = arith.constant 0 : i32
    %11 = arith.cmpi ne, %10, %c0_i32_7 : i32
    scf.if %11 {
      %c0_8 = arith.constant 0 : index
      %c0_9 = arith.constant 0 : index
      %12 = vector.load %arg7[%c0_8, %c0_9] : memref<256x128xf32, #tpu.memory_space<vmem>>, vector<256x128xf32>
      %c0_10 = arith.constant 0 : index
      %c0_11 = arith.constant 0 : index
      %13 = vector.load %arg5[%c0_10, %c0_11] : memref<1x128xf32, #tpu.memory_space<vmem>>, vector<1x128xf32>
      %14 = vector.broadcast %13 : vector<1x128xf32> to vector<256x128xf32>
      %15 = arith.addf %12, %14 : vector<256x128xf32>
      %cst_12 = arith.constant 0.000000e+00 : f32
      %16 = vector.broadcast %cst_12 : f32 to vector<256x128xf32>
      %17 = arith.maximumf %15, %16 : vector<256x128xf32>
      %18 = arith.truncf %17 : vector<256x128xf32> to vector<256x128xbf16>
      %c0_13 = arith.constant 0 : index
      %c0_14 = arith.constant 0 : index
      %19 = vector.load %arg6[%c0_13, %c0_14] : memref<256x128xbf16, #tpu.memory_space<vmem>>, vector<256x128xbf16>
      tpu.vector_store %arg6[%c0_13, %c0_14], %18 {strides = array<i32>} : memref<256x128xbf16, #tpu.memory_space<vmem>>, vector<256x128xbf16>,
    } else {
    }
    return
  }
  func.func @transform_0(%arg0: i32, %arg1: i32, %arg2: i32) -> (i32, i32) {
    %c0_i32 = arith.constant 0 : i32
    return %arg0, %arg2 : i32, i32
  }
  func.func @transform_1(%arg0: i32, %arg1: i32, %arg2: i32) -> (i32, i32) {
    %c0_i32 = arith.constant 0 : i32
    return %arg2, %arg1 : i32, i32
  }
  func.func @transform_2(%arg0: i32, %arg1: i32, %arg2: i32) -> (i32, i32) {
    %c0_i32 = arith.constant 0 : i32
    %c0_i32_0 = arith.constant 0 : i32
    return %c0_i32, %arg1 : i32, i32
  }
  func.func @transform_3(%arg0: i32, %arg1: i32, %arg2: i32) -> (i32, i32) {
    %c0_i32 = arith.constant 0 : i32
    return %arg0, %arg1 : i32, i32
  }
}

module attributes {stable_mosaic.version = 11 : i64} {
  func.func @_matmul_kernel(%arg0: i32, %arg1: i32, %arg2: i32, %arg3: memref<64x1024xbf16, #tpu.memory_space<vmem>>, %arg4: memref<1024x128xbf16, #tpu.memory_space<vmem>>, %arg5: memref<1x128xf32, #tpu.memory_space<vmem>>, %arg6: memref<64x128xbf16, #tpu.memory_space<vmem>>, %arg7: memref<64x128xf32, #tpu.memory_space<vmem>>) attributes {dimension_semantics = [#tpu.dimension_semantics<parallel>, #tpu.dimension_semantics<parallel>, #tpu.dimension_semantics<arbitrary>], iteration_bounds = array<i64: 2, 1, 1>, scalar_prefetch = 0 : i64, scratch_operands = 1 : i64, tpu.core_type = #tpu.core_type<tc>, window_params = [{transform_indices = @transform_0, window_bounds = array<i64: 64, 1024>}, {transform_indices = @transform_1, window_bounds = array<i64: 1024, 128>}, {transform_indices = @transform_2, window_bounds = array<i64: 1, 128>}, {transform_indices = @transform_3, window_bounds = array<i64: 64, 128>}]} {
    %c0 = arith.constant 0 : index
    %c0_0 = arith.constant 0 : index
    %0 = vector.load %arg3[%c0, %c0_0] : memref<64x1024xbf16, #tpu.memory_space<vmem>>, vector<64x1024xbf16>
    %c0_1 = arith.constant 0 : index
    %c0_2 = arith.constant 0 : index
    %1 = vector.load %arg4[%c0_1, %c0_2] : memref<1024x128xbf16, #tpu.memory_space<vmem>>, vector<1024x128xbf16>
    %cst = arith.constant dense<0.000000e+00> : vector<64x128xf32>
    %2 = tpu.matmul %0, %1, %cst {dimension_numbers = #tpu.dot_dimension_numbers<[1], [0], [0], [1], [0, 0, 1, 1], [], []>} : vector<64x1024xbf16>, vector<1024x128xbf16>, vector<64x128xf32> -> vector<64x128xf32>
    %c0_i32 = arith.constant 0 : i32
    %3 = arith.cmpi eq, %arg2, %c0_i32 : i32
    %4 = arith.extui %3 : i1 to i32
    %c0_i32_3 = arith.constant 0 : i32
    %5 = arith.cmpi ne, %4, %c0_i32_3 : i32
    scf.if %5 {
      %c0_8 = arith.constant 0 : index
      %c0_9 = arith.constant 0 : index
      %12 = vector.load %arg7[%c0_8, %c0_9] : memref<64x128xf32, #tpu.memory_space<vmem>>, vector<64x128xf32>
      tpu.vector_store %arg7[%c0_8, %c0_9], %2 {strides = array<i32>} : memref<64x128xf32, #tpu.memory_space<vmem>>, vector<64x128xf32>,
    } else {
    }
    %c0_i32_4 = arith.constant 0 : i32
    %6 = arith.cmpi sgt, %arg2, %c0_i32_4 : i32
    %7 = arith.extui %6 : i1 to i32
    %c0_i32_5 = arith.constant 0 : i32
    %8 = arith.cmpi ne, %7, %c0_i32_5 : i32
    scf.if %8 {
      %c0_8 = arith.constant 0 : index
      %c0_9 = arith.constant 0 : index
      %12 = vector.load %arg7[%c0_8, %c0_9] : memref<64x128xf32, #tpu.memory_space<vmem>>, vector<64x128xf32>
      %13 = arith.addf %12, %2 : vector<64x128xf32>
      %c0_10 = arith.constant 0 : index
      %c0_11 = arith.constant 0 : index
      %14 = vector.load %arg7[%c0_10, %c0_11] : memref<64x128xf32, #tpu.memory_space<vmem>>, vector<64x128xf32>
      tpu.vector_store %arg7[%c0_10, %c0_11], %13 {strides = array<i32>} : memref<64x128xf32, #tpu.memory_space<vmem>>, vector<64x128xf32>,
    } else {
    }
    %c0_i32_6 = arith.constant 0 : i32
    %9 = arith.cmpi eq, %arg2, %c0_i32_6 : i32
    %10 = arith.extui %9 : i1 to i32
    %c0_i32_7 = arith.constant 0 : i32
    %11 = arith.cmpi ne, %10, %c0_i32_7 : i32
    scf.if %11 {
      %c0_8 = arith.constant 0 : index
      %c0_9 = arith.constant 0 : index
      %12 = vector.load %arg7[%c0_8, %c0_9] : memref<64x128xf32, #tpu.memory_space<vmem>>, vector<64x128xf32>
      %c0_10 = arith.constant 0 : index
      %c0_11 = arith.constant 0 : index
      %13 = vector.load %arg5[%c0_10, %c0_11] : memref<1x128xf32, #tpu.memory_space<vmem>>, vector<1x128xf32>
      %14 = vector.broadcast %13 : vector<1x128xf32> to vector<64x128xf32>
      %15 = arith.addf %12, %14 : vector<64x128xf32>
      %cst_12 = arith.constant 0.000000e+00 : f32
      %16 = vector.broadcast %cst_12 : f32 to vector<64x128xf32>
      %17 = arith.maximumf %15, %16 : vector<64x128xf32>
      %18 = arith.truncf %17 : vector<64x128xf32> to vector<64x128xbf16>
      %c0_13 = arith.constant 0 : index
      %c0_14 = arith.constant 0 : index
      %19 = vector.load %arg6[%c0_13, %c0_14] : memref<64x128xbf16, #tpu.memory_space<vmem>>, vector<64x128xbf16>
      tpu.vector_store %arg6[%c0_13, %c0_14], %18 {strides = array<i32>} : memref<64x128xbf16, #tpu.memory_space<vmem>>, vector<64x128xbf16>,
    } else {
    }
    return
  }
  func.func @transform_0(%arg0: i32, %arg1: i32, %arg2: i32) -> (i32, i32) {
    %c0_i32 = arith.constant 0 : i32
    return %arg0, %arg2 : i32, i32
  }
  func.func @transform_1(%arg0: i32, %arg1: i32, %arg2: i32) -> (i32, i32) {
    %c0_i32 = arith.constant 0 : i32
    return %arg2, %arg1 : i32, i32
  }
  func.func @transform_2(%arg0: i32, %arg1: i32, %arg2: i32) -> (i32, i32) {
    %c0_i32 = arith.constant 0 : i32
    %c0_i32_0 = arith.constant 0 : i32
    return %c0_i32, %arg1 : i32, i32
  }
  func.func @transform_3(%arg0: i32, %arg1: i32, %arg2: i32) -> (i32, i32) {
    %c0_i32 = arith.constant 0 : i32
    return %arg0, %arg1 : i32, i32
  }
}

module attributes {stable_mosaic.version = 11 : i64} {
  func.func @_matmul_kernel(%arg0: i32, %arg1: i32, %arg2: i32, %arg3: memref<16x2048xbf16, #tpu.memory_space<vmem>>, %arg4: memref<2048x256xbf16, #tpu.memory_space<vmem>>, %arg5: memref<1x256xf32, #tpu.memory_space<vmem>>, %arg6: memref<16x256xbf16, #tpu.memory_space<vmem>>, %arg7: memref<16x256xf32, #tpu.memory_space<vmem>>) attributes {dimension_semantics = [#tpu.dimension_semantics<parallel>, #tpu.dimension_semantics<parallel>, #tpu.dimension_semantics<arbitrary>], iteration_bounds = array<i64: 2, 1, 1>, scalar_prefetch = 0 : i64, scratch_operands = 1 : i64, tpu.core_type = #tpu.core_type<tc>, window_params = [{transform_indices = @transform_0, window_bounds = array<i64: 16, 2048>}, {transform_indices = @transform_1, window_bounds = array<i64: 2048, 256>}, {transform_indices = @transform_2, window_bounds = array<i64: 1, 256>}, {transform_indices = @transform_3, window_bounds = array<i64: 16, 256>}]} {
    %c0 = arith.constant 0 : index
    %c0_0 = arith.constant 0 : index
    %0 = vector.load %arg3[%c0, %c0_0] : memref<16x2048xbf16, #tpu.memory_space<vmem>>, vector<16x2048xbf16>
    %c0_1 = arith.constant 0 : index
    %c0_2 = arith.constant 0 : index
    %1 = vector.load %arg4[%c0_1, %c0_2] : memref<2048x256xbf16, #tpu.memory_space<vmem>>, vector<2048x256xbf16>
    %cst = arith.constant dense<0.000000e+00> : vector<16x256xf32>
    %2 = tpu.matmul %0, %1, %cst {dimension_numbers = #tpu.dot_dimension_numbers<[1], [0], [0], [1], [0, 0, 1, 1], [], []>} : vector<16x2048xbf16>, vector<2048x256xbf16>, vector<16x256xf32> -> vector<16x256xf32>
    %c0_i32 = arith.constant 0 : i32
    %3 = arith.cmpi eq, %arg2, %c0_i32 : i32
    %4 = arith.extui %3 : i1 to i32
    %c0_i32_3 = arith.constant 0 : i32
    %5 = arith.cmpi ne, %4, %c0_i32_3 : i32
    scf.if %5 {
      %c0_8 = arith.constant 0 : index
      %c0_9 = arith.constant 0 : index
      %12 = vector.load %arg7[%c0_8, %c0_9] : memref<16x256xf32, #tpu.memory_space<vmem>>, vector<16x256xf32>
      tpu.vector_store %arg7[%c0_8, %c0_9], %2 {strides = array<i32>} : memref<16x256xf32, #tpu.memory_space<vmem>>, vector<16x256xf32>,
    } else {
    }
    %c0_i32_4 = arith.constant 0 : i32
    %6 = arith.cmpi sgt, %arg2, %c0_i32_4 : i32
    %7 = arith.extui %6 : i1 to i32
    %c0_i32_5 = arith.constant 0 : i32
    %8 = arith.cmpi ne, %7, %c0_i32_5 : i32
    scf.if %8 {
      %c0_8 = arith.constant 0 : index
      %c0_9 = arith.constant 0 : index
      %12 = vector.load %arg7[%c0_8, %c0_9] : memref<16x256xf32, #tpu.memory_space<vmem>>, vector<16x256xf32>
      %13 = arith.addf %12, %2 : vector<16x256xf32>
      %c0_10 = arith.constant 0 : index
      %c0_11 = arith.constant 0 : index
      %14 = vector.load %arg7[%c0_10, %c0_11] : memref<16x256xf32, #tpu.memory_space<vmem>>, vector<16x256xf32>
      tpu.vector_store %arg7[%c0_10, %c0_11], %13 {strides = array<i32>} : memref<16x256xf32, #tpu.memory_space<vmem>>, vector<16x256xf32>,
    } else {
    }
    %c0_i32_6 = arith.constant 0 : i32
    %9 = arith.cmpi eq, %arg2, %c0_i32_6 : i32
    %10 = arith.extui %9 : i1 to i32
    %c0_i32_7 = arith.constant 0 : i32
    %11 = arith.cmpi ne, %10, %c0_i32_7 : i32
    scf.if %11 {
      %c0_8 = arith.constant 0 : index
      %c0_9 = arith.constant 0 : index
      %12 = vector.load %arg7[%c0_8, %c0_9] : memref<16x256xf32, #tpu.memory_space<vmem>>, vector<16x256xf32>
      %c0_10 = arith.constant 0 : index
      %c0_11 = arith.constant 0 : index
      %13 = vector.load %arg5[%c0_10, %c0_11] : memref<1x256xf32, #tpu.memory_space<vmem>>, vector<1x256xf32>
      %14 = vector.broadcast %13 : vector<1x256xf32> to vector<16x256xf32>
      %15 = arith.addf %12, %14 : vector<16x256xf32>
      %cst_12 = arith.constant 0.000000e+00 : f32
      %16 = vector.broadcast %cst_12 : f32 to vector<16x256xf32>
      %17 = arith.maximumf %15, %16 : vector<16x256xf32>
      %18 = arith.truncf %17 : vector<16x256xf32> to vector<16x256xbf16>
      %c0_13 = arith.constant 0 : index
      %c0_14 = arith.constant 0 : index
      %19 = vector.load %arg6[%c0_13, %c0_14] : memref<16x256xbf16, #tpu.memory_space<vmem>>, vector<16x256xbf16>
      tpu.vector_store %arg6[%c0_13, %c0_14], %18 {strides = array<i32>} : memref<16x256xbf16, #tpu.memory_space<vmem>>, vector<16x256xbf16>,
    } else {
    }
    return
  }
  func.func @transform_0(%arg0: i32, %arg1: i32, %arg2: i32) -> (i32, i32) {
    %c0_i32 = arith.constant 0 : i32
    return %arg0, %arg2 : i32, i32
  }
  func.func @transform_1(%arg0: i32, %arg1: i32, %arg2: i32) -> (i32, i32) {
    %c0_i32 = arith.constant 0 : i32
    return %arg2, %arg1 : i32, i32
  }
  func.func @transform_2(%arg0: i32, %arg1: i32, %arg2: i32) -> (i32, i32) {
    %c0_i32 = arith.constant 0 : i32
    %c0_i32_0 = arith.constant 0 : i32
    return %c0_i32, %arg1 : i32, i32
  }
  func.func @transform_3(%arg0: i32, %arg1: i32, %arg2: i32) -> (i32, i32) {
    %c0_i32 = arith.constant 0 : i32
    return %arg0, %arg1 : i32, i32
  }
}

module attributes {stable_mosaic.version = 11 : i64} {
  func.func @_matmul_kernel(%arg0: i32, %arg1: i32, %arg2: i32, %arg3: memref<8x2048xbf16, #tpu.memory_space<vmem>>, %arg4: memref<2048x512xbf16, #tpu.memory_space<vmem>>, %arg5: memref<1x512xf32, #tpu.memory_space<vmem>>, %arg6: memref<8x512xbf16, #tpu.memory_space<vmem>>, %arg7: memref<8x512xf32, #tpu.memory_space<vmem>>) attributes {dimension_semantics = [#tpu.dimension_semantics<parallel>, #tpu.dimension_semantics<parallel>, #tpu.dimension_semantics<arbitrary>], iteration_bounds = array<i64: 1, 1, 2>, scalar_prefetch = 0 : i64, scratch_operands = 1 : i64, tpu.core_type = #tpu.core_type<tc>, window_params = [{transform_indices = @transform_0, window_bounds = array<i64: 8, 2048>}, {transform_indices = @transform_1, window_bounds = array<i64: 2048, 512>}, {transform_indices = @transform_2, window_bounds = array<i64: 1, 512>}, {transform_indices = @transform_3, window_bounds = array<i64: 8, 512>}]} {
    %c0 = arith.constant 0 : index
    %c0_0 = arith.constant 0 : index
    %0 = vector.load %arg3[%c0, %c0_0] : memref<8x2048xbf16, #tpu.memory_space<vmem>>, vector<8x2048xbf16>
    %c0_1 = arith.constant 0 : index
    %c0_2 = arith.constant 0 : index
    %1 = vector.load %arg4[%c0_1, %c0_2] : memref<2048x512xbf16, #tpu.memory_space<vmem>>, vector<2048x512xbf16>
    %cst = arith.constant dense<0.000000e+00> : vector<8x512xf32>
    %2 = tpu.matmul %0, %1, %cst {dimension_numbers = #tpu.dot_dimension_numbers<[1], [0], [0], [1], [0, 0, 1, 1], [], []>} : vector<8x2048xbf16>, vector<2048x512xbf16>, vector<8x512xf32> -> vector<8x512xf32>
    %c0_i32 = arith.constant 0 : i32
    %3 = arith.cmpi eq, %arg2, %c0_i32 : i32
    %4 = arith.extui %3 : i1 to i32
    %c0_i32_3 = arith.constant 0 : i32
    %5 = arith.cmpi ne, %4, %c0_i32_3 : i32
    scf.if %5 {
      %c0_7 = arith.constant 0 : index
      %c0_8 = arith.constant 0 : index
      %12 = vector.load %arg7[%c0_7, %c0_8] : memref<8x512xf32, #tpu.memory_space<vmem>>, vector<8x512xf32>
      tpu.vector_store %arg7[%c0_7, %c0_8], %2 {strides = array<i32>} : memref<8x512xf32, #tpu.memory_space<vmem>>, vector<8x512xf32>,
    } else {
    }
    %c0_i32_4 = arith.constant 0 : i32
    %6 = arith.cmpi sgt, %arg2, %c0_i32_4 : i32
    %7 = arith.extui %6 : i1 to i32
    %c0_i32_5 = arith.constant 0 : i32
    %8 = arith.cmpi ne, %7, %c0_i32_5 : i32
    scf.if %8 {
      %c0_7 = arith.constant 0 : index
      %c0_8 = arith.constant 0 : index
      %12 = vector.load %arg7[%c0_7, %c0_8] : memref<8x512xf32, #tpu.memory_space<vmem>>, vector<8x512xf32>
      %13 = arith.addf %12, %2 : vector<8x512xf32>
      %c0_9 = arith.constant 0 : index
      %c0_10 = arith.constant 0 : index
      %14 = vector.load %arg7[%c0_9, %c0_10] : memref<8x512xf32, #tpu.memory_space<vmem>>, vector<8x512xf32>
      tpu.vector_store %arg7[%c0_9, %c0_10], %13 {strides = array<i32>} : memref<8x512xf32, #tpu.memory_space<vmem>>, vector<8x512xf32>,
    } else {
    }
    %c1_i32 = arith.constant 1 : i32
    %9 = arith.cmpi eq, %arg2, %c1_i32 : i32
    %10 = arith.extui %9 : i1 to i32
    %c0_i32_6 = arith.constant 0 : i32
    %11 = arith.cmpi ne, %10, %c0_i32_6 : i32
    scf.if %11 {
      %c0_7 = arith.constant 0 : index
      %c0_8 = arith.constant 0 : index
      %12 = vector.load %arg7[%c0_7, %c0_8] : memref<8x512xf32, #tpu.memory_space<vmem>>, vector<8x512xf32>
      %c0_9 = arith.constant 0 : index
      %c0_10 = arith.constant 0 : index
      %13 = vector.load %arg5[%c0_9, %c0_10] : memref<1x512xf32, #tpu.memory_space<vmem>>, vector<1x512xf32>
      %14 = vector.broadcast %13 : vector<1x512xf32> to vector<8x512xf32>
      %15 = arith.addf %12, %14 : vector<8x512xf32>
      %cst_11 = arith.constant 0.000000e+00 : f32
      %16 = vector.broadcast %cst_11 : f32 to vector<8x512xf32>
      %17 = arith.maximumf %15, %16 : vector<8x512xf32>
      %18 = arith.truncf %17 : vector<8x512xf32> to vector<8x512xbf16>
      %c0_12 = arith.constant 0 : index
      %c0_13 = arith.constant 0 : index
      %19 = vector.load %arg6[%c0_12, %c0_13] : memref<8x512xbf16, #tpu.memory_space<vmem>>, vector<8x512xbf16>
      tpu.vector_store %arg6[%c0_12, %c0_13], %18 {strides = array<i32>} : memref<8x512xbf16, #tpu.memory_space<vmem>>, vector<8x512xbf16>,
    } else {
    }
    return
  }
  func.func @transform_0(%arg0: i32, %arg1: i32, %arg2: i32) -> (i32, i32) {
    %c0_i32 = arith.constant 0 : i32
    return %arg0, %arg2 : i32, i32
  }
  func.func @transform_1(%arg0: i32, %arg1: i32, %arg2: i32) -> (i32, i32) {
    %c0_i32 = arith.constant 0 : i32
    return %arg2, %arg1 : i32, i32
  }
  func.func @transform_2(%arg0: i32, %arg1: i32, %arg2: i32) -> (i32, i32) {
    %c0_i32 = arith.constant 0 : i32
    %c0_i32_0 = arith.constant 0 : i32
    return %c0_i32, %arg1 : i32, i32
  }
  func.func @transform_3(%arg0: i32, %arg1: i32, %arg2: i32) -> (i32, i32) {
    %c0_i32 = arith.constant 0 : i32
    return %arg0, %arg1 : i32, i32
  }
}

module attributes {stable_mosaic.version = 11 : i64} {
  func.func @_matmul_kernel(%arg0: i32, %arg1: i32, %arg2: i32, %arg3: memref<8x2048xbf16, #tpu.memory_space<vmem>>, %arg4: memref<2048x128xbf16, #tpu.memory_space<vmem>>, %arg5: memref<1x128xf32, #tpu.memory_space<vmem>>, %arg6: memref<8x128xf32, #tpu.memory_space<vmem>>, %arg7: memref<8x128xf32, #tpu.memory_space<vmem>>) attributes {dimension_semantics = [#tpu.dimension_semantics<parallel>, #tpu.dimension_semantics<parallel>, #tpu.dimension_semantics<arbitrary>], iteration_bounds = array<i64: 1, 1, 1>, scalar_prefetch = 0 : i64, scratch_operands = 1 : i64, tpu.core_type = #tpu.core_type<tc>, window_params = [{transform_indices = @transform_0, window_bounds = array<i64: 8, 2048>}, {transform_indices = @transform_1, window_bounds = array<i64: 2048, 128>}, {transform_indices = @transform_2, window_bounds = array<i64: 1, 128>}, {transform_indices = @transform_3, window_bounds = array<i64: 8, 128>}]} {
    %c0 = arith.constant 0 : index
    %c0_0 = arith.constant 0 : index
    %0 = vector.load %arg3[%c0, %c0_0] : memref<8x2048xbf16, #tpu.memory_space<vmem>>, vector<8x2048xbf16>
    %c0_1 = arith.constant 0 : index
    %c0_2 = arith.constant 0 : index
    %1 = vector.load %arg4[%c0_1, %c0_2] : memref<2048x128xbf16, #tpu.memory_space<vmem>>, vector<2048x128xbf16>
    %cst = arith.constant dense<0.000000e+00> : vector<8x128xf32>
    %2 = tpu.matmul %0, %1, %cst {dimension_numbers = #tpu.dot_dimension_numbers<[1], [0], [0], [1], [0, 0, 1, 1], [], []>} : vector<8x2048xbf16>, vector<2048x128xbf16>, vector<8x128xf32> -> vector<8x128xf32>
    %c0_i32 = arith.constant 0 : i32
    %3 = arith.cmpi eq, %arg2, %c0_i32 : i32
    %4 = arith.extui %3 : i1 to i32
    %c0_i32_3 = arith.constant 0 : i32
    %5 = arith.cmpi ne, %4, %c0_i32_3 : i32
    scf.if %5 {
      %c0_8 = arith.constant 0 : index
      %c0_9 = arith.constant 0 : index
      %12 = vector.load %arg7[%c0_8, %c0_9] : memref<8x128xf32, #tpu.memory_space<vmem>>, vector<8x128xf32>
      tpu.vector_store %arg7[%c0_8, %c0_9], %2 {strides = array<i32>} : memref<8x128xf32, #tpu.memory_space<vmem>>, vector<8x128xf32>,
    } else {
    }
    %c0_i32_4 = arith.constant 0 : i32
    %6 = arith.cmpi sgt, %arg2, %c0_i32_4 : i32
    %7 = arith.extui %6 : i1 to i32
    %c0_i32_5 = arith.constant 0 : i32
    %8 = arith.cmpi ne, %7, %c0_i32_5 : i32
    scf.if %8 {
      %c0_8 = arith.constant 0 : index
      %c0_9 = arith.constant 0 : index
      %12 = vector.load %arg7[%c0_8, %c0_9] : memref<8x128xf32, #tpu.memory_space<vmem>>, vector<8x128xf32>
      %13 = arith.addf %12, %2 : vector<8x128xf32>
      %c0_10 = arith.constant 0 : index
      %c0_11 = arith.constant 0 : index
      %14 = vector.load %arg7[%c0_10, %c0_11] : memref<8x128xf32, #tpu.memory_space<vmem>>, vector<8x128xf32>
      tpu.vector_store %arg7[%c0_10, %c0_11], %13 {strides = array<i32>} : memref<8x128xf32, #tpu.memory_space<vmem>>, vector<8x128xf32>,
    } else {
    }
    %c0_i32_6 = arith.constant 0 : i32
    %9 = arith.cmpi eq, %arg2, %c0_i32_6 : i32
    %10 = arith.extui %9 : i1 to i32
    %c0_i32_7 = arith.constant 0 : i32
    %11 = arith.cmpi ne, %10, %c0_i32_7 : i32
    scf.if %11 {
      %c0_8 = arith.constant 0 : index
      %c0_9 = arith.constant 0 : index
      %12 = vector.load %arg7[%c0_8, %c0_9] : memref<8x128xf32, #tpu.memory_space<vmem>>, vector<8x128xf32>
      %c0_10 = arith.constant 0 : index
      %c0_11 = arith.constant 0 : index
      %13 = vector.load %arg5[%c0_10, %c0_11] : memref<1x128xf32, #tpu.memory_space<vmem>>, vector<1x128xf32>
      %14 = vector.broadcast %13 : vector<1x128xf32> to vector<8x128xf32>
      %15 = arith.addf %12, %14 : vector<8x128xf32>
      %c0_12 = arith.constant 0 : index
      %c0_13 = arith.constant 0 : index
      %16 = vector.load %arg6[%c0_12, %c0_13] : memref<8x128xf32, #tpu.memory_space<vmem>>, vector<8x128xf32>
      tpu.vector_store %arg6[%c0_12, %c0_13], %15 {strides = array<i32>} : memref<8x128xf32, #tpu.memory_space<vmem>>, vector<8x128xf32>,
    } else {
    }
    return
  }
  func.func @transform_0(%arg0: i32, %arg1: i32, %arg2: i32) -> (i32, i32) {
    %c0_i32 = arith.constant 0 : i32
    return %arg0, %arg2 : i32, i32
  }
  func.func @transform_1(%arg0: i32, %arg1: i32, %arg2: i32) -> (i32, i32) {
    %c0_i32 = arith.constant 0 : i32
    return %arg2, %arg1 : i32, i32
  }
  func.func @transform_2(%arg0: i32, %arg1: i32, %arg2: i32) -> (i32, i32) {
    %c0_i32 = arith.constant 0 : i32
    %c0_i32_0 = arith.constant 0 : i32
    return %c0_i32, %arg1 : i32, i32
  }
  func.func @transform_3(%arg0: i32, %arg1: i32, %arg2: i32) -> (i32, i32) {
    %c0_i32 = arith.constant 0 : i32
    return %arg0, %arg1 : i32, i32
  }
}

module attributes {stable_mosaic.version = 11 : i64} {
  func.func @_matmul_kernel(%arg0: i32, %arg1: i32, %arg2: i32, %arg3: memref<8x128xbf16, #tpu.memory_space<vmem>>, %arg4: memref<128x512xbf16, #tpu.memory_space<vmem>>, %arg5: memref<1x512xf32, #tpu.memory_space<vmem>>, %arg6: memref<8x512xbf16, #tpu.memory_space<vmem>>, %arg7: memref<8x512xf32, #tpu.memory_space<vmem>>) attributes {dimension_semantics = [#tpu.dimension_semantics<parallel>, #tpu.dimension_semantics<parallel>, #tpu.dimension_semantics<arbitrary>], iteration_bounds = array<i64: 1, 4, 1>, scalar_prefetch = 0 : i64, scratch_operands = 1 : i64, tpu.core_type = #tpu.core_type<tc>, window_params = [{transform_indices = @transform_0, window_bounds = array<i64: 8, 128>}, {transform_indices = @transform_1, window_bounds = array<i64: 128, 512>}, {transform_indices = @transform_2, window_bounds = array<i64: 1, 512>}, {transform_indices = @transform_3, window_bounds = array<i64: 8, 512>}]} {
    %c0 = arith.constant 0 : index
    %c0_0 = arith.constant 0 : index
    %0 = vector.load %arg3[%c0, %c0_0] : memref<8x128xbf16, #tpu.memory_space<vmem>>, vector<8x128xbf16>
    %c0_1 = arith.constant 0 : index
    %c0_2 = arith.constant 0 : index
    %1 = vector.load %arg4[%c0_1, %c0_2] : memref<128x512xbf16, #tpu.memory_space<vmem>>, vector<128x512xbf16>
    %cst = arith.constant dense<0.000000e+00> : vector<8x512xf32>
    %2 = tpu.matmul %0, %1, %cst {dimension_numbers = #tpu.dot_dimension_numbers<[1], [0], [0], [1], [0, 0, 1, 1], [], []>} : vector<8x128xbf16>, vector<128x512xbf16>, vector<8x512xf32> -> vector<8x512xf32>
    %c0_i32 = arith.constant 0 : i32
    %3 = arith.cmpi eq, %arg2, %c0_i32 : i32
    %4 = arith.extui %3 : i1 to i32
    %c0_i32_3 = arith.constant 0 : i32
    %5 = arith.cmpi ne, %4, %c0_i32_3 : i32
    scf.if %5 {
      %c0_8 = arith.constant 0 : index
      %c0_9 = arith.constant 0 : index
      %12 = vector.load %arg7[%c0_8, %c0_9] : memref<8x512xf32, #tpu.memory_space<vmem>>, vector<8x512xf32>
      tpu.vector_store %arg7[%c0_8, %c0_9], %2 {strides = array<i32>} : memref<8x512xf32, #tpu.memory_space<vmem>>, vector<8x512xf32>,
    } else {
    }
    %c0_i32_4 = arith.constant 0 : i32
    %6 = arith.cmpi sgt, %arg2, %c0_i32_4 : i32
    %7 = arith.extui %6 : i1 to i32
    %c0_i32_5 = arith.constant 0 : i32
    %8 = arith.cmpi ne, %7, %c0_i32_5 : i32
    scf.if %8 {
      %c0_8 = arith.constant 0 : index
      %c0_9 = arith.constant 0 : index
      %12 = vector.load %arg7[%c0_8, %c0_9] : memref<8x512xf32, #tpu.memory_space<vmem>>, vector<8x512xf32>
      %13 = arith.addf %12, %2 : vector<8x512xf32>
      %c0_10 = arith.constant 0 : index
      %c0_11 = arith.constant 0 : index
      %14 = vector.load %arg7[%c0_10, %c0_11] : memref<8x512xf32, #tpu.memory_space<vmem>>, vector<8x512xf32>
      tpu.vector_store %arg7[%c0_10, %c0_11], %13 {strides = array<i32>} : memref<8x512xf32, #tpu.memory_space<vmem>>, vector<8x512xf32>,
    } else {
    }
    %c0_i32_6 = arith.constant 0 : i32
    %9 = arith.cmpi eq, %arg2, %c0_i32_6 : i32
    %10 = arith.extui %9 : i1 to i32
    %c0_i32_7 = arith.constant 0 : i32
    %11 = arith.cmpi ne, %10, %c0_i32_7 : i32
    scf.if %11 {
      %c0_8 = arith.constant 0 : index
      %c0_9 = arith.constant 0 : index
      %12 = vector.load %arg7[%c0_8, %c0_9] : memref<8x512xf32, #tpu.memory_space<vmem>>, vector<8x512xf32>
      %c0_10 = arith.constant 0 : index
      %c0_11 = arith.constant 0 : index
      %13 = vector.load %arg5[%c0_10, %c0_11] : memref<1x512xf32, #tpu.memory_space<vmem>>, vector<1x512xf32>
      %14 = vector.broadcast %13 : vector<1x512xf32> to vector<8x512xf32>
      %15 = arith.addf %12, %14 : vector<8x512xf32>
      %cst_12 = arith.constant 0.000000e+00 : f32
      %16 = vector.broadcast %cst_12 : f32 to vector<8x512xf32>
      %17 = arith.maximumf %15, %16 : vector<8x512xf32>
      %18 = arith.truncf %17 : vector<8x512xf32> to vector<8x512xbf16>
      %c0_13 = arith.constant 0 : index
      %c0_14 = arith.constant 0 : index
      %19 = vector.load %arg6[%c0_13, %c0_14] : memref<8x512xbf16, #tpu.memory_space<vmem>>, vector<8x512xbf16>
      tpu.vector_store %arg6[%c0_13, %c0_14], %18 {strides = array<i32>} : memref<8x512xbf16, #tpu.memory_space<vmem>>, vector<8x512xbf16>,
    } else {
    }
    return
  }
  func.func @transform_0(%arg0: i32, %arg1: i32, %arg2: i32) -> (i32, i32) {
    %c0_i32 = arith.constant 0 : i32
    return %arg0, %arg2 : i32, i32
  }
  func.func @transform_1(%arg0: i32, %arg1: i32, %arg2: i32) -> (i32, i32) {
    %c0_i32 = arith.constant 0 : i32
    return %arg2, %arg1 : i32, i32
  }
  func.func @transform_2(%arg0: i32, %arg1: i32, %arg2: i32) -> (i32, i32) {
    %c0_i32 = arith.constant 0 : i32
    %c0_i32_0 = arith.constant 0 : i32
    return %c0_i32, %arg1 : i32, i32
  }
  func.func @transform_3(%arg0: i32, %arg1: i32, %arg2: i32) -> (i32, i32) {
    %c0_i32 = arith.constant 0 : i32
    return %arg0, %arg1 : i32, i32
  }
}

module attributes {stable_mosaic.version = 11 : i64} {
  func.func @_matmul_kernel(%arg0: i32, %arg1: i32, %arg2: i32, %arg3: memref<8x2048xbf16, #tpu.memory_space<vmem>>, %arg4: memref<2048x256xbf16, #tpu.memory_space<vmem>>, %arg5: memref<1x256xf32, #tpu.memory_space<vmem>>, %arg6: memref<8x256xbf16, #tpu.memory_space<vmem>>, %arg7: memref<8x256xf32, #tpu.memory_space<vmem>>) attributes {dimension_semantics = [#tpu.dimension_semantics<parallel>, #tpu.dimension_semantics<parallel>, #tpu.dimension_semantics<arbitrary>], iteration_bounds = array<i64: 1, 1, 1>, scalar_prefetch = 0 : i64, scratch_operands = 1 : i64, tpu.core_type = #tpu.core_type<tc>, window_params = [{transform_indices = @transform_0, window_bounds = array<i64: 8, 2048>}, {transform_indices = @transform_1, window_bounds = array<i64: 2048, 256>}, {transform_indices = @transform_2, window_bounds = array<i64: 1, 256>}, {transform_indices = @transform_3, window_bounds = array<i64: 8, 256>}]} {
    %c0 = arith.constant 0 : index
    %c0_0 = arith.constant 0 : index
    %0 = vector.load %arg3[%c0, %c0_0] : memref<8x2048xbf16, #tpu.memory_space<vmem>>, vector<8x2048xbf16>
    %c0_1 = arith.constant 0 : index
    %c0_2 = arith.constant 0 : index
    %1 = vector.load %arg4[%c0_1, %c0_2] : memref<2048x256xbf16, #tpu.memory_space<vmem>>, vector<2048x256xbf16>
    %cst = arith.constant dense<0.000000e+00> : vector<8x256xf32>
    %2 = tpu.matmul %0, %1, %cst {dimension_numbers = #tpu.dot_dimension_numbers<[1], [0], [0], [1], [0, 0, 1, 1], [], []>} : vector<8x2048xbf16>, vector<2048x256xbf16>, vector<8x256xf32> -> vector<8x256xf32>
    %c0_i32 = arith.constant 0 : i32
    %3 = arith.cmpi eq, %arg2, %c0_i32 : i32
    %4 = arith.extui %3 : i1 to i32
    %c0_i32_3 = arith.constant 0 : i32
    %5 = arith.cmpi ne, %4, %c0_i32_3 : i32
    scf.if %5 {
      %c0_8 = arith.constant 0 : index
      %c0_9 = arith.constant 0 : index
      %12 = vector.load %arg7[%c0_8, %c0_9] : memref<8x256xf32, #tpu.memory_space<vmem>>, vector<8x256xf32>
      tpu.vector_store %arg7[%c0_8, %c0_9], %2 {strides = array<i32>} : memref<8x256xf32, #tpu.memory_space<vmem>>, vector<8x256xf32>,
    } else {
    }
    %c0_i32_4 = arith.constant 0 : i32
    %6 = arith.cmpi sgt, %arg2, %c0_i32_4 : i32
    %7 = arith.extui %6 : i1 to i32
    %c0_i32_5 = arith.constant 0 : i32
    %8 = arith.cmpi ne, %7, %c0_i32_5 : i32
    scf.if %8 {
      %c0_8 = arith.constant 0 : index
      %c0_9 = arith.constant 0 : index
      %12 = vector.load %arg7[%c0_8, %c0_9] : memref<8x256xf32, #tpu.memory_space<vmem>>, vector<8x256xf32>
      %13 = arith.addf %12, %2 : vector<8x256xf32>
      %c0_10 = arith.constant 0 : index
      %c0_11 = arith.constant 0 : index
      %14 = vector.load %arg7[%c0_10, %c0_11] : memref<8x256xf32, #tpu.memory_space<vmem>>, vector<8x256xf32>
      tpu.vector_store %arg7[%c0_10, %c0_11], %13 {strides = array<i32>} : memref<8x256xf32, #tpu.memory_space<vmem>>, vector<8x256xf32>,
    } else {
    }
    %c0_i32_6 = arith.constant 0 : i32
    %9 = arith.cmpi eq, %arg2, %c0_i32_6 : i32
    %10 = arith.extui %9 : i1 to i32
    %c0_i32_7 = arith.constant 0 : i32
    %11 = arith.cmpi ne, %10, %c0_i32_7 : i32
    scf.if %11 {
      %c0_8 = arith.constant 0 : index
      %c0_9 = arith.constant 0 : index
      %12 = vector.load %arg7[%c0_8, %c0_9] : memref<8x256xf32, #tpu.memory_space<vmem>>, vector<8x256xf32>
      %c0_10 = arith.constant 0 : index
      %c0_11 = arith.constant 0 : index
      %13 = vector.load %arg5[%c0_10, %c0_11] : memref<1x256xf32, #tpu.memory_space<vmem>>, vector<1x256xf32>
      %14 = vector.broadcast %13 : vector<1x256xf32> to vector<8x256xf32>
      %15 = arith.addf %12, %14 : vector<8x256xf32>
      %cst_12 = arith.constant 0.000000e+00 : f32
      %16 = vector.broadcast %cst_12 : f32 to vector<8x256xf32>
      %17 = arith.maximumf %15, %16 : vector<8x256xf32>
      %18 = arith.truncf %17 : vector<8x256xf32> to vector<8x256xbf16>
      %c0_13 = arith.constant 0 : index
      %c0_14 = arith.constant 0 : index
      %19 = vector.load %arg6[%c0_13, %c0_14] : memref<8x256xbf16, #tpu.memory_space<vmem>>, vector<8x256xbf16>
      tpu.vector_store %arg6[%c0_13, %c0_14], %18 {strides = array<i32>} : memref<8x256xbf16, #tpu.memory_space<vmem>>, vector<8x256xbf16>,
    } else {
    }
    return
  }
  func.func @transform_0(%arg0: i32, %arg1: i32, %arg2: i32) -> (i32, i32) {
    %c0_i32 = arith.constant 0 : i32
    return %arg0, %arg2 : i32, i32
  }
  func.func @transform_1(%arg0: i32, %arg1: i32, %arg2: i32) -> (i32, i32) {
    %c0_i32 = arith.constant 0 : i32
    return %arg2, %arg1 : i32, i32
  }
  func.func @transform_2(%arg0: i32, %arg1: i32, %arg2: i32) -> (i32, i32) {
    %c0_i32 = arith.constant 0 : i32
    %c0_i32_0 = arith.constant 0 : i32
    return %c0_i32, %arg1 : i32, i32
  }
  func.func @transform_3(%arg0: i32, %arg1: i32, %arg2: i32) -> (i32, i32) {
    %c0_i32 = arith.constant 0 : i32
    return %arg0, %arg1 : i32, i32
  }
}

module attributes {stable_mosaic.version = 11 : i64} {
  func.func @_matmul_kernel(%arg0: i32, %arg1: i32, %arg2: i32, %arg3: memref<16x1024xbf16, #tpu.memory_space<vmem>>, %arg4: memref<1024x128xbf16, #tpu.memory_space<vmem>>, %arg5: memref<1x128xf32, #tpu.memory_space<vmem>>, %arg6: memref<16x128xbf16, #tpu.memory_space<vmem>>, %arg7: memref<16x128xf32, #tpu.memory_space<vmem>>) attributes {dimension_semantics = [#tpu.dimension_semantics<parallel>, #tpu.dimension_semantics<parallel>, #tpu.dimension_semantics<arbitrary>], iteration_bounds = array<i64: 2, 1, 1>, scalar_prefetch = 0 : i64, scratch_operands = 1 : i64, tpu.core_type = #tpu.core_type<tc>, window_params = [{transform_indices = @transform_0, window_bounds = array<i64: 16, 1024>}, {transform_indices = @transform_1, window_bounds = array<i64: 1024, 128>}, {transform_indices = @transform_2, window_bounds = array<i64: 1, 128>}, {transform_indices = @transform_3, window_bounds = array<i64: 16, 128>}]} {
    %c0 = arith.constant 0 : index
    %c0_0 = arith.constant 0 : index
    %0 = vector.load %arg3[%c0, %c0_0] : memref<16x1024xbf16, #tpu.memory_space<vmem>>, vector<16x1024xbf16>
    %c0_1 = arith.constant 0 : index
    %c0_2 = arith.constant 0 : index
    %1 = vector.load %arg4[%c0_1, %c0_2] : memref<1024x128xbf16, #tpu.memory_space<vmem>>, vector<1024x128xbf16>
    %cst = arith.constant dense<0.000000e+00> : vector<16x128xf32>
    %2 = tpu.matmul %0, %1, %cst {dimension_numbers = #tpu.dot_dimension_numbers<[1], [0], [0], [1], [0, 0, 1, 1], [], []>} : vector<16x1024xbf16>, vector<1024x128xbf16>, vector<16x128xf32> -> vector<16x128xf32>
    %c0_i32 = arith.constant 0 : i32
    %3 = arith.cmpi eq, %arg2, %c0_i32 : i32
    %4 = arith.extui %3 : i1 to i32
    %c0_i32_3 = arith.constant 0 : i32
    %5 = arith.cmpi ne, %4, %c0_i32_3 : i32
    scf.if %5 {
      %c0_8 = arith.constant 0 : index
      %c0_9 = arith.constant 0 : index
      %12 = vector.load %arg7[%c0_8, %c0_9] : memref<16x128xf32, #tpu.memory_space<vmem>>, vector<16x128xf32>
      tpu.vector_store %arg7[%c0_8, %c0_9], %2 {strides = array<i32>} : memref<16x128xf32, #tpu.memory_space<vmem>>, vector<16x128xf32>,
    } else {
    }
    %c0_i32_4 = arith.constant 0 : i32
    %6 = arith.cmpi sgt, %arg2, %c0_i32_4 : i32
    %7 = arith.extui %6 : i1 to i32
    %c0_i32_5 = arith.constant 0 : i32
    %8 = arith.cmpi ne, %7, %c0_i32_5 : i32
    scf.if %8 {
      %c0_8 = arith.constant 0 : index
      %c0_9 = arith.constant 0 : index
      %12 = vector.load %arg7[%c0_8, %c0_9] : memref<16x128xf32, #tpu.memory_space<vmem>>, vector<16x128xf32>
      %13 = arith.addf %12, %2 : vector<16x128xf32>
      %c0_10 = arith.constant 0 : index
      %c0_11 = arith.constant 0 : index
      %14 = vector.load %arg7[%c0_10, %c0_11] : memref<16x128xf32, #tpu.memory_space<vmem>>, vector<16x128xf32>
      tpu.vector_store %arg7[%c0_10, %c0_11], %13 {strides = array<i32>} : memref<16x128xf32, #tpu.memory_space<vmem>>, vector<16x128xf32>,
    } else {
    }
    %c0_i32_6 = arith.constant 0 : i32
    %9 = arith.cmpi eq, %arg2, %c0_i32_6 : i32
    %10 = arith.extui %9 : i1 to i32
    %c0_i32_7 = arith.constant 0 : i32
    %11 = arith.cmpi ne, %10, %c0_i32_7 : i32
    scf.if %11 {
      %c0_8 = arith.constant 0 : index
      %c0_9 = arith.constant 0 : index
      %12 = vector.load %arg7[%c0_8, %c0_9] : memref<16x128xf32, #tpu.memory_space<vmem>>, vector<16x128xf32>
      %c0_10 = arith.constant 0 : index
      %c0_11 = arith.constant 0 : index
      %13 = vector.load %arg5[%c0_10, %c0_11] : memref<1x128xf32, #tpu.memory_space<vmem>>, vector<1x128xf32>
      %14 = vector.broadcast %13 : vector<1x128xf32> to vector<16x128xf32>
      %15 = arith.addf %12, %14 : vector<16x128xf32>
      %cst_12 = arith.constant 0.000000e+00 : f32
      %16 = vector.broadcast %cst_12 : f32 to vector<16x128xf32>
      %17 = arith.maximumf %15, %16 : vector<16x128xf32>
      %18 = arith.truncf %17 : vector<16x128xf32> to vector<16x128xbf16>
      %c0_13 = arith.constant 0 : index
      %c0_14 = arith.constant 0 : index
      %19 = vector.load %arg6[%c0_13, %c0_14] : memref<16x128xbf16, #tpu.memory_space<vmem>>, vector<16x128xbf16>
      tpu.vector_store %arg6[%c0_13, %c0_14], %18 {strides = array<i32>} : memref<16x128xbf16, #tpu.memory_space<vmem>>, vector<16x128xbf16>,
    } else {
    }
    return
  }
  func.func @transform_0(%arg0: i32, %arg1: i32, %arg2: i32) -> (i32, i32) {
    %c0_i32 = arith.constant 0 : i32
    return %arg0, %arg2 : i32, i32
  }
  func.func @transform_1(%arg0: i32, %arg1: i32, %arg2: i32) -> (i32, i32) {
    %c0_i32 = arith.constant 0 : i32
    return %arg2, %arg1 : i32, i32
  }
  func.func @transform_2(%arg0: i32, %arg1: i32, %arg2: i32) -> (i32, i32) {
    %c0_i32 = arith.constant 0 : i32
    %c0_i32_0 = arith.constant 0 : i32
    return %c0_i32, %arg1 : i32, i32
  }
  func.func @transform_3(%arg0: i32, %arg1: i32, %arg2: i32) -> (i32, i32) {
    %c0_i32 = arith.constant 0 : i32
    return %arg0, %arg1 : i32, i32
  }
}

module attributes {stable_mosaic.version = 11 : i64} {
  func.func @_matmul_kernel(%arg0: i32, %arg1: i32, %arg2: i32, %arg3: memref<64x512xbf16, #tpu.memory_space<vmem>>, %arg4: memref<512x128xbf16, #tpu.memory_space<vmem>>, %arg5: memref<1x128xf32, #tpu.memory_space<vmem>>, %arg6: memref<64x128xbf16, #tpu.memory_space<vmem>>, %arg7: memref<64x128xf32, #tpu.memory_space<vmem>>) attributes {dimension_semantics = [#tpu.dimension_semantics<parallel>, #tpu.dimension_semantics<parallel>, #tpu.dimension_semantics<arbitrary>], iteration_bounds = array<i64: 2, 1, 1>, scalar_prefetch = 0 : i64, scratch_operands = 1 : i64, tpu.core_type = #tpu.core_type<tc>, window_params = [{transform_indices = @transform_0, window_bounds = array<i64: 64, 512>}, {transform_indices = @transform_1, window_bounds = array<i64: 512, 128>}, {transform_indices = @transform_2, window_bounds = array<i64: 1, 128>}, {transform_indices = @transform_3, window_bounds = array<i64: 64, 128>}]} {
    %c0 = arith.constant 0 : index
    %c0_0 = arith.constant 0 : index
    %0 = vector.load %arg3[%c0, %c0_0] : memref<64x512xbf16, #tpu.memory_space<vmem>>, vector<64x512xbf16>
    %c0_1 = arith.constant 0 : index
    %c0_2 = arith.constant 0 : index
    %1 = vector.load %arg4[%c0_1, %c0_2] : memref<512x128xbf16, #tpu.memory_space<vmem>>, vector<512x128xbf16>
    %cst = arith.constant dense<0.000000e+00> : vector<64x128xf32>
    %2 = tpu.matmul %0, %1, %cst {dimension_numbers = #tpu.dot_dimension_numbers<[1], [0], [0], [1], [0, 0, 1, 1], [], []>} : vector<64x512xbf16>, vector<512x128xbf16>, vector<64x128xf32> -> vector<64x128xf32>
    %c0_i32 = arith.constant 0 : i32
    %3 = arith.cmpi eq, %arg2, %c0_i32 : i32
    %4 = arith.extui %3 : i1 to i32
    %c0_i32_3 = arith.constant 0 : i32
    %5 = arith.cmpi ne, %4, %c0_i32_3 : i32
    scf.if %5 {
      %c0_8 = arith.constant 0 : index
      %c0_9 = arith.constant 0 : index
      %12 = vector.load %arg7[%c0_8, %c0_9] : memref<64x128xf32, #tpu.memory_space<vmem>>, vector<64x128xf32>
      tpu.vector_store %arg7[%c0_8, %c0_9], %2 {strides = array<i32>} : memref<64x128xf32, #tpu.memory_space<vmem>>, vector<64x128xf32>,
    } else {
    }
    %c0_i32_4 = arith.constant 0 : i32
    %6 = arith.cmpi sgt, %arg2, %c0_i32_4 : i32
    %7 = arith.extui %6 : i1 to i32
    %c0_i32_5 = arith.constant 0 : i32
    %8 = arith.cmpi ne, %7, %c0_i32_5 : i32
    scf.if %8 {
      %c0_8 = arith.constant 0 : index
      %c0_9 = arith.constant 0 : index
      %12 = vector.load %arg7[%c0_8, %c0_9] : memref<64x128xf32, #tpu.memory_space<vmem>>, vector<64x128xf32>
      %13 = arith.addf %12, %2 : vector<64x128xf32>
      %c0_10 = arith.constant 0 : index
      %c0_11 = arith.constant 0 : index
      %14 = vector.load %arg7[%c0_10, %c0_11] : memref<64x128xf32, #tpu.memory_space<vmem>>, vector<64x128xf32>
      tpu.vector_store %arg7[%c0_10, %c0_11], %13 {strides = array<i32>} : memref<64x128xf32, #tpu.memory_space<vmem>>, vector<64x128xf32>,
    } else {
    }
    %c0_i32_6 = arith.constant 0 : i32
    %9 = arith.cmpi eq, %arg2, %c0_i32_6 : i32
    %10 = arith.extui %9 : i1 to i32
    %c0_i32_7 = arith.constant 0 : i32
    %11 = arith.cmpi ne, %10, %c0_i32_7 : i32
    scf.if %11 {
      %c0_8 = arith.constant 0 : index
      %c0_9 = arith.constant 0 : index
      %12 = vector.load %arg7[%c0_8, %c0_9] : memref<64x128xf32, #tpu.memory_space<vmem>>, vector<64x128xf32>
      %c0_10 = arith.constant 0 : index
      %c0_11 = arith.constant 0 : index
      %13 = vector.load %arg5[%c0_10, %c0_11] : memref<1x128xf32, #tpu.memory_space<vmem>>, vector<1x128xf32>
      %14 = vector.broadcast %13 : vector<1x128xf32> to vector<64x128xf32>
      %15 = arith.addf %12, %14 : vector<64x128xf32>
      %cst_12 = arith.constant 0.000000e+00 : f32
      %16 = vector.broadcast %cst_12 : f32 to vector<64x128xf32>
      %17 = arith.maximumf %15, %16 : vector<64x128xf32>
      %18 = arith.truncf %17 : vector<64x128xf32> to vector<64x128xbf16>
      %c0_13 = arith.constant 0 : index
      %c0_14 = arith.constant 0 : index
      %19 = vector.load %arg6[%c0_13, %c0_14] : memref<64x128xbf16, #tpu.memory_space<vmem>>, vector<64x128xbf16>
      tpu.vector_store %arg6[%c0_13, %c0_14], %18 {strides = array<i32>} : memref<64x128xbf16, #tpu.memory_space<vmem>>, vector<64x128xbf16>,
    } else {
    }
    return
  }
  func.func @transform_0(%arg0: i32, %arg1: i32, %arg2: i32) -> (i32, i32) {
    %c0_i32 = arith.constant 0 : i32
    return %arg0, %arg2 : i32, i32
  }
  func.func @transform_1(%arg0: i32, %arg1: i32, %arg2: i32) -> (i32, i32) {
    %c0_i32 = arith.constant 0 : i32
    return %arg2, %arg1 : i32, i32
  }
  func.func @transform_2(%arg0: i32, %arg1: i32, %arg2: i32) -> (i32, i32) {
    %c0_i32 = arith.constant 0 : i32
    %c0_i32_0 = arith.constant 0 : i32
    return %c0_i32, %arg1 : i32, i32
  }
  func.func @transform_3(%arg0: i32, %arg1: i32, %arg2: i32) -> (i32, i32) {
    %c0_i32 = arith.constant 0 : i32
    return %arg0, %arg1 : i32, i32
  }
}

module attributes {stable_mosaic.version = 11 : i64} {
  func.func @_matmul_kernel(%arg0: i32, %arg1: i32, %arg2: i32, %arg3: memref<256x640xbf16, #tpu.memory_space<vmem>>, %arg4: memref<640x128xbf16, #tpu.memory_space<vmem>>, %arg5: memref<1x128xf32, #tpu.memory_space<vmem>>, %arg6: memref<256x128xf32, #tpu.memory_space<vmem>>, %arg7: memref<256x128xf32, #tpu.memory_space<vmem>>) attributes {dimension_semantics = [#tpu.dimension_semantics<parallel>, #tpu.dimension_semantics<parallel>, #tpu.dimension_semantics<arbitrary>], iteration_bounds = array<i64: 2, 1, 1>, scalar_prefetch = 0 : i64, scratch_operands = 1 : i64, tpu.core_type = #tpu.core_type<tc>, window_params = [{transform_indices = @transform_0, window_bounds = array<i64: 256, 640>}, {transform_indices = @transform_1, window_bounds = array<i64: 640, 128>}, {transform_indices = @transform_2, window_bounds = array<i64: 1, 128>}, {transform_indices = @transform_3, window_bounds = array<i64: 256, 128>}]} {
    %c0 = arith.constant 0 : index
    %c0_0 = arith.constant 0 : index
    %0 = vector.load %arg3[%c0, %c0_0] : memref<256x640xbf16, #tpu.memory_space<vmem>>, vector<256x640xbf16>
    %c0_1 = arith.constant 0 : index
    %c0_2 = arith.constant 0 : index
    %1 = vector.load %arg4[%c0_1, %c0_2] : memref<640x128xbf16, #tpu.memory_space<vmem>>, vector<640x128xbf16>
    %cst = arith.constant dense<0.000000e+00> : vector<256x128xf32>
    %2 = tpu.matmul %0, %1, %cst {dimension_numbers = #tpu.dot_dimension_numbers<[1], [0], [0], [1], [0, 0, 1, 1], [], []>} : vector<256x640xbf16>, vector<640x128xbf16>, vector<256x128xf32> -> vector<256x128xf32>
    %c0_i32 = arith.constant 0 : i32
    %3 = arith.cmpi eq, %arg2, %c0_i32 : i32
    %4 = arith.extui %3 : i1 to i32
    %c0_i32_3 = arith.constant 0 : i32
    %5 = arith.cmpi ne, %4, %c0_i32_3 : i32
    scf.if %5 {
      %c0_8 = arith.constant 0 : index
      %c0_9 = arith.constant 0 : index
      %12 = vector.load %arg7[%c0_8, %c0_9] : memref<256x128xf32, #tpu.memory_space<vmem>>, vector<256x128xf32>
      tpu.vector_store %arg7[%c0_8, %c0_9], %2 {strides = array<i32>} : memref<256x128xf32, #tpu.memory_space<vmem>>, vector<256x128xf32>,
    } else {
    }
    %c0_i32_4 = arith.constant 0 : i32
    %6 = arith.cmpi sgt, %arg2, %c0_i32_4 : i32
    %7 = arith.extui %6 : i1 to i32
    %c0_i32_5 = arith.constant 0 : i32
    %8 = arith.cmpi ne, %7, %c0_i32_5 : i32
    scf.if %8 {
      %c0_8 = arith.constant 0 : index
      %c0_9 = arith.constant 0 : index
      %12 = vector.load %arg7[%c0_8, %c0_9] : memref<256x128xf32, #tpu.memory_space<vmem>>, vector<256x128xf32>
      %13 = arith.addf %12, %2 : vector<256x128xf32>
      %c0_10 = arith.constant 0 : index
      %c0_11 = arith.constant 0 : index
      %14 = vector.load %arg7[%c0_10, %c0_11] : memref<256x128xf32, #tpu.memory_space<vmem>>, vector<256x128xf32>
      tpu.vector_store %arg7[%c0_10, %c0_11], %13 {strides = array<i32>} : memref<256x128xf32, #tpu.memory_space<vmem>>, vector<256x128xf32>,
    } else {
    }
    %c0_i32_6 = arith.constant 0 : i32
    %9 = arith.cmpi eq, %arg2, %c0_i32_6 : i32
    %10 = arith.extui %9 : i1 to i32
    %c0_i32_7 = arith.constant 0 : i32
    %11 = arith.cmpi ne, %10, %c0_i32_7 : i32
    scf.if %11 {
      %c0_8 = arith.constant 0 : index
      %c0_9 = arith.constant 0 : index
      %12 = vector.load %arg7[%c0_8, %c0_9] : memref<256x128xf32, #tpu.memory_space<vmem>>, vector<256x128xf32>
      %c0_10 = arith.constant 0 : index
      %c0_11 = arith.constant 0 : index
      %13 = vector.load %arg5[%c0_10, %c0_11] : memref<1x128xf32, #tpu.memory_space<vmem>>, vector<1x128xf32>
      %14 = vector.broadcast %13 : vector<1x128xf32> to vector<256x128xf32>
      %15 = arith.addf %12, %14 : vector<256x128xf32>
      %16 = arith.negf %15 : vector<256x128xf32>
      %17 = math.exp %16 : vector<256x128xf32>
      %cst_12 = arith.constant 1.000000e+00 : f32
      %18 = vector.broadcast %cst_12 : f32 to vector<256x128xf32>
      %19 = arith.addf %18, %17 : vector<256x128xf32>
      %20 = arith.divf %18, %19 : vector<256x128xf32>
      %c0_13 = arith.constant 0 : index
      %c0_14 = arith.constant 0 : index
      %21 = vector.load %arg6[%c0_13, %c0_14] : memref<256x128xf32, #tpu.memory_space<vmem>>, vector<256x128xf32>
      tpu.vector_store %arg6[%c0_13, %c0_14], %20 {strides = array<i32>} : memref<256x128xf32, #tpu.memory_space<vmem>>, vector<256x128xf32>,
    } else {
    }
    return
  }
  func.func @transform_0(%arg0: i32, %arg1: i32, %arg2: i32) -> (i32, i32) {
    %c0_i32 = arith.constant 0 : i32
    return %arg0, %arg2 : i32, i32
  }
  func.func @transform_1(%arg0: i32, %arg1: i32, %arg2: i32) -> (i32, i32) {
    %c0_i32 = arith.constant 0 : i32
    return %arg2, %arg1 : i32, i32
  }
  func.func @transform_2(%arg0: i32, %arg1: i32, %arg2: i32) -> (i32, i32) {
    %c0_i32 = arith.constant 0 : i32
    %c0_i32_0 = arith.constant 0 : i32
    return %c0_i32, %arg1 : i32, i32
  }
  func.func @transform_3(%arg0: i32, %arg1: i32, %arg2: i32) -> (i32, i32) {
    %c0_i32 = arith.constant 0 : i32
    return %arg0, %arg1 : i32, i32
  }
}

</mosaic_0001>

<bundles_post_ra>
// kernel: vae_forward.19
= control target key start
LH: loop header
LB: loop body
LE: loop exit
PB: predicated region body
PF: predicated region fallthrough
CT: control target
= control target key end

     0   :  { %s1503_s12 = smov 0   ;;  %s1505_s13 = smov 0   ;;  %s1640_s0 = inlined_call_operand.vmem [shape: bf16[512,128], index: 0, kind: input, shape index: {}]   ;;  %s1641_s1 = inlined_call_operand.vmem [shape: bf16[128,128], index: 1, kind: input, shape index: {}]   ;;  %s1642_s2 = inlined_call_operand.vmem [shape: f32[1,128], index: 2, kind: input, shape index: {}]   ;;  %s1643_s3 = inlined_call_operand.vmem [shape: bf16[512,128], index: 3, kind: output, shape index: {}]  }
   0x1   :  { %s1507_s14 = smov 0  }
   0x2 LB: > { %s32_s15 = sadd.s32 1, %s1477_s13  ;;  %p1132_p0 = scmp.ge.s32.totalorder %s1481_s14, 1  ;;  %s1481_s14 = sphi %s1507_s14, %s13_s14   ;;  %s1477_s13 = sphi %s1505_s13, %s1645_s13   ;;  %s1473_s12 = sphi %s1503_s12, %s1644_s12  }
   0x3   : > { %p34_p1 = scmp.ge.s32.totalorder %s32_s15, 2  ;;  %p188_p2 = scmp.lt.s32.totalorder %s1481_s14, 3 }
   0x5   : > { %s1647_s15 = smov (%p34_p1, %s32_s15), 0  ;;  %p189_p3 = pnand %p1132_p0, %p188_p2 }
   0x6   : > { %v1435_v0 = vld [vmem:[%s1641_s1] sm:$0xff] (!%p189_p3)   ;;  %s1133_s18 = sshll.u32 (!%p189_p3), %s1473_s12, 5  ;;  %v1436_v1 = vld [vmem:[%s1641_s1 + $0x8] sm:$0xff] (!%p189_p3)   ;;  %v1437_v2 = vld [vmem:[%s1641_s1 + $0x10] sm:$0xff] (!%p189_p3)  }
   0x7   : > { %192 = sbr.rel (%p189_p3) target bundleno = 285 (0x11d), region = 32  ;;  %p230_p4 = scmp.lt.s32.totalorder (!%p189_p3), %s1133_s18, 63  ;;  %1347 = vmatprep.subr.bf16.mxu0 (!%p189_p3), %v1435_v0  ;;  %1395 = vmatprep.subr.bf16.mxu1 (!%p189_p3), %v1435_v0  ;;  %v1438_v3 = vld [vmem:[%s1641_s1 + $0x18] sm:$0xff] (!%p189_p3)   ;;  %v1439_v6 = vld [vmem:[%s1641_s1 + $0x20] sm:$0xff] (!%p189_p3)   ;;  %v1440_v7 = vld [vmem:[%s1641_s1 + $0x28] sm:$0xff] (!%p189_p3)  }
   0x8   : > { %1348 = vmatpush3.bf16.msra.mxu0 (!%p189_p3), %v1435_v0  ;;  %1403 = vmatpush3.bf16.msra.mxu1 (!%p189_p3), %v1435_v0  ;;  %v1441_v8 = vld [vmem:[%s1641_s1 + $0x30] sm:$0xff] (!%p189_p3)   ;;  %v1442_v9 = vld [vmem:[%s1641_s1 + $0x38] sm:$0xff] (!%p189_p3)   ;;  %v1574_v24 = vld [vmem:[%s1642_s2] ss:$0 sm:$0xff] (!%p189_p3) }
   0x9   : > { %1349 = vmatprep.subr.bf16.mxu0 (!%p189_p3), %v1436_v1  ;;  %1396 = vmatprep.subr.bf16.mxu1 (!%p189_p3), %v1436_v1 }
   0xc   : > { %1350 = vmatpush3.bf16.msra.mxu0 (!%p189_p3), %v1436_v1  ;;  %1404 = vmatpush3.bf16.msra.mxu1 (!%p189_p3), %v1436_v1 }
   0xd   : > { %1351 = vmatprep.subr.bf16.mxu0 (!%p189_p3), %v1437_v2  ;;  %1397 = vmatprep.subr.bf16.mxu1 (!%p189_p3), %v1437_v2 }
   0xe   : > { %s1649_s18 = smov (!%p230_p4, %s1133_s18), 63 }
   0xf   : > { %s1134_s23 = sshll.u32 %s1649_s18, 2 }
  0x10   : > { %s1538_s26 = scalar_lea.vmem %s1640_s0, %s1134_s23  ;;  %1352 = vmatpush3.bf16.msra.mxu0 %v1437_v2  ;;  %1405 = vmatpush3.bf16.msra.mxu1 %v1437_v2  ;;  %s1589_s17 = scalar_lea.vmem %s1643_s3, %s1134_s23 }
  0x11   : > { %v1443_v4 = vld [vmem:[%s1538_s26] sm:$0xff]   ;;  %1353 = vmatprep.subr.bf16.mxu0 %v1438_v3  ;;  %1398 = vmatprep.subr.bf16.mxu1 %v1438_v3  ;;  %v1445_v10 = vld [vmem:[%s1538_s26 + $0x8] sm:$0xff]   ;;  %v1447_v12 = vld [vmem:[%s1538_s26 + $0x10] sm:$0xff]  }
  0x12   : > { %v1444_v5 = vld [vmem:[%s1538_s26 + $0x40] sm:$0xff]   ;;  %1363 = vmatprep.mubr.bf16.mxu0 %v1443_v4  ;;  %v1446_v11 = vld [vmem:[%s1538_s26 + $0x48] sm:$0xff]   ;;  %v1448_v13 = vld [vmem:[%s1538_s26 + $0x50] sm:$0xff]  }
  0x13   : > { %1379 = vmatprep.mubr.bf16.mxu1 %v1444_v5  ;;  %v1449_v14 = vld [vmem:[%s1538_s26 + $0x18] sm:$0xff]   ;;  %v1451_v16 = vld [vmem:[%s1538_s26 + $0x20] sm:$0xff]   ;;  %v1453_v18 = vld [vmem:[%s1538_s26 + $0x28] sm:$0xff]  }
  0x14   : > { %1354 = vmatpush3.bf16.msra.mxu0 %v1438_v3  ;;  %1406 = vmatpush3.bf16.msra.mxu1 %v1438_v3  ;;  %v1450_v15 = vld [vmem:[%s1538_s26 + $0x58] sm:$0xff]   ;;  %v1452_v17 = vld [vmem:[%s1538_s26 + $0x60] sm:$0xff]   ;;  %v1454_v19 = vld [vmem:[%s1538_s26 + $0x68] sm:$0xff]  }
  0x15   : > { %1355 = vmatprep.subr.bf16.mxu0 %v1439_v6  ;;  %1399 = vmatprep.subr.bf16.mxu1 %v1439_v6  ;;  %v1455_v20 = vld [vmem:[%s1538_s26 + $0x30] sm:$0xff]   ;;  %v1457_v22 = vld [vmem:[%s1538_s26 + $0x38] sm:$0xff]  }
  0x16   : > { %v1456_v21 = vld [vmem:[%s1538_s26 + $0x70] sm:$0xff]   ;;  %v1458_v23 = vld [vmem:[%s1538_s26 + $0x78] sm:$0xff]  }
  0x18   : > { %1356 = vmatpush3.bf16.msra.mxu0 %v1439_v6  ;;  %1407 = vmatpush3.bf16.msra.mxu1 %v1439_v6 }
  0x19   : > { %1357 = vmatprep.subr.bf16.mxu0 %v1440_v7  ;;  %1400 = vmatprep.subr.bf16.mxu1 %v1440_v7 }
  0x1c   : > { %1358 = vmatpush3.bf16.msra.mxu0 %v1440_v7  ;;  %1408 = vmatpush3.bf16.msra.mxu1 %v1440_v7 }
  0x1d   : > { %1359 = vmatprep.subr.bf16.mxu0 %v1441_v8  ;;  %1401 = vmatprep.subr.bf16.mxu1 %v1441_v8 }
  0x20   : > { %1360 = vmatpush3.bf16.msra.mxu0 %v1441_v8  ;;  %1409 = vmatpush3.bf16.msra.mxu1 %v1441_v8 }
  0x21   : > { %1361 = vmatprep.subr.bf16.mxu0 %v1442_v9  ;;  %1402 = vmatprep.subr.bf16.mxu1 %v1442_v9 }
  0x24   : > { %1362 = vmatpush3.bf16.msra.mxu0 %v1442_v9  ;;  %1410 = vmatpush3.bf16.msra.mxu1 %v1442_v9 }
  0x27   : > { %1364 = vmatmul.mubr.bf16.vlgmr.msra.gmra.mrb[0].mxu0 %v1445_v10  ;;  %1380 = vmatmul.mubr.bf16.vlgmr.msra.gmra.mrb[0].mxu1 %v1446_v11 }
  0x28   : > { %1367 = vmatprep.mubr.bf16.mxu0 %v1447_v12  ;;  %1383 = vmatprep.mubr.bf16.mxu1 %v1448_v13 }
  0x2f   : > { %1368 = vmatmul.mubr.bf16.gmra.mrb[4].mxu0 %v1449_v14  ;;  %1384 = vmatmul.mubr.bf16.gmra.mrb[4].mxu1 %v1450_v15 }
  0x30   : > { %1371 = vmatprep.mubr.bf16.mxu0 %v1451_v16  ;;  %1387 = vmatprep.mubr.bf16.mxu1 %v1452_v17 }
  0x37   : > { %1372 = vmatmul.mubr.bf16.gmra.mrb[8].mxu0 %v1453_v18  ;;  %1388 = vmatmul.mubr.bf16.gmra.mrb[8].mxu1 %v1454_v19 }
  0x38   : > { %1375 = vmatprep.mubr.bf16.mxu0 %v1455_v20  ;;  %1391 = vmatprep.mubr.bf16.mxu1 %v1456_v21 }
  0x3f   : > { %1376 = vmatmul.mubr.bf16.gmra.mrb[12].mxu0 %v1457_v22  ;;  %1392 = vmatmul.mubr.bf16.gmra.mrb[12].mxu1 %v1458_v23 }
  0xfa   : > { %v1365_v25 = vpop.f32.mrb[0].mxu0  ;;  %v1381_v26 = vpop.f32.mrb[0].mxu1 }
  0xfb   : > { %v793_v27 = vadd.f32 %v1365_v25, %v1574_v24  ;;  %v809_v28 = vadd.f32 %v1381_v26, %v1574_v24  ;;  %v486_v29 = vpop.f32.mrb[1].mxu0  ;;  %v550_v30 = vpop.f32.mrb[1].mxu1 }
  0xfc   : > { %v791_v31 = vadd.f32 %v1574_v24, %v486_v29  ;;  %v807_v32 = vadd.f32 %v1574_v24, %v550_v30  ;;  %v1366_v33 = vpop.f32.mrb[2].mxu0  ;;  %v1382_v34 = vpop.f32.mrb[2].mxu1 }
  0xfd   : > { %v794_v35 = vadd.f32 %v1366_v33, %v1574_v24  ;;  %v810_v36 = vadd.f32 %v1382_v34, %v1574_v24  ;;  %v489_v37 = vpop.f32.mrb[3].mxu0  ;;  %v553_v38 = vpop.f32.mrb[3].mxu1  ;;  %v825_v41 = vmax.f32 %v793_v27, 0.0  ;;  %v841_v42 = vmax.f32 %v809_v28, 0.0 }
  0xfe   : > { %v792_v39 = vadd.f32 %v1574_v24, %v489_v37  ;;  %v808_v40 = vadd.f32 %v1574_v24, %v553_v38  ;;  %v823_v45 = vmax.f32 %v791_v31, 0.0  ;;  %v839_v46 = vmax.f32 %v807_v32, 0.0 }
  0xff   : > { %v826_v43 = vmax.f32 %v794_v35, 0.0  ;;  %v842_v44 = vmax.f32 %v810_v36, 0.0 }
 0x100   : > { %v824_v47 = vmax.f32 %v792_v39, 0.0  ;;  %v840_v48 = vmax.f32 %v808_v40, 0.0 }
 0x101   : > { %v1236_v49 = vpack.c.bf16 %v826_v43, %v825_v41  ;;  %v1276_v50 = vpack.c.bf16 %v842_v44, %v841_v42 }
 0x102   : > { %v1231_v51 = vpack.c.bf16 %v824_v47, %v823_v45  ;;  %v1271_v52 = vpack.c.bf16 %v840_v48, %v839_v46  ;;  %v1369_v53 = vpop.f32.mrb[4].mxu0  ;;  %v1385_v54 = vpop.f32.mrb[4].mxu1 }
 0x103   : > { %1308 = vst [vmem:[%s1589_s17 + $0x8] sm:$0xff] %v1236_v49   ;;  %1316 = vst [vmem:[%s1589_s17 + $0x48] sm:$0xff] %v1276_v50   ;;  %v797_v55 = vadd.f32 %v1369_v53, %v1574_v24  ;;  %v813_v56 = vadd.f32 %v1385_v54, %v1574_v24  ;;  %v502_v57 = vpop.f32.mrb[5].mxu0  ;;  %v566_v58 = vpop.f32.mrb[5].mxu1 }
 0x104   : > { %1232 = vst [vmem:[%s1589_s17] sm:$0xff] %v1231_v51   ;;  %1315 = vst [vmem:[%s1589_s17 + $0x40] sm:$0xff] %v1271_v52   ;;  %v795_v59 = vadd.f32 %v1574_v24, %v502_v57  ;;  %v811_v60 = vadd.f32 %v1574_v24, %v566_v58  ;;  %v1370_v61 = vpop.f32.mrb[6].mxu0  ;;  %v1386_v62 = vpop.f32.mrb[6].mxu1 }
 0x105   : > { %v798_v63 = vadd.f32 %v1370_v61, %v1574_v24  ;;  %v814_v0 = vadd.f32 %v1386_v62, %v1574_v24  ;;  %v505_v1 = vpop.f32.mrb[7].mxu0  ;;  %v569_v2 = vpop.f32.mrb[7].mxu1  ;;  %v829_v5 = vmax.f32 %v797_v55, 0.0  ;;  %v845_v6 = vmax.f32 %v813_v56, 0.0 }
 0x106   : > { %v796_v3 = vadd.f32 %v1574_v24, %v505_v1  ;;  %v812_v4 = vadd.f32 %v1574_v24, %v569_v2  ;;  %v827_v9 = vmax.f32 %v795_v59, 0.0  ;;  %v843_v10 = vmax.f32 %v811_v60, 0.0 }
 0x107   : > { %v830_v7 = vmax.f32 %v798_v63, 0.0  ;;  %v846_v8 = vmax.f32 %v814_v0, 0.0 }
 0x108   : > { %v828_v11 = vmax.f32 %v796_v3, 0.0  ;;  %v844_v12 = vmax.f32 %v812_v4, 0.0 }
 0x109   : > { %v1246_v13 = vpack.c.bf16 %v830_v7, %v829_v5  ;;  %v1286_v14 = vpack.c.bf16 %v846_v8, %v845_v6 }
 0x10a   : > { %v1241_v15 = vpack.c.bf16 %v828_v11, %v827_v9  ;;  %v1281_v16 = vpack.c.bf16 %v844_v12, %v843_v10  ;;  %v1373_v17 = vpop.f32.mrb[8].mxu0  ;;  %v1389_v18 = vpop.f32.mrb[8].mxu1 }
 0x10b   : > { %1310 = vst [vmem:[%s1589_s17 + $0x18] sm:$0xff] %v1246_v13   ;;  %1318 = vst [vmem:[%s1589_s17 + $0x58] sm:$0xff] %v1286_v14   ;;  %v801_v19 = vadd.f32 %v1373_v17, %v1574_v24  ;;  %v817_v20 = vadd.f32 %v1389_v18, %v1574_v24  ;;  %v518_v21 = vpop.f32.mrb[9].mxu0  ;;  %v582_v22 = vpop.f32.mrb[9].mxu1 }
 0x10c   : > { %1309 = vst [vmem:[%s1589_s17 + $0x10] sm:$0xff] %v1241_v15   ;;  %1317 = vst [vmem:[%s1589_s17 + $0x50] sm:$0xff] %v1281_v16   ;;  %v799_v23 = vadd.f32 %v1574_v24, %v518_v21  ;;  %v815_v25 = vadd.f32 %v1574_v24, %v582_v22  ;;  %v1374_v26 = vpop.f32.mrb[10].mxu0  ;;  %v1390_v27 = vpop.f32.mrb[10].mxu1 }
 0x10d   : > { %v802_v28 = vadd.f32 %v1374_v26, %v1574_v24  ;;  %v818_v29 = vadd.f32 %v1390_v27, %v1574_v24  ;;  %v521_v30 = vpop.f32.mrb[11].mxu0  ;;  %v585_v31 = vpop.f32.mrb[11].mxu1  ;;  %v833_v34 = vmax.f32 %v801_v19, 0.0  ;;  %v849_v35 = vmax.f32 %v817_v20, 0.0 }
 0x10e   : > { %v800_v32 = vadd.f32 %v1574_v24, %v521_v30  ;;  %v816_v33 = vadd.f32 %v1574_v24, %v585_v31  ;;  %v831_v38 = vmax.f32 %v799_v23, 0.0  ;;  %v847_v39 = vmax.f32 %v815_v25, 0.0 }
 0x10f   : > { %v834_v36 = vmax.f32 %v802_v28, 0.0  ;;  %v850_v37 = vmax.f32 %v818_v29, 0.0 }
 0x110   : > { %v832_v40 = vmax.f32 %v800_v32, 0.0  ;;  %v848_v41 = vmax.f32 %v816_v33, 0.0 }
 0x111   : > { %v1256_v42 = vpack.c.bf16 %v834_v36, %v833_v34  ;;  %v1296_v43 = vpack.c.bf16 %v850_v37, %v849_v35 }
 0x112   : > { %v1251_v44 = vpack.c.bf16 %v832_v40, %v831_v38  ;;  %v1291_v45 = vpack.c.bf16 %v848_v41, %v847_v39  ;;  %v1377_v46 = vpop.f32.mrb[12].mxu0  ;;  %v1393_v47 = vpop.f32.mrb[12].mxu1 }
 0x113   : > { %1312 = vst [vmem:[%s1589_s17 + $0x28] sm:$0xff] %v1256_v42   ;;  %1320 = vst [vmem:[%s1589_s17 + $0x68] sm:$0xff] %v1296_v43   ;;  %v805_v48 = vadd.f32 %v1377_v46, %v1574_v24  ;;  %v821_v49 = vadd.f32 %v1393_v47, %v1574_v24  ;;  %v534_v50 = vpop.f32.mrb[13].mxu0  ;;  %v598_v51 = vpop.f32.mrb[13].mxu1 }
 0x114   : > { %1311 = vst [vmem:[%s1589_s17 + $0x20] sm:$0xff] %v1251_v44   ;;  %1319 = vst [vmem:[%s1589_s17 + $0x60] sm:$0xff] %v1291_v45   ;;  %v803_v52 = vadd.f32 %v1574_v24, %v534_v50  ;;  %v819_v53 = vadd.f32 %v1574_v24, %v598_v51  ;;  %v1378_v54 = vpop.f32.mrb[14].mxu0  ;;  %v1394_v55 = vpop.f32.mrb[14].mxu1 }
 0x115   : > { %v806_v56 = vadd.f32 %v1378_v54, %v1574_v24  ;;  %v822_v57 = vadd.f32 %v1394_v55, %v1574_v24  ;;  %v537_v58 = vpop.f32.mrb[15].mxu0  ;;  %v601_v59 = vpop.f32.mrb[15].mxu1  ;;  %v837_v62 = vmax.f32 %v805_v48, 0.0  ;;  %v853_v63 = vmax.f32 %v821_v49, 0.0 }
 0x116   : > { %v804_v60 = vadd.f32 %v1574_v24, %v537_v58  ;;  %v820_v61 = vadd.f32 %v1574_v24, %v601_v59  ;;  %v835_v2 = vmax.f32 %v803_v52, 0.0  ;;  %v851_v3 = vmax.f32 %v819_v53, 0.0 }
 0x117   : > { %v838_v0 = vmax.f32 %v806_v56, 0.0  ;;  %v854_v1 = vmax.f32 %v822_v57, 0.0 }
 0x118   : > { %v836_v4 = vmax.f32 %v804_v60, 0.0  ;;  %v852_v5 = vmax.f32 %v820_v61, 0.0 }
 0x119   : > { %v1266_v6 = vpack.c.bf16 %v838_v0, %v837_v62  ;;  %v1306_v7 = vpack.c.bf16 %v854_v1, %v853_v63 }
 0x11a   : > { %v1261_v8 = vpack.c.bf16 %v836_v4, %v835_v2  ;;  %v1301_v9 = vpack.c.bf16 %v852_v5, %v851_v3 }
 0x11b   : > { %1314 = vst [vmem:[%s1589_s17 + $0x38] sm:$0xff] %v1266_v6   ;;  %1322 = vst [vmem:[%s1589_s17 + $0x78] sm:$0xff] %v1306_v7  }
 0x11c   : > { %1313 = vst [vmem:[%s1589_s17 + $0x30] sm:$0xff] %v1261_v8   ;;  %1321 = vst [vmem:[%s1589_s17 + $0x70] sm:$0xff] %v1301_v9  }
 0x11d PF: > { %s13_s14 = sadd.s32 1, %s1481_s14   ;;  %s1644_s12 = smov %s1477_s13 }
 0x11e   : > { %p10_p5 = scmp.ge.s32.totalorder %s13_s14, 4   ;;  %s1645_s13 = smov %s1647_s15 }
 0x120   :  { %12 = sbr.rel (!%p10_p5) target bundleno = 2 (0x2), region = 80 }

// kernel: vae_forward.20
= control target key start
LH: loop header
LB: loop body
LE: loop exit
PB: predicated region body
PF: predicated region fallthrough
CT: control target
= control target key end

     0   :  { %s1903_s12 = smov 0   ;;  %s1905_s13 = smov 0   ;;  %s2203_s0 = inlined_call_operand.vmem [shape: bf16[128,1024], index: 0, kind: input, shape index: {}]   ;;  %s2204_s1 = inlined_call_operand.vmem [shape: bf16[1024,128], index: 1, kind: input, shape index: {}]   ;;  %s2205_s2 = inlined_call_operand.vmem [shape: f32[1,128], index: 2, kind: input, shape index: {}]   ;;  %s2206_s3 = inlined_call_operand.vmem [shape: bf16[128,128], index: 3, kind: output, shape index: {}]  }
   0x1   :  { %s1907_s14 = smov 0  }
   0x2 LB: > { %s32_s15 = sadd.s32 1, %s1877_s13  ;;  %p1466_p0 = scmp.ge.s32.totalorder %s1881_s14, 1  ;;  %s1881_s14 = sphi %s1907_s14, %s13_s14   ;;  %s1877_s13 = sphi %s1905_s13, %s2208_s13   ;;  %s1873_s12 = sphi %s1903_s12, %s2207_s12  }
   0x3   : > { %p34_p1 = scmp.ge.s32.totalorder %s32_s15, 2  ;;  %p191_p2 = scmp.lt.s32.totalorder %s1881_s14, 3 }
   0x5   : > { %s2210_s15 = smov (%p34_p1, %s32_s15), 0  ;;  %p192_p3 = pnand %p1466_p0, %p191_p2 }
   0x6   : > { %v1795_v0 = vld [vmem:[%s2204_s1 + $0x40] sm:$0xff] (!%p192_p3)   ;;  %v1799_v4 = vld [vmem:[%s2204_s1 + $0x48] sm:$0xff] (!%p192_p3)   ;;  %v1803_v8 = vld [vmem:[%s2204_s1 + $0x50] sm:$0xff] (!%p192_p3)   ;;  %s1467_s25 = sshll.u32 (!%p192_p3), %s1873_s12, 3 }
   0x7   : > { %195 = sbr.rel (%p192_p3) target bundleno = 324 (0x144), region = 32  ;;  %v1796_v1 = vld [vmem:[%s2204_s1 + $0xc0] sm:$0xff] (!%p192_p3)   ;;  %1611 = vmatprep.subr.bf16.mxu0 (!%p192_p3), %v1795_v0  ;;  %v1800_v5 = vld [vmem:[%s2204_s1 + $0xc8] sm:$0xff] (!%p192_p3)   ;;  %v1804_v9 = vld [vmem:[%s2204_s1 + $0xd0] sm:$0xff] (!%p192_p3)   ;;  %p236_p4 = scmp.lt.s32.totalorder (!%p192_p3), %s1467_s25, 15 }
   0x8   : > { %v1797_v2 = vld [vmem:[%s2204_s1] sm:$0xff] (!%p192_p3)   ;;  %1651 = vmatprep.subr.bf16.mxu1 (!%p192_p3), %v1796_v1  ;;  %v1801_v6 = vld [vmem:[%s2204_s1 + $0x8] sm:$0xff] (!%p192_p3)   ;;  %v1805_v10 = vld [vmem:[%s2204_s1 + $0x10] sm:$0xff] (!%p192_p3)  }
   0x9   : > { %v1798_v3 = vld [vmem:[%s2204_s1 + $0x80] sm:$0xff] (!%p192_p3)   ;;  %1612 = vmatpush3.bf16.msra.mxu0 (!%p192_p3), %v1797_v2  ;;  %v1802_v7 = vld [vmem:[%s2204_s1 + $0x88] sm:$0xff] (!%p192_p3)   ;;  %v1806_v11 = vld [vmem:[%s2204_s1 + $0x90] sm:$0xff] (!%p192_p3)  }
   0xa   : > { %1652 = vmatpush3.bf16.msra.mxu1 (!%p192_p3), %v1798_v3  ;;  %1613 = vmatprep.subr.bf16.mxu0 (!%p192_p3), %v1799_v4  ;;  %v1807_v12 = vld [vmem:[%s2204_s1 + $0x58] sm:$0xff] (!%p192_p3)   ;;  %v1811_v16 = vld [vmem:[%s2204_s1 + $0x60] sm:$0xff] (!%p192_p3)   ;;  %v1815_v20 = vld [vmem:[%s2204_s1 + $0x68] sm:$0xff] (!%p192_p3)  }
   0xb   : > { %1653 = vmatprep.subr.bf16.mxu1 (!%p192_p3), %v1800_v5  ;;  %v1808_v13 = vld [vmem:[%s2204_s1 + $0xd8] sm:$0xff] (!%p192_p3)   ;;  %v1812_v17 = vld [vmem:[%s2204_s1 + $0xe0] sm:$0xff] (!%p192_p3)   ;;  %v1816_v21 = vld [vmem:[%s2204_s1 + $0xe8] sm:$0xff] (!%p192_p3)  }
   0xc   : > { %v1809_v14 = vld [vmem:[%s2204_s1 + $0x18] sm:$0xff] (!%p192_p3)   ;;  %v1813_v18 = vld [vmem:[%s2204_s1 + $0x20] sm:$0xff] (!%p192_p3)   ;;  %v1817_v22 = vld [vmem:[%s2204_s1 + $0x28] sm:$0xff] (!%p192_p3)  }
   0xd   : > { %1614 = vmatpush3.bf16.msra.mxu0 (!%p192_p3), %v1801_v6  ;;  %v1810_v15 = vld [vmem:[%s2204_s1 + $0x98] sm:$0xff] (!%p192_p3)   ;;  %v1814_v19 = vld [vmem:[%s2204_s1 + $0xa0] sm:$0xff] (!%p192_p3)   ;;  %v1818_v23 = vld [vmem:[%s2204_s1 + $0xa8] sm:$0xff] (!%p192_p3)  }
   0xe   : > { %1654 = vmatpush3.bf16.msra.mxu1 %v1802_v7  ;;  %1615 = vmatprep.subr.bf16.mxu0 %v1803_v8  ;;  %s2212_s25 = smov (!%p236_p4, %s1467_s25), 15  ;;  %v1819_v24 = vld [vmem:[%s2204_s1 + $0x70] sm:$0xff]   ;;  %v1823_v28 = vld [vmem:[%s2204_s1 + $0x78] sm:$0xff]   ;;  %v1827_v40 = vld [vmem:[%s2204_s1 + $0x140] sm:$0xff]  }
   0xf   : > { %1655 = vmatprep.subr.bf16.mxu1 %v1804_v9  ;;  %v1820_v25 = vld [vmem:[%s2204_s1 + $0xf0] sm:$0xff]   ;;  %s1579_s24 = sshll.u32 %s2212_s25, 5  ;;  %v1824_v29 = vld [vmem:[%s2204_s1 + $0xf8] sm:$0xff]   ;;  %v1828_v41 = vld [vmem:[%s2204_s1 + $0x1c0] sm:$0xff]   ;;  %s1471_s10 = sshll.u32 %s2212_s25, 2 }
  0x10   : > { %v1821_v26 = vld [vmem:[%s2204_s1 + $0x30] sm:$0xff]   ;;  %s2020_s12 = scalar_lea.vmem %s2203_s0, %s1579_s24  ;;  %v1825_v30 = vld [vmem:[%s2204_s1 + $0x38] sm:$0xff]   ;;  %v1829_v42 = vld [vmem:[%s2204_s1 + $0x100] sm:$0xff]   ;;  %s2177_s17 = scalar_lea.vmem %s2206_s3, %s1471_s10 }
  0x11   : > { %1616 = vmatpush3.bf16.msra.mxu0 %v1805_v10  ;;  %v1822_v27 = vld [vmem:[%s2204_s1 + $0xb0] sm:$0xff]   ;;  %v1826_v31 = vld [vmem:[%s2204_s1 + $0xb8] sm:$0xff]   ;;  %v268_v32 = vld [vmem:[%s2020_s12] sm:$0xff] }
  0x12   : > { %1656 = vmatpush3.bf16.msra.mxu1 %v1806_v11  ;;  %1617 = vmatprep.subr.bf16.mxu0 %v1807_v12  ;;  %v272_v33 = vld [vmem:[%s2020_s12 + $0x20] sm:$0xff]  ;;  %v269_v34 = vld [vmem:[%s2020_s12 + $0x8] sm:$0xff]  ;;  %v1835_v56 = vld [vmem:[%s2204_s1 + $0x150] sm:$0xff]  }
  0x13   : > { %1657 = vmatprep.subr.bf16.mxu1 %v1808_v13  ;;  %v1472_v35 = vcombine.low %v268_v32, %v272_v33  ;;  %v1473_v36 = vcombine.high %v268_v32, %v272_v33  ;;  %v273_v37 = vld [vmem:[%s2020_s12 + $0x28] sm:$0xff]  ;;  %v1830_v43 = vld [vmem:[%s2204_s1 + $0x180] sm:$0xff]   ;;  %v1836_v57 = vld [vmem:[%s2204_s1 + $0x1d0] sm:$0xff]  }
  0x14   : > { %v1474_v38 = vcombine.low %v269_v34, %v273_v37  ;;  %v1475_v39 = vcombine.high %v269_v34, %v273_v37  ;;  %v1831_v44 = vld [vmem:[%s2204_s1 + $0x148] sm:$0xff]   ;;  %v276_v48 = vld [vmem:[%s2020_s12 + $0x40] sm:$0xff]  ;;  %v1837_v58 = vld [vmem:[%s2204_s1 + $0x110] sm:$0xff]  }
  0x15   : > { %1618 = vmatpush3.bf16.msra.mxu0 %v1809_v14  ;;  %1004 = vmatprep.mubr.bf16.mxu0 %v1473_v36  ;;  %v1832_v45 = vld [vmem:[%s2204_s1 + $0x1c8] sm:$0xff]   ;;  %v280_v49 = vld [vmem:[%s2020_s12 + $0x60] sm:$0xff]  ;;  %v1838_v59 = vld [vmem:[%s2204_s1 + $0x190] sm:$0xff]  }
  0x16   : > { %1658 = vmatpush3.bf16.msra.mxu1 %v1810_v15  ;;  %1619 = vmatprep.subr.bf16.mxu0 %v1811_v16  ;;  %v1833_v46 = vld [vmem:[%s2204_s1 + $0x108] sm:$0xff]   ;;  %v1481_v50 = vcombine.high %v276_v48, %v280_v49  ;;  %v1480_v53 = vcombine.low %v276_v48, %v280_v49  ;;  %v1839_v60 = vld [vmem:[%s2204_s1 + $0x158] sm:$0xff]   ;;  %v284_v0 = vld [vmem:[%s2020_s12 + $0x80] sm:$0xff] }
  0x17   : > { %1659 = vmatprep.subr.bf16.mxu1 %v1812_v17  ;;  %1069 = vmatprep.mubr.bf16.mxu1 %v1475_v39  ;;  %v1834_v47 = vld [vmem:[%s2204_s1 + $0x188] sm:$0xff]   ;;  %v1840_v61 = vld [vmem:[%s2204_s1 + $0x1d8] sm:$0xff]   ;;  %v288_v1 = vld [vmem:[%s2020_s12 + $0xa0] sm:$0xff] }
  0x18   : > { %v277_v51 = vld [vmem:[%s2020_s12 + $0x48] sm:$0xff]  ;;  %v1841_v62 = vld [vmem:[%s2204_s1 + $0x118] sm:$0xff]   ;;  %v1489_v4 = vcombine.high %v284_v0, %v288_v1  ;;  %v1488_v6 = vcombine.low %v284_v0, %v288_v1  ;;  %v1843_v8 = vld [vmem:[%s2204_s1 + $0x160] sm:$0xff]  }
  0x19   : > { %1620 = vmatpush3.bf16.msra.mxu0 %v1813_v18  ;;  %v281_v52 = vld [vmem:[%s2020_s12 + $0x68] sm:$0xff]  ;;  %v1842_v63 = vld [vmem:[%s2204_s1 + $0x198] sm:$0xff]   ;;  %v1844_v9 = vld [vmem:[%s2204_s1 + $0x1e0] sm:$0xff]  }
  0x1a   : > { %1660 = vmatpush3.bf16.msra.mxu1 %v1814_v19  ;;  %1621 = vmatprep.subr.bf16.mxu0 %v1815_v20  ;;  %v1483_v54 = vcombine.high %v277_v51, %v281_v52  ;;  %v1482_v55 = vcombine.low %v277_v51, %v281_v52  ;;  %v285_v2 = vld [vmem:[%s2020_s12 + $0x88] sm:$0xff]  ;;  %v1845_v10 = vld [vmem:[%s2204_s1 + $0x120] sm:$0xff]   ;;  %v270_v32 = vld [vmem:[%s2020_s12 + $0x10] sm:$0xff] }
  0x1b   : > { %1661 = vmatprep.subr.bf16.mxu1 %v1816_v21  ;;  %v289_v3 = vld [vmem:[%s2020_s12 + $0xa8] sm:$0xff]  ;;  %v1846_v11 = vld [vmem:[%s2204_s1 + $0x1a0] sm:$0xff]   ;;  %v274_v33 = vld [vmem:[%s2020_s12 + $0x30] sm:$0xff] }
  0x1c   : > { %v1491_v5 = vcombine.high %v285_v2, %v289_v3  ;;  %v1490_v7 = vcombine.low %v285_v2, %v289_v3  ;;  %v1847_v12 = vld [vmem:[%s2204_s1 + $0x168] sm:$0xff]   ;;  %v292_v16 = vld [vmem:[%s2020_s12 + $0xc0] sm:$0xff]  ;;  %v1476_v34 = vcombine.low %v270_v32, %v274_v33  ;;  %v271_v36 = vld [vmem:[%s2020_s12 + $0x18] sm:$0xff] }
  0x1d   : > { %1622 = vmatpush3.bf16.msra.mxu0 %v1817_v22  ;;  %v1848_v13 = vld [vmem:[%s2204_s1 + $0x1e8] sm:$0xff]   ;;  %v296_v17 = vld [vmem:[%s2020_s12 + $0xe0] sm:$0xff]  ;;  %v275_v37 = vld [vmem:[%s2020_s12 + $0x38] sm:$0xff] }
  0x1e   : > { %1662 = vmatpush3.bf16.msra.mxu1 %v1818_v23  ;;  %1623 = vmatprep.subr.bf16.mxu0 %v1819_v24  ;;  %v1849_v14 = vld [vmem:[%s2204_s1 + $0x128] sm:$0xff]   ;;  %v1497_v19 = vcombine.high %v292_v16, %v296_v17  ;;  %v1496_v21 = vcombine.low %v292_v16, %v296_v17  ;;  %v1851_v24 = vld [vmem:[%s2204_s1 + $0x170] sm:$0xff]   ;;  %v1478_v39 = vcombine.low %v271_v36, %v275_v37  ;;  %v287_v48 = vld [vmem:[%s2020_s12 + $0x98] sm:$0xff] }
  0x1f   : > { %1663 = vmatprep.subr.bf16.mxu1 %v1820_v25  ;;  %v1850_v15 = vld [vmem:[%s2204_s1 + $0x1a8] sm:$0xff]   ;;  %v1852_v25 = vld [vmem:[%s2204_s1 + $0x1f0] sm:$0xff]   ;;  %v291_v49 = vld [vmem:[%s2020_s12 + $0xb8] sm:$0xff] }
  0x20   : > { %v293_v18 = vld [vmem:[%s2020_s12 + $0xc8] sm:$0xff] }
  0x21   : > { %1624 = vmatpush3.bf16.msra.mxu0 %v1821_v26  ;;  %v297_v20 = vld [vmem:[%s2020_s12 + $0xe8] sm:$0xff]  ;;  %v1853_v26 = vld [vmem:[%s2204_s1 + $0x130] sm:$0xff]  }
  0x22   : > { %1664 = vmatpush3.bf16.msra.mxu1 %v1822_v27  ;;  %1625 = vmatprep.subr.bf16.mxu0 %v1823_v28  ;;  %v1499_v22 = vcombine.high %v293_v18, %v297_v20  ;;  %v1498_v23 = vcombine.low %v293_v18, %v297_v20  ;;  %v1854_v27 = vld [vmem:[%s2204_s1 + $0x1b0] sm:$0xff]   ;;  %v1855_v28 = vld [vmem:[%s2204_s1 + $0x178] sm:$0xff]  }
  0x23   : > { %1665 = vmatprep.subr.bf16.mxu1 %v1824_v29  ;;  %v1856_v29 = vld [vmem:[%s2204_s1 + $0x1f8] sm:$0xff]  }
  0x25   : > { %1626 = vmatpush3.bf16.msra.mxu0 %v1825_v30  ;;  %v1857_v30 = vld [vmem:[%s2204_s1 + $0x138] sm:$0xff]  }
  0x26   : > { %1666 = vmatpush3.bf16.msra.mxu1 %v1826_v31  ;;  %1691 = vmatprep.subr.bf16.mxu0 %v1827_v40  ;;  %v1858_v31 = vld [vmem:[%s2204_s1 + $0x1b8] sm:$0xff]   ;;  %v1479_v40 = vcombine.high %v271_v36, %v275_v37 }
  0x27   : > { %1731 = vmatprep.subr.bf16.mxu1 %v1828_v41  ;;  %v282_v41 = vld [vmem:[%s2020_s12 + $0x70] sm:$0xff] }
  0x28   : > { %1005 = vmatmul.mubr.bf16.vlgmr.msra.gmra.mrb[0].mxu0 %v1472_v35  ;;  %v1477_v35 = vcombine.high %v270_v32, %v274_v33 }
  0x29   : > { %1070 = vmatmul.mubr.bf16.vlgmr.msra.gmra.mrb[0].mxu1 %v1474_v38  ;;  %1692 = vmatpush3.bf16.msra.mxu0 %v1829_v42  ;;  %v278_v38 = vld [vmem:[%s2020_s12 + $0x50] sm:$0xff]  ;;  %v279_v42 = vld [vmem:[%s2020_s12 + $0x58] sm:$0xff] }
  0x2a   : > { %1732 = vmatpush3.bf16.msra.mxu1 %v1830_v43  ;;  %1693 = vmatprep.subr.bf16.mxu0 %v1831_v44  ;;  %v283_v43 = vld [vmem:[%s2020_s12 + $0x78] sm:$0xff]  ;;  %v1485_v44 = vcombine.high %v278_v38, %v282_v41 }
  0x2b   : > { %1733 = vmatprep.subr.bf16.mxu1 %v1832_v45  ;;  %1012 = vmatprep.mubr.bf16.mxu0 %v1481_v50  ;;  %v1487_v45 = vcombine.high %v279_v42, %v283_v43  ;;  %v1484_v50 = vcombine.low %v278_v38, %v282_v41  ;;  %v1486_v51 = vcombine.low %v279_v42, %v283_v43 }
  0x2c   : > { %1077 = vmatprep.mubr.bf16.mxu1 %v1483_v54  ;;  %v294_v54 = vld [vmem:[%s2020_s12 + $0xd0] sm:$0xff] }
  0x2d   : > { %1694 = vmatpush3.bf16.msra.mxu0 %v1833_v46  ;;  %v286_v46 = vld [vmem:[%s2020_s12 + $0x90] sm:$0xff] }
  0x2e   : > { %1734 = vmatpush3.bf16.msra.mxu1 %v1834_v47  ;;  %1695 = vmatprep.subr.bf16.mxu0 %v1835_v56  ;;  %v290_v47 = vld [vmem:[%s2020_s12 + $0xb0] sm:$0xff]  ;;  %v295_v56 = vld [vmem:[%s2020_s12 + $0xd8] sm:$0xff] }
  0x2f   : > { %1735 = vmatprep.subr.bf16.mxu1 %v1836_v57  ;;  %v1493_v52 = vcombine.high %v286_v46, %v290_v47  ;;  %v299_v57 = vld [vmem:[%s2020_s12 + $0xf8] sm:$0xff] }
  0x30   : > { %1013 = vmatmul.mubr.bf16.gmra.mrb[4].mxu0 %v1480_v53  ;;  %v1495_v53 = vcombine.high %v287_v48, %v291_v49 }
  0x31   : > { %1078 = vmatmul.mubr.bf16.gmra.mrb[4].mxu1 %v1482_v55  ;;  %1696 = vmatpush3.bf16.msra.mxu0 %v1837_v58  ;;  %v298_v55 = vld [vmem:[%s2020_s12 + $0xf0] sm:$0xff]  ;;  %v1492_v58 = vcombine.low %v286_v46, %v290_v47 }
  0x32   : > { %1736 = vmatpush3.bf16.msra.mxu1 %v1838_v59  ;;  %1697 = vmatprep.subr.bf16.mxu0 %v1839_v60  ;;  %v1494_v59 = vcombine.low %v287_v48, %v291_v49  ;;  %v1501_v60 = vcombine.high %v294_v54, %v298_v55 }
  0x33   : > { %1737 = vmatprep.subr.bf16.mxu1 %v1840_v61  ;;  %1020 = vmatprep.mubr.bf16.mxu0 %v1489_v4  ;;  %v1503_v61 = vcombine.high %v295_v56, %v299_v57 }
  0x34   : > { %1085 = vmatprep.mubr.bf16.mxu1 %v1491_v5 }
  0x35   : > { %1698 = vmatpush3.bf16.msra.mxu0 %v1841_v62  ;;  %v1500_v62 = vcombine.low %v294_v54, %v298_v55 }
  0x36   : > { %1738 = vmatpush3.bf16.msra.mxu1 %v1842_v63  ;;  %1699 = vmatprep.subr.bf16.mxu0 %v1843_v8  ;;  %v1502_v63 = vcombine.low %v295_v56, %v299_v57 }
  0x37   : > { %1739 = vmatprep.subr.bf16.mxu1 %v1844_v9 }
  0x38   : > { %1021 = vmatmul.mubr.bf16.gmra.mrb[8].mxu0 %v1488_v6 }
  0x39   : > { %1086 = vmatmul.mubr.bf16.gmra.mrb[8].mxu1 %v1490_v7  ;;  %1700 = vmatpush3.bf16.msra.mxu0 %v1845_v10 }
  0x3a   : > { %1740 = vmatpush3.bf16.msra.mxu1 %v1846_v11  ;;  %1701 = vmatprep.subr.bf16.mxu0 %v1847_v12 }
  0x3b   : > { %1741 = vmatprep.subr.bf16.mxu1 %v1848_v13  ;;  %1028 = vmatprep.mubr.bf16.mxu0 %v1497_v19 }
  0x3c   : > { %1093 = vmatprep.mubr.bf16.mxu1 %v1499_v22 }
  0x3d   : > { %1702 = vmatpush3.bf16.msra.mxu0 %v1849_v14 }
  0x3e   : > { %1742 = vmatpush3.bf16.msra.mxu1 %v1850_v15  ;;  %1703 = vmatprep.subr.bf16.mxu0 %v1851_v24 }
  0x3f   : > { %1743 = vmatprep.subr.bf16.mxu1 %v1852_v25 }
  0x40   : > { %1029 = vmatmul.mubr.bf16.gmra.mrb[12].mxu0 %v1496_v21 }
  0x41   : > { %1094 = vmatmul.mubr.bf16.gmra.mrb[12].mxu1 %v1498_v23  ;;  %1704 = vmatpush3.bf16.msra.mxu0 %v1853_v26 }
  0x42   : > { %1744 = vmatpush3.bf16.msra.mxu1 %v1854_v27  ;;  %1705 = vmatprep.subr.bf16.mxu0 %v1855_v28 }
  0x43   : > { %1745 = vmatprep.subr.bf16.mxu1 %v1856_v29  ;;  %1134 = vmatprep.mubr.bf16.mxu0 %v1477_v35 }
  0x44   : > { %1199 = vmatprep.mubr.bf16.mxu1 %v1479_v40 }
  0x45   : > { %1706 = vmatpush3.bf16.msra.mxu0 %v1857_v30 }
  0x46   : > { %1746 = vmatpush3.bf16.msra.mxu1 %v1858_v31 }
  0x48   : > { %1135 = vmatmul.mubr.bf16.vlgmr.msra.gmra.mrb[16].mxu0 %v1476_v34 }
  0x49   : > { %1200 = vmatmul.mubr.bf16.vlgmr.msra.gmra.mrb[16].mxu1 %v1478_v39  ;;  %1142 = vmatprep.mubr.bf16.mxu0 %v1485_v44 }
  0x4a   : > { %1207 = vmatprep.mubr.bf16.mxu1 %v1487_v45 }
  0x50   : > { %1143 = vmatmul.mubr.bf16.gmra.mrb[20].mxu0 %v1484_v50 }
  0x51   : > { %1208 = vmatmul.mubr.bf16.gmra.mrb[20].mxu1 %v1486_v51  ;;  %1150 = vmatprep.mubr.bf16.mxu0 %v1493_v52 }
  0x52   : > { %1215 = vmatprep.mubr.bf16.mxu1 %v1495_v53 }
  0x58   : > { %1151 = vmatmul.mubr.bf16.gmra.mrb[24].mxu0 %v1492_v58 }
  0x59   : > { %1216 = vmatmul.mubr.bf16.gmra.mrb[24].mxu1 %v1494_v59  ;;  %1158 = vmatprep.mubr.bf16.mxu0 %v1501_v60 }
  0x5a   : > { %1223 = vmatprep.mubr.bf16.mxu1 %v1503_v61 }
  0x60   : > { %1159 = vmatmul.mubr.bf16.gmra.mrb[28].mxu0 %v1500_v62 }
  0x61   : > { %1224 = vmatmul.mubr.bf16.gmra.mrb[28].mxu1 %v1502_v63 }
  0xfb   : > { %v1627_v0 = vpop.f32.mrb[0].mxu0 }
  0xfc   : > { %v1667_v1 = vpop.f32.mrb[0].mxu1  ;;  %v1628_v2 = vpop.f32.mrb[1].mxu0 }
  0xfd   : > { %v1629_v3 = vadd.f32 %v1628_v2, %v1627_v0  ;;  %v1668_v4 = vpop.f32.mrb[1].mxu1  ;;  %v1630_v5 = vpop.f32.mrb[2].mxu0 }
  0xfe   : > { %v1669_v6 = vadd.f32 %v1668_v4, %v1667_v1  ;;  %v1670_v7 = vpop.f32.mrb[2].mxu1  ;;  %v1631_v8 = vpop.f32.mrb[3].mxu0  ;;  %v2169_v4 = vld [vmem:[%s2205_s2] ss:$0 sm:$0xff] }
  0xff   : > { %v1632_v9 = vadd.f32 %v1631_v8, %v1630_v5  ;;  %v1671_v10 = vpop.f32.mrb[3].mxu1 }
 0x100   : > { %v1072_v11 = vadd.f32 %v1669_v6, %v1629_v3  ;;  %v1672_v12 = vadd.f32 %v1671_v10, %v1670_v7 }
 0x102   : > { %v1075_v13 = vadd.f32 %v1672_v12, %v1632_v9 }
 0x103   : > { %v1633_v14 = vpop.f32.mrb[4].mxu0 }
 0x104   : > { %v1673_v15 = vpop.f32.mrb[4].mxu1  ;;  %v1634_v16 = vpop.f32.mrb[5].mxu0 }
 0x105   : > { %v1635_v17 = vadd.f32 %v1634_v16, %v1633_v14  ;;  %v1674_v18 = vpop.f32.mrb[5].mxu1  ;;  %v1636_v19 = vpop.f32.mrb[6].mxu0 }
 0x106   : > { %v1675_v20 = vadd.f32 %v1674_v18, %v1673_v15  ;;  %v1676_v21 = vpop.f32.mrb[6].mxu1  ;;  %v1637_v22 = vpop.f32.mrb[7].mxu0 }
 0x107   : > { %v1638_v23 = vadd.f32 %v1637_v22, %v1636_v19  ;;  %v1677_v24 = vpop.f32.mrb[7].mxu1 }
 0x108   : > { %v1080_v25 = vadd.f32 %v1675_v20, %v1635_v17  ;;  %v1678_v26 = vadd.f32 %v1677_v24, %v1676_v21 }
 0x10a   : > { %v2156_v27 = vadd.f32 %v1678_v26, %v1638_v23 }
 0x10b   : > { %v1639_v28 = vpop.f32.mrb[8].mxu0 }
 0x10c   : > { %v1679_v29 = vpop.f32.mrb[8].mxu1  ;;  %v1640_v30 = vpop.f32.mrb[9].mxu0 }
 0x10d   : > { %v1680_v31 = vpop.f32.mrb[9].mxu1  ;;  %v1641_v32 = vadd.f32 %v1640_v30, %v1639_v28  ;;  %v1642_v34 = vpop.f32.mrb[10].mxu0 }
 0x10e   : > { %v1681_v33 = vadd.f32 %v1680_v31, %v1679_v29  ;;  %v1682_v35 = vpop.f32.mrb[10].mxu1  ;;  %v1643_v36 = vpop.f32.mrb[11].mxu0 }
 0x10f   : > { %v1683_v37 = vpop.f32.mrb[11].mxu1  ;;  %v1644_v39 = vadd.f32 %v1643_v36, %v1642_v34 }
 0x110   : > { %v2158_v38 = vadd.f32 %v1681_v33, %v1641_v32  ;;  %v1684_v40 = vadd.f32 %v1683_v37, %v1682_v35 }
 0x112   : > { %v2160_v41 = vadd.f32 %v1684_v40, %v1644_v39 }
 0x113   : > { %v1645_v42 = vpop.f32.mrb[12].mxu0 }
 0x114   : > { %v1685_v43 = vpop.f32.mrb[12].mxu1  ;;  %v1646_v44 = vpop.f32.mrb[13].mxu0 }
 0x115   : > { %v1647_v45 = vadd.f32 %v1646_v44, %v1645_v42  ;;  %v1686_v46 = vpop.f32.mrb[13].mxu1  ;;  %v1648_v47 = vpop.f32.mrb[14].mxu0 }
 0x116   : > { %v1687_v48 = vadd.f32 %v1686_v46, %v1685_v43  ;;  %v1688_v49 = vpop.f32.mrb[14].mxu1  ;;  %v1649_v50 = vpop.f32.mrb[15].mxu0 }
 0x117   : > { %v1650_v51 = vadd.f32 %v1649_v50, %v1648_v47  ;;  %v1689_v52 = vpop.f32.mrb[15].mxu1 }
 0x118   : > { %v2162_v53 = vadd.f32 %v1687_v48, %v1647_v45  ;;  %v1690_v54 = vadd.f32 %v1689_v52, %v1688_v49 }
 0x11a   : > { %v2164_v55 = vadd.f32 %v1690_v54, %v1650_v51 }
 0x11b   : > { %v1707_v56 = vpop.f32.mrb[16].mxu0 }
 0x11c   : > { %v1747_v57 = vpop.f32.mrb[16].mxu1  ;;  %v1708_v58 = vpop.f32.mrb[17].mxu0 }
 0x11d   : > { %v1709_v59 = vadd.f32 %v1708_v58, %v1707_v56  ;;  %v1748_v60 = vpop.f32.mrb[17].mxu1  ;;  %v1710_v61 = vpop.f32.mrb[18].mxu0 }
 0x11e   : > { %v1749_v62 = vadd.f32 %v1748_v60, %v1747_v57  ;;  %v1750_v63 = vpop.f32.mrb[18].mxu1  ;;  %v1711_v0 = vpop.f32.mrb[19].mxu0 }
 0x11f   : > { %v1137_v1 = vadd.f32 %v1709_v59, %v1072_v11  ;;  %v1712_v2 = vadd.f32 %v1711_v0, %v1710_v61  ;;  %v1751_v3 = vpop.f32.mrb[19].mxu1 }
 0x120   : > { %v1752_v5 = vadd.f32 %v1751_v3, %v1750_v63 }
 0x121   : > { %v1202_v6 = vadd.f32 %v1749_v62, %v1137_v1  ;;  %v1140_v7 = vadd.f32 %v1712_v2, %v1075_v13 }
 0x123   : > { %v1290_v8 = vadd.f32 %v2169_v4, %v1202_v6  ;;  %v1205_v9 = vadd.f32 %v1752_v5, %v1140_v7  ;;  %v1713_v10 = vpop.f32.mrb[20].mxu0 }
 0x124   : > { %v1753_v12 = vpop.f32.mrb[20].mxu1  ;;  %v1714_v14 = vpop.f32.mrb[21].mxu0 }
 0x125   : > { %v1291_v15 = vadd.f32 %v2169_v4, %v1205_v9  ;;  %v1715_v11 = vadd.f32 %v1714_v14, %v1713_v10  ;;  %v1754_v16 = vpop.f32.mrb[21].mxu1  ;;  %v1716_v17 = vpop.f32.mrb[22].mxu0  ;;  %v1298_v21 = vmax.f32 %v1290_v8, 0.0 }
 0x126   : > { %v1755_v18 = vadd.f32 %v1754_v16, %v1753_v12  ;;  %v1756_v19 = vpop.f32.mrb[22].mxu1  ;;  %v1717_v20 = vpop.f32.mrb[23].mxu0 }
 0x127   : > { %v1299_v22 = vmax.f32 %v1291_v15, 0.0  ;;  %v1145_v23 = vadd.f32 %v1715_v11, %v1080_v25  ;;  %v1718_v24 = vadd.f32 %v1717_v20, %v1716_v17  ;;  %v1757_v13 = vpop.f32.mrb[23].mxu1 }
 0x128   : > { %v1758_v26 = vadd.f32 %v1757_v13, %v1756_v19 }
 0x129   : > { %v1591_v28 = vpack.c.bf16 %v1299_v22, %v1298_v21  ;;  %v1210_v29 = vadd.f32 %v1755_v18, %v1145_v23  ;;  %v1148_v30 = vadd.f32 %v1718_v24, %v2156_v27 }
 0x12b   : > { %1592 = vst [vmem:[%s2177_s17] sm:$0xff] %v1591_v28   ;;  %v1292_v31 = vadd.f32 %v2169_v4, %v1210_v29  ;;  %v1213_v32 = vadd.f32 %v1758_v26, %v1148_v30  ;;  %v1719_v33 = vpop.f32.mrb[24].mxu0 }
 0x12c   : > { %v1759_v34 = vpop.f32.mrb[24].mxu1  ;;  %v1720_v25 = vpop.f32.mrb[25].mxu0 }
 0x12d   : > { %v1293_v35 = vadd.f32 %v2169_v4, %v1213_v32  ;;  %v1721_v36 = vadd.f32 %v1720_v25, %v1719_v33  ;;  %v1760_v37 = vpop.f32.mrb[25].mxu1  ;;  %v1722_v39 = vpop.f32.mrb[26].mxu0  ;;  %v1300_v44 = vmax.f32 %v1292_v31, 0.0 }
 0x12e   : > { %v1761_v40 = vadd.f32 %v1760_v37, %v1759_v34  ;;  %v1762_v42 = vpop.f32.mrb[26].mxu1  ;;  %v1723_v43 = vpop.f32.mrb[27].mxu0 }
 0x12f   : > { %v1301_v45 = vmax.f32 %v1293_v35, 0.0  ;;  %v1153_v27 = vadd.f32 %v1721_v36, %v2158_v38  ;;  %v1724_v46 = vadd.f32 %v1723_v43, %v1722_v39  ;;  %v1763_v47 = vpop.f32.mrb[27].mxu1 }
 0x130   : > { %v1764_v48 = vadd.f32 %v1763_v47, %v1762_v42 }
 0x131   : > { %v1596_v49 = vpack.c.bf16 %v1301_v45, %v1300_v44  ;;  %v1218_v50 = vadd.f32 %v1761_v40, %v1153_v27  ;;  %v1156_v51 = vadd.f32 %v1724_v46, %v2160_v41 }
 0x133   : > { %1608 = vst [vmem:[%s2177_s17 + $0x8] sm:$0xff] %v1596_v49   ;;  %v1294_v52 = vadd.f32 %v2169_v4, %v1218_v50  ;;  %v1221_v54 = vadd.f32 %v1764_v48, %v1156_v51  ;;  %v1725_v56 = vpop.f32.mrb[28].mxu0 }
 0x134   : > { %v1765_v57 = vpop.f32.mrb[28].mxu1  ;;  %v1726_v58 = vpop.f32.mrb[29].mxu0 }
 0x135   : > { %v1295_v59 = vadd.f32 %v2169_v4, %v1221_v54  ;;  %v1727_v60 = vadd.f32 %v1726_v58, %v1725_v56  ;;  %v1766_v61 = vpop.f32.mrb[29].mxu1  ;;  %v1728_v38 = vpop.f32.mrb[30].mxu0  ;;  %v1302_v1 = vmax.f32 %v1294_v52, 0.0 }
 0x136   : > { %v1767_v62 = vadd.f32 %v1766_v61, %v1765_v57  ;;  %v1768_v63 = vpop.f32.mrb[30].mxu1  ;;  %v1729_v0 = vpop.f32.mrb[31].mxu0 }
 0x137   : > { %v1303_v2 = vmax.f32 %v1295_v59, 0.0  ;;  %v1161_v41 = vadd.f32 %v1727_v60, %v2162_v53  ;;  %v1730_v3 = vadd.f32 %v1729_v0, %v1728_v38  ;;  %v1769_v5 = vpop.f32.mrb[31].mxu1 }
 0x138   : > { %v1770_v6 = vadd.f32 %v1769_v5, %v1768_v63 }
 0x139   : > { %v1601_v7 = vpack.c.bf16 %v1303_v2, %v1302_v1  ;;  %v1226_v8 = vadd.f32 %v1767_v62, %v1161_v41  ;;  %v1164_v9 = vadd.f32 %v1730_v3, %v2164_v55 }
 0x13b   : > { %1609 = vst [vmem:[%s2177_s17 + $0x10] sm:$0xff] %v1601_v7   ;;  %v1296_v10 = vadd.f32 %v2169_v4, %v1226_v8  ;;  %v1229_v12 = vadd.f32 %v1770_v6, %v1164_v9 }
 0x13d   : > { %v1297_v14 = vadd.f32 %v2169_v4, %v1229_v12  ;;  %v1304_v15 = vmax.f32 %v1296_v10, 0.0 }
 0x13f   : > { %v1305_v11 = vmax.f32 %v1297_v14, 0.0 }
 0x141   : > { %v1606_v16 = vpack.c.bf16 %v1305_v11, %v1304_v15 }
 0x143   : > { %1610 = vst [vmem:[%s2177_s17 + $0x18] sm:$0xff] %v1606_v16  }
 0x144 PF: > { %s13_s14 = sadd.s32 1, %s1881_s14   ;;  %s2207_s12 = smov %s1877_s13 }
 0x145   : > { %p10_p5 = scmp.ge.s32.totalorder %s13_s14, 4   ;;  %s2208_s13 = smov %s2210_s15 }
 0x147   :  { %12 = sbr.rel (!%p10_p5) target bundleno = 2 (0x2), region = 80 }

// kernel: vae_forward.21
= control target key start
LH: loop header
LB: loop body
LE: loop exit
PB: predicated region body
PF: predicated region fallthrough
CT: control target
= control target key end

     0   :  { %s3225_s12 = smov 0   ;;  %s3227_s13 = smov 0   ;;  %s4102_s0 = inlined_call_operand.vmem [shape: bf16[32,2048], index: 0, kind: input, shape index: {}]   ;;  %s4103_s1 = inlined_call_operand.vmem [shape: bf16[2048,256], index: 1, kind: input, shape index: {}]   ;;  %s4104_s2 = inlined_call_operand.vmem [shape: f32[1,256], index: 2, kind: input, shape index: {}]   ;;  %s4105_s3 = inlined_call_operand.vmem [shape: bf16[32,256], index: 3, kind: output, shape index: {}]  }
   0x1   :  { %s3229_s14 = smov 0  }
   0x2 LB: > { %s32_s15 = sadd.s32 1, %s3199_s13  ;;  %p2458_p0 = scmp.ge.s32.totalorder %s3203_s14, 1  ;;  %s3203_s14 = sphi %s3229_s14, %s13_s14   ;;  %s3199_s13 = sphi %s3227_s13, %s4107_s13   ;;  %s3195_s12 = sphi %s3225_s12, %s4106_s12  }
   0x3   : > { %p34_p1 = scmp.ge.s32.totalorder %s32_s15, 2  ;;  %p196_p2 = scmp.lt.s32.totalorder %s3203_s14, 3 }
   0x5   : > { %s4109_s15 = smov (%p34_p1, %s32_s15), 0  ;;  %p197_p3 = pnand %p2458_p0, %p196_p2 }
   0x6   : > { %v2797_v0 = vld [vmem:[%s4103_s1 + $0x4] ss:$8 sps:$4 sm:$0xff] (!%p197_p3)   ;;  %v2801_v2 = vld [vmem:[%s4103_s1] ss:$8 sps:$4 sm:$0xff] (!%p197_p3)   ;;  %v2803_v4 = vld [vmem:[%s4103_s1 + $0x14] ss:$8 sps:$4 sm:$0xff] (!%p197_p3)  }
   0x7   : > { %200 = sbr.rel (%p197_p3) target bundleno = 488 (0x1e8), region = 32  ;;  %v2799_v1 = vld [vmem:[%s4103_s1 + $0x404] ss:$8 sps:$4 sm:$0xff] (!%p197_p3)   ;;  %1917 = vmatprep.subr.bf16.mxu1 (!%p197_p3), %v2797_v0  ;;  %v2802_v3 = vld [vmem:[%s4103_s1 + $0x400] ss:$8 sps:$4 sm:$0xff] (!%p197_p3)   ;;  %s2459_s30 = sshll.u32 (!%p197_p3), %s3195_s12, 1 }
   0x8   : > { %2089 = vmatprep.subr.bf16.mxu0 (!%p197_p3), %v2799_v1  ;;  %1918 = vmatpush1.bf16.msra.mxu1 (!%p197_p3), %v2801_v2  ;;  %v2805_v5 = vld [vmem:[%s4103_s1 + $0x414] ss:$8 sps:$4 sm:$0xff] (!%p197_p3)   ;;  %v2807_v6 = vld [vmem:[%s4103_s1 + $0x10] ss:$8 sps:$4 sm:$0xff] (!%p197_p3)   ;;  %v2809_v8 = vld [vmem:[%s4103_s1 + $0x24] ss:$8 sps:$4 sm:$0xff] (!%p197_p3)  }
   0x9   : > { %2090 = vmatpush1.bf16.msra.mxu0 (!%p197_p3), %v2802_v3  ;;  %1919 = vmatprep.subr.bf16.mxu1 (!%p197_p3), %v2803_v4  ;;  %v2808_v7 = vld [vmem:[%s4103_s1 + $0x410] ss:$8 sps:$4 sm:$0xff] (!%p197_p3)   ;;  %v2811_v9 = vld [vmem:[%s4103_s1 + $0x424] ss:$8 sps:$4 sm:$0xff] (!%p197_p3)   ;;  %v2813_v10 = vld [vmem:[%s4103_s1 + $0x20] ss:$8 sps:$4 sm:$0xff] (!%p197_p3)  }
   0xa   : > { %2091 = vmatprep.subr.bf16.mxu0 (!%p197_p3), %v2805_v5  ;;  %v2814_v11 = vld [vmem:[%s4103_s1 + $0x420] ss:$8 sps:$4 sm:$0xff] (!%p197_p3)   ;;  %v2815_v12 = vld [vmem:[%s4103_s1 + $0x34] ss:$8 sps:$4 sm:$0xff] (!%p197_p3)   ;;  %v2819_v14 = vld [vmem:[%s4103_s1 + $0x30] ss:$8 sps:$4 sm:$0xff] (!%p197_p3)  }
   0xb   : > { %v2817_v13 = vld [vmem:[%s4103_s1 + $0x434] ss:$8 sps:$4 sm:$0xff] (!%p197_p3)   ;;  %v2820_v15 = vld [vmem:[%s4103_s1 + $0x430] ss:$8 sps:$4 sm:$0xff] (!%p197_p3)   ;;  %v2821_v16 = vld [vmem:[%s4103_s1 + $0x44] ss:$8 sps:$4 sm:$0xff] (!%p197_p3)  }
   0xc   : > { %1920 = vmatpush1.bf16.msra.mxu1 (!%p197_p3), %v2807_v6  ;;  %v2823_v17 = vld [vmem:[%s4103_s1 + $0x444] ss:$8 sps:$4 sm:$0xff] (!%p197_p3)   ;;  %v2825_v18 = vld [vmem:[%s4103_s1 + $0x40] ss:$8 sps:$4 sm:$0xff] (!%p197_p3)   ;;  %v2827_v20 = vld [vmem:[%s4103_s1 + $0x54] ss:$8 sps:$4 sm:$0xff] (!%p197_p3)  }
   0xd   : > { %2092 = vmatpush1.bf16.msra.mxu0 (!%p197_p3), %v2808_v7  ;;  %1921 = vmatprep.subr.bf16.mxu1 (!%p197_p3), %v2809_v8  ;;  %v2826_v19 = vld [vmem:[%s4103_s1 + $0x440] ss:$8 sps:$4 sm:$0xff] (!%p197_p3)   ;;  %v2829_v21 = vld [vmem:[%s4103_s1 + $0x454] ss:$8 sps:$4 sm:$0xff] (!%p197_p3)   ;;  %v2831_v22 = vld [vmem:[%s4103_s1 + $0x50] ss:$8 sps:$4 sm:$0xff] (!%p197_p3)  }
   0xe   : > { %2093 = vmatprep.subr.bf16.mxu0 %v2811_v9  ;;  %v2832_v23 = vld [vmem:[%s4103_s1 + $0x450] ss:$8 sps:$4 sm:$0xff]   ;;  %v2833_v24 = vld [vmem:[%s4103_s1 + $0x64] ss:$8 sps:$4 sm:$0xff]   ;;  %v2837_v26 = vld [vmem:[%s4103_s1 + $0x60] ss:$8 sps:$4 sm:$0xff]  }
   0xf   : > { %v2835_v25 = vld [vmem:[%s4103_s1 + $0x464] ss:$8 sps:$4 sm:$0xff]   ;;  %v2838_v27 = vld [vmem:[%s4103_s1 + $0x460] ss:$8 sps:$4 sm:$0xff]   ;;  %v2839_v28 = vld [vmem:[%s4103_s1 + $0x74] ss:$8 sps:$4 sm:$0xff]  }
  0x10   : > { %1922 = vmatpush1.bf16.msra.mxu1 %v2813_v10  ;;  %v2841_v29 = vld [vmem:[%s4103_s1 + $0x474] ss:$8 sps:$4 sm:$0xff]   ;;  %v2843_v30 = vld [vmem:[%s4103_s1 + $0x70] ss:$8 sps:$4 sm:$0xff]   ;;  %v2845_v32 = vld [vmem:[%s4103_s1 + $0x84] ss:$8 sps:$4 sm:$0xff]  }
  0x11   : > { %2094 = vmatpush1.bf16.msra.mxu0 %v2814_v11  ;;  %1923 = vmatprep.subr.bf16.mxu1 %v2815_v12  ;;  %v2844_v31 = vld [vmem:[%s4103_s1 + $0x470] ss:$8 sps:$4 sm:$0xff]   ;;  %p246_p4 = scmp.lt.s32.totalorder %s2459_s30, 3  ;;  %v2847_v33 = vld [vmem:[%s4103_s1 + $0x484] ss:$8 sps:$4 sm:$0xff]  }
  0x12   : > { %2095 = vmatprep.subr.bf16.mxu0 %v2817_v13  ;;  %v2849_v34 = vld [vmem:[%s4103_s1 + $0x80] ss:$8 sps:$4 sm:$0xff]   ;;  %v2851_v36 = vld [vmem:[%s4103_s1 + $0x94] ss:$8 sps:$4 sm:$0xff]   ;;  %v2855_v38 = vld [vmem:[%s4103_s1 + $0x90] ss:$8 sps:$4 sm:$0xff]  }
  0x13   : > { %v2850_v35 = vld [vmem:[%s4103_s1 + $0x480] ss:$8 sps:$4 sm:$0xff]   ;;  %s4111_s30 = smov (!%p246_p4, %s2459_s30), 3  ;;  %v2853_v37 = vld [vmem:[%s4103_s1 + $0x494] ss:$8 sps:$4 sm:$0xff]  }
  0x14   : > { %1924 = vmatpush1.bf16.msra.mxu1 %v2819_v14  ;;  %v2856_v39 = vld [vmem:[%s4103_s1 + $0x490] ss:$8 sps:$4 sm:$0xff]   ;;  %v2857_v40 = vld [vmem:[%s4103_s1 + $0xa4] ss:$8 sps:$4 sm:$0xff]   ;;  %s2741_s29 = sshll.u32 %s4111_s30, 6  ;;  %s2742_s18 = sshll.u32 %s4111_s30, 3 }
  0x15   : > { %2096 = vmatpush1.bf16.msra.mxu0 %v2820_v15  ;;  %1925 = vmatprep.subr.bf16.mxu1 %v2821_v16  ;;  %v2859_v41 = vld [vmem:[%s4103_s1 + $0x4a4] ss:$8 sps:$4 sm:$0xff]   ;;  %v2861_v42 = vld [vmem:[%s4103_s1 + $0xa0] ss:$8 sps:$4 sm:$0xff]   ;;  %s3384_s12 = scalar_lea.vmem %s4102_s0, %s2741_s29  ;;  %v2863_v44 = vld [vmem:[%s4103_s1 + $0xb4] ss:$8 sps:$4 sm:$0xff]   ;;  %s282_s21 = scalar_lea.vmem %s4105_s3, %s2742_s18 }
  0x16   : > { %2097 = vmatprep.subr.bf16.mxu0 %v2823_v17  ;;  %v2862_v43 = vld [vmem:[%s4103_s1 + $0x4a0] ss:$8 sps:$4 sm:$0xff]   ;;  %v2865_v45 = vld [vmem:[%s4103_s1 + $0x4b4] ss:$8 sps:$4 sm:$0xff]   ;;  %v2867_v46 = vld [vmem:[%s4103_s1 + $0xb0] ss:$8 sps:$4 sm:$0xff]  }
  0x17   : > { %v2868_v47 = vld [vmem:[%s4103_s1 + $0x4b0] ss:$8 sps:$4 sm:$0xff]   ;;  %v285_v48 = vld [vmem:[%s3384_s12] sm:$0xff]  ;;  %v2875_v58 = vld [vmem:[%s4103_s1 + $0xd4] ss:$8 sps:$4 sm:$0xff]  }
  0x18   : > { %1926 = vmatpush1.bf16.msra.mxu1 %v2825_v18  ;;  %v293_v49 = vld [vmem:[%s3384_s12 + $0x40] sm:$0xff]  ;;  %v2877_v59 = vld [vmem:[%s4103_s1 + $0x4d4] ss:$8 sps:$4 sm:$0xff]   ;;  %v2879_v60 = vld [vmem:[%s4103_s1 + $0xd0] ss:$8 sps:$4 sm:$0xff]  }
  0x19   : > { %2098 = vmatpush1.bf16.msra.mxu0 %v2826_v19  ;;  %1927 = vmatprep.subr.bf16.mxu1 %v2827_v20  ;;  %v2869_v50 = vld [vmem:[%s4103_s1 + $0xc4] ss:$8 sps:$4 sm:$0xff]   ;;  %v2466_v52 = vcombine.high %v285_v48, %v293_v49  ;;  %v2873_v56 = vld [vmem:[%s4103_s1 + $0xc0] ss:$8 sps:$4 sm:$0xff]   ;;  %v2880_v61 = vld [vmem:[%s4103_s1 + $0x4d0] ss:$8 sps:$4 sm:$0xff]   ;;  %v2465_v8 = vcombine.low %v285_v48, %v293_v49 }
  0x1a   : > { %2099 = vmatprep.subr.bf16.mxu0 %v2829_v21  ;;  %v2871_v51 = vld [vmem:[%s4103_s1 + $0x4c4] ss:$8 sps:$4 sm:$0xff]   ;;  %v2874_v57 = vld [vmem:[%s4103_s1 + $0x4c0] ss:$8 sps:$4 sm:$0xff]   ;;  %v2887_v2 = vld [vmem:[%s4103_s1 + $0xf4] ss:$8 sps:$4 sm:$0xff]  }
  0x1b   : > { %v289_v53 = vld [vmem:[%s3384_s12 + $0x20] sm:$0xff]  ;;  %1949 = vmatprep.mubr.bf16.mxu1 %v2466_v52  ;;  %v2889_v3 = vld [vmem:[%s4103_s1 + $0x4f4] ss:$8 sps:$4 sm:$0xff]   ;;  %v2891_v4 = vld [vmem:[%s4103_s1 + $0xf0] ss:$8 sps:$4 sm:$0xff]  }
  0x1c   : > { %1928 = vmatpush1.bf16.msra.mxu1 %v2831_v22  ;;  %v297_v54 = vld [vmem:[%s3384_s12 + $0x60] sm:$0xff]  ;;  %v2892_v5 = vld [vmem:[%s4103_s1 + $0x4f0] ss:$8 sps:$4 sm:$0xff]   ;;  %v2901_v12 = vld [vmem:[%s4103_s1 + $0x114] ss:$8 sps:$4 sm:$0xff]  }
  0x1d   : > { %2100 = vmatpush1.bf16.msra.mxu0 %v2832_v23  ;;  %1929 = vmatprep.subr.bf16.mxu1 %v2833_v24  ;;  %v2474_v55 = vcombine.high %v289_v53, %v297_v54  ;;  %v2881_v62 = vld [vmem:[%s4103_s1 + $0xe4] ss:$8 sps:$4 sm:$0xff]   ;;  %v2885_v0 = vld [vmem:[%s4103_s1 + $0xe0] ss:$8 sps:$4 sm:$0xff]   ;;  %v2473_v10 = vcombine.low %v289_v53, %v297_v54  ;;  %v2904_v13 = vld [vmem:[%s4103_s1 + $0x514] ss:$8 sps:$4 sm:$0xff]  }
  0x1e   : > { %2101 = vmatprep.subr.bf16.mxu0 %v2835_v25  ;;  %v2883_v63 = vld [vmem:[%s4103_s1 + $0x4e4] ss:$8 sps:$4 sm:$0xff]   ;;  %v2886_v1 = vld [vmem:[%s4103_s1 + $0x4e0] ss:$8 sps:$4 sm:$0xff]   ;;  %v2899_v14 = vld [vmem:[%s4103_s1 + $0x110] ss:$8 sps:$4 sm:$0xff]  }
  0x1f   : > { %2121 = vmatprep.mubr.bf16.mxu0 %v2474_v55  ;;  %v2895_v6 = vld [vmem:[%s4103_s1 + $0x104] ss:$8 sps:$4 sm:$0xff]   ;;  %v2893_v9 = vld [vmem:[%s4103_s1 + $0x100] ss:$8 sps:$4 sm:$0xff]   ;;  %v2902_v15 = vld [vmem:[%s4103_s1 + $0x510] ss:$8 sps:$4 sm:$0xff]  }
  0x20   : > { %1930 = vmatpush1.bf16.msra.mxu1 %v2837_v26  ;;  %v2898_v7 = vld [vmem:[%s4103_s1 + $0x504] ss:$8 sps:$4 sm:$0xff]   ;;  %v2896_v11 = vld [vmem:[%s4103_s1 + $0x500] ss:$8 sps:$4 sm:$0xff]   ;;  %v2913_v20 = vld [vmem:[%s4103_s1 + $0x134] ss:$8 sps:$4 sm:$0xff]  }
  0x21   : > { %2102 = vmatpush1.bf16.msra.mxu0 %v2838_v27  ;;  %1931 = vmatprep.subr.bf16.mxu1 %v2839_v28  ;;  %v2907_v16 = vld [vmem:[%s4103_s1 + $0x124] ss:$8 sps:$4 sm:$0xff]   ;;  %v2905_v18 = vld [vmem:[%s4103_s1 + $0x120] ss:$8 sps:$4 sm:$0xff]   ;;  %v2916_v21 = vld [vmem:[%s4103_s1 + $0x534] ss:$8 sps:$4 sm:$0xff]  }
  0x22   : > { %2103 = vmatprep.subr.bf16.mxu0 %v2841_v29  ;;  %v2910_v17 = vld [vmem:[%s4103_s1 + $0x524] ss:$8 sps:$4 sm:$0xff]   ;;  %v2908_v19 = vld [vmem:[%s4103_s1 + $0x520] ss:$8 sps:$4 sm:$0xff]   ;;  %v2911_v22 = vld [vmem:[%s4103_s1 + $0x130] ss:$8 sps:$4 sm:$0xff]  }
  0x23   : > { %v2914_v23 = vld [vmem:[%s4103_s1 + $0x530] ss:$8 sps:$4 sm:$0xff]   ;;  %v2919_v24 = vld [vmem:[%s4103_s1 + $0x144] ss:$8 sps:$4 sm:$0xff]   ;;  %v2917_v26 = vld [vmem:[%s4103_s1 + $0x140] ss:$8 sps:$4 sm:$0xff]  }
  0x24   : > { %1932 = vmatpush1.bf16.msra.mxu1 %v2843_v30  ;;  %v2922_v25 = vld [vmem:[%s4103_s1 + $0x544] ss:$8 sps:$4 sm:$0xff]   ;;  %v2920_v27 = vld [vmem:[%s4103_s1 + $0x540] ss:$8 sps:$4 sm:$0xff]   ;;  %v2925_v28 = vld [vmem:[%s4103_s1 + $0x154] ss:$8 sps:$4 sm:$0xff]  }
  0x25   : > { %2104 = vmatpush1.bf16.msra.mxu0 %v2844_v31  ;;  %1933 = vmatprep.subr.bf16.mxu1 %v2845_v32  ;;  %v2928_v29 = vld [vmem:[%s4103_s1 + $0x554] ss:$8 sps:$4 sm:$0xff]   ;;  %v2923_v30 = vld [vmem:[%s4103_s1 + $0x150] ss:$8 sps:$4 sm:$0xff]   ;;  %v2931_v32 = vld [vmem:[%s4103_s1 + $0x164] ss:$8 sps:$4 sm:$0xff]  }
  0x26   : > { %2105 = vmatprep.subr.bf16.mxu0 %v2847_v33  ;;  %v2926_v31 = vld [vmem:[%s4103_s1 + $0x550] ss:$8 sps:$4 sm:$0xff]   ;;  %v2934_v33 = vld [vmem:[%s4103_s1 + $0x564] ss:$8 sps:$4 sm:$0xff]   ;;  %v2941_v48 = vld [vmem:[%s4103_s1 + $0x180] ss:$8 sps:$4 sm:$0xff]  }
  0x27   : > { %v2944_v49 = vld [vmem:[%s4103_s1 + $0x580] ss:$8 sps:$4 sm:$0xff]   ;;  %v2947_v52 = vld [vmem:[%s4103_s1 + $0x190] ss:$8 sps:$4 sm:$0xff]   ;;  %v2955_v54 = vld [vmem:[%s4103_s1 + $0x1a4] ss:$8 sps:$4 sm:$0xff]  }
  0x28   : > { %1934 = vmatpush1.bf16.msra.mxu1 %v2849_v34  ;;  %v2929_v34 = vld [vmem:[%s4103_s1 + $0x160] ss:$8 sps:$4 sm:$0xff]   ;;  %v2950_v53 = vld [vmem:[%s4103_s1 + $0x590] ss:$8 sps:$4 sm:$0xff]   ;;  %v2958_v55 = vld [vmem:[%s4103_s1 + $0x5a4] ss:$8 sps:$4 sm:$0xff]  }
  0x29   : > { %2106 = vmatpush1.bf16.msra.mxu0 %v2850_v35  ;;  %1935 = vmatprep.subr.bf16.mxu1 %v2851_v36  ;;  %v2932_v35 = vld [vmem:[%s4103_s1 + $0x560] ss:$8 sps:$4 sm:$0xff]  }
  0x2a   : > { %2107 = vmatprep.subr.bf16.mxu0 %v2853_v37  ;;  %v3535_v36 = vld [vmem:[%s3384_s12 + $0x8] sm:$0xff] }
  0x2b   : > { %v3538_v37 = vld [vmem:[%s3384_s12 + $0x48] sm:$0xff] }
  0x2c   : > { %1936 = vmatpush1.bf16.msra.mxu1 %v2855_v38  ;;  %v2937_v38 = vld [vmem:[%s4103_s1 + $0x174] ss:$8 sps:$4 sm:$0xff]  }
  0x2d   : > { %2108 = vmatpush1.bf16.msra.mxu0 %v2856_v39  ;;  %1937 = vmatprep.subr.bf16.mxu1 %v2857_v40  ;;  %v2940_v39 = vld [vmem:[%s4103_s1 + $0x574] ss:$8 sps:$4 sm:$0xff]   ;;  %v2468_v40 = vcombine.high %v3535_v36, %v3538_v37 }
  0x2e   : > { %2109 = vmatprep.subr.bf16.mxu0 %v2859_v41  ;;  %v3549_v41 = vld [vmem:[%s3384_s12 + $0x28] sm:$0xff] }
  0x30   : > { %1938 = vmatpush1.bf16.msra.mxu1 %v2861_v42  ;;  %v3552_v42 = vld [vmem:[%s3384_s12 + $0x68] sm:$0xff] }
  0x31   : > { %2110 = vmatpush1.bf16.msra.mxu0 %v2862_v43  ;;  %1939 = vmatprep.subr.bf16.mxu1 %v2863_v44  ;;  %v2476_v43 = vcombine.high %v3549_v41, %v3552_v42  ;;  %v2935_v44 = vld [vmem:[%s4103_s1 + $0x170] ss:$8 sps:$4 sm:$0xff]  }
  0x32   : > { %2111 = vmatprep.subr.bf16.mxu0 %v2865_v45  ;;  %v2938_v45 = vld [vmem:[%s4103_s1 + $0x570] ss:$8 sps:$4 sm:$0xff]  }
  0x34   : > { %1940 = vmatpush1.bf16.msra.mxu1 %v2867_v46  ;;  %v2943_v46 = vld [vmem:[%s4103_s1 + $0x184] ss:$8 sps:$4 sm:$0xff]  }
  0x35   : > { %2112 = vmatpush1.bf16.msra.mxu0 %v2868_v47  ;;  %1941 = vmatprep.subr.bf16.mxu1 %v2869_v50  ;;  %v2946_v47 = vld [vmem:[%s4103_s1 + $0x584] ss:$8 sps:$4 sm:$0xff]   ;;  %v2949_v50 = vld [vmem:[%s4103_s1 + $0x194] ss:$8 sps:$4 sm:$0xff]  }
  0x36   : > { %2113 = vmatprep.subr.bf16.mxu0 %v2871_v51  ;;  %v2952_v51 = vld [vmem:[%s4103_s1 + $0x594] ss:$8 sps:$4 sm:$0xff]  }
  0x38   : > { %1942 = vmatpush1.bf16.msra.mxu1 %v2873_v56  ;;  %v2953_v56 = vld [vmem:[%s4103_s1 + $0x1a0] ss:$8 sps:$4 sm:$0xff]  }
  0x39   : > { %2114 = vmatpush1.bf16.msra.mxu0 %v2874_v57  ;;  %1943 = vmatprep.subr.bf16.mxu1 %v2875_v58  ;;  %v2956_v57 = vld [vmem:[%s4103_s1 + $0x5a0] ss:$8 sps:$4 sm:$0xff]   ;;  %v2961_v58 = vld [vmem:[%s4103_s1 + $0x1b4] ss:$8 sps:$4 sm:$0xff]  }
  0x3a   : > { %2115 = vmatprep.subr.bf16.mxu0 %v2877_v59  ;;  %v2964_v59 = vld [vmem:[%s4103_s1 + $0x5b4] ss:$8 sps:$4 sm:$0xff]  }
  0x3c   : > { %1944 = vmatpush1.bf16.msra.mxu1 %v2879_v60  ;;  %v2959_v60 = vld [vmem:[%s4103_s1 + $0x1b0] ss:$8 sps:$4 sm:$0xff]  }
  0x3d   : > { %2116 = vmatpush1.bf16.msra.mxu0 %v2880_v61  ;;  %1945 = vmatprep.subr.bf16.mxu1 %v2881_v62  ;;  %v2962_v61 = vld [vmem:[%s4103_s1 + $0x5b0] ss:$8 sps:$4 sm:$0xff]   ;;  %v2967_v62 = vld [vmem:[%s4103_s1 + $0x1c4] ss:$8 sps:$4 sm:$0xff]  }
  0x3e   : > { %2117 = vmatprep.subr.bf16.mxu0 %v2883_v63  ;;  %v2970_v63 = vld [vmem:[%s4103_s1 + $0x5c4] ss:$8 sps:$4 sm:$0xff]  }
  0x40   : > { %1946 = vmatpush1.bf16.msra.mxu1 %v2885_v0  ;;  %v2965_v0 = vld [vmem:[%s4103_s1 + $0x1c0] ss:$8 sps:$4 sm:$0xff]  }
  0x41   : > { %2118 = vmatpush1.bf16.msra.mxu0 %v2886_v1  ;;  %1947 = vmatprep.subr.bf16.mxu1 %v2887_v2  ;;  %v2968_v1 = vld [vmem:[%s4103_s1 + $0x5c0] ss:$8 sps:$4 sm:$0xff]   ;;  %v2973_v2 = vld [vmem:[%s4103_s1 + $0x1d4] ss:$8 sps:$4 sm:$0xff]  }
  0x42   : > { %2119 = vmatprep.subr.bf16.mxu0 %v2889_v3  ;;  %v2976_v3 = vld [vmem:[%s4103_s1 + $0x5d4] ss:$8 sps:$4 sm:$0xff]  }
  0x44   : > { %1948 = vmatpush1.bf16.msra.mxu1 %v2891_v4  ;;  %v2971_v4 = vld [vmem:[%s4103_s1 + $0x1d0] ss:$8 sps:$4 sm:$0xff]  }
  0x45   : > { %2120 = vmatpush1.bf16.msra.mxu0 %v2892_v5  ;;  %1960 = vmatprep.subr.bf16.mxu1 %v2895_v6  ;;  %v2974_v5 = vld [vmem:[%s4103_s1 + $0x5d0] ss:$8 sps:$4 sm:$0xff]   ;;  %v2979_v6 = vld [vmem:[%s4103_s1 + $0x1e4] ss:$8 sps:$4 sm:$0xff]  }
  0x46   : > { %2132 = vmatprep.subr.bf16.mxu0 %v2898_v7  ;;  %v2982_v7 = vld [vmem:[%s4103_s1 + $0x5e4] ss:$8 sps:$4 sm:$0xff]  }
  0x47   : > { %1950 = vmatmul.mubr.bf16.vlgmr.msra.gmra.mrb[0].mxu1 %v2465_v8  ;;  %v2977_v8 = vld [vmem:[%s4103_s1 + $0x1e0] ss:$8 sps:$4 sm:$0xff]  }
  0x48   : > { %2122 = vmatmul.mubr.bf16.vlgmr.msra.gmra.mrb[0].mxu0 %v2473_v10  ;;  %1961 = vmatpush1.bf16.msra.mxu1 %v2893_v9  ;;  %v2980_v9 = vld [vmem:[%s4103_s1 + $0x5e0] ss:$8 sps:$4 sm:$0xff]   ;;  %v2985_v10 = vld [vmem:[%s4103_s1 + $0x1f4] ss:$8 sps:$4 sm:$0xff]  }
  0x49   : > { %2133 = vmatpush1.bf16.msra.mxu0 %v2896_v11  ;;  %1962 = vmatprep.subr.bf16.mxu1 %v2901_v12  ;;  %v2988_v11 = vld [vmem:[%s4103_s1 + $0x5f4] ss:$8 sps:$4 sm:$0xff]   ;;  %v2983_v12 = vld [vmem:[%s4103_s1 + $0x1f0] ss:$8 sps:$4 sm:$0xff]  }
  0x4a   : > { %2134 = vmatprep.subr.bf16.mxu0 %v2904_v13  ;;  %1992 = vmatprep.mubr.bf16.mxu1 %v2468_v40  ;;  %v2986_v13 = vld [vmem:[%s4103_s1 + $0x5f0] ss:$8 sps:$4 sm:$0xff]   ;;  %v3013_v40 = vld [vmem:[%s4103_s1 + $0x240] ss:$8 sps:$4 sm:$0xff]  }
  0x4b   : > { %2164 = vmatprep.mubr.bf16.mxu0 %v2476_v43  ;;  %v3024_v43 = vld [vmem:[%s4103_s1 + $0x654] ss:$8 sps:$4 sm:$0xff]  }
  0x4c   : > { %1963 = vmatpush1.bf16.msra.mxu1 %v2899_v14  ;;  %v2991_v14 = vld [vmem:[%s4103_s1 + $0x204] ss:$8 sps:$4 sm:$0xff]  }
  0x4d   : > { %2135 = vmatpush1.bf16.msra.mxu0 %v2902_v15  ;;  %1964 = vmatprep.subr.bf16.mxu1 %v2907_v16  ;;  %v2994_v15 = vld [vmem:[%s4103_s1 + $0x604] ss:$8 sps:$4 sm:$0xff]   ;;  %v2467_v16 = vcombine.low %v3535_v36, %v3538_v37  ;;  %v3007_v36 = vld [vmem:[%s4103_s1 + $0x230] ss:$8 sps:$4 sm:$0xff]  }
  0x4e   : > { %2136 = vmatprep.subr.bf16.mxu0 %v2910_v17  ;;  %v2989_v17 = vld [vmem:[%s4103_s1 + $0x200] ss:$8 sps:$4 sm:$0xff]   ;;  %v3010_v37 = vld [vmem:[%s4103_s1 + $0x630] ss:$8 sps:$4 sm:$0xff]  }
  0x50   : > { %1965 = vmatpush1.bf16.msra.mxu1 %v2905_v18  ;;  %v2475_v18 = vcombine.low %v3549_v41, %v3552_v42  ;;  %v3016_v41 = vld [vmem:[%s4103_s1 + $0x640] ss:$8 sps:$4 sm:$0xff]   ;;  %v3021_v42 = vld [vmem:[%s4103_s1 + $0x254] ss:$8 sps:$4 sm:$0xff]  }
  0x51   : > { %2137 = vmatpush1.bf16.msra.mxu0 %v2908_v19  ;;  %1966 = vmatprep.subr.bf16.mxu1 %v2913_v20  ;;  %v2992_v19 = vld [vmem:[%s4103_s1 + $0x600] ss:$8 sps:$4 sm:$0xff]   ;;  %v2997_v20 = vld [vmem:[%s4103_s1 + $0x214] ss:$8 sps:$4 sm:$0xff]  }
  0x52   : > { %2138 = vmatprep.subr.bf16.mxu0 %v2916_v21  ;;  %v3000_v21 = vld [vmem:[%s4103_s1 + $0x614] ss:$8 sps:$4 sm:$0xff]  }
  0x54   : > { %1967 = vmatpush1.bf16.msra.mxu1 %v2911_v22  ;;  %v2995_v22 = vld [vmem:[%s4103_s1 + $0x210] ss:$8 sps:$4 sm:$0xff]  }
  0x55   : > { %2139 = vmatpush1.bf16.msra.mxu0 %v2914_v23  ;;  %1968 = vmatprep.subr.bf16.mxu1 %v2919_v24  ;;  %v2998_v23 = vld [vmem:[%s4103_s1 + $0x610] ss:$8 sps:$4 sm:$0xff]  }
  0x56   : > { %2140 = vmatprep.subr.bf16.mxu0 %v2922_v25  ;;  %v3687_v24 = vld [vmem:[%s3384_s12 + $0x10] sm:$0xff] }
  0x57   : > { %v3690_v25 = vld [vmem:[%s3384_s12 + $0x50] sm:$0xff] }
  0x58   : > { %1969 = vmatpush1.bf16.msra.mxu1 %v2917_v26  ;;  %v3003_v26 = vld [vmem:[%s4103_s1 + $0x224] ss:$8 sps:$4 sm:$0xff]  }
  0x59   : > { %2141 = vmatpush1.bf16.msra.mxu0 %v2920_v27  ;;  %1970 = vmatprep.subr.bf16.mxu1 %v2925_v28  ;;  %v3006_v27 = vld [vmem:[%s4103_s1 + $0x624] ss:$8 sps:$4 sm:$0xff]   ;;  %v2470_v28 = vcombine.high %v3687_v24, %v3690_v25 }
  0x5a   : > { %2142 = vmatprep.subr.bf16.mxu0 %v2928_v29  ;;  %v3701_v29 = vld [vmem:[%s3384_s12 + $0x30] sm:$0xff] }
  0x5c   : > { %1971 = vmatpush1.bf16.msra.mxu1 %v2923_v30  ;;  %v3704_v30 = vld [vmem:[%s3384_s12 + $0x70] sm:$0xff] }
  0x5d   : > { %2143 = vmatpush1.bf16.msra.mxu0 %v2926_v31  ;;  %1972 = vmatprep.subr.bf16.mxu1 %v2931_v32  ;;  %v2478_v31 = vcombine.high %v3701_v29, %v3704_v30  ;;  %v3001_v32 = vld [vmem:[%s4103_s1 + $0x220] ss:$8 sps:$4 sm:$0xff]  }
  0x5e   : > { %2144 = vmatprep.subr.bf16.mxu0 %v2934_v33  ;;  %v3004_v33 = vld [vmem:[%s4103_s1 + $0x620] ss:$8 sps:$4 sm:$0xff]  }
  0x60   : > { %1973 = vmatpush1.bf16.msra.mxu1 %v2929_v34  ;;  %v3009_v34 = vld [vmem:[%s4103_s1 + $0x234] ss:$8 sps:$4 sm:$0xff]  }
  0x61   : > { %2145 = vmatpush1.bf16.msra.mxu0 %v2932_v35  ;;  %1974 = vmatprep.subr.bf16.mxu1 %v2937_v38  ;;  %v3012_v35 = vld [vmem:[%s4103_s1 + $0x634] ss:$8 sps:$4 sm:$0xff]   ;;  %v3015_v38 = vld [vmem:[%s4103_s1 + $0x244] ss:$8 sps:$4 sm:$0xff]  }
  0x62   : > { %2146 = vmatprep.subr.bf16.mxu0 %v2940_v39  ;;  %v3018_v39 = vld [vmem:[%s4103_s1 + $0x644] ss:$8 sps:$4 sm:$0xff]  }
  0x64   : > { %1975 = vmatpush1.bf16.msra.mxu1 %v2935_v44  ;;  %v3019_v44 = vld [vmem:[%s4103_s1 + $0x250] ss:$8 sps:$4 sm:$0xff]  }
  0x65   : > { %2147 = vmatpush1.bf16.msra.mxu0 %v2938_v45  ;;  %1976 = vmatprep.subr.bf16.mxu1 %v2943_v46  ;;  %v3022_v45 = vld [vmem:[%s4103_s1 + $0x650] ss:$8 sps:$4 sm:$0xff]   ;;  %v3027_v46 = vld [vmem:[%s4103_s1 + $0x264] ss:$8 sps:$4 sm:$0xff]  }
  0x66   : > { %2148 = vmatprep.subr.bf16.mxu0 %v2946_v47  ;;  %v3030_v47 = vld [vmem:[%s4103_s1 + $0x664] ss:$8 sps:$4 sm:$0xff]  }
  0x68   : > { %1977 = vmatpush1.bf16.msra.mxu1 %v2941_v48  ;;  %v3025_v48 = vld [vmem:[%s4103_s1 + $0x260] ss:$8 sps:$4 sm:$0xff]  }
  0x69   : > { %2149 = vmatpush1.bf16.msra.mxu0 %v2944_v49  ;;  %1978 = vmatprep.subr.bf16.mxu1 %v2949_v50  ;;  %v3028_v49 = vld [vmem:[%s4103_s1 + $0x660] ss:$8 sps:$4 sm:$0xff]   ;;  %v3033_v50 = vld [vmem:[%s4103_s1 + $0x274] ss:$8 sps:$4 sm:$0xff]  }
  0x6a   : > { %2150 = vmatprep.subr.bf16.mxu0 %v2952_v51  ;;  %v3036_v51 = vld [vmem:[%s4103_s1 + $0x674] ss:$8 sps:$4 sm:$0xff]  }
  0x6c   : > { %1979 = vmatpush1.bf16.msra.mxu1 %v2947_v52  ;;  %v3031_v52 = vld [vmem:[%s4103_s1 + $0x270] ss:$8 sps:$4 sm:$0xff]  }
  0x6d   : > { %2151 = vmatpush1.bf16.msra.mxu0 %v2950_v53  ;;  %1980 = vmatprep.subr.bf16.mxu1 %v2955_v54  ;;  %v3034_v53 = vld [vmem:[%s4103_s1 + $0x670] ss:$8 sps:$4 sm:$0xff]   ;;  %v3039_v54 = vld [vmem:[%s4103_s1 + $0x284] ss:$8 sps:$4 sm:$0xff]  }
  0x6e   : > { %2152 = vmatprep.subr.bf16.mxu0 %v2958_v55  ;;  %v3042_v55 = vld [vmem:[%s4103_s1 + $0x684] ss:$8 sps:$4 sm:$0xff]  }
  0x70   : > { %1981 = vmatpush1.bf16.msra.mxu1 %v2953_v56  ;;  %v3037_v56 = vld [vmem:[%s4103_s1 + $0x280] ss:$8 sps:$4 sm:$0xff]  }
  0x71   : > { %2153 = vmatpush1.bf16.msra.mxu0 %v2956_v57  ;;  %1982 = vmatprep.subr.bf16.mxu1 %v2961_v58  ;;  %v3040_v57 = vld [vmem:[%s4103_s1 + $0x680] ss:$8 sps:$4 sm:$0xff]   ;;  %v3045_v58 = vld [vmem:[%s4103_s1 + $0x294] ss:$8 sps:$4 sm:$0xff]  }
  0x72   : > { %2154 = vmatprep.subr.bf16.mxu0 %v2964_v59  ;;  %v3048_v59 = vld [vmem:[%s4103_s1 + $0x694] ss:$8 sps:$4 sm:$0xff]  }
  0x74   : > { %1983 = vmatpush1.bf16.msra.mxu1 %v2959_v60  ;;  %v3043_v60 = vld [vmem:[%s4103_s1 + $0x290] ss:$8 sps:$4 sm:$0xff]  }
  0x75   : > { %2155 = vmatpush1.bf16.msra.mxu0 %v2962_v61  ;;  %1984 = vmatprep.subr.bf16.mxu1 %v2967_v62  ;;  %v3046_v61 = vld [vmem:[%s4103_s1 + $0x690] ss:$8 sps:$4 sm:$0xff]   ;;  %v3051_v62 = vld [vmem:[%s4103_s1 + $0x2a4] ss:$8 sps:$4 sm:$0xff]  }
  0x76   : > { %2156 = vmatprep.subr.bf16.mxu0 %v2970_v63  ;;  %v3054_v63 = vld [vmem:[%s4103_s1 + $0x6a4] ss:$8 sps:$4 sm:$0xff]  }
  0x78   : > { %1985 = vmatpush1.bf16.msra.mxu1 %v2965_v0  ;;  %v3049_v0 = vld [vmem:[%s4103_s1 + $0x2a0] ss:$8 sps:$4 sm:$0xff]  }
  0x79   : > { %2157 = vmatpush1.bf16.msra.mxu0 %v2968_v1  ;;  %1986 = vmatprep.subr.bf16.mxu1 %v2973_v2  ;;  %v3052_v1 = vld [vmem:[%s4103_s1 + $0x6a0] ss:$8 sps:$4 sm:$0xff]   ;;  %v3057_v2 = vld [vmem:[%s4103_s1 + $0x2b4] ss:$8 sps:$4 sm:$0xff]  }
  0x7a   : > { %2158 = vmatprep.subr.bf16.mxu0 %v2976_v3  ;;  %v3060_v3 = vld [vmem:[%s4103_s1 + $0x6b4] ss:$8 sps:$4 sm:$0xff]  }
  0x7c   : > { %1987 = vmatpush1.bf16.msra.mxu1 %v2971_v4  ;;  %v3055_v4 = vld [vmem:[%s4103_s1 + $0x2b0] ss:$8 sps:$4 sm:$0xff]  }
  0x7d   : > { %2159 = vmatpush1.bf16.msra.mxu0 %v2974_v5  ;;  %1988 = vmatprep.subr.bf16.mxu1 %v2979_v6  ;;  %v3058_v5 = vld [vmem:[%s4103_s1 + $0x6b0] ss:$8 sps:$4 sm:$0xff]   ;;  %v3063_v6 = vld [vmem:[%s4103_s1 + $0x2c4] ss:$8 sps:$4 sm:$0xff]  }
  0x7e   : > { %2160 = vmatprep.subr.bf16.mxu0 %v2982_v7  ;;  %v3066_v7 = vld [vmem:[%s4103_s1 + $0x6c4] ss:$8 sps:$4 sm:$0xff]  }
  0x80   : > { %1989 = vmatpush1.bf16.msra.mxu1 %v2977_v8  ;;  %v3061_v8 = vld [vmem:[%s4103_s1 + $0x2c0] ss:$8 sps:$4 sm:$0xff]  }
  0x81   : > { %2161 = vmatpush1.bf16.msra.mxu0 %v2980_v9  ;;  %1990 = vmatprep.subr.bf16.mxu1 %v2985_v10  ;;  %v3064_v9 = vld [vmem:[%s4103_s1 + $0x6c0] ss:$8 sps:$4 sm:$0xff]   ;;  %v3069_v10 = vld [vmem:[%s4103_s1 + $0x2d4] ss:$8 sps:$4 sm:$0xff]  }
  0x82   : > { %2162 = vmatprep.subr.bf16.mxu0 %v2988_v11  ;;  %v3072_v11 = vld [vmem:[%s4103_s1 + $0x6d4] ss:$8 sps:$4 sm:$0xff]  }
  0x84   : > { %1991 = vmatpush1.bf16.msra.mxu1 %v2983_v12  ;;  %v3067_v12 = vld [vmem:[%s4103_s1 + $0x2d0] ss:$8 sps:$4 sm:$0xff]  }
  0x85   : > { %2163 = vmatpush1.bf16.msra.mxu0 %v2986_v13  ;;  %2003 = vmatprep.subr.bf16.mxu1 %v2991_v14  ;;  %v3070_v13 = vld [vmem:[%s4103_s1 + $0x6d0] ss:$8 sps:$4 sm:$0xff]   ;;  %v3075_v14 = vld [vmem:[%s4103_s1 + $0x2e4] ss:$8 sps:$4 sm:$0xff]  }
  0x86   : > { %2175 = vmatprep.subr.bf16.mxu0 %v2994_v15  ;;  %v3078_v15 = vld [vmem:[%s4103_s1 + $0x6e4] ss:$8 sps:$4 sm:$0xff]  }
  0x87   : > { %1993 = vmatmul.mubr.bf16.vlgmr.msra.gmra.mrb[0].mxu1 %v2467_v16  ;;  %v3073_v16 = vld [vmem:[%s4103_s1 + $0x2e0] ss:$8 sps:$4 sm:$0xff]  }
  0x88   : > { %2165 = vmatmul.mubr.bf16.vlgmr.msra.gmra.mrb[0].mxu0 %v2475_v18  ;;  %2004 = vmatpush1.bf16.msra.mxu1 %v2989_v17  ;;  %v3076_v17 = vld [vmem:[%s4103_s1 + $0x6e0] ss:$8 sps:$4 sm:$0xff]   ;;  %v3081_v18 = vld [vmem:[%s4103_s1 + $0x2f4] ss:$8 sps:$4 sm:$0xff]  }
  0x89   : > { %2176 = vmatpush1.bf16.msra.mxu0 %v2992_v19  ;;  %2005 = vmatprep.subr.bf16.mxu1 %v2997_v20  ;;  %v3084_v19 = vld [vmem:[%s4103_s1 + $0x6f4] ss:$8 sps:$4 sm:$0xff]   ;;  %v3079_v20 = vld [vmem:[%s4103_s1 + $0x2f0] ss:$8 sps:$4 sm:$0xff]  }
  0x8a   : > { %2177 = vmatprep.subr.bf16.mxu0 %v3000_v21  ;;  %2035 = vmatprep.mubr.bf16.mxu1 %v2470_v28  ;;  %v3082_v21 = vld [vmem:[%s4103_s1 + $0x6f0] ss:$8 sps:$4 sm:$0xff]   ;;  %v2477_v28 = vcombine.low %v3701_v29, %v3704_v30 }
  0x8b   : > { %2207 = vmatprep.mubr.bf16.mxu0 %v2478_v31  ;;  %v3884_v31 = vld [vmem:[%s3384_s12 + $0x58] sm:$0xff] }
  0x8c   : > { %2006 = vmatpush1.bf16.msra.mxu1 %v2995_v22  ;;  %v3087_v22 = vld [vmem:[%s4103_s1 + $0x304] ss:$8 sps:$4 sm:$0xff]  }
  0x8d   : > { %2178 = vmatpush1.bf16.msra.mxu0 %v2998_v23  ;;  %2007 = vmatprep.subr.bf16.mxu1 %v3003_v26  ;;  %v3090_v23 = vld [vmem:[%s4103_s1 + $0x704] ss:$8 sps:$4 sm:$0xff]   ;;  %v3877_v26 = vld [vmem:[%s3384_s12 + $0x18] sm:$0xff] }
  0x8e   : > { %2179 = vmatprep.subr.bf16.mxu0 %v3006_v27  ;;  %v2469_v27 = vcombine.low %v3687_v24, %v3690_v25  ;;  %v3093_v24 = vld [vmem:[%s4103_s1 + $0x314] ss:$8 sps:$4 sm:$0xff]   ;;  %v2472_v29 = vcombine.high %v3877_v26, %v3884_v31 }
  0x8f   : > { %v3096_v25 = vld [vmem:[%s4103_s1 + $0x714] ss:$8 sps:$4 sm:$0xff]  }
  0x90   : > { %2008 = vmatpush1.bf16.msra.mxu1 %v3001_v32  ;;  %v3887_v32 = vld [vmem:[%s3384_s12 + $0x38] sm:$0xff] }
  0x91   : > { %2180 = vmatpush1.bf16.msra.mxu0 %v3004_v33  ;;  %2009 = vmatprep.subr.bf16.mxu1 %v3009_v34  ;;  %v3890_v33 = vld [vmem:[%s3384_s12 + $0x78] sm:$0xff]  ;;  %v3085_v34 = vld [vmem:[%s4103_s1 + $0x300] ss:$8 sps:$4 sm:$0xff]  }
  0x92   : > { %2181 = vmatprep.subr.bf16.mxu0 %v3012_v35  ;;  %v3088_v35 = vld [vmem:[%s4103_s1 + $0x700] ss:$8 sps:$4 sm:$0xff]   ;;  %v2480_v30 = vcombine.high %v3887_v32, %v3890_v33 }
  0x94   : > { %2010 = vmatpush1.bf16.msra.mxu1 %v3007_v36  ;;  %v3091_v36 = vld [vmem:[%s4103_s1 + $0x310] ss:$8 sps:$4 sm:$0xff]  }
  0x95   : > { %2182 = vmatpush1.bf16.msra.mxu0 %v3010_v37  ;;  %2011 = vmatprep.subr.bf16.mxu1 %v3015_v38  ;;  %v3094_v37 = vld [vmem:[%s4103_s1 + $0x710] ss:$8 sps:$4 sm:$0xff]   ;;  %v3099_v38 = vld [vmem:[%s4103_s1 + $0x324] ss:$8 sps:$4 sm:$0xff]  }
  0x96   : > { %2183 = vmatprep.subr.bf16.mxu0 %v3018_v39  ;;  %v3102_v39 = vld [vmem:[%s4103_s1 + $0x724] ss:$8 sps:$4 sm:$0xff]  }
  0x98   : > { %2012 = vmatpush1.bf16.msra.mxu1 %v3013_v40  ;;  %v3097_v40 = vld [vmem:[%s4103_s1 + $0x320] ss:$8 sps:$4 sm:$0xff]  }
  0x99   : > { %2184 = vmatpush1.bf16.msra.mxu0 %v3016_v41  ;;  %2013 = vmatprep.subr.bf16.mxu1 %v3021_v42  ;;  %v3100_v41 = vld [vmem:[%s4103_s1 + $0x720] ss:$8 sps:$4 sm:$0xff]   ;;  %v3105_v42 = vld [vmem:[%s4103_s1 + $0x334] ss:$8 sps:$4 sm:$0xff]  }
  0x9a   : > { %2185 = vmatprep.subr.bf16.mxu0 %v3024_v43  ;;  %v3108_v43 = vld [vmem:[%s4103_s1 + $0x734] ss:$8 sps:$4 sm:$0xff]  }
  0x9c   : > { %2014 = vmatpush1.bf16.msra.mxu1 %v3019_v44  ;;  %v3103_v44 = vld [vmem:[%s4103_s1 + $0x330] ss:$8 sps:$4 sm:$0xff]  }
  0x9d   : > { %2186 = vmatpush1.bf16.msra.mxu0 %v3022_v45  ;;  %2015 = vmatprep.subr.bf16.mxu1 %v3027_v46  ;;  %v3106_v45 = vld [vmem:[%s4103_s1 + $0x730] ss:$8 sps:$4 sm:$0xff]   ;;  %v3111_v46 = vld [vmem:[%s4103_s1 + $0x344] ss:$8 sps:$4 sm:$0xff]  }
  0x9e   : > { %2187 = vmatprep.subr.bf16.mxu0 %v3030_v47  ;;  %v3114_v47 = vld [vmem:[%s4103_s1 + $0x744] ss:$8 sps:$4 sm:$0xff]  }
  0xa0   : > { %2016 = vmatpush1.bf16.msra.mxu1 %v3025_v48  ;;  %v3109_v48 = vld [vmem:[%s4103_s1 + $0x340] ss:$8 sps:$4 sm:$0xff]  }
  0xa1   : > { %2188 = vmatpush1.bf16.msra.mxu0 %v3028_v49  ;;  %2017 = vmatprep.subr.bf16.mxu1 %v3033_v50  ;;  %v3112_v49 = vld [vmem:[%s4103_s1 + $0x740] ss:$8 sps:$4 sm:$0xff]   ;;  %v3117_v50 = vld [vmem:[%s4103_s1 + $0x354] ss:$8 sps:$4 sm:$0xff]  }
  0xa2   : > { %2189 = vmatprep.subr.bf16.mxu0 %v3036_v51  ;;  %v3120_v51 = vld [vmem:[%s4103_s1 + $0x754] ss:$8 sps:$4 sm:$0xff]  }
  0xa4   : > { %2018 = vmatpush1.bf16.msra.mxu1 %v3031_v52  ;;  %v3115_v52 = vld [vmem:[%s4103_s1 + $0x350] ss:$8 sps:$4 sm:$0xff]  }
  0xa5   : > { %2190 = vmatpush1.bf16.msra.mxu0 %v3034_v53  ;;  %2019 = vmatprep.subr.bf16.mxu1 %v3039_v54  ;;  %v3118_v53 = vld [vmem:[%s4103_s1 + $0x750] ss:$8 sps:$4 sm:$0xff]   ;;  %v3123_v54 = vld [vmem:[%s4103_s1 + $0x364] ss:$8 sps:$4 sm:$0xff]  }
  0xa6   : > { %2191 = vmatprep.subr.bf16.mxu0 %v3042_v55  ;;  %v3126_v55 = vld [vmem:[%s4103_s1 + $0x764] ss:$8 sps:$4 sm:$0xff]  }
  0xa8   : > { %2020 = vmatpush1.bf16.msra.mxu1 %v3037_v56  ;;  %v3121_v56 = vld [vmem:[%s4103_s1 + $0x360] ss:$8 sps:$4 sm:$0xff]  }
  0xa9   : > { %2192 = vmatpush1.bf16.msra.mxu0 %v3040_v57  ;;  %2021 = vmatprep.subr.bf16.mxu1 %v3045_v58  ;;  %v3124_v57 = vld [vmem:[%s4103_s1 + $0x760] ss:$8 sps:$4 sm:$0xff]   ;;  %v3129_v58 = vld [vmem:[%s4103_s1 + $0x374] ss:$8 sps:$4 sm:$0xff]  }
  0xaa   : > { %2193 = vmatprep.subr.bf16.mxu0 %v3048_v59  ;;  %v3132_v59 = vld [vmem:[%s4103_s1 + $0x774] ss:$8 sps:$4 sm:$0xff]  }
  0xac   : > { %2022 = vmatpush1.bf16.msra.mxu1 %v3043_v60  ;;  %v3127_v60 = vld [vmem:[%s4103_s1 + $0x370] ss:$8 sps:$4 sm:$0xff]  }
  0xad   : > { %2194 = vmatpush1.bf16.msra.mxu0 %v3046_v61  ;;  %2023 = vmatprep.subr.bf16.mxu1 %v3051_v62  ;;  %v3130_v61 = vld [vmem:[%s4103_s1 + $0x770] ss:$8 sps:$4 sm:$0xff]   ;;  %v3135_v62 = vld [vmem:[%s4103_s1 + $0x384] ss:$8 sps:$4 sm:$0xff]  }
  0xae   : > { %2195 = vmatprep.subr.bf16.mxu0 %v3054_v63  ;;  %v3138_v63 = vld [vmem:[%s4103_s1 + $0x784] ss:$8 sps:$4 sm:$0xff]  }
  0xb0   : > { %2024 = vmatpush1.bf16.msra.mxu1 %v3049_v0  ;;  %v3133_v0 = vld [vmem:[%s4103_s1 + $0x380] ss:$8 sps:$4 sm:$0xff]  }
  0xb1   : > { %2196 = vmatpush1.bf16.msra.mxu0 %v3052_v1  ;;  %2025 = vmatprep.subr.bf16.mxu1 %v3057_v2  ;;  %v3136_v1 = vld [vmem:[%s4103_s1 + $0x780] ss:$8 sps:$4 sm:$0xff]   ;;  %v3141_v2 = vld [vmem:[%s4103_s1 + $0x394] ss:$8 sps:$4 sm:$0xff]  }
  0xb2   : > { %2197 = vmatprep.subr.bf16.mxu0 %v3060_v3  ;;  %v3144_v3 = vld [vmem:[%s4103_s1 + $0x794] ss:$8 sps:$4 sm:$0xff]  }
  0xb4   : > { %2026 = vmatpush1.bf16.msra.mxu1 %v3055_v4  ;;  %v3139_v4 = vld [vmem:[%s4103_s1 + $0x390] ss:$8 sps:$4 sm:$0xff]  }
  0xb5   : > { %2198 = vmatpush1.bf16.msra.mxu0 %v3058_v5  ;;  %2027 = vmatprep.subr.bf16.mxu1 %v3063_v6  ;;  %v3142_v5 = vld [vmem:[%s4103_s1 + $0x790] ss:$8 sps:$4 sm:$0xff]   ;;  %v3147_v6 = vld [vmem:[%s4103_s1 + $0x3a4] ss:$8 sps:$4 sm:$0xff]  }
  0xb6   : > { %2199 = vmatprep.subr.bf16.mxu0 %v3066_v7  ;;  %v3150_v7 = vld [vmem:[%s4103_s1 + $0x7a4] ss:$8 sps:$4 sm:$0xff]  }
  0xb8   : > { %2028 = vmatpush1.bf16.msra.mxu1 %v3061_v8  ;;  %v3145_v8 = vld [vmem:[%s4103_s1 + $0x3a0] ss:$8 sps:$4 sm:$0xff]  }
  0xb9   : > { %2200 = vmatpush1.bf16.msra.mxu0 %v3064_v9  ;;  %2029 = vmatprep.subr.bf16.mxu1 %v3069_v10  ;;  %v3148_v9 = vld [vmem:[%s4103_s1 + $0x7a0] ss:$8 sps:$4 sm:$0xff]   ;;  %v3153_v10 = vld [vmem:[%s4103_s1 + $0x3b4] ss:$8 sps:$4 sm:$0xff]  }
  0xba   : > { %2201 = vmatprep.subr.bf16.mxu0 %v3072_v11  ;;  %v3156_v11 = vld [vmem:[%s4103_s1 + $0x7b4] ss:$8 sps:$4 sm:$0xff]  }
  0xbc   : > { %2030 = vmatpush1.bf16.msra.mxu1 %v3067_v12  ;;  %v3151_v12 = vld [vmem:[%s4103_s1 + $0x3b0] ss:$8 sps:$4 sm:$0xff]  }
  0xbd   : > { %2202 = vmatpush1.bf16.msra.mxu0 %v3070_v13  ;;  %2031 = vmatprep.subr.bf16.mxu1 %v3075_v14  ;;  %v3154_v13 = vld [vmem:[%s4103_s1 + $0x7b0] ss:$8 sps:$4 sm:$0xff]   ;;  %v3159_v14 = vld [vmem:[%s4103_s1 + $0x3c4] ss:$8 sps:$4 sm:$0xff]  }
  0xbe   : > { %2203 = vmatprep.subr.bf16.mxu0 %v3078_v15  ;;  %v3162_v15 = vld [vmem:[%s4103_s1 + $0x7c4] ss:$8 sps:$4 sm:$0xff]  }
  0xc0   : > { %2032 = vmatpush1.bf16.msra.mxu1 %v3073_v16  ;;  %v3157_v16 = vld [vmem:[%s4103_s1 + $0x3c0] ss:$8 sps:$4 sm:$0xff]  }
  0xc1   : > { %2204 = vmatpush1.bf16.msra.mxu0 %v3076_v17  ;;  %2033 = vmatprep.subr.bf16.mxu1 %v3081_v18  ;;  %v3160_v17 = vld [vmem:[%s4103_s1 + $0x7c0] ss:$8 sps:$4 sm:$0xff]   ;;  %v3165_v18 = vld [vmem:[%s4103_s1 + $0x3d4] ss:$8 sps:$4 sm:$0xff]  }
  0xc2   : > { %2205 = vmatprep.subr.bf16.mxu0 %v3084_v19  ;;  %v3168_v19 = vld [vmem:[%s4103_s1 + $0x7d4] ss:$8 sps:$4 sm:$0xff]  }
  0xc4   : > { %2034 = vmatpush1.bf16.msra.mxu1 %v3079_v20  ;;  %v3163_v20 = vld [vmem:[%s4103_s1 + $0x3d0] ss:$8 sps:$4 sm:$0xff]  }
  0xc5   : > { %2206 = vmatpush1.bf16.msra.mxu0 %v3082_v21  ;;  %2046 = vmatprep.subr.bf16.mxu1 %v3087_v22  ;;  %v3166_v21 = vld [vmem:[%s4103_s1 + $0x7d0] ss:$8 sps:$4 sm:$0xff]   ;;  %v3171_v22 = vld [vmem:[%s4103_s1 + $0x3e4] ss:$8 sps:$4 sm:$0xff]  }
  0xc6   : > { %2218 = vmatprep.subr.bf16.mxu0 %v3090_v23  ;;  %v3174_v23 = vld [vmem:[%s4103_s1 + $0x7e4] ss:$8 sps:$4 sm:$0xff]  }
  0xc7   : > { %2036 = vmatmul.mubr.bf16.vlgmr.msra.gmra.mrb[0].mxu1 %v2469_v27  ;;  %v3169_v27 = vld [vmem:[%s4103_s1 + $0x3e0] ss:$8 sps:$4 sm:$0xff]  }
  0xc8   : > { %2208 = vmatmul.mubr.bf16.vlgmr.msra.gmra.mrb[0].mxu0 %v2477_v28  ;;  %2047 = vmatpush1.bf16.msra.mxu1 %v3085_v34  ;;  %v3172_v28 = vld [vmem:[%s4103_s1 + $0x7e0] ss:$8 sps:$4 sm:$0xff]   ;;  %v3177_v34 = vld [vmem:[%s4103_s1 + $0x3f4] ss:$8 sps:$4 sm:$0xff]  }
  0xc9   : > { %2219 = vmatpush1.bf16.msra.mxu0 %v3088_v35  ;;  %2048 = vmatprep.subr.bf16.mxu1 %v3093_v24  ;;  %v3180_v35 = vld [vmem:[%s4103_s1 + $0x7f4] ss:$8 sps:$4 sm:$0xff]   ;;  %v3175_v24 = vld [vmem:[%s4103_s1 + $0x3f0] ss:$8 sps:$4 sm:$0xff]  }
  0xca   : > { %2220 = vmatprep.subr.bf16.mxu0 %v3096_v25  ;;  %2078 = vmatprep.mubr.bf16.mxu1 %v2472_v29  ;;  %v3178_v25 = vld [vmem:[%s4103_s1 + $0x7f0] ss:$8 sps:$4 sm:$0xff]   ;;  %v2471_v29 = vcombine.low %v3877_v26, %v3884_v31 }
  0xcb   : > { %2250 = vmatprep.mubr.bf16.mxu0 %v2480_v30  ;;  %v2479_v30 = vcombine.low %v3887_v32, %v3890_v33 }
  0xcc   : > { %2049 = vmatpush1.bf16.msra.mxu1 %v3091_v36  ;;  %v2294_v36 = vlaneseq }
  0xcd   : > { %2221 = vmatpush1.bf16.msra.mxu0 %v3094_v37  ;;  %2050 = vmatprep.subr.bf16.mxu1 %v3099_v38 }
  0xce   : > { %2222 = vmatprep.subr.bf16.mxu0 %v3102_v39  ;;  %v2295_v37 = vshrl.u32 %v2294_v36, 7  ;;  %v2292_v39 = vld [vmem:[%s4104_s2] sm:$0x3] }
  0xd0   : > { %2051 = vmatpush1.bf16.msra.mxu1 %v3097_v40  ;;  %v2296_v38 = vsub.s32 0, %v2295_v37  ;;  %v2300_v40 = vsub.s32 1, %v2295_v37 }
  0xd1   : > { %2223 = vmatpush1.bf16.msra.mxu0 %v3100_v41  ;;  %2052 = vmatprep.subr.bf16.mxu1 %v3105_v42 }
  0xd2   : > { %2224 = vmatprep.subr.bf16.mxu0 %v3108_v43  ;;  %v2297_v41 = vrot.slane %v2292_v39, %v2296_v38  ;;  %v2301_v26 = vrot.slane %v2292_v39, %v2300_v40 }
  0xd4   : > { %2053 = vmatpush1.bf16.msra.mxu1 %v3103_v44 }
  0xd5   : > { %2225 = vmatpush1.bf16.msra.mxu0 %v3106_v45  ;;  %2054 = vmatprep.subr.bf16.mxu1 %v3111_v46 }
  0xd6   : > { %2226 = vmatprep.subr.bf16.mxu0 %v3114_v47 }
  0xd8   : > { %2055 = vmatpush1.bf16.msra.mxu1 %v3109_v48 }
  0xd9   : > { %2227 = vmatpush1.bf16.msra.mxu0 %v3112_v49  ;;  %2056 = vmatprep.subr.bf16.mxu1 %v3117_v50 }
  0xda   : > { %2228 = vmatprep.subr.bf16.mxu0 %v3120_v51 }
  0xdc   : > { %2057 = vmatpush1.bf16.msra.mxu1 %v3115_v52 }
  0xdd   : > { %2229 = vmatpush1.bf16.msra.mxu0 %v3118_v53  ;;  %2058 = vmatprep.subr.bf16.mxu1 %v3123_v54 }
  0xde   : > { %2230 = vmatprep.subr.bf16.mxu0 %v3126_v55 }
  0xe0   : > { %2059 = vmatpush1.bf16.msra.mxu1 %v3121_v56 }
  0xe1   : > { %2231 = vmatpush1.bf16.msra.mxu0 %v3124_v57  ;;  %2060 = vmatprep.subr.bf16.mxu1 %v3129_v58 }
  0xe2   : > { %2232 = vmatprep.subr.bf16.mxu0 %v3132_v59 }
  0xe4   : > { %2061 = vmatpush1.bf16.msra.mxu1 %v3127_v60 }
  0xe5   : > { %2233 = vmatpush1.bf16.msra.mxu0 %v3130_v61  ;;  %2062 = vmatprep.subr.bf16.mxu1 %v3135_v62 }
  0xe6   : > { %2234 = vmatprep.subr.bf16.mxu0 %v3138_v63 }
  0xe8   : > { %2063 = vmatpush1.bf16.msra.mxu1 %v3133_v0 }
  0xe9   : > { %2235 = vmatpush1.bf16.msra.mxu0 %v3136_v1  ;;  %2064 = vmatprep.subr.bf16.mxu1 %v3141_v2 }
  0xea   : > { %2236 = vmatprep.subr.bf16.mxu0 %v3144_v3 }
  0xec   : > { %2065 = vmatpush1.bf16.msra.mxu1 %v3139_v4 }
  0xed   : > { %2237 = vmatpush1.bf16.msra.mxu0 %v3142_v5  ;;  %2066 = vmatprep.subr.bf16.mxu1 %v3147_v6 }
  0xee   : > { %2238 = vmatprep.subr.bf16.mxu0 %v3150_v7 }
  0xf0   : > { %2067 = vmatpush1.bf16.msra.mxu1 %v3145_v8 }
  0xf1   : > { %2239 = vmatpush1.bf16.msra.mxu0 %v3148_v9  ;;  %2068 = vmatprep.subr.bf16.mxu1 %v3153_v10 }
  0xf2   : > { %2240 = vmatprep.subr.bf16.mxu0 %v3156_v11 }
  0xf4   : > { %2069 = vmatpush1.bf16.msra.mxu1 %v3151_v12 }
  0xf5   : > { %2241 = vmatpush1.bf16.msra.mxu0 %v3154_v13  ;;  %2070 = vmatprep.subr.bf16.mxu1 %v3159_v14 }
  0xf6   : > { %2242 = vmatprep.subr.bf16.mxu0 %v3162_v15 }
  0xf8   : > { %2071 = vmatpush1.bf16.msra.mxu1 %v3157_v16 }
  0xf9   : > { %2243 = vmatpush1.bf16.msra.mxu0 %v3160_v17  ;;  %2072 = vmatprep.subr.bf16.mxu1 %v3165_v18 }
  0xfa   : > { %2244 = vmatprep.subr.bf16.mxu0 %v3168_v19 }
  0xfc   : > { %2073 = vmatpush1.bf16.msra.mxu1 %v3163_v20 }
  0xfd   : > { %2245 = vmatpush1.bf16.msra.mxu0 %v3166_v21  ;;  %2074 = vmatprep.subr.bf16.mxu1 %v3171_v22 }
  0xfe   : > { %2246 = vmatprep.subr.bf16.mxu0 %v3174_v23 }
 0x100   : > { %2075 = vmatpush1.bf16.msra.mxu1 %v3169_v27 }
 0x101   : > { %2247 = vmatpush1.bf16.msra.mxu0 %v3172_v28  ;;  %2076 = vmatprep.subr.bf16.mxu1 %v3177_v34 }
 0x102   : > { %2248 = vmatprep.subr.bf16.mxu0 %v3180_v35 }
 0x104   : > { %2077 = vmatpush1.bf16.msra.mxu1 %v3175_v24 }
 0x105   : > { %2249 = vmatpush1.bf16.msra.mxu0 %v3178_v25 }
 0x107   : > { %2079 = vmatmul.mubr.bf16.vlgmr.msra.gmra.mrb[0].mxu1 %v2471_v29 }
 0x108   : > { %2251 = vmatmul.mubr.bf16.vlgmr.msra.gmra.mrb[0].mxu0 %v2479_v30 }
 0x1da   : > { %v2080_v42 = vpop.f32.mrb[0].mxu1 }
 0x1db   : > { %v2252_v43 = vpop.f32.mrb[0].mxu0  ;;  %v2082_v44 = vpop.f32.mrb[1].mxu1 }
 0x1dc   : > { %v2745_v31 = vadd.f32 %v2252_v43, %v2080_v42  ;;  %v2254_v32 = vpop.f32.mrb[1].mxu0  ;;  %v2084_v45 = vpop.f32.mrb[2].mxu1 }
 0x1dd   : > { %v2746_v33 = vadd.f32 %v2254_v32, %v2082_v44  ;;  %v2256_v46 = vpop.f32.mrb[2].mxu0  ;;  %v2086_v49 = vpop.f32.mrb[3].mxu1 }
 0x1de   : > { %v2304_v47 = vadd.f32 %v2745_v31, %v2297_v41  ;;  %v2747_v48 = vadd.f32 %v2256_v46, %v2084_v45  ;;  %v2258_v50 = vpop.f32.mrb[3].mxu0 }
 0x1df   : > { %v2305_v51 = vadd.f32 %v2746_v33, %v2301_v26  ;;  %v2748_v52 = vadd.f32 %v2258_v50, %v2086_v49 }
 0x1e0   : > { %v2308_v53 = vmax.f32 %v2304_v47, 0.0  ;;  %v2306_v54 = vadd.f32 %v2747_v48, %v2297_v41 }
 0x1e1   : > { %v2309_v55 = vmax.f32 %v2305_v51, 0.0  ;;  %v2307_v56 = vadd.f32 %v2748_v52, %v2301_v26 }
 0x1e2   : > { %v2310_v57 = vmax.f32 %v2306_v54, 0.0 }
 0x1e3   : > { %v2743_v58 = vpack.c.bf16 %v2309_v55, %v2308_v53  ;;  %v2311_v59 = vmax.f32 %v2307_v56, 0.0 }
 0x1e5   : > { %2324 = vst [vmem:[%s282_s21] sm:$0xff] %v2743_v58  ;;  %v2744_v60 = vpack.c.bf16 %v2311_v59, %v2310_v57 }
 0x1e7   : > { %2325 = vst [vmem:[%s282_s21 + $0x8] sm:$0xff] %v2744_v60 }
 0x1e8 PF: > { %s13_s14 = sadd.s32 1, %s3203_s14   ;;  %s4106_s12 = smov %s3199_s13 }
 0x1e9   : > { %p10_p5 = scmp.ge.s32.totalorder %s13_s14, 4   ;;  %s4107_s13 = smov %s4109_s15 }
 0x1eb   :  { %12 = sbr.rel (!%p10_p5) target bundleno = 2 (0x2), region = 80 }

// kernel: vae_forward.22
= control target key start
LH: loop header
LB: loop body
LE: loop exit
PB: predicated region body
PF: predicated region fallthrough
CT: control target
= control target key end

     0   :  { %s5724_s12 = smov 0   ;;  %s5726_s13 = smov 0   ;;  %s6339_s0 = inlined_call_operand.vmem [shape: bf16[8,4096], index: 0, kind: input, shape index: {}]   ;;  %s6340_s1 = inlined_call_operand.vmem [shape: bf16[4096,512], index: 1, kind: input, shape index: {}]   ;;  %s6341_s2 = inlined_call_operand.vmem [shape: f32[1,512], index: 2, kind: input, shape index: {}]   ;;  %s6342_s3 = inlined_call_operand.vmem [shape: bf16[8,512], index: 3, kind: output, shape index: {}]  }
   0x1   :  { %s5728_s14 = smov 0  }
   0x2 LB: > { %s25_s15 = sadd.s32 1, %s5698_s13  ;;  %p4270_p0 = scmp.ge.s32.totalorder %s5702_s14, 1  ;;  %s5702_s14 = sphi %s5728_s14, %s13_s14   ;;  %s5698_s13 = sphi %s5726_s13, %s6344_s13   ;;  %s5694_s12 = sphi %s5724_s12, %s6343_s12  }
   0x3   : > { %p26_p1 = scmp.ge.s32.totalorder %s25_s15, 2  ;;  %p194_p2 = scmp.lt.s32.totalorder %s5702_s14, 3 }
   0x5   : > { %s6346_s15 = smov (%p26_p1, %s25_s15), 0  ;;  %p195_p3 = pnand %p4270_p0, %p194_p2 }
   0x6   : > { %s4273_s16 = sshll.u32 (!%p195_p3), %s5694_s12, 8  ;;  %s4271_s21 = sshll.u32 (!%p195_p3), %s5694_s12, 4 }
   0x7   : > { %198 = sbr.rel (%p195_p3) target bundleno = 770 (0x302), region = 32  ;;  %p252_p4 = scmp.lt.s32.totalorder (!%p195_p3), %s4273_s16, 511 }
   0x8   : > { %p243_p5 = scmp.lt.s32.totalorder (!%p195_p3), %s4271_s21, 31  ;;  %p4804_p6 = scmp.ne.s32.totalorder (!%p195_p3), %s5694_s12, 0 }
   0xe   : > { %s6348_s16 = smov (!%p252_p4, %s4273_s16), 511  ;;  %s6350_s21 = smov (!%p243_p5, %s4271_s21), 31 }
   0xf   : > { %s4813_s17 = sshll.u32 %s6348_s16, 4  ;;  %s4272_s22 = sshll.u32 %s6350_s21, 2 }
  0x10   : > { %s5748_s20 = scalar_lea.vmem %s6340_s1, %s4813_s17  ;;  %s5798_s25 = scalar_lea.vmem %s6339_s0, %s4272_s22 }
  0x11   : > { %v4896_v0 = vld [vmem:[%s5748_s20 + $0x4] ss:$16 sps:$4 sm:$0xff]   ;;  %v4898_v1 = vld [vmem:[%s5748_s20 + $0xc] ss:$16 sps:$4 sm:$0xff]   ;;  %v4900_v2 = vld [vmem:[%s5748_s20] ss:$16 sps:$4 sm:$0xff]  }
  0x12   : > { %3413 = vmatprep.subr.bf16.mxu0 %v4896_v0  ;;  %v4901_v3 = vld [vmem:[%s5748_s20 + $0x8] ss:$16 sps:$4 sm:$0xff]   ;;  %3741 = vmatprep.subr.bf16.mxu1 %v4898_v1  ;;  %v4902_v4 = vld [vmem:[%s5748_s20 + $0x24] ss:$16 sps:$4 sm:$0xff]   ;;  %v4904_v5 = vld [vmem:[%s5748_s20 + $0x2c] ss:$16 sps:$4 sm:$0xff]  }
  0x13   : > { %3414 = vmatpush1.bf16.msra.mxu0 %v4900_v2  ;;  %3742 = vmatpush1.bf16.msra.mxu1 %v4901_v3  ;;  %v4906_v6 = vld [vmem:[%s5748_s20 + $0x20] ss:$16 sps:$4 sm:$0xff]   ;;  %v4907_v7 = vld [vmem:[%s5748_s20 + $0x28] ss:$16 sps:$4 sm:$0xff]   ;;  %v4908_v8 = vld [vmem:[%s5748_s20 + $0x44] ss:$16 sps:$4 sm:$0xff]  }
  0x14   : > { %3415 = vmatprep.subr.bf16.mxu0 %v4902_v4  ;;  %3743 = vmatprep.subr.bf16.mxu1 %v4904_v5  ;;  %v4910_v9 = vld [vmem:[%s5748_s20 + $0x4c] ss:$16 sps:$4 sm:$0xff]   ;;  %v4912_v10 = vld [vmem:[%s5748_s20 + $0x40] ss:$16 sps:$4 sm:$0xff]   ;;  %v4913_v11 = vld [vmem:[%s5748_s20 + $0x48] ss:$16 sps:$4 sm:$0xff]  }
  0x15   : > { %v4914_v12 = vld [vmem:[%s5748_s20 + $0x64] ss:$16 sps:$4 sm:$0xff]   ;;  %v4916_v13 = vld [vmem:[%s5748_s20 + $0x6c] ss:$16 sps:$4 sm:$0xff]   ;;  %v4918_v14 = vld [vmem:[%s5748_s20 + $0x60] ss:$16 sps:$4 sm:$0xff]  }
  0x16   : > { %v4919_v15 = vld [vmem:[%s5748_s20 + $0x68] ss:$16 sps:$4 sm:$0xff]   ;;  %v4920_v16 = vld [vmem:[%s5748_s20 + $0x84] ss:$16 sps:$4 sm:$0xff]   ;;  %v4922_v17 = vld [vmem:[%s5748_s20 + $0x8c] ss:$16 sps:$4 sm:$0xff]  }
  0x17   : > { %3416 = vmatpush1.bf16.msra.mxu0 %v4906_v6  ;;  %3744 = vmatpush1.bf16.msra.mxu1 %v4907_v7  ;;  %v4924_v18 = vld [vmem:[%s5748_s20 + $0x80] ss:$16 sps:$4 sm:$0xff]   ;;  %v4925_v19 = vld [vmem:[%s5748_s20 + $0x88] ss:$16 sps:$4 sm:$0xff]   ;;  %v4926_v20 = vld [vmem:[%s5748_s20 + $0xa4] ss:$16 sps:$4 sm:$0xff]  }
  0x18   : > { %3417 = vmatprep.subr.bf16.mxu0 %v4908_v8  ;;  %3745 = vmatprep.subr.bf16.mxu1 %v4910_v9  ;;  %v4928_v21 = vld [vmem:[%s5748_s20 + $0xac] ss:$16 sps:$4 sm:$0xff]   ;;  %v4930_v22 = vld [vmem:[%s5748_s20 + $0xa0] ss:$16 sps:$4 sm:$0xff]   ;;  %v4931_v23 = vld [vmem:[%s5748_s20 + $0xa8] ss:$16 sps:$4 sm:$0xff]  }
  0x19   : > { %v4932_v24 = vld [vmem:[%s5748_s20 + $0xc4] ss:$16 sps:$4 sm:$0xff]   ;;  %v4934_v25 = vld [vmem:[%s5748_s20 + $0xcc] ss:$16 sps:$4 sm:$0xff]   ;;  %v4936_v26 = vld [vmem:[%s5748_s20 + $0xc0] ss:$16 sps:$4 sm:$0xff]  }
  0x1a   : > { %v4937_v27 = vld [vmem:[%s5748_s20 + $0xc8] ss:$16 sps:$4 sm:$0xff]   ;;  %v4938_v28 = vld [vmem:[%s5748_s20 + $0xe4] ss:$16 sps:$4 sm:$0xff]   ;;  %v4940_v29 = vld [vmem:[%s5748_s20 + $0xec] ss:$16 sps:$4 sm:$0xff]  }
  0x1b   : > { %3418 = vmatpush1.bf16.msra.mxu0 %v4912_v10  ;;  %3746 = vmatpush1.bf16.msra.mxu1 %v4913_v11  ;;  %v4942_v30 = vld [vmem:[%s5748_s20 + $0xe0] ss:$16 sps:$4 sm:$0xff]   ;;  %v4943_v31 = vld [vmem:[%s5748_s20 + $0xe8] ss:$16 sps:$4 sm:$0xff]   ;;  %v4944_v32 = vld [vmem:[%s5748_s20 + $0x104] ss:$16 sps:$4 sm:$0xff]  }
  0x1c   : > { %3419 = vmatprep.subr.bf16.mxu0 %v4914_v12  ;;  %3747 = vmatprep.subr.bf16.mxu1 %v4916_v13  ;;  %v4946_v33 = vld [vmem:[%s5748_s20 + $0x10c] ss:$16 sps:$4 sm:$0xff]   ;;  %v4948_v34 = vld [vmem:[%s5748_s20 + $0x100] ss:$16 sps:$4 sm:$0xff]   ;;  %v4949_v35 = vld [vmem:[%s5748_s20 + $0x108] ss:$16 sps:$4 sm:$0xff]  }
  0x1d   : > { %v4950_v36 = vld [vmem:[%s5748_s20 + $0x124] ss:$16 sps:$4 sm:$0xff]   ;;  %v4952_v37 = vld [vmem:[%s5748_s20 + $0x12c] ss:$16 sps:$4 sm:$0xff]   ;;  %v4954_v38 = vld [vmem:[%s5748_s20 + $0x120] ss:$16 sps:$4 sm:$0xff]  }
  0x1e   : > { %v4955_v39 = vld [vmem:[%s5748_s20 + $0x128] ss:$16 sps:$4 sm:$0xff]   ;;  %v4956_v40 = vld [vmem:[%s5748_s20 + $0x144] ss:$16 sps:$4 sm:$0xff]   ;;  %v4958_v41 = vld [vmem:[%s5748_s20 + $0x14c] ss:$16 sps:$4 sm:$0xff]  }
  0x1f   : > { %3420 = vmatpush1.bf16.msra.mxu0 %v4918_v14  ;;  %3748 = vmatpush1.bf16.msra.mxu1 %v4919_v15  ;;  %v4960_v42 = vld [vmem:[%s5748_s20 + $0x140] ss:$16 sps:$4 sm:$0xff]   ;;  %v4961_v43 = vld [vmem:[%s5748_s20 + $0x148] ss:$16 sps:$4 sm:$0xff]   ;;  %v4962_v44 = vld [vmem:[%s5748_s20 + $0x164] ss:$16 sps:$4 sm:$0xff]  }
  0x20   : > { %3421 = vmatprep.subr.bf16.mxu0 %v4920_v16  ;;  %3749 = vmatprep.subr.bf16.mxu1 %v4922_v17  ;;  %v4964_v45 = vld [vmem:[%s5748_s20 + $0x16c] ss:$16 sps:$4 sm:$0xff]   ;;  %v277_v46 = vld [vmem:[%s5798_s25] sm:$0xff]  ;;  %v4967_v49 = vld [vmem:[%s5748_s20 + $0x168] ss:$16 sps:$4 sm:$0xff]  }
  0x21   : > { %v4966_v47 = vld [vmem:[%s5748_s20 + $0x160] ss:$16 sps:$4 sm:$0xff]   ;;  %v4277_v48 = vcombine.high %v277_v46, %v277_v46  ;;  %v4968_v50 = vld [vmem:[%s5748_s20 + $0x184] ss:$16 sps:$4 sm:$0xff]   ;;  %v4970_v51 = vld [vmem:[%s5748_s20 + $0x18c] ss:$16 sps:$4 sm:$0xff]   ;;  %v4276_v4 = vcombine.low %v277_v46, %v277_v46 }
  0x22   : > { %v4972_v52 = vld [vmem:[%s5748_s20 + $0x180] ss:$16 sps:$4 sm:$0xff]   ;;  %v4973_v53 = vld [vmem:[%s5748_s20 + $0x188] ss:$16 sps:$4 sm:$0xff]   ;;  %v4974_v54 = vld [vmem:[%s5748_s20 + $0x1a4] ss:$16 sps:$4 sm:$0xff]  }
  0x23   : > { %3422 = vmatpush1.bf16.msra.mxu0 %v4924_v18  ;;  %3750 = vmatpush1.bf16.msra.mxu1 %v4925_v19  ;;  %v4976_v55 = vld [vmem:[%s5748_s20 + $0x1ac] ss:$16 sps:$4 sm:$0xff]   ;;  %v4978_v56 = vld [vmem:[%s5748_s20 + $0x1a0] ss:$16 sps:$4 sm:$0xff]   ;;  %v4979_v57 = vld [vmem:[%s5748_s20 + $0x1a8] ss:$16 sps:$4 sm:$0xff]  }
  0x24   : > { %3423 = vmatprep.subr.bf16.mxu0 %v4926_v20  ;;  %3751 = vmatprep.subr.bf16.mxu1 %v4928_v21  ;;  %v4980_v58 = vld [vmem:[%s5748_s20 + $0x1c4] ss:$16 sps:$4 sm:$0xff]   ;;  %v4982_v59 = vld [vmem:[%s5748_s20 + $0x1cc] ss:$16 sps:$4 sm:$0xff]   ;;  %v4984_v60 = vld [vmem:[%s5748_s20 + $0x1c0] ss:$16 sps:$4 sm:$0xff]  }
  0x25   : > { %3445 = vmatprep.mubr.bf16.mxu0 %v4277_v48  ;;  %3773 = vmatprep.mubr.bf16.mxu1 %v4277_v48  ;;  %v4985_v61 = vld [vmem:[%s5748_s20 + $0x1c8] ss:$16 sps:$4 sm:$0xff]   ;;  %v4986_v62 = vld [vmem:[%s5748_s20 + $0x1e4] ss:$16 sps:$4 sm:$0xff]   ;;  %v4988_v63 = vld [vmem:[%s5748_s20 + $0x1ec] ss:$16 sps:$4 sm:$0xff]  }
  0x26   : > { %v4990_v0 = vld [vmem:[%s5748_s20 + $0x1e0] ss:$16 sps:$4 sm:$0xff]   ;;  %v4991_v1 = vld [vmem:[%s5748_s20 + $0x1e8] ss:$16 sps:$4 sm:$0xff]   ;;  %v4996_v2 = vld [vmem:[%s5748_s20 + $0x204] ss:$16 sps:$4 sm:$0xff]  }
  0x27   : > { %3424 = vmatpush1.bf16.msra.mxu0 %v4930_v22  ;;  %3752 = vmatpush1.bf16.msra.mxu1 %v4931_v23  ;;  %v4999_v3 = vld [vmem:[%s5748_s20 + $0x20c] ss:$16 sps:$4 sm:$0xff]   ;;  %v4994_v5 = vld [vmem:[%s5748_s20 + $0x200] ss:$16 sps:$4 sm:$0xff]   ;;  %v4997_v6 = vld [vmem:[%s5748_s20 + $0x208] ss:$16 sps:$4 sm:$0xff]  }
  0x28   : > { %3425 = vmatprep.subr.bf16.mxu0 %v4932_v24  ;;  %3753 = vmatprep.subr.bf16.mxu1 %v4934_v25  ;;  %v5002_v7 = vld [vmem:[%s5748_s20 + $0x224] ss:$16 sps:$4 sm:$0xff]   ;;  %v5005_v8 = vld [vmem:[%s5748_s20 + $0x22c] ss:$16 sps:$4 sm:$0xff]   ;;  %v5000_v9 = vld [vmem:[%s5748_s20 + $0x220] ss:$16 sps:$4 sm:$0xff]  }
  0x29   : > { %v5003_v10 = vld [vmem:[%s5748_s20 + $0x228] ss:$16 sps:$4 sm:$0xff]   ;;  %v5008_v11 = vld [vmem:[%s5748_s20 + $0x244] ss:$16 sps:$4 sm:$0xff]   ;;  %v5011_v12 = vld [vmem:[%s5748_s20 + $0x24c] ss:$16 sps:$4 sm:$0xff]  }
  0x2a   : > { %v5006_v13 = vld [vmem:[%s5748_s20 + $0x240] ss:$16 sps:$4 sm:$0xff]   ;;  %v5009_v14 = vld [vmem:[%s5748_s20 + $0x248] ss:$16 sps:$4 sm:$0xff]   ;;  %v5014_v15 = vld [vmem:[%s5748_s20 + $0x264] ss:$16 sps:$4 sm:$0xff]  }
  0x2b   : > { %3426 = vmatpush1.bf16.msra.mxu0 %v4936_v26  ;;  %3754 = vmatpush1.bf16.msra.mxu1 %v4937_v27  ;;  %v5017_v16 = vld [vmem:[%s5748_s20 + $0x26c] ss:$16 sps:$4 sm:$0xff]   ;;  %v5012_v17 = vld [vmem:[%s5748_s20 + $0x260] ss:$16 sps:$4 sm:$0xff]   ;;  %v5015_v18 = vld [vmem:[%s5748_s20 + $0x268] ss:$16 sps:$4 sm:$0xff]  }
  0x2c   : > { %3427 = vmatprep.subr.bf16.mxu0 %v4938_v28  ;;  %3755 = vmatprep.subr.bf16.mxu1 %v4940_v29  ;;  %v5020_v19 = vld [vmem:[%s5748_s20 + $0x284] ss:$16 sps:$4 sm:$0xff]   ;;  %v5023_v20 = vld [vmem:[%s5748_s20 + $0x28c] ss:$16 sps:$4 sm:$0xff]   ;;  %v5018_v21 = vld [vmem:[%s5748_s20 + $0x280] ss:$16 sps:$4 sm:$0xff]  }
  0x2d   : > { %v5021_v22 = vld [vmem:[%s5748_s20 + $0x288] ss:$16 sps:$4 sm:$0xff]   ;;  %v5026_v23 = vld [vmem:[%s5748_s20 + $0x2a4] ss:$16 sps:$4 sm:$0xff]   ;;  %v5029_v24 = vld [vmem:[%s5748_s20 + $0x2ac] ss:$16 sps:$4 sm:$0xff]  }
  0x2e   : > { %v5024_v25 = vld [vmem:[%s5748_s20 + $0x2a0] ss:$16 sps:$4 sm:$0xff]   ;;  %v5027_v26 = vld [vmem:[%s5748_s20 + $0x2a8] ss:$16 sps:$4 sm:$0xff]   ;;  %v5032_v27 = vld [vmem:[%s5748_s20 + $0x2c4] ss:$16 sps:$4 sm:$0xff]  }
  0x2f   : > { %3428 = vmatpush1.bf16.msra.mxu0 %v4942_v30  ;;  %3756 = vmatpush1.bf16.msra.mxu1 %v4943_v31  ;;  %v5035_v28 = vld [vmem:[%s5748_s20 + $0x2cc] ss:$16 sps:$4 sm:$0xff]   ;;  %v5030_v31 = vld [vmem:[%s5748_s20 + $0x2c0] ss:$16 sps:$4 sm:$0xff]   ;;  %v5057_v48 = vld [vmem:[%s5748_s20 + $0x348] ss:$16 sps:$4 sm:$0xff]  }
  0x30   : > { %3429 = vmatprep.subr.bf16.mxu0 %v4944_v32  ;;  %3757 = vmatprep.subr.bf16.mxu1 %v4946_v33  ;;  %v5848_v29 = vld [vmem:[%s5798_s25 + $0x8] sm:$0xff]  ;;  %v5038_v33 = vld [vmem:[%s5748_s20 + $0x2e4] ss:$16 sps:$4 sm:$0xff]  }
  0x31   : > { %v4279_v30 = vcombine.high %v5848_v29, %v5848_v29  ;;  %v5033_v32 = vld [vmem:[%s5748_s20 + $0x2c8] ss:$16 sps:$4 sm:$0xff]   ;;  %v5059_v46 = vld [vmem:[%s5748_s20 + $0x34c] ss:$16 sps:$4 sm:$0xff]  }
  0x33   : > { %3430 = vmatpush1.bf16.msra.mxu0 %v4948_v34  ;;  %3758 = vmatpush1.bf16.msra.mxu1 %v4949_v35  ;;  %v5041_v34 = vld [vmem:[%s5748_s20 + $0x2ec] ss:$16 sps:$4 sm:$0xff]   ;;  %v5036_v35 = vld [vmem:[%s5748_s20 + $0x2e0] ss:$16 sps:$4 sm:$0xff]  }
  0x34   : > { %3431 = vmatprep.subr.bf16.mxu0 %v4950_v36  ;;  %3759 = vmatprep.subr.bf16.mxu1 %v4952_v37  ;;  %v5039_v36 = vld [vmem:[%s5748_s20 + $0x2e8] ss:$16 sps:$4 sm:$0xff]   ;;  %v5044_v37 = vld [vmem:[%s5748_s20 + $0x304] ss:$16 sps:$4 sm:$0xff]  }
  0x37   : > { %3432 = vmatpush1.bf16.msra.mxu0 %v4954_v38  ;;  %3760 = vmatpush1.bf16.msra.mxu1 %v4955_v39  ;;  %v5047_v38 = vld [vmem:[%s5748_s20 + $0x30c] ss:$16 sps:$4 sm:$0xff]   ;;  %v5042_v39 = vld [vmem:[%s5748_s20 + $0x300] ss:$16 sps:$4 sm:$0xff]  }
  0x38   : > { %3433 = vmatprep.subr.bf16.mxu0 %v4956_v40  ;;  %3761 = vmatprep.subr.bf16.mxu1 %v4958_v41  ;;  %v5045_v40 = vld [vmem:[%s5748_s20 + $0x308] ss:$16 sps:$4 sm:$0xff]   ;;  %v5050_v41 = vld [vmem:[%s5748_s20 + $0x324] ss:$16 sps:$4 sm:$0xff]  }
  0x3b   : > { %3434 = vmatpush1.bf16.msra.mxu0 %v4960_v42  ;;  %3762 = vmatpush1.bf16.msra.mxu1 %v4961_v43  ;;  %v5053_v42 = vld [vmem:[%s5748_s20 + $0x32c] ss:$16 sps:$4 sm:$0xff]   ;;  %v5048_v43 = vld [vmem:[%s5748_s20 + $0x320] ss:$16 sps:$4 sm:$0xff]  }
  0x3c   : > { %3435 = vmatprep.subr.bf16.mxu0 %v4962_v44  ;;  %3763 = vmatprep.subr.bf16.mxu1 %v4964_v45  ;;  %v5051_v44 = vld [vmem:[%s5748_s20 + $0x328] ss:$16 sps:$4 sm:$0xff]   ;;  %v5056_v45 = vld [vmem:[%s5748_s20 + $0x344] ss:$16 sps:$4 sm:$0xff]  }
  0x3f   : > { %3436 = vmatpush1.bf16.msra.mxu0 %v4966_v47  ;;  %3764 = vmatpush1.bf16.msra.mxu1 %v4967_v49  ;;  %v5054_v47 = vld [vmem:[%s5748_s20 + $0x340] ss:$16 sps:$4 sm:$0xff]   ;;  %v5062_v49 = vld [vmem:[%s5748_s20 + $0x364] ss:$16 sps:$4 sm:$0xff]  }
  0x40   : > { %3437 = vmatprep.subr.bf16.mxu0 %v4968_v50  ;;  %3765 = vmatprep.subr.bf16.mxu1 %v4970_v51  ;;  %v5065_v50 = vld [vmem:[%s5748_s20 + $0x36c] ss:$16 sps:$4 sm:$0xff]   ;;  %v5060_v51 = vld [vmem:[%s5748_s20 + $0x360] ss:$16 sps:$4 sm:$0xff]  }
  0x43   : > { %3438 = vmatpush1.bf16.msra.mxu0 %v4972_v52  ;;  %3766 = vmatpush1.bf16.msra.mxu1 %v4973_v53  ;;  %v5063_v52 = vld [vmem:[%s5748_s20 + $0x368] ss:$16 sps:$4 sm:$0xff]   ;;  %v5068_v53 = vld [vmem:[%s5748_s20 + $0x384] ss:$16 sps:$4 sm:$0xff]  }
  0x44   : > { %3439 = vmatprep.subr.bf16.mxu0 %v4974_v54  ;;  %3767 = vmatprep.subr.bf16.mxu1 %v4976_v55  ;;  %v5071_v54 = vld [vmem:[%s5748_s20 + $0x38c] ss:$16 sps:$4 sm:$0xff]   ;;  %v5066_v55 = vld [vmem:[%s5748_s20 + $0x380] ss:$16 sps:$4 sm:$0xff]  }
  0x47   : > { %3440 = vmatpush1.bf16.msra.mxu0 %v4978_v56  ;;  %3768 = vmatpush1.bf16.msra.mxu1 %v4979_v57  ;;  %v5069_v56 = vld [vmem:[%s5748_s20 + $0x388] ss:$16 sps:$4 sm:$0xff]   ;;  %v5074_v57 = vld [vmem:[%s5748_s20 + $0x3a4] ss:$16 sps:$4 sm:$0xff]  }
  0x48   : > { %3441 = vmatprep.subr.bf16.mxu0 %v4980_v58  ;;  %3769 = vmatprep.subr.bf16.mxu1 %v4982_v59  ;;  %v5077_v58 = vld [vmem:[%s5748_s20 + $0x3ac] ss:$16 sps:$4 sm:$0xff]   ;;  %v5072_v59 = vld [vmem:[%s5748_s20 + $0x3a0] ss:$16 sps:$4 sm:$0xff]  }
  0x4b   : > { %3442 = vmatpush1.bf16.msra.mxu0 %v4984_v60  ;;  %3770 = vmatpush1.bf16.msra.mxu1 %v4985_v61  ;;  %v5075_v60 = vld [vmem:[%s5748_s20 + $0x3a8] ss:$16 sps:$4 sm:$0xff]   ;;  %v5080_v61 = vld [vmem:[%s5748_s20 + $0x3c4] ss:$16 sps:$4 sm:$0xff]  }
  0x4c   : > { %3443 = vmatprep.subr.bf16.mxu0 %v4986_v62  ;;  %3771 = vmatprep.subr.bf16.mxu1 %v4988_v63  ;;  %v5083_v62 = vld [vmem:[%s5748_s20 + $0x3cc] ss:$16 sps:$4 sm:$0xff]   ;;  %v5078_v63 = vld [vmem:[%s5748_s20 + $0x3c0] ss:$16 sps:$4 sm:$0xff]  }
  0x4f   : > { %3444 = vmatpush1.bf16.msra.mxu0 %v4990_v0  ;;  %3772 = vmatpush1.bf16.msra.mxu1 %v4991_v1  ;;  %v5081_v0 = vld [vmem:[%s5748_s20 + $0x3c8] ss:$16 sps:$4 sm:$0xff]   ;;  %v5086_v1 = vld [vmem:[%s5748_s20 + $0x3e4] ss:$16 sps:$4 sm:$0xff]  }
  0x50   : > { %3454 = vmatprep.subr.bf16.mxu0 %v4996_v2  ;;  %3782 = vmatprep.subr.bf16.mxu1 %v4999_v3  ;;  %v5089_v2 = vld [vmem:[%s5748_s20 + $0x3ec] ss:$16 sps:$4 sm:$0xff]   ;;  %v5084_v3 = vld [vmem:[%s5748_s20 + $0x3e0] ss:$16 sps:$4 sm:$0xff]  }
  0x52   : > { %3446 = vmatmul.mubr.bf16.vlgmr.msra.gmra.mrb[0].mxu0 %v4276_v4  ;;  %3774 = vmatmul.mubr.bf16.vlgmr.msra.gmra.mrb[0].mxu1 %v4276_v4  ;;  %v5087_v4 = vld [vmem:[%s5748_s20 + $0x3e8] ss:$16 sps:$4 sm:$0xff]  }
  0x53   : > { %3455 = vmatpush1.bf16.msra.mxu0 %v4994_v5  ;;  %3783 = vmatpush1.bf16.msra.mxu1 %v4997_v6  ;;  %v5094_v5 = vld [vmem:[%s5748_s20 + $0x404] ss:$16 sps:$4 sm:$0xff]   ;;  %v5097_v6 = vld [vmem:[%s5748_s20 + $0x40c] ss:$16 sps:$4 sm:$0xff]  }
  0x54   : > { %3456 = vmatprep.subr.bf16.mxu0 %v5002_v7  ;;  %3784 = vmatprep.subr.bf16.mxu1 %v5005_v8  ;;  %v4278_v7 = vcombine.low %v5848_v29, %v5848_v29  ;;  %v5092_v8 = vld [vmem:[%s5748_s20 + $0x400] ss:$16 sps:$4 sm:$0xff]   ;;  %v5127_v29 = vld [vmem:[%s5748_s20 + $0x4ac] ss:$16 sps:$4 sm:$0xff]  }
  0x55   : > { %3486 = vmatprep.mubr.bf16.mxu0 %v4279_v30  ;;  %3814 = vmatprep.mubr.bf16.mxu1 %v4279_v30  ;;  %v5122_v30 = vld [vmem:[%s5748_s20 + $0x4a0] ss:$16 sps:$4 sm:$0xff]  }
  0x57   : > { %3457 = vmatpush1.bf16.msra.mxu0 %v5000_v9  ;;  %3785 = vmatpush1.bf16.msra.mxu1 %v5003_v10  ;;  %v5095_v9 = vld [vmem:[%s5748_s20 + $0x408] ss:$16 sps:$4 sm:$0xff]   ;;  %v5100_v10 = vld [vmem:[%s5748_s20 + $0x424] ss:$16 sps:$4 sm:$0xff]  }
  0x58   : > { %3458 = vmatprep.subr.bf16.mxu0 %v5008_v11  ;;  %3786 = vmatprep.subr.bf16.mxu1 %v5011_v12  ;;  %v5898_v11 = vld [vmem:[%s5798_s25 + $0x10] sm:$0xff]  ;;  %v5103_v12 = vld [vmem:[%s5748_s20 + $0x42c] ss:$16 sps:$4 sm:$0xff]  }
  0x5b   : > { %3459 = vmatpush1.bf16.msra.mxu0 %v5006_v13  ;;  %3787 = vmatpush1.bf16.msra.mxu1 %v5009_v14  ;;  %v4281_v13 = vcombine.high %v5898_v11, %v5898_v11  ;;  %v5098_v14 = vld [vmem:[%s5748_s20 + $0x420] ss:$16 sps:$4 sm:$0xff]  }
  0x5c   : > { %3460 = vmatprep.subr.bf16.mxu0 %v5014_v15  ;;  %3788 = vmatprep.subr.bf16.mxu1 %v5017_v16  ;;  %v5101_v15 = vld [vmem:[%s5748_s20 + $0x428] ss:$16 sps:$4 sm:$0xff]   ;;  %v5106_v16 = vld [vmem:[%s5748_s20 + $0x444] ss:$16 sps:$4 sm:$0xff]  }
  0x5f   : > { %3461 = vmatpush1.bf16.msra.mxu0 %v5012_v17  ;;  %3789 = vmatpush1.bf16.msra.mxu1 %v5015_v18  ;;  %v5109_v17 = vld [vmem:[%s5748_s20 + $0x44c] ss:$16 sps:$4 sm:$0xff]   ;;  %v5104_v18 = vld [vmem:[%s5748_s20 + $0x440] ss:$16 sps:$4 sm:$0xff]  }
  0x60   : > { %3462 = vmatprep.subr.bf16.mxu0 %v5020_v19  ;;  %3790 = vmatprep.subr.bf16.mxu1 %v5023_v20  ;;  %v5107_v19 = vld [vmem:[%s5748_s20 + $0x448] ss:$16 sps:$4 sm:$0xff]   ;;  %v5112_v20 = vld [vmem:[%s5748_s20 + $0x464] ss:$16 sps:$4 sm:$0xff]  }
  0x63   : > { %3463 = vmatpush1.bf16.msra.mxu0 %v5018_v21  ;;  %3791 = vmatpush1.bf16.msra.mxu1 %v5021_v22  ;;  %v5115_v21 = vld [vmem:[%s5748_s20 + $0x46c] ss:$16 sps:$4 sm:$0xff]   ;;  %v5110_v22 = vld [vmem:[%s5748_s20 + $0x460] ss:$16 sps:$4 sm:$0xff]  }
  0x64   : > { %3464 = vmatprep.subr.bf16.mxu0 %v5026_v23  ;;  %3792 = vmatprep.subr.bf16.mxu1 %v5029_v24  ;;  %v5113_v23 = vld [vmem:[%s5748_s20 + $0x468] ss:$16 sps:$4 sm:$0xff]   ;;  %v5118_v24 = vld [vmem:[%s5748_s20 + $0x484] ss:$16 sps:$4 sm:$0xff]  }
  0x67   : > { %3465 = vmatpush1.bf16.msra.mxu0 %v5024_v25  ;;  %3793 = vmatpush1.bf16.msra.mxu1 %v5027_v26  ;;  %v5121_v25 = vld [vmem:[%s5748_s20 + $0x48c] ss:$16 sps:$4 sm:$0xff]   ;;  %v5116_v26 = vld [vmem:[%s5748_s20 + $0x480] ss:$16 sps:$4 sm:$0xff]  }
  0x68   : > { %3466 = vmatprep.subr.bf16.mxu0 %v5032_v27  ;;  %3794 = vmatprep.subr.bf16.mxu1 %v5035_v28  ;;  %v5119_v27 = vld [vmem:[%s5748_s20 + $0x488] ss:$16 sps:$4 sm:$0xff]   ;;  %v5124_v28 = vld [vmem:[%s5748_s20 + $0x4a4] ss:$16 sps:$4 sm:$0xff]  }
  0x6b   : > { %3467 = vmatpush1.bf16.msra.mxu0 %v5030_v31  ;;  %3795 = vmatpush1.bf16.msra.mxu1 %v5033_v32  ;;  %v5125_v31 = vld [vmem:[%s5748_s20 + $0x4a8] ss:$16 sps:$4 sm:$0xff]   ;;  %v5130_v32 = vld [vmem:[%s5748_s20 + $0x4c4] ss:$16 sps:$4 sm:$0xff]  }
  0x6c   : > { %3468 = vmatprep.subr.bf16.mxu0 %v5038_v33  ;;  %3796 = vmatprep.subr.bf16.mxu1 %v5041_v34  ;;  %v5133_v33 = vld [vmem:[%s5748_s20 + $0x4cc] ss:$16 sps:$4 sm:$0xff]   ;;  %v5128_v34 = vld [vmem:[%s5748_s20 + $0x4c0] ss:$16 sps:$4 sm:$0xff]  }
  0x6f   : > { %3469 = vmatpush1.bf16.msra.mxu0 %v5036_v35  ;;  %3797 = vmatpush1.bf16.msra.mxu1 %v5039_v36  ;;  %v5131_v35 = vld [vmem:[%s5748_s20 + $0x4c8] ss:$16 sps:$4 sm:$0xff]   ;;  %v5136_v36 = vld [vmem:[%s5748_s20 + $0x4e4] ss:$16 sps:$4 sm:$0xff]  }
  0x70   : > { %3470 = vmatprep.subr.bf16.mxu0 %v5044_v37  ;;  %3798 = vmatprep.subr.bf16.mxu1 %v5047_v38  ;;  %v5139_v37 = vld [vmem:[%s5748_s20 + $0x4ec] ss:$16 sps:$4 sm:$0xff]   ;;  %v5134_v38 = vld [vmem:[%s5748_s20 + $0x4e0] ss:$16 sps:$4 sm:$0xff]  }
  0x73   : > { %3471 = vmatpush1.bf16.msra.mxu0 %v5042_v39  ;;  %3799 = vmatpush1.bf16.msra.mxu1 %v5045_v40  ;;  %v5137_v39 = vld [vmem:[%s5748_s20 + $0x4e8] ss:$16 sps:$4 sm:$0xff]   ;;  %v5142_v40 = vld [vmem:[%s5748_s20 + $0x504] ss:$16 sps:$4 sm:$0xff]  }
  0x74   : > { %3472 = vmatprep.subr.bf16.mxu0 %v5050_v41  ;;  %3800 = vmatprep.subr.bf16.mxu1 %v5053_v42  ;;  %v5145_v41 = vld [vmem:[%s5748_s20 + $0x50c] ss:$16 sps:$4 sm:$0xff]   ;;  %v5140_v42 = vld [vmem:[%s5748_s20 + $0x500] ss:$16 sps:$4 sm:$0xff]  }
  0x77   : > { %3473 = vmatpush1.bf16.msra.mxu0 %v5048_v43  ;;  %3801 = vmatpush1.bf16.msra.mxu1 %v5051_v44  ;;  %v5143_v43 = vld [vmem:[%s5748_s20 + $0x508] ss:$16 sps:$4 sm:$0xff]   ;;  %v5148_v44 = vld [vmem:[%s5748_s20 + $0x524] ss:$16 sps:$4 sm:$0xff]  }
  0x78   : > { %3474 = vmatprep.subr.bf16.mxu0 %v5056_v45  ;;  %3802 = vmatprep.subr.bf16.mxu1 %v5059_v46  ;;  %v5151_v45 = vld [vmem:[%s5748_s20 + $0x52c] ss:$16 sps:$4 sm:$0xff]   ;;  %v5146_v46 = vld [vmem:[%s5748_s20 + $0x520] ss:$16 sps:$4 sm:$0xff]  }
  0x7b   : > { %3475 = vmatpush1.bf16.msra.mxu0 %v5054_v47  ;;  %3803 = vmatpush1.bf16.msra.mxu1 %v5057_v48  ;;  %v5149_v47 = vld [vmem:[%s5748_s20 + $0x528] ss:$16 sps:$4 sm:$0xff]   ;;  %v5154_v48 = vld [vmem:[%s5748_s20 + $0x544] ss:$16 sps:$4 sm:$0xff]  }
  0x7c   : > { %3476 = vmatprep.subr.bf16.mxu0 %v5062_v49  ;;  %3804 = vmatprep.subr.bf16.mxu1 %v5065_v50  ;;  %v5157_v49 = vld [vmem:[%s5748_s20 + $0x54c] ss:$16 sps:$4 sm:$0xff]   ;;  %v5152_v50 = vld [vmem:[%s5748_s20 + $0x540] ss:$16 sps:$4 sm:$0xff]  }
  0x7f   : > { %3477 = vmatpush1.bf16.msra.mxu0 %v5060_v51  ;;  %3805 = vmatpush1.bf16.msra.mxu1 %v5063_v52  ;;  %v5155_v51 = vld [vmem:[%s5748_s20 + $0x548] ss:$16 sps:$4 sm:$0xff]   ;;  %v5160_v52 = vld [vmem:[%s5748_s20 + $0x564] ss:$16 sps:$4 sm:$0xff]  }
  0x80   : > { %3478 = vmatprep.subr.bf16.mxu0 %v5068_v53  ;;  %3806 = vmatprep.subr.bf16.mxu1 %v5071_v54  ;;  %v5163_v53 = vld [vmem:[%s5748_s20 + $0x56c] ss:$16 sps:$4 sm:$0xff]   ;;  %v5158_v54 = vld [vmem:[%s5748_s20 + $0x560] ss:$16 sps:$4 sm:$0xff]  }
  0x83   : > { %3479 = vmatpush1.bf16.msra.mxu0 %v5066_v55  ;;  %3807 = vmatpush1.bf16.msra.mxu1 %v5069_v56  ;;  %v5161_v55 = vld [vmem:[%s5748_s20 + $0x568] ss:$16 sps:$4 sm:$0xff]   ;;  %v5166_v56 = vld [vmem:[%s5748_s20 + $0x584] ss:$16 sps:$4 sm:$0xff]  }
  0x84   : > { %3480 = vmatprep.subr.bf16.mxu0 %v5074_v57  ;;  %3808 = vmatprep.subr.bf16.mxu1 %v5077_v58  ;;  %v5169_v57 = vld [vmem:[%s5748_s20 + $0x58c] ss:$16 sps:$4 sm:$0xff]   ;;  %v5164_v58 = vld [vmem:[%s5748_s20 + $0x580] ss:$16 sps:$4 sm:$0xff]  }
  0x87   : > { %3481 = vmatpush1.bf16.msra.mxu0 %v5072_v59  ;;  %3809 = vmatpush1.bf16.msra.mxu1 %v5075_v60  ;;  %v5167_v59 = vld [vmem:[%s5748_s20 + $0x588] ss:$16 sps:$4 sm:$0xff]   ;;  %v5172_v60 = vld [vmem:[%s5748_s20 + $0x5a4] ss:$16 sps:$4 sm:$0xff]  }
  0x88   : > { %3482 = vmatprep.subr.bf16.mxu0 %v5080_v61  ;;  %3810 = vmatprep.subr.bf16.mxu1 %v5083_v62  ;;  %v5175_v61 = vld [vmem:[%s5748_s20 + $0x5ac] ss:$16 sps:$4 sm:$0xff]   ;;  %v5170_v62 = vld [vmem:[%s5748_s20 + $0x5a0] ss:$16 sps:$4 sm:$0xff]  }
  0x8b   : > { %3483 = vmatpush1.bf16.msra.mxu0 %v5078_v63  ;;  %3811 = vmatpush1.bf16.msra.mxu1 %v5081_v0  ;;  %v5173_v63 = vld [vmem:[%s5748_s20 + $0x5a8] ss:$16 sps:$4 sm:$0xff]   ;;  %v5178_v0 = vld [vmem:[%s5748_s20 + $0x5c4] ss:$16 sps:$4 sm:$0xff]  }
  0x8c   : > { %3484 = vmatprep.subr.bf16.mxu0 %v5086_v1  ;;  %3812 = vmatprep.subr.bf16.mxu1 %v5089_v2  ;;  %v5181_v1 = vld [vmem:[%s5748_s20 + $0x5cc] ss:$16 sps:$4 sm:$0xff]   ;;  %v5176_v2 = vld [vmem:[%s5748_s20 + $0x5c0] ss:$16 sps:$4 sm:$0xff]  }
  0x8f   : > { %3485 = vmatpush1.bf16.msra.mxu0 %v5084_v3  ;;  %3813 = vmatpush1.bf16.msra.mxu1 %v5087_v4  ;;  %v5179_v3 = vld [vmem:[%s5748_s20 + $0x5c8] ss:$16 sps:$4 sm:$0xff]   ;;  %v5184_v4 = vld [vmem:[%s5748_s20 + $0x5e4] ss:$16 sps:$4 sm:$0xff]  }
  0x90   : > { %3495 = vmatprep.subr.bf16.mxu0 %v5094_v5  ;;  %3823 = vmatprep.subr.bf16.mxu1 %v5097_v6  ;;  %v5187_v5 = vld [vmem:[%s5748_s20 + $0x5ec] ss:$16 sps:$4 sm:$0xff]   ;;  %v5182_v6 = vld [vmem:[%s5748_s20 + $0x5e0] ss:$16 sps:$4 sm:$0xff]  }
  0x92   : > { %3487 = vmatmul.mubr.bf16.vlgmr.msra.gmra.mrb[0].mxu0 %v4278_v7  ;;  %3815 = vmatmul.mubr.bf16.vlgmr.msra.gmra.mrb[0].mxu1 %v4278_v7  ;;  %v5185_v7 = vld [vmem:[%s5748_s20 + $0x5e8] ss:$16 sps:$4 sm:$0xff]  }
  0x93   : > { %3496 = vmatpush1.bf16.msra.mxu0 %v5092_v8  ;;  %3824 = vmatpush1.bf16.msra.mxu1 %v5095_v9  ;;  %v5192_v8 = vld [vmem:[%s5748_s20 + $0x604] ss:$16 sps:$4 sm:$0xff]   ;;  %v5195_v9 = vld [vmem:[%s5748_s20 + $0x60c] ss:$16 sps:$4 sm:$0xff]  }
  0x94   : > { %3497 = vmatprep.subr.bf16.mxu0 %v5100_v10  ;;  %3825 = vmatprep.subr.bf16.mxu1 %v5103_v12  ;;  %v5190_v10 = vld [vmem:[%s5748_s20 + $0x600] ss:$16 sps:$4 sm:$0xff]   ;;  %v4280_v12 = vcombine.low %v5898_v11, %v5898_v11 }
  0x95   : > { %3527 = vmatprep.mubr.bf16.mxu0 %v4281_v13  ;;  %3855 = vmatprep.mubr.bf16.mxu1 %v4281_v13  ;;  %v5193_v13 = vld [vmem:[%s5748_s20 + $0x608] ss:$16 sps:$4 sm:$0xff]   ;;  %v5196_v11 = vld [vmem:[%s5748_s20 + $0x620] ss:$16 sps:$4 sm:$0xff]  }
  0x97   : > { %3498 = vmatpush1.bf16.msra.mxu0 %v5098_v14  ;;  %3826 = vmatpush1.bf16.msra.mxu1 %v5101_v15  ;;  %v5968_v14 = vld [vmem:[%s5798_s25 + $0x18] sm:$0xff]  ;;  %v5198_v15 = vld [vmem:[%s5748_s20 + $0x624] ss:$16 sps:$4 sm:$0xff]  }
  0x98   : > { %3499 = vmatprep.subr.bf16.mxu0 %v5106_v16  ;;  %3827 = vmatprep.subr.bf16.mxu1 %v5109_v17  ;;  %v5201_v16 = vld [vmem:[%s5748_s20 + $0x62c] ss:$16 sps:$4 sm:$0xff]   ;;  %v4283_v17 = vcombine.high %v5968_v14, %v5968_v14 }
  0x9b   : > { %3500 = vmatpush1.bf16.msra.mxu0 %v5104_v18  ;;  %3828 = vmatpush1.bf16.msra.mxu1 %v5107_v19  ;;  %v5199_v18 = vld [vmem:[%s5748_s20 + $0x628] ss:$16 sps:$4 sm:$0xff]   ;;  %v5204_v19 = vld [vmem:[%s5748_s20 + $0x644] ss:$16 sps:$4 sm:$0xff]  }
  0x9c   : > { %3501 = vmatprep.subr.bf16.mxu0 %v5112_v20  ;;  %3829 = vmatprep.subr.bf16.mxu1 %v5115_v21  ;;  %v5207_v20 = vld [vmem:[%s5748_s20 + $0x64c] ss:$16 sps:$4 sm:$0xff]   ;;  %v5202_v21 = vld [vmem:[%s5748_s20 + $0x640] ss:$16 sps:$4 sm:$0xff]  }
  0x9f   : > { %3502 = vmatpush1.bf16.msra.mxu0 %v5110_v22  ;;  %3830 = vmatpush1.bf16.msra.mxu1 %v5113_v23  ;;  %v5205_v22 = vld [vmem:[%s5748_s20 + $0x648] ss:$16 sps:$4 sm:$0xff]   ;;  %v5210_v23 = vld [vmem:[%s5748_s20 + $0x664] ss:$16 sps:$4 sm:$0xff]  }
  0xa0   : > { %3503 = vmatprep.subr.bf16.mxu0 %v5118_v24  ;;  %3831 = vmatprep.subr.bf16.mxu1 %v5121_v25  ;;  %v5213_v24 = vld [vmem:[%s5748_s20 + $0x66c] ss:$16 sps:$4 sm:$0xff]   ;;  %v5208_v25 = vld [vmem:[%s5748_s20 + $0x660] ss:$16 sps:$4 sm:$0xff]  }
  0xa3   : > { %3504 = vmatpush1.bf16.msra.mxu0 %v5116_v26  ;;  %3832 = vmatpush1.bf16.msra.mxu1 %v5119_v27  ;;  %v5211_v26 = vld [vmem:[%s5748_s20 + $0x668] ss:$16 sps:$4 sm:$0xff]   ;;  %v5216_v27 = vld [vmem:[%s5748_s20 + $0x684] ss:$16 sps:$4 sm:$0xff]  }
  0xa4   : > { %3505 = vmatprep.subr.bf16.mxu0 %v5124_v28  ;;  %3833 = vmatprep.subr.bf16.mxu1 %v5127_v29  ;;  %v5219_v28 = vld [vmem:[%s5748_s20 + $0x68c] ss:$16 sps:$4 sm:$0xff]   ;;  %v5214_v29 = vld [vmem:[%s5748_s20 + $0x680] ss:$16 sps:$4 sm:$0xff]  }
  0xa7   : > { %3506 = vmatpush1.bf16.msra.mxu0 %v5122_v30  ;;  %3834 = vmatpush1.bf16.msra.mxu1 %v5125_v31  ;;  %v5217_v30 = vld [vmem:[%s5748_s20 + $0x688] ss:$16 sps:$4 sm:$0xff]   ;;  %v5222_v31 = vld [vmem:[%s5748_s20 + $0x6a4] ss:$16 sps:$4 sm:$0xff]  }
  0xa8   : > { %3507 = vmatprep.subr.bf16.mxu0 %v5130_v32  ;;  %3835 = vmatprep.subr.bf16.mxu1 %v5133_v33  ;;  %v5225_v32 = vld [vmem:[%s5748_s20 + $0x6ac] ss:$16 sps:$4 sm:$0xff]   ;;  %v5220_v33 = vld [vmem:[%s5748_s20 + $0x6a0] ss:$16 sps:$4 sm:$0xff]  }
  0xab   : > { %3508 = vmatpush1.bf16.msra.mxu0 %v5128_v34  ;;  %3836 = vmatpush1.bf16.msra.mxu1 %v5131_v35  ;;  %v5223_v34 = vld [vmem:[%s5748_s20 + $0x6a8] ss:$16 sps:$4 sm:$0xff]   ;;  %v5228_v35 = vld [vmem:[%s5748_s20 + $0x6c4] ss:$16 sps:$4 sm:$0xff]  }
  0xac   : > { %3509 = vmatprep.subr.bf16.mxu0 %v5136_v36  ;;  %3837 = vmatprep.subr.bf16.mxu1 %v5139_v37  ;;  %v5231_v36 = vld [vmem:[%s5748_s20 + $0x6cc] ss:$16 sps:$4 sm:$0xff]   ;;  %v5226_v37 = vld [vmem:[%s5748_s20 + $0x6c0] ss:$16 sps:$4 sm:$0xff]  }
  0xaf   : > { %3510 = vmatpush1.bf16.msra.mxu0 %v5134_v38  ;;  %3838 = vmatpush1.bf16.msra.mxu1 %v5137_v39  ;;  %v5229_v38 = vld [vmem:[%s5748_s20 + $0x6c8] ss:$16 sps:$4 sm:$0xff]   ;;  %v5234_v39 = vld [vmem:[%s5748_s20 + $0x6e4] ss:$16 sps:$4 sm:$0xff]  }
  0xb0   : > { %3511 = vmatprep.subr.bf16.mxu0 %v5142_v40  ;;  %3839 = vmatprep.subr.bf16.mxu1 %v5145_v41  ;;  %v5237_v40 = vld [vmem:[%s5748_s20 + $0x6ec] ss:$16 sps:$4 sm:$0xff]   ;;  %v5232_v41 = vld [vmem:[%s5748_s20 + $0x6e0] ss:$16 sps:$4 sm:$0xff]  }
  0xb3   : > { %3512 = vmatpush1.bf16.msra.mxu0 %v5140_v42  ;;  %3840 = vmatpush1.bf16.msra.mxu1 %v5143_v43  ;;  %v5235_v42 = vld [vmem:[%s5748_s20 + $0x6e8] ss:$16 sps:$4 sm:$0xff]   ;;  %v5240_v43 = vld [vmem:[%s5748_s20 + $0x704] ss:$16 sps:$4 sm:$0xff]  }
  0xb4   : > { %3513 = vmatprep.subr.bf16.mxu0 %v5148_v44  ;;  %3841 = vmatprep.subr.bf16.mxu1 %v5151_v45  ;;  %v5243_v44 = vld [vmem:[%s5748_s20 + $0x70c] ss:$16 sps:$4 sm:$0xff]   ;;  %v5238_v45 = vld [vmem:[%s5748_s20 + $0x700] ss:$16 sps:$4 sm:$0xff]  }
  0xb7   : > { %3514 = vmatpush1.bf16.msra.mxu0 %v5146_v46  ;;  %3842 = vmatpush1.bf16.msra.mxu1 %v5149_v47  ;;  %v5241_v46 = vld [vmem:[%s5748_s20 + $0x708] ss:$16 sps:$4 sm:$0xff]   ;;  %v5246_v47 = vld [vmem:[%s5748_s20 + $0x724] ss:$16 sps:$4 sm:$0xff]  }
  0xb8   : > { %3515 = vmatprep.subr.bf16.mxu0 %v5154_v48  ;;  %3843 = vmatprep.subr.bf16.mxu1 %v5157_v49  ;;  %v5249_v48 = vld [vmem:[%s5748_s20 + $0x72c] ss:$16 sps:$4 sm:$0xff]   ;;  %v5244_v49 = vld [vmem:[%s5748_s20 + $0x720] ss:$16 sps:$4 sm:$0xff]  }
  0xbb   : > { %3516 = vmatpush1.bf16.msra.mxu0 %v5152_v50  ;;  %3844 = vmatpush1.bf16.msra.mxu1 %v5155_v51  ;;  %v5247_v50 = vld [vmem:[%s5748_s20 + $0x728] ss:$16 sps:$4 sm:$0xff]   ;;  %v5252_v51 = vld [vmem:[%s5748_s20 + $0x744] ss:$16 sps:$4 sm:$0xff]  }
  0xbc   : > { %3517 = vmatprep.subr.bf16.mxu0 %v5160_v52  ;;  %3845 = vmatprep.subr.bf16.mxu1 %v5163_v53  ;;  %v5255_v52 = vld [vmem:[%s5748_s20 + $0x74c] ss:$16 sps:$4 sm:$0xff]   ;;  %v5250_v53 = vld [vmem:[%s5748_s20 + $0x740] ss:$16 sps:$4 sm:$0xff]  }
  0xbf   : > { %3518 = vmatpush1.bf16.msra.mxu0 %v5158_v54  ;;  %3846 = vmatpush1.bf16.msra.mxu1 %v5161_v55  ;;  %v5253_v54 = vld [vmem:[%s5748_s20 + $0x748] ss:$16 sps:$4 sm:$0xff]   ;;  %v5258_v55 = vld [vmem:[%s5748_s20 + $0x764] ss:$16 sps:$4 sm:$0xff]  }
  0xc0   : > { %3519 = vmatprep.subr.bf16.mxu0 %v5166_v56  ;;  %3847 = vmatprep.subr.bf16.mxu1 %v5169_v57  ;;  %v5261_v56 = vld [vmem:[%s5748_s20 + $0x76c] ss:$16 sps:$4 sm:$0xff]   ;;  %v5256_v57 = vld [vmem:[%s5748_s20 + $0x760] ss:$16 sps:$4 sm:$0xff]  }
  0xc3   : > { %3520 = vmatpush1.bf16.msra.mxu0 %v5164_v58  ;;  %3848 = vmatpush1.bf16.msra.mxu1 %v5167_v59  ;;  %v5259_v58 = vld [vmem:[%s5748_s20 + $0x768] ss:$16 sps:$4 sm:$0xff]   ;;  %v5264_v59 = vld [vmem:[%s5748_s20 + $0x784] ss:$16 sps:$4 sm:$0xff]  }
  0xc4   : > { %3521 = vmatprep.subr.bf16.mxu0 %v5172_v60  ;;  %3849 = vmatprep.subr.bf16.mxu1 %v5175_v61  ;;  %v5267_v60 = vld [vmem:[%s5748_s20 + $0x78c] ss:$16 sps:$4 sm:$0xff]   ;;  %v5262_v61 = vld [vmem:[%s5748_s20 + $0x780] ss:$16 sps:$4 sm:$0xff]  }
  0xc7   : > { %3522 = vmatpush1.bf16.msra.mxu0 %v5170_v62  ;;  %3850 = vmatpush1.bf16.msra.mxu1 %v5173_v63  ;;  %v5265_v62 = vld [vmem:[%s5748_s20 + $0x788] ss:$16 sps:$4 sm:$0xff]   ;;  %v5270_v63 = vld [vmem:[%s5748_s20 + $0x7a4] ss:$16 sps:$4 sm:$0xff]  }
  0xc8   : > { %3523 = vmatprep.subr.bf16.mxu0 %v5178_v0  ;;  %3851 = vmatprep.subr.bf16.mxu1 %v5181_v1  ;;  %v5273_v0 = vld [vmem:[%s5748_s20 + $0x7ac] ss:$16 sps:$4 sm:$0xff]   ;;  %v5268_v1 = vld [vmem:[%s5748_s20 + $0x7a0] ss:$16 sps:$4 sm:$0xff]  }
  0xcb   : > { %3524 = vmatpush1.bf16.msra.mxu0 %v5176_v2  ;;  %3852 = vmatpush1.bf16.msra.mxu1 %v5179_v3  ;;  %v5271_v2 = vld [vmem:[%s5748_s20 + $0x7a8] ss:$16 sps:$4 sm:$0xff]   ;;  %v5276_v3 = vld [vmem:[%s5748_s20 + $0x7c4] ss:$16 sps:$4 sm:$0xff]  }
  0xcc   : > { %3525 = vmatprep.subr.bf16.mxu0 %v5184_v4  ;;  %3853 = vmatprep.subr.bf16.mxu1 %v5187_v5  ;;  %v5279_v4 = vld [vmem:[%s5748_s20 + $0x7cc] ss:$16 sps:$4 sm:$0xff]   ;;  %v5274_v5 = vld [vmem:[%s5748_s20 + $0x7c0] ss:$16 sps:$4 sm:$0xff]  }
  0xcf   : > { %3526 = vmatpush1.bf16.msra.mxu0 %v5182_v6  ;;  %3854 = vmatpush1.bf16.msra.mxu1 %v5185_v7  ;;  %v5277_v6 = vld [vmem:[%s5748_s20 + $0x7c8] ss:$16 sps:$4 sm:$0xff]   ;;  %v5282_v7 = vld [vmem:[%s5748_s20 + $0x7e4] ss:$16 sps:$4 sm:$0xff]  }
  0xd0   : > { %3536 = vmatprep.subr.bf16.mxu0 %v5192_v8  ;;  %3864 = vmatprep.subr.bf16.mxu1 %v5195_v9  ;;  %v5285_v8 = vld [vmem:[%s5748_s20 + $0x7ec] ss:$16 sps:$4 sm:$0xff]   ;;  %v5280_v9 = vld [vmem:[%s5748_s20 + $0x7e0] ss:$16 sps:$4 sm:$0xff]  }
  0xd2   : > { %3528 = vmatmul.mubr.bf16.vlgmr.msra.gmra.mrb[0].mxu0 %v4280_v12  ;;  %3856 = vmatmul.mubr.bf16.vlgmr.msra.gmra.mrb[0].mxu1 %v4280_v12  ;;  %v5290_v12 = vld [vmem:[%s5748_s20 + $0x804] ss:$16 sps:$4 sm:$0xff]  }
  0xd3   : > { %3537 = vmatpush1.bf16.msra.mxu0 %v5190_v10  ;;  %3865 = vmatpush1.bf16.msra.mxu1 %v5193_v13  ;;  %v5283_v10 = vld [vmem:[%s5748_s20 + $0x7e8] ss:$16 sps:$4 sm:$0xff]   ;;  %v5293_v13 = vld [vmem:[%s5748_s20 + $0x80c] ss:$16 sps:$4 sm:$0xff]  }
  0xd4   : > { %3538 = vmatprep.subr.bf16.mxu0 %v5198_v15  ;;  %3866 = vmatprep.subr.bf16.mxu1 %v5201_v16  ;;  %v5288_v15 = vld [vmem:[%s5748_s20 + $0x800] ss:$16 sps:$4 sm:$0xff]   ;;  %v4282_v16 = vcombine.low %v5968_v14, %v5968_v14 }
  0xd5   : > { %3568 = vmatprep.mubr.bf16.mxu0 %v4283_v17  ;;  %3896 = vmatprep.mubr.bf16.mxu1 %v4283_v17  ;;  %v6038_v17 = vld [vmem:[%s5798_s25 + $0x20] sm:$0xff] }
  0xd6   : > { %v5294_v14 = vld [vmem:[%s5748_s20 + $0x820] ss:$16 sps:$4 sm:$0xff]  }
  0xd7   : > { %3539 = vmatpush1.bf16.msra.mxu0 %v5196_v11  ;;  %3867 = vmatpush1.bf16.msra.mxu1 %v5199_v18  ;;  %v5291_v11 = vld [vmem:[%s5748_s20 + $0x808] ss:$16 sps:$4 sm:$0xff]   ;;  %v5296_v18 = vld [vmem:[%s5748_s20 + $0x824] ss:$16 sps:$4 sm:$0xff]  }
  0xd8   : > { %3540 = vmatprep.subr.bf16.mxu0 %v5204_v19  ;;  %3868 = vmatprep.subr.bf16.mxu1 %v5207_v20  ;;  %v5299_v19 = vld [vmem:[%s5748_s20 + $0x82c] ss:$16 sps:$4 sm:$0xff]   ;;  %v4285_v20 = vcombine.high %v6038_v17, %v6038_v17 }
  0xdb   : > { %3541 = vmatpush1.bf16.msra.mxu0 %v5202_v21  ;;  %3869 = vmatpush1.bf16.msra.mxu1 %v5205_v22  ;;  %v5297_v21 = vld [vmem:[%s5748_s20 + $0x828] ss:$16 sps:$4 sm:$0xff]   ;;  %v5302_v22 = vld [vmem:[%s5748_s20 + $0x844] ss:$16 sps:$4 sm:$0xff]  }
  0xdc   : > { %3542 = vmatprep.subr.bf16.mxu0 %v5210_v23  ;;  %3870 = vmatprep.subr.bf16.mxu1 %v5213_v24  ;;  %v5305_v23 = vld [vmem:[%s5748_s20 + $0x84c] ss:$16 sps:$4 sm:$0xff]   ;;  %v5300_v24 = vld [vmem:[%s5748_s20 + $0x840] ss:$16 sps:$4 sm:$0xff]  }
  0xdf   : > { %3543 = vmatpush1.bf16.msra.mxu0 %v5208_v25  ;;  %3871 = vmatpush1.bf16.msra.mxu1 %v5211_v26  ;;  %v5303_v25 = vld [vmem:[%s5748_s20 + $0x848] ss:$16 sps:$4 sm:$0xff]   ;;  %v5308_v26 = vld [vmem:[%s5748_s20 + $0x864] ss:$16 sps:$4 sm:$0xff]  }
  0xe0   : > { %3544 = vmatprep.subr.bf16.mxu0 %v5216_v27  ;;  %3872 = vmatprep.subr.bf16.mxu1 %v5219_v28  ;;  %v5311_v27 = vld [vmem:[%s5748_s20 + $0x86c] ss:$16 sps:$4 sm:$0xff]   ;;  %v5306_v28 = vld [vmem:[%s5748_s20 + $0x860] ss:$16 sps:$4 sm:$0xff]  }
  0xe3   : > { %3545 = vmatpush1.bf16.msra.mxu0 %v5214_v29  ;;  %3873 = vmatpush1.bf16.msra.mxu1 %v5217_v30  ;;  %v5309_v29 = vld [vmem:[%s5748_s20 + $0x868] ss:$16 sps:$4 sm:$0xff]   ;;  %v5314_v30 = vld [vmem:[%s5748_s20 + $0x884] ss:$16 sps:$4 sm:$0xff]  }
  0xe4   : > { %3546 = vmatprep.subr.bf16.mxu0 %v5222_v31  ;;  %3874 = vmatprep.subr.bf16.mxu1 %v5225_v32  ;;  %v5317_v31 = vld [vmem:[%s5748_s20 + $0x88c] ss:$16 sps:$4 sm:$0xff]   ;;  %v5312_v32 = vld [vmem:[%s5748_s20 + $0x880] ss:$16 sps:$4 sm:$0xff]  }
  0xe7   : > { %3547 = vmatpush1.bf16.msra.mxu0 %v5220_v33  ;;  %3875 = vmatpush1.bf16.msra.mxu1 %v5223_v34  ;;  %v5315_v33 = vld [vmem:[%s5748_s20 + $0x888] ss:$16 sps:$4 sm:$0xff]   ;;  %v5320_v34 = vld [vmem:[%s5748_s20 + $0x8a4] ss:$16 sps:$4 sm:$0xff]  }
  0xe8   : > { %3548 = vmatprep.subr.bf16.mxu0 %v5228_v35  ;;  %3876 = vmatprep.subr.bf16.mxu1 %v5231_v36  ;;  %v5323_v35 = vld [vmem:[%s5748_s20 + $0x8ac] ss:$16 sps:$4 sm:$0xff]   ;;  %v5318_v36 = vld [vmem:[%s5748_s20 + $0x8a0] ss:$16 sps:$4 sm:$0xff]  }
  0xeb   : > { %3549 = vmatpush1.bf16.msra.mxu0 %v5226_v37  ;;  %3877 = vmatpush1.bf16.msra.mxu1 %v5229_v38  ;;  %v5321_v37 = vld [vmem:[%s5748_s20 + $0x8a8] ss:$16 sps:$4 sm:$0xff]   ;;  %v5326_v38 = vld [vmem:[%s5748_s20 + $0x8c4] ss:$16 sps:$4 sm:$0xff]  }
  0xec   : > { %3550 = vmatprep.subr.bf16.mxu0 %v5234_v39  ;;  %3878 = vmatprep.subr.bf16.mxu1 %v5237_v40  ;;  %v5329_v39 = vld [vmem:[%s5748_s20 + $0x8cc] ss:$16 sps:$4 sm:$0xff]   ;;  %v5324_v40 = vld [vmem:[%s5748_s20 + $0x8c0] ss:$16 sps:$4 sm:$0xff]  }
  0xef   : > { %3551 = vmatpush1.bf16.msra.mxu0 %v5232_v41  ;;  %3879 = vmatpush1.bf16.msra.mxu1 %v5235_v42  ;;  %v5327_v41 = vld [vmem:[%s5748_s20 + $0x8c8] ss:$16 sps:$4 sm:$0xff]   ;;  %v5332_v42 = vld [vmem:[%s5748_s20 + $0x8e4] ss:$16 sps:$4 sm:$0xff]  }
  0xf0   : > { %3552 = vmatprep.subr.bf16.mxu0 %v5240_v43  ;;  %3880 = vmatprep.subr.bf16.mxu1 %v5243_v44  ;;  %v5335_v43 = vld [vmem:[%s5748_s20 + $0x8ec] ss:$16 sps:$4 sm:$0xff]   ;;  %v5330_v44 = vld [vmem:[%s5748_s20 + $0x8e0] ss:$16 sps:$4 sm:$0xff]  }
  0xf3   : > { %3553 = vmatpush1.bf16.msra.mxu0 %v5238_v45  ;;  %3881 = vmatpush1.bf16.msra.mxu1 %v5241_v46  ;;  %v5333_v45 = vld [vmem:[%s5748_s20 + $0x8e8] ss:$16 sps:$4 sm:$0xff]   ;;  %v5338_v46 = vld [vmem:[%s5748_s20 + $0x904] ss:$16 sps:$4 sm:$0xff]  }
  0xf4   : > { %3554 = vmatprep.subr.bf16.mxu0 %v5246_v47  ;;  %3882 = vmatprep.subr.bf16.mxu1 %v5249_v48  ;;  %v5341_v47 = vld [vmem:[%s5748_s20 + $0x90c] ss:$16 sps:$4 sm:$0xff]   ;;  %v5336_v48 = vld [vmem:[%s5748_s20 + $0x900] ss:$16 sps:$4 sm:$0xff]  }
  0xf7   : > { %3555 = vmatpush1.bf16.msra.mxu0 %v5244_v49  ;;  %3883 = vmatpush1.bf16.msra.mxu1 %v5247_v50  ;;  %v5339_v49 = vld [vmem:[%s5748_s20 + $0x908] ss:$16 sps:$4 sm:$0xff]   ;;  %v5344_v50 = vld [vmem:[%s5748_s20 + $0x924] ss:$16 sps:$4 sm:$0xff]  }
  0xf8   : > { %3556 = vmatprep.subr.bf16.mxu0 %v5252_v51  ;;  %3884 = vmatprep.subr.bf16.mxu1 %v5255_v52  ;;  %v5347_v51 = vld [vmem:[%s5748_s20 + $0x92c] ss:$16 sps:$4 sm:$0xff]   ;;  %v5342_v52 = vld [vmem:[%s5748_s20 + $0x920] ss:$16 sps:$4 sm:$0xff]  }
  0xfb   : > { %3557 = vmatpush1.bf16.msra.mxu0 %v5250_v53  ;;  %3885 = vmatpush1.bf16.msra.mxu1 %v5253_v54  ;;  %v5345_v53 = vld [vmem:[%s5748_s20 + $0x928] ss:$16 sps:$4 sm:$0xff]   ;;  %v5350_v54 = vld [vmem:[%s5748_s20 + $0x944] ss:$16 sps:$4 sm:$0xff]  }
  0xfc   : > { %3558 = vmatprep.subr.bf16.mxu0 %v5258_v55  ;;  %3886 = vmatprep.subr.bf16.mxu1 %v5261_v56  ;;  %v5353_v55 = vld [vmem:[%s5748_s20 + $0x94c] ss:$16 sps:$4 sm:$0xff]   ;;  %v5348_v56 = vld [vmem:[%s5748_s20 + $0x940] ss:$16 sps:$4 sm:$0xff]  }
  0xff   : > { %3559 = vmatpush1.bf16.msra.mxu0 %v5256_v57  ;;  %3887 = vmatpush1.bf16.msra.mxu1 %v5259_v58  ;;  %v5351_v57 = vld [vmem:[%s5748_s20 + $0x948] ss:$16 sps:$4 sm:$0xff]   ;;  %v5356_v58 = vld [vmem:[%s5748_s20 + $0x964] ss:$16 sps:$4 sm:$0xff]  }
 0x100   : > { %3560 = vmatprep.subr.bf16.mxu0 %v5264_v59  ;;  %3888 = vmatprep.subr.bf16.mxu1 %v5267_v60  ;;  %v5359_v59 = vld [vmem:[%s5748_s20 + $0x96c] ss:$16 sps:$4 sm:$0xff]   ;;  %v5354_v60 = vld [vmem:[%s5748_s20 + $0x960] ss:$16 sps:$4 sm:$0xff]  }
 0x103   : > { %3561 = vmatpush1.bf16.msra.mxu0 %v5262_v61  ;;  %3889 = vmatpush1.bf16.msra.mxu1 %v5265_v62  ;;  %v5357_v61 = vld [vmem:[%s5748_s20 + $0x968] ss:$16 sps:$4 sm:$0xff]   ;;  %v5362_v62 = vld [vmem:[%s5748_s20 + $0x984] ss:$16 sps:$4 sm:$0xff]  }
 0x104   : > { %3562 = vmatprep.subr.bf16.mxu0 %v5270_v63  ;;  %3890 = vmatprep.subr.bf16.mxu1 %v5273_v0  ;;  %v5365_v63 = vld [vmem:[%s5748_s20 + $0x98c] ss:$16 sps:$4 sm:$0xff]   ;;  %v5360_v0 = vld [vmem:[%s5748_s20 + $0x980] ss:$16 sps:$4 sm:$0xff]  }
 0x107   : > { %3563 = vmatpush1.bf16.msra.mxu0 %v5268_v1  ;;  %3891 = vmatpush1.bf16.msra.mxu1 %v5271_v2  ;;  %v5363_v1 = vld [vmem:[%s5748_s20 + $0x988] ss:$16 sps:$4 sm:$0xff]   ;;  %v5368_v2 = vld [vmem:[%s5748_s20 + $0x9a4] ss:$16 sps:$4 sm:$0xff]  }
 0x108   : > { %3564 = vmatprep.subr.bf16.mxu0 %v5276_v3  ;;  %3892 = vmatprep.subr.bf16.mxu1 %v5279_v4  ;;  %v5371_v3 = vld [vmem:[%s5748_s20 + $0x9ac] ss:$16 sps:$4 sm:$0xff]   ;;  %v5366_v4 = vld [vmem:[%s5748_s20 + $0x9a0] ss:$16 sps:$4 sm:$0xff]  }
 0x10b   : > { %3565 = vmatpush1.bf16.msra.mxu0 %v5274_v5  ;;  %3893 = vmatpush1.bf16.msra.mxu1 %v5277_v6  ;;  %v5369_v5 = vld [vmem:[%s5748_s20 + $0x9a8] ss:$16 sps:$4 sm:$0xff]   ;;  %v5374_v6 = vld [vmem:[%s5748_s20 + $0x9c4] ss:$16 sps:$4 sm:$0xff]  }
 0x10c   : > { %3566 = vmatprep.subr.bf16.mxu0 %v5282_v7  ;;  %3894 = vmatprep.subr.bf16.mxu1 %v5285_v8  ;;  %v5377_v7 = vld [vmem:[%s5748_s20 + $0x9cc] ss:$16 sps:$4 sm:$0xff]   ;;  %v5372_v8 = vld [vmem:[%s5748_s20 + $0x9c0] ss:$16 sps:$4 sm:$0xff]  }
 0x10f   : > { %3567 = vmatpush1.bf16.msra.mxu0 %v5280_v9  ;;  %3895 = vmatpush1.bf16.msra.mxu1 %v5283_v10  ;;  %v5375_v9 = vld [vmem:[%s5748_s20 + $0x9c8] ss:$16 sps:$4 sm:$0xff]   ;;  %v5380_v10 = vld [vmem:[%s5748_s20 + $0x9e4] ss:$16 sps:$4 sm:$0xff]  }
 0x110   : > { %3577 = vmatprep.subr.bf16.mxu0 %v5290_v12  ;;  %3905 = vmatprep.subr.bf16.mxu1 %v5293_v13  ;;  %v5383_v12 = vld [vmem:[%s5748_s20 + $0x9ec] ss:$16 sps:$4 sm:$0xff]   ;;  %v5378_v13 = vld [vmem:[%s5748_s20 + $0x9e0] ss:$16 sps:$4 sm:$0xff]  }
 0x112   : > { %3569 = vmatmul.mubr.bf16.vlgmr.msra.gmra.mrb[0].mxu0 %v4282_v16  ;;  %3897 = vmatmul.mubr.bf16.vlgmr.msra.gmra.mrb[0].mxu1 %v4282_v16  ;;  %v5388_v16 = vld [vmem:[%s5748_s20 + $0xa04] ss:$16 sps:$4 sm:$0xff]  }
 0x113   : > { %3578 = vmatpush1.bf16.msra.mxu0 %v5288_v15  ;;  %3906 = vmatpush1.bf16.msra.mxu1 %v5291_v11  ;;  %v5381_v15 = vld [vmem:[%s5748_s20 + $0x9e8] ss:$16 sps:$4 sm:$0xff]   ;;  %v5391_v11 = vld [vmem:[%s5748_s20 + $0xa0c] ss:$16 sps:$4 sm:$0xff]  }
 0x114   : > { %3579 = vmatprep.subr.bf16.mxu0 %v5296_v18  ;;  %3907 = vmatprep.subr.bf16.mxu1 %v5299_v19  ;;  %v6106_v18 = vld [vmem:[%s5798_s25 + $0x28] sm:$0xff]  ;;  %v4284_v19 = vcombine.low %v6038_v17, %v6038_v17  ;;  %v5392_v17 = vld [vmem:[%s5748_s20 + $0xa20] ss:$16 sps:$4 sm:$0xff]  }
 0x115   : > { %3609 = vmatprep.mubr.bf16.mxu0 %v4285_v20  ;;  %3937 = vmatprep.mubr.bf16.mxu1 %v4285_v20  ;;  %v5386_v20 = vld [vmem:[%s5748_s20 + $0xa00] ss:$16 sps:$4 sm:$0xff]  }
 0x117   : > { %3580 = vmatpush1.bf16.msra.mxu0 %v5294_v14  ;;  %3908 = vmatpush1.bf16.msra.mxu1 %v5297_v21  ;;  %v5389_v14 = vld [vmem:[%s5748_s20 + $0xa08] ss:$16 sps:$4 sm:$0xff]   ;;  %v5394_v21 = vld [vmem:[%s5748_s20 + $0xa24] ss:$16 sps:$4 sm:$0xff]  }
 0x118   : > { %3581 = vmatprep.subr.bf16.mxu0 %v5302_v22  ;;  %3909 = vmatprep.subr.bf16.mxu1 %v5305_v23  ;;  %v5397_v22 = vld [vmem:[%s5748_s20 + $0xa2c] ss:$16 sps:$4 sm:$0xff]   ;;  %v4287_v23 = vcombine.high %v6106_v18, %v6106_v18 }
 0x11b   : > { %3582 = vmatpush1.bf16.msra.mxu0 %v5300_v24  ;;  %3910 = vmatpush1.bf16.msra.mxu1 %v5303_v25  ;;  %v5395_v24 = vld [vmem:[%s5748_s20 + $0xa28] ss:$16 sps:$4 sm:$0xff]   ;;  %v5400_v25 = vld [vmem:[%s5748_s20 + $0xa44] ss:$16 sps:$4 sm:$0xff]  }
 0x11c   : > { %3583 = vmatprep.subr.bf16.mxu0 %v5308_v26  ;;  %3911 = vmatprep.subr.bf16.mxu1 %v5311_v27  ;;  %v5403_v26 = vld [vmem:[%s5748_s20 + $0xa4c] ss:$16 sps:$4 sm:$0xff]   ;;  %v5398_v27 = vld [vmem:[%s5748_s20 + $0xa40] ss:$16 sps:$4 sm:$0xff]  }
 0x11f   : > { %3584 = vmatpush1.bf16.msra.mxu0 %v5306_v28  ;;  %3912 = vmatpush1.bf16.msra.mxu1 %v5309_v29  ;;  %v5401_v28 = vld [vmem:[%s5748_s20 + $0xa48] ss:$16 sps:$4 sm:$0xff]   ;;  %v5406_v29 = vld [vmem:[%s5748_s20 + $0xa64] ss:$16 sps:$4 sm:$0xff]  }
 0x120   : > { %3585 = vmatprep.subr.bf16.mxu0 %v5314_v30  ;;  %3913 = vmatprep.subr.bf16.mxu1 %v5317_v31  ;;  %v5409_v30 = vld [vmem:[%s5748_s20 + $0xa6c] ss:$16 sps:$4 sm:$0xff]   ;;  %v5404_v31 = vld [vmem:[%s5748_s20 + $0xa60] ss:$16 sps:$4 sm:$0xff]  }
 0x123   : > { %3586 = vmatpush1.bf16.msra.mxu0 %v5312_v32  ;;  %3914 = vmatpush1.bf16.msra.mxu1 %v5315_v33  ;;  %v5407_v32 = vld [vmem:[%s5748_s20 + $0xa68] ss:$16 sps:$4 sm:$0xff]   ;;  %v5412_v33 = vld [vmem:[%s5748_s20 + $0xa84] ss:$16 sps:$4 sm:$0xff]  }
 0x124   : > { %3587 = vmatprep.subr.bf16.mxu0 %v5320_v34  ;;  %3915 = vmatprep.subr.bf16.mxu1 %v5323_v35  ;;  %v5415_v34 = vld [vmem:[%s5748_s20 + $0xa8c] ss:$16 sps:$4 sm:$0xff]   ;;  %v5410_v35 = vld [vmem:[%s5748_s20 + $0xa80] ss:$16 sps:$4 sm:$0xff]  }
 0x127   : > { %3588 = vmatpush1.bf16.msra.mxu0 %v5318_v36  ;;  %3916 = vmatpush1.bf16.msra.mxu1 %v5321_v37  ;;  %v5413_v36 = vld [vmem:[%s5748_s20 + $0xa88] ss:$16 sps:$4 sm:$0xff]   ;;  %v5418_v37 = vld [vmem:[%s5748_s20 + $0xaa4] ss:$16 sps:$4 sm:$0xff]  }
 0x128   : > { %3589 = vmatprep.subr.bf16.mxu0 %v5326_v38  ;;  %3917 = vmatprep.subr.bf16.mxu1 %v5329_v39  ;;  %v5421_v38 = vld [vmem:[%s5748_s20 + $0xaac] ss:$16 sps:$4 sm:$0xff]   ;;  %v5416_v39 = vld [vmem:[%s5748_s20 + $0xaa0] ss:$16 sps:$4 sm:$0xff]  }
 0x12b   : > { %3590 = vmatpush1.bf16.msra.mxu0 %v5324_v40  ;;  %3918 = vmatpush1.bf16.msra.mxu1 %v5327_v41  ;;  %v5419_v40 = vld [vmem:[%s5748_s20 + $0xaa8] ss:$16 sps:$4 sm:$0xff]   ;;  %v5424_v41 = vld [vmem:[%s5748_s20 + $0xac4] ss:$16 sps:$4 sm:$0xff]  }
 0x12c   : > { %3591 = vmatprep.subr.bf16.mxu0 %v5332_v42  ;;  %3919 = vmatprep.subr.bf16.mxu1 %v5335_v43  ;;  %v5427_v42 = vld [vmem:[%s5748_s20 + $0xacc] ss:$16 sps:$4 sm:$0xff]   ;;  %v5422_v43 = vld [vmem:[%s5748_s20 + $0xac0] ss:$16 sps:$4 sm:$0xff]  }
 0x12f   : > { %3592 = vmatpush1.bf16.msra.mxu0 %v5330_v44  ;;  %3920 = vmatpush1.bf16.msra.mxu1 %v5333_v45  ;;  %v5425_v44 = vld [vmem:[%s5748_s20 + $0xac8] ss:$16 sps:$4 sm:$0xff]   ;;  %v5430_v45 = vld [vmem:[%s5748_s20 + $0xae4] ss:$16 sps:$4 sm:$0xff]  }
 0x130   : > { %3593 = vmatprep.subr.bf16.mxu0 %v5338_v46  ;;  %3921 = vmatprep.subr.bf16.mxu1 %v5341_v47  ;;  %v5433_v46 = vld [vmem:[%s5748_s20 + $0xaec] ss:$16 sps:$4 sm:$0xff]   ;;  %v5428_v47 = vld [vmem:[%s5748_s20 + $0xae0] ss:$16 sps:$4 sm:$0xff]  }
 0x133   : > { %3594 = vmatpush1.bf16.msra.mxu0 %v5336_v48  ;;  %3922 = vmatpush1.bf16.msra.mxu1 %v5339_v49  ;;  %v5431_v48 = vld [vmem:[%s5748_s20 + $0xae8] ss:$16 sps:$4 sm:$0xff]   ;;  %v5436_v49 = vld [vmem:[%s5748_s20 + $0xb04] ss:$16 sps:$4 sm:$0xff]  }
 0x134   : > { %3595 = vmatprep.subr.bf16.mxu0 %v5344_v50  ;;  %3923 = vmatprep.subr.bf16.mxu1 %v5347_v51  ;;  %v5439_v50 = vld [vmem:[%s5748_s20 + $0xb0c] ss:$16 sps:$4 sm:$0xff]   ;;  %v5434_v51 = vld [vmem:[%s5748_s20 + $0xb00] ss:$16 sps:$4 sm:$0xff]  }
 0x137   : > { %3596 = vmatpush1.bf16.msra.mxu0 %v5342_v52  ;;  %3924 = vmatpush1.bf16.msra.mxu1 %v5345_v53  ;;  %v5437_v52 = vld [vmem:[%s5748_s20 + $0xb08] ss:$16 sps:$4 sm:$0xff]   ;;  %v5442_v53 = vld [vmem:[%s5748_s20 + $0xb24] ss:$16 sps:$4 sm:$0xff]  }
 0x138   : > { %3597 = vmatprep.subr.bf16.mxu0 %v5350_v54  ;;  %3925 = vmatprep.subr.bf16.mxu1 %v5353_v55  ;;  %v5445_v54 = vld [vmem:[%s5748_s20 + $0xb2c] ss:$16 sps:$4 sm:$0xff]   ;;  %v5440_v55 = vld [vmem:[%s5748_s20 + $0xb20] ss:$16 sps:$4 sm:$0xff]  }
 0x13b   : > { %3598 = vmatpush1.bf16.msra.mxu0 %v5348_v56  ;;  %3926 = vmatpush1.bf16.msra.mxu1 %v5351_v57  ;;  %v5443_v56 = vld [vmem:[%s5748_s20 + $0xb28] ss:$16 sps:$4 sm:$0xff]   ;;  %v5448_v57 = vld [vmem:[%s5748_s20 + $0xb44] ss:$16 sps:$4 sm:$0xff]  }
 0x13c   : > { %3599 = vmatprep.subr.bf16.mxu0 %v5356_v58  ;;  %3927 = vmatprep.subr.bf16.mxu1 %v5359_v59  ;;  %v5451_v58 = vld [vmem:[%s5748_s20 + $0xb4c] ss:$16 sps:$4 sm:$0xff]   ;;  %v5446_v59 = vld [vmem:[%s5748_s20 + $0xb40] ss:$16 sps:$4 sm:$0xff]  }
 0x13f   : > { %3600 = vmatpush1.bf16.msra.mxu0 %v5354_v60  ;;  %3928 = vmatpush1.bf16.msra.mxu1 %v5357_v61  ;;  %v5449_v60 = vld [vmem:[%s5748_s20 + $0xb48] ss:$16 sps:$4 sm:$0xff]   ;;  %v5454_v61 = vld [vmem:[%s5748_s20 + $0xb64] ss:$16 sps:$4 sm:$0xff]  }
 0x140   : > { %3601 = vmatprep.subr.bf16.mxu0 %v5362_v62  ;;  %3929 = vmatprep.subr.bf16.mxu1 %v5365_v63  ;;  %v5457_v62 = vld [vmem:[%s5748_s20 + $0xb6c] ss:$16 sps:$4 sm:$0xff]   ;;  %v5452_v63 = vld [vmem:[%s5748_s20 + $0xb60] ss:$16 sps:$4 sm:$0xff]  }
 0x143   : > { %3602 = vmatpush1.bf16.msra.mxu0 %v5360_v0  ;;  %3930 = vmatpush1.bf16.msra.mxu1 %v5363_v1  ;;  %v5455_v0 = vld [vmem:[%s5748_s20 + $0xb68] ss:$16 sps:$4 sm:$0xff]   ;;  %v5460_v1 = vld [vmem:[%s5748_s20 + $0xb84] ss:$16 sps:$4 sm:$0xff]  }
 0x144   : > { %3603 = vmatprep.subr.bf16.mxu0 %v5368_v2  ;;  %3931 = vmatprep.subr.bf16.mxu1 %v5371_v3  ;;  %v5463_v2 = vld [vmem:[%s5748_s20 + $0xb8c] ss:$16 sps:$4 sm:$0xff]   ;;  %v5458_v3 = vld [vmem:[%s5748_s20 + $0xb80] ss:$16 sps:$4 sm:$0xff]  }
 0x147   : > { %3604 = vmatpush1.bf16.msra.mxu0 %v5366_v4  ;;  %3932 = vmatpush1.bf16.msra.mxu1 %v5369_v5  ;;  %v5461_v4 = vld [vmem:[%s5748_s20 + $0xb88] ss:$16 sps:$4 sm:$0xff]   ;;  %v5466_v5 = vld [vmem:[%s5748_s20 + $0xba4] ss:$16 sps:$4 sm:$0xff]  }
 0x148   : > { %3605 = vmatprep.subr.bf16.mxu0 %v5374_v6  ;;  %3933 = vmatprep.subr.bf16.mxu1 %v5377_v7  ;;  %v5469_v6 = vld [vmem:[%s5748_s20 + $0xbac] ss:$16 sps:$4 sm:$0xff]   ;;  %v5464_v7 = vld [vmem:[%s5748_s20 + $0xba0] ss:$16 sps:$4 sm:$0xff]  }
 0x14b   : > { %3606 = vmatpush1.bf16.msra.mxu0 %v5372_v8  ;;  %3934 = vmatpush1.bf16.msra.mxu1 %v5375_v9  ;;  %v5467_v8 = vld [vmem:[%s5748_s20 + $0xba8] ss:$16 sps:$4 sm:$0xff]   ;;  %v5472_v9 = vld [vmem:[%s5748_s20 + $0xbc4] ss:$16 sps:$4 sm:$0xff]  }
 0x14c   : > { %3607 = vmatprep.subr.bf16.mxu0 %v5380_v10  ;;  %3935 = vmatprep.subr.bf16.mxu1 %v5383_v12  ;;  %v5475_v10 = vld [vmem:[%s5748_s20 + $0xbcc] ss:$16 sps:$4 sm:$0xff]   ;;  %v5470_v12 = vld [vmem:[%s5748_s20 + $0xbc0] ss:$16 sps:$4 sm:$0xff]  }
 0x14f   : > { %3608 = vmatpush1.bf16.msra.mxu0 %v5378_v13  ;;  %3936 = vmatpush1.bf16.msra.mxu1 %v5381_v15  ;;  %v5473_v13 = vld [vmem:[%s5748_s20 + $0xbc8] ss:$16 sps:$4 sm:$0xff]   ;;  %v5478_v15 = vld [vmem:[%s5748_s20 + $0xbe4] ss:$16 sps:$4 sm:$0xff]  }
 0x150   : > { %3618 = vmatprep.subr.bf16.mxu0 %v5388_v16  ;;  %3946 = vmatprep.subr.bf16.mxu1 %v5391_v11  ;;  %v5481_v16 = vld [vmem:[%s5748_s20 + $0xbec] ss:$16 sps:$4 sm:$0xff]   ;;  %v5476_v11 = vld [vmem:[%s5748_s20 + $0xbe0] ss:$16 sps:$4 sm:$0xff]  }
 0x152   : > { %3610 = vmatmul.mubr.bf16.vlgmr.msra.gmra.mrb[0].mxu0 %v4284_v19  ;;  %3938 = vmatmul.mubr.bf16.vlgmr.msra.gmra.mrb[0].mxu1 %v4284_v19  ;;  %v5479_v19 = vld [vmem:[%s5748_s20 + $0xbe8] ss:$16 sps:$4 sm:$0xff]  }
 0x153   : > { %3619 = vmatpush1.bf16.msra.mxu0 %v5386_v20  ;;  %3947 = vmatpush1.bf16.msra.mxu1 %v5389_v14  ;;  %v5486_v20 = vld [vmem:[%s5748_s20 + $0xc04] ss:$16 sps:$4 sm:$0xff]   ;;  %v5489_v14 = vld [vmem:[%s5748_s20 + $0xc0c] ss:$16 sps:$4 sm:$0xff]  }
 0x154   : > { %3620 = vmatprep.subr.bf16.mxu0 %v5394_v21  ;;  %3948 = vmatprep.subr.bf16.mxu1 %v5397_v22  ;;  %v4286_v21 = vcombine.low %v6106_v18, %v6106_v18  ;;  %v6179_v22 = vld [vmem:[%s5798_s25 + $0x30] sm:$0xff] }
 0x155   : > { %3650 = vmatprep.mubr.bf16.mxu0 %v4287_v23  ;;  %3978 = vmatprep.mubr.bf16.mxu1 %v4287_v23  ;;  %v5484_v23 = vld [vmem:[%s5748_s20 + $0xc00] ss:$16 sps:$4 sm:$0xff]  }
 0x156   : > { %v5490_v18 = vld [vmem:[%s5748_s20 + $0xc20] ss:$16 sps:$4 sm:$0xff]  }
 0x157   : > { %3621 = vmatpush1.bf16.msra.mxu0 %v5392_v17  ;;  %3949 = vmatpush1.bf16.msra.mxu1 %v5395_v24  ;;  %v5487_v17 = vld [vmem:[%s5748_s20 + $0xc08] ss:$16 sps:$4 sm:$0xff]   ;;  %v5492_v24 = vld [vmem:[%s5748_s20 + $0xc24] ss:$16 sps:$4 sm:$0xff]  }
 0x158   : > { %3622 = vmatprep.subr.bf16.mxu0 %v5400_v25  ;;  %3950 = vmatprep.subr.bf16.mxu1 %v5403_v26  ;;  %v5495_v25 = vld [vmem:[%s5748_s20 + $0xc2c] ss:$16 sps:$4 sm:$0xff]   ;;  %v4289_v26 = vcombine.high %v6179_v22, %v6179_v22 }
 0x15b   : > { %3623 = vmatpush1.bf16.msra.mxu0 %v5398_v27  ;;  %3951 = vmatpush1.bf16.msra.mxu1 %v5401_v28  ;;  %v5493_v27 = vld [vmem:[%s5748_s20 + $0xc28] ss:$16 sps:$4 sm:$0xff]   ;;  %v5498_v28 = vld [vmem:[%s5748_s20 + $0xc44] ss:$16 sps:$4 sm:$0xff]  }
 0x15c   : > { %3624 = vmatprep.subr.bf16.mxu0 %v5406_v29  ;;  %3952 = vmatprep.subr.bf16.mxu1 %v5409_v30  ;;  %v5501_v29 = vld [vmem:[%s5748_s20 + $0xc4c] ss:$16 sps:$4 sm:$0xff]   ;;  %v5496_v30 = vld [vmem:[%s5748_s20 + $0xc40] ss:$16 sps:$4 sm:$0xff]  }
 0x15f   : > { %3625 = vmatpush1.bf16.msra.mxu0 %v5404_v31  ;;  %3953 = vmatpush1.bf16.msra.mxu1 %v5407_v32  ;;  %v5499_v31 = vld [vmem:[%s5748_s20 + $0xc48] ss:$16 sps:$4 sm:$0xff]   ;;  %v5504_v32 = vld [vmem:[%s5748_s20 + $0xc64] ss:$16 sps:$4 sm:$0xff]  }
 0x160   : > { %3626 = vmatprep.subr.bf16.mxu0 %v5412_v33  ;;  %3954 = vmatprep.subr.bf16.mxu1 %v5415_v34  ;;  %v5507_v33 = vld [vmem:[%s5748_s20 + $0xc6c] ss:$16 sps:$4 sm:$0xff]   ;;  %v5502_v34 = vld [vmem:[%s5748_s20 + $0xc60] ss:$16 sps:$4 sm:$0xff]  }
 0x163   : > { %3627 = vmatpush1.bf16.msra.mxu0 %v5410_v35  ;;  %3955 = vmatpush1.bf16.msra.mxu1 %v5413_v36  ;;  %v5505_v35 = vld [vmem:[%s5748_s20 + $0xc68] ss:$16 sps:$4 sm:$0xff]   ;;  %v5510_v36 = vld [vmem:[%s5748_s20 + $0xc84] ss:$16 sps:$4 sm:$0xff]  }
 0x164   : > { %3628 = vmatprep.subr.bf16.mxu0 %v5418_v37  ;;  %3956 = vmatprep.subr.bf16.mxu1 %v5421_v38  ;;  %v5513_v37 = vld [vmem:[%s5748_s20 + $0xc8c] ss:$16 sps:$4 sm:$0xff]   ;;  %v5508_v38 = vld [vmem:[%s5748_s20 + $0xc80] ss:$16 sps:$4 sm:$0xff]  }
 0x167   : > { %3629 = vmatpush1.bf16.msra.mxu0 %v5416_v39  ;;  %3957 = vmatpush1.bf16.msra.mxu1 %v5419_v40  ;;  %v5511_v39 = vld [vmem:[%s5748_s20 + $0xc88] ss:$16 sps:$4 sm:$0xff]   ;;  %v5516_v40 = vld [vmem:[%s5748_s20 + $0xca4] ss:$16 sps:$4 sm:$0xff]  }
 0x168   : > { %3630 = vmatprep.subr.bf16.mxu0 %v5424_v41  ;;  %3958 = vmatprep.subr.bf16.mxu1 %v5427_v42  ;;  %v5519_v41 = vld [vmem:[%s5748_s20 + $0xcac] ss:$16 sps:$4 sm:$0xff]   ;;  %v5514_v42 = vld [vmem:[%s5748_s20 + $0xca0] ss:$16 sps:$4 sm:$0xff]  }
 0x16b   : > { %3631 = vmatpush1.bf16.msra.mxu0 %v5422_v43  ;;  %3959 = vmatpush1.bf16.msra.mxu1 %v5425_v44  ;;  %v5517_v43 = vld [vmem:[%s5748_s20 + $0xca8] ss:$16 sps:$4 sm:$0xff]   ;;  %v5522_v44 = vld [vmem:[%s5748_s20 + $0xcc4] ss:$16 sps:$4 sm:$0xff]  }
 0x16c   : > { %3632 = vmatprep.subr.bf16.mxu0 %v5430_v45  ;;  %3960 = vmatprep.subr.bf16.mxu1 %v5433_v46  ;;  %v5525_v45 = vld [vmem:[%s5748_s20 + $0xccc] ss:$16 sps:$4 sm:$0xff]   ;;  %v5520_v46 = vld [vmem:[%s5748_s20 + $0xcc0] ss:$16 sps:$4 sm:$0xff]  }
 0x16f   : > { %3633 = vmatpush1.bf16.msra.mxu0 %v5428_v47  ;;  %3961 = vmatpush1.bf16.msra.mxu1 %v5431_v48  ;;  %v5523_v47 = vld [vmem:[%s5748_s20 + $0xcc8] ss:$16 sps:$4 sm:$0xff]   ;;  %v5528_v48 = vld [vmem:[%s5748_s20 + $0xce4] ss:$16 sps:$4 sm:$0xff]  }
 0x170   : > { %3634 = vmatprep.subr.bf16.mxu0 %v5436_v49  ;;  %3962 = vmatprep.subr.bf16.mxu1 %v5439_v50  ;;  %v5531_v49 = vld [vmem:[%s5748_s20 + $0xcec] ss:$16 sps:$4 sm:$0xff]   ;;  %v5526_v50 = vld [vmem:[%s5748_s20 + $0xce0] ss:$16 sps:$4 sm:$0xff]  }
 0x173   : > { %3635 = vmatpush1.bf16.msra.mxu0 %v5434_v51  ;;  %3963 = vmatpush1.bf16.msra.mxu1 %v5437_v52  ;;  %v5529_v51 = vld [vmem:[%s5748_s20 + $0xce8] ss:$16 sps:$4 sm:$0xff]   ;;  %v5534_v52 = vld [vmem:[%s5748_s20 + $0xd04] ss:$16 sps:$4 sm:$0xff]  }
 0x174   : > { %3636 = vmatprep.subr.bf16.mxu0 %v5442_v53  ;;  %3964 = vmatprep.subr.bf16.mxu1 %v5445_v54  ;;  %v5537_v53 = vld [vmem:[%s5748_s20 + $0xd0c] ss:$16 sps:$4 sm:$0xff]   ;;  %v5532_v54 = vld [vmem:[%s5748_s20 + $0xd00] ss:$16 sps:$4 sm:$0xff]  }
 0x177   : > { %3637 = vmatpush1.bf16.msra.mxu0 %v5440_v55  ;;  %3965 = vmatpush1.bf16.msra.mxu1 %v5443_v56  ;;  %v5535_v55 = vld [vmem:[%s5748_s20 + $0xd08] ss:$16 sps:$4 sm:$0xff]   ;;  %v5540_v56 = vld [vmem:[%s5748_s20 + $0xd24] ss:$16 sps:$4 sm:$0xff]  }
 0x178   : > { %3638 = vmatprep.subr.bf16.mxu0 %v5448_v57  ;;  %3966 = vmatprep.subr.bf16.mxu1 %v5451_v58  ;;  %v5543_v57 = vld [vmem:[%s5748_s20 + $0xd2c] ss:$16 sps:$4 sm:$0xff]   ;;  %v5538_v58 = vld [vmem:[%s5748_s20 + $0xd20] ss:$16 sps:$4 sm:$0xff]  }
 0x17b   : > { %3639 = vmatpush1.bf16.msra.mxu0 %v5446_v59  ;;  %3967 = vmatpush1.bf16.msra.mxu1 %v5449_v60  ;;  %v5541_v59 = vld [vmem:[%s5748_s20 + $0xd28] ss:$16 sps:$4 sm:$0xff]   ;;  %v5546_v60 = vld [vmem:[%s5748_s20 + $0xd44] ss:$16 sps:$4 sm:$0xff]  }
 0x17c   : > { %3640 = vmatprep.subr.bf16.mxu0 %v5454_v61  ;;  %3968 = vmatprep.subr.bf16.mxu1 %v5457_v62  ;;  %v5549_v61 = vld [vmem:[%s5748_s20 + $0xd4c] ss:$16 sps:$4 sm:$0xff]   ;;  %v5544_v62 = vld [vmem:[%s5748_s20 + $0xd40] ss:$16 sps:$4 sm:$0xff]  }
 0x17f   : > { %3641 = vmatpush1.bf16.msra.mxu0 %v5452_v63  ;;  %3969 = vmatpush1.bf16.msra.mxu1 %v5455_v0  ;;  %v5547_v63 = vld [vmem:[%s5748_s20 + $0xd48] ss:$16 sps:$4 sm:$0xff]   ;;  %v5552_v0 = vld [vmem:[%s5748_s20 + $0xd64] ss:$16 sps:$4 sm:$0xff]  }
 0x180   : > { %3642 = vmatprep.subr.bf16.mxu0 %v5460_v1  ;;  %3970 = vmatprep.subr.bf16.mxu1 %v5463_v2  ;;  %v5555_v1 = vld [vmem:[%s5748_s20 + $0xd6c] ss:$16 sps:$4 sm:$0xff]   ;;  %v5550_v2 = vld [vmem:[%s5748_s20 + $0xd60] ss:$16 sps:$4 sm:$0xff]  }
 0x183   : > { %3643 = vmatpush1.bf16.msra.mxu0 %v5458_v3  ;;  %3971 = vmatpush1.bf16.msra.mxu1 %v5461_v4  ;;  %v5553_v3 = vld [vmem:[%s5748_s20 + $0xd68] ss:$16 sps:$4 sm:$0xff]   ;;  %v5558_v4 = vld [vmem:[%s5748_s20 + $0xd84] ss:$16 sps:$4 sm:$0xff]  }
 0x184   : > { %3644 = vmatprep.subr.bf16.mxu0 %v5466_v5  ;;  %3972 = vmatprep.subr.bf16.mxu1 %v5469_v6  ;;  %v5561_v5 = vld [vmem:[%s5748_s20 + $0xd8c] ss:$16 sps:$4 sm:$0xff]   ;;  %v5556_v6 = vld [vmem:[%s5748_s20 + $0xd80] ss:$16 sps:$4 sm:$0xff]  }
 0x187   : > { %3645 = vmatpush1.bf16.msra.mxu0 %v5464_v7  ;;  %3973 = vmatpush1.bf16.msra.mxu1 %v5467_v8  ;;  %v5559_v7 = vld [vmem:[%s5748_s20 + $0xd88] ss:$16 sps:$4 sm:$0xff]   ;;  %v5564_v8 = vld [vmem:[%s5748_s20 + $0xda4] ss:$16 sps:$4 sm:$0xff]  }
 0x188   : > { %3646 = vmatprep.subr.bf16.mxu0 %v5472_v9  ;;  %3974 = vmatprep.subr.bf16.mxu1 %v5475_v10  ;;  %v5567_v9 = vld [vmem:[%s5748_s20 + $0xdac] ss:$16 sps:$4 sm:$0xff]   ;;  %v5562_v10 = vld [vmem:[%s5748_s20 + $0xda0] ss:$16 sps:$4 sm:$0xff]  }
 0x18b   : > { %3647 = vmatpush1.bf16.msra.mxu0 %v5470_v12  ;;  %3975 = vmatpush1.bf16.msra.mxu1 %v5473_v13  ;;  %v5565_v12 = vld [vmem:[%s5748_s20 + $0xda8] ss:$16 sps:$4 sm:$0xff]   ;;  %v5570_v13 = vld [vmem:[%s5748_s20 + $0xdc4] ss:$16 sps:$4 sm:$0xff]  }
 0x18c   : > { %3648 = vmatprep.subr.bf16.mxu0 %v5478_v15  ;;  %3976 = vmatprep.subr.bf16.mxu1 %v5481_v16  ;;  %v5573_v15 = vld [vmem:[%s5748_s20 + $0xdcc] ss:$16 sps:$4 sm:$0xff]   ;;  %v5568_v16 = vld [vmem:[%s5748_s20 + $0xdc0] ss:$16 sps:$4 sm:$0xff]  }
 0x18f   : > { %3649 = vmatpush1.bf16.msra.mxu0 %v5476_v11  ;;  %3977 = vmatpush1.bf16.msra.mxu1 %v5479_v19  ;;  %v5571_v11 = vld [vmem:[%s5748_s20 + $0xdc8] ss:$16 sps:$4 sm:$0xff]   ;;  %v5576_v19 = vld [vmem:[%s5748_s20 + $0xde4] ss:$16 sps:$4 sm:$0xff]  }
 0x190   : > { %3659 = vmatprep.subr.bf16.mxu0 %v5486_v20  ;;  %3987 = vmatprep.subr.bf16.mxu1 %v5489_v14  ;;  %v5579_v20 = vld [vmem:[%s5748_s20 + $0xdec] ss:$16 sps:$4 sm:$0xff]   ;;  %v5574_v14 = vld [vmem:[%s5748_s20 + $0xde0] ss:$16 sps:$4 sm:$0xff]  }
 0x192   : > { %3651 = vmatmul.mubr.bf16.vlgmr.msra.gmra.mrb[0].mxu0 %v4286_v21  ;;  %3979 = vmatmul.mubr.bf16.vlgmr.msra.gmra.mrb[0].mxu1 %v4286_v21  ;;  %v5577_v21 = vld [vmem:[%s5748_s20 + $0xde8] ss:$16 sps:$4 sm:$0xff]  }
 0x193   : > { %3660 = vmatpush1.bf16.msra.mxu0 %v5484_v23  ;;  %3988 = vmatpush1.bf16.msra.mxu1 %v5487_v17  ;;  %v5584_v23 = vld [vmem:[%s5748_s20 + $0xe04] ss:$16 sps:$4 sm:$0xff]   ;;  %v5587_v17 = vld [vmem:[%s5748_s20 + $0xe0c] ss:$16 sps:$4 sm:$0xff]  }
 0x194   : > { %3661 = vmatprep.subr.bf16.mxu0 %v5492_v24  ;;  %3989 = vmatprep.subr.bf16.mxu1 %v5495_v25  ;;  %v4288_v24 = vcombine.low %v6179_v22, %v6179_v22  ;;  %v6250_v25 = vld [vmem:[%s5798_s25 + $0x38] sm:$0xff]  ;;  %v5588_v22 = vld [vmem:[%s5748_s20 + $0xe20] ss:$16 sps:$4 sm:$0xff]  }
 0x195   : > { %3691 = vmatprep.mubr.bf16.mxu0 %v4289_v26  ;;  %4019 = vmatprep.mubr.bf16.mxu1 %v4289_v26  ;;  %v5582_v26 = vld [vmem:[%s5748_s20 + $0xe00] ss:$16 sps:$4 sm:$0xff]  }
 0x197   : > { %3662 = vmatpush1.bf16.msra.mxu0 %v5490_v18  ;;  %3990 = vmatpush1.bf16.msra.mxu1 %v5493_v27  ;;  %v5585_v18 = vld [vmem:[%s5748_s20 + $0xe08] ss:$16 sps:$4 sm:$0xff]   ;;  %v5590_v27 = vld [vmem:[%s5748_s20 + $0xe24] ss:$16 sps:$4 sm:$0xff]  }
 0x198   : > { %3663 = vmatprep.subr.bf16.mxu0 %v5498_v28  ;;  %3991 = vmatprep.subr.bf16.mxu1 %v5501_v29  ;;  %v5593_v28 = vld [vmem:[%s5748_s20 + $0xe2c] ss:$16 sps:$4 sm:$0xff]   ;;  %v4291_v29 = vcombine.high %v6250_v25, %v6250_v25 }
 0x19b   : > { %3664 = vmatpush1.bf16.msra.mxu0 %v5496_v30  ;;  %3992 = vmatpush1.bf16.msra.mxu1 %v5499_v31  ;;  %v5591_v30 = vld [vmem:[%s5748_s20 + $0xe28] ss:$16 sps:$4 sm:$0xff]   ;;  %v5596_v31 = vld [vmem:[%s5748_s20 + $0xe44] ss:$16 sps:$4 sm:$0xff]  }
 0x19c   : > { %3665 = vmatprep.subr.bf16.mxu0 %v5504_v32  ;;  %3993 = vmatprep.subr.bf16.mxu1 %v5507_v33  ;;  %v5599_v32 = vld [vmem:[%s5748_s20 + $0xe4c] ss:$16 sps:$4 sm:$0xff]   ;;  %v5594_v33 = vld [vmem:[%s5748_s20 + $0xe40] ss:$16 sps:$4 sm:$0xff]  }
 0x19f   : > { %3666 = vmatpush1.bf16.msra.mxu0 %v5502_v34  ;;  %3994 = vmatpush1.bf16.msra.mxu1 %v5505_v35  ;;  %v5597_v34 = vld [vmem:[%s5748_s20 + $0xe48] ss:$16 sps:$4 sm:$0xff]   ;;  %v5602_v35 = vld [vmem:[%s5748_s20 + $0xe64] ss:$16 sps:$4 sm:$0xff]  }
 0x1a0   : > { %3667 = vmatprep.subr.bf16.mxu0 %v5510_v36  ;;  %3995 = vmatprep.subr.bf16.mxu1 %v5513_v37  ;;  %v5605_v36 = vld [vmem:[%s5748_s20 + $0xe6c] ss:$16 sps:$4 sm:$0xff]   ;;  %v5600_v37 = vld [vmem:[%s5748_s20 + $0xe60] ss:$16 sps:$4 sm:$0xff]  }
 0x1a3   : > { %3668 = vmatpush1.bf16.msra.mxu0 %v5508_v38  ;;  %3996 = vmatpush1.bf16.msra.mxu1 %v5511_v39  ;;  %v5603_v38 = vld [vmem:[%s5748_s20 + $0xe68] ss:$16 sps:$4 sm:$0xff]   ;;  %v5608_v39 = vld [vmem:[%s5748_s20 + $0xe84] ss:$16 sps:$4 sm:$0xff]  }
 0x1a4   : > { %3669 = vmatprep.subr.bf16.mxu0 %v5516_v40  ;;  %3997 = vmatprep.subr.bf16.mxu1 %v5519_v41  ;;  %v5611_v40 = vld [vmem:[%s5748_s20 + $0xe8c] ss:$16 sps:$4 sm:$0xff]   ;;  %v5606_v41 = vld [vmem:[%s5748_s20 + $0xe80] ss:$16 sps:$4 sm:$0xff]  }
 0x1a7   : > { %3670 = vmatpush1.bf16.msra.mxu0 %v5514_v42  ;;  %3998 = vmatpush1.bf16.msra.mxu1 %v5517_v43  ;;  %v5609_v42 = vld [vmem:[%s5748_s20 + $0xe88] ss:$16 sps:$4 sm:$0xff]   ;;  %v5614_v43 = vld [vmem:[%s5748_s20 + $0xea4] ss:$16 sps:$4 sm:$0xff]  }
 0x1a8   : > { %3671 = vmatprep.subr.bf16.mxu0 %v5522_v44  ;;  %3999 = vmatprep.subr.bf16.mxu1 %v5525_v45  ;;  %v5617_v44 = vld [vmem:[%s5748_s20 + $0xeac] ss:$16 sps:$4 sm:$0xff]   ;;  %v5612_v45 = vld [vmem:[%s5748_s20 + $0xea0] ss:$16 sps:$4 sm:$0xff]  }
 0x1ab   : > { %3672 = vmatpush1.bf16.msra.mxu0 %v5520_v46  ;;  %4000 = vmatpush1.bf16.msra.mxu1 %v5523_v47  ;;  %v5615_v46 = vld [vmem:[%s5748_s20 + $0xea8] ss:$16 sps:$4 sm:$0xff]   ;;  %v5620_v47 = vld [vmem:[%s5748_s20 + $0xec4] ss:$16 sps:$4 sm:$0xff]  }
 0x1ac   : > { %3673 = vmatprep.subr.bf16.mxu0 %v5528_v48  ;;  %4001 = vmatprep.subr.bf16.mxu1 %v5531_v49  ;;  %v5623_v48 = vld [vmem:[%s5748_s20 + $0xecc] ss:$16 sps:$4 sm:$0xff]   ;;  %v5618_v49 = vld [vmem:[%s5748_s20 + $0xec0] ss:$16 sps:$4 sm:$0xff]  }
 0x1af   : > { %3674 = vmatpush1.bf16.msra.mxu0 %v5526_v50  ;;  %4002 = vmatpush1.bf16.msra.mxu1 %v5529_v51  ;;  %v5621_v50 = vld [vmem:[%s5748_s20 + $0xec8] ss:$16 sps:$4 sm:$0xff]   ;;  %v5626_v51 = vld [vmem:[%s5748_s20 + $0xee4] ss:$16 sps:$4 sm:$0xff]  }
 0x1b0   : > { %3675 = vmatprep.subr.bf16.mxu0 %v5534_v52  ;;  %4003 = vmatprep.subr.bf16.mxu1 %v5537_v53  ;;  %v5629_v52 = vld [vmem:[%s5748_s20 + $0xeec] ss:$16 sps:$4 sm:$0xff]   ;;  %v5624_v53 = vld [vmem:[%s5748_s20 + $0xee0] ss:$16 sps:$4 sm:$0xff]  }
 0x1b3   : > { %3676 = vmatpush1.bf16.msra.mxu0 %v5532_v54  ;;  %4004 = vmatpush1.bf16.msra.mxu1 %v5535_v55  ;;  %v5627_v54 = vld [vmem:[%s5748_s20 + $0xee8] ss:$16 sps:$4 sm:$0xff]   ;;  %v5632_v55 = vld [vmem:[%s5748_s20 + $0xf04] ss:$16 sps:$4 sm:$0xff]  }
 0x1b4   : > { %3677 = vmatprep.subr.bf16.mxu0 %v5540_v56  ;;  %4005 = vmatprep.subr.bf16.mxu1 %v5543_v57  ;;  %v5635_v56 = vld [vmem:[%s5748_s20 + $0xf0c] ss:$16 sps:$4 sm:$0xff]   ;;  %v5630_v57 = vld [vmem:[%s5748_s20 + $0xf00] ss:$16 sps:$4 sm:$0xff]  }
 0x1b7   : > { %3678 = vmatpush1.bf16.msra.mxu0 %v5538_v58  ;;  %4006 = vmatpush1.bf16.msra.mxu1 %v5541_v59  ;;  %v5633_v58 = vld [vmem:[%s5748_s20 + $0xf08] ss:$16 sps:$4 sm:$0xff]   ;;  %v5638_v59 = vld [vmem:[%s5748_s20 + $0xf24] ss:$16 sps:$4 sm:$0xff]  }
 0x1b8   : > { %3679 = vmatprep.subr.bf16.mxu0 %v5546_v60  ;;  %4007 = vmatprep.subr.bf16.mxu1 %v5549_v61  ;;  %v5641_v60 = vld [vmem:[%s5748_s20 + $0xf2c] ss:$16 sps:$4 sm:$0xff]   ;;  %v5636_v61 = vld [vmem:[%s5748_s20 + $0xf20] ss:$16 sps:$4 sm:$0xff]  }
 0x1bb   : > { %3680 = vmatpush1.bf16.msra.mxu0 %v5544_v62  ;;  %4008 = vmatpush1.bf16.msra.mxu1 %v5547_v63  ;;  %v5639_v62 = vld [vmem:[%s5748_s20 + $0xf28] ss:$16 sps:$4 sm:$0xff]   ;;  %v5644_v63 = vld [vmem:[%s5748_s20 + $0xf44] ss:$16 sps:$4 sm:$0xff]  }
 0x1bc   : > { %3681 = vmatprep.subr.bf16.mxu0 %v5552_v0  ;;  %4009 = vmatprep.subr.bf16.mxu1 %v5555_v1  ;;  %v5647_v0 = vld [vmem:[%s5748_s20 + $0xf4c] ss:$16 sps:$4 sm:$0xff]   ;;  %v5642_v1 = vld [vmem:[%s5748_s20 + $0xf40] ss:$16 sps:$4 sm:$0xff]  }
 0x1bf   : > { %3682 = vmatpush1.bf16.msra.mxu0 %v5550_v2  ;;  %4010 = vmatpush1.bf16.msra.mxu1 %v5553_v3  ;;  %v5645_v2 = vld [vmem:[%s5748_s20 + $0xf48] ss:$16 sps:$4 sm:$0xff]   ;;  %v5650_v3 = vld [vmem:[%s5748_s20 + $0xf64] ss:$16 sps:$4 sm:$0xff]  }
 0x1c0   : > { %3683 = vmatprep.subr.bf16.mxu0 %v5558_v4  ;;  %4011 = vmatprep.subr.bf16.mxu1 %v5561_v5  ;;  %v5653_v4 = vld [vmem:[%s5748_s20 + $0xf6c] ss:$16 sps:$4 sm:$0xff]   ;;  %v5648_v5 = vld [vmem:[%s5748_s20 + $0xf60] ss:$16 sps:$4 sm:$0xff]  }
 0x1c3   : > { %3684 = vmatpush1.bf16.msra.mxu0 %v5556_v6  ;;  %4012 = vmatpush1.bf16.msra.mxu1 %v5559_v7  ;;  %v5651_v6 = vld [vmem:[%s5748_s20 + $0xf68] ss:$16 sps:$4 sm:$0xff]   ;;  %v5656_v7 = vld [vmem:[%s5748_s20 + $0xf84] ss:$16 sps:$4 sm:$0xff]  }
 0x1c4   : > { %3685 = vmatprep.subr.bf16.mxu0 %v5564_v8  ;;  %4013 = vmatprep.subr.bf16.mxu1 %v5567_v9  ;;  %v5659_v8 = vld [vmem:[%s5748_s20 + $0xf8c] ss:$16 sps:$4 sm:$0xff]   ;;  %v5654_v9 = vld [vmem:[%s5748_s20 + $0xf80] ss:$16 sps:$4 sm:$0xff]  }
 0x1c7   : > { %3686 = vmatpush1.bf16.msra.mxu0 %v5562_v10  ;;  %4014 = vmatpush1.bf16.msra.mxu1 %v5565_v12  ;;  %v5657_v10 = vld [vmem:[%s5748_s20 + $0xf88] ss:$16 sps:$4 sm:$0xff]   ;;  %v5662_v12 = vld [vmem:[%s5748_s20 + $0xfa4] ss:$16 sps:$4 sm:$0xff]  }
 0x1c8   : > { %3687 = vmatprep.subr.bf16.mxu0 %v5570_v13  ;;  %4015 = vmatprep.subr.bf16.mxu1 %v5573_v15  ;;  %v5665_v13 = vld [vmem:[%s5748_s20 + $0xfac] ss:$16 sps:$4 sm:$0xff]   ;;  %v5660_v15 = vld [vmem:[%s5748_s20 + $0xfa0] ss:$16 sps:$4 sm:$0xff]  }
 0x1cb   : > { %3688 = vmatpush1.bf16.msra.mxu0 %v5568_v16  ;;  %4016 = vmatpush1.bf16.msra.mxu1 %v5571_v11  ;;  %v5663_v16 = vld [vmem:[%s5748_s20 + $0xfa8] ss:$16 sps:$4 sm:$0xff]   ;;  %v5668_v11 = vld [vmem:[%s5748_s20 + $0xfc4] ss:$16 sps:$4 sm:$0xff]  }
 0x1cc   : > { %3689 = vmatprep.subr.bf16.mxu0 %v5576_v19  ;;  %4017 = vmatprep.subr.bf16.mxu1 %v5579_v20  ;;  %v5671_v19 = vld [vmem:[%s5748_s20 + $0xfcc] ss:$16 sps:$4 sm:$0xff]   ;;  %v5666_v20 = vld [vmem:[%s5748_s20 + $0xfc0] ss:$16 sps:$4 sm:$0xff]  }
 0x1cf   : > { %3690 = vmatpush1.bf16.msra.mxu0 %v5574_v14  ;;  %4018 = vmatpush1.bf16.msra.mxu1 %v5577_v21  ;;  %v5669_v14 = vld [vmem:[%s5748_s20 + $0xfc8] ss:$16 sps:$4 sm:$0xff]   ;;  %v5674_v21 = vld [vmem:[%s5748_s20 + $0xfe4] ss:$16 sps:$4 sm:$0xff]  }
 0x1d0   : > { %3700 = vmatprep.subr.bf16.mxu0 %v5584_v23  ;;  %4028 = vmatprep.subr.bf16.mxu1 %v5587_v17  ;;  %v5677_v23 = vld [vmem:[%s5748_s20 + $0xfec] ss:$16 sps:$4 sm:$0xff]   ;;  %v5672_v17 = vld [vmem:[%s5748_s20 + $0xfe0] ss:$16 sps:$4 sm:$0xff]  }
 0x1d2   : > { %3692 = vmatmul.mubr.bf16.vlgmr.msra.gmra.mrb[0].mxu0 %v4288_v24  ;;  %4020 = vmatmul.mubr.bf16.vlgmr.msra.gmra.mrb[0].mxu1 %v4288_v24  ;;  %v5675_v24 = vld [vmem:[%s5748_s20 + $0xfe8] ss:$16 sps:$4 sm:$0xff]  }
 0x1d3   : > { %3701 = vmatpush1.bf16.msra.mxu0 %v5582_v26  ;;  %4029 = vmatpush1.bf16.msra.mxu1 %v5585_v18  ;;  %v4290_v26 = vcombine.low %v6250_v25, %v6250_v25 }
 0x1d4   : > { %3702 = vmatprep.subr.bf16.mxu0 %v5590_v27  ;;  %4030 = vmatprep.subr.bf16.mxu1 %v5593_v28 }
 0x1d5   : > { %3732 = vmatprep.mubr.bf16.mxu0 %v4291_v29  ;;  %4060 = vmatprep.mubr.bf16.mxu1 %v4291_v29 }
 0x1d7   : > { %3703 = vmatpush1.bf16.msra.mxu0 %v5588_v22  ;;  %4031 = vmatpush1.bf16.msra.mxu1 %v5591_v30 }
 0x1d8   : > { %3704 = vmatprep.subr.bf16.mxu0 %v5596_v31  ;;  %4032 = vmatprep.subr.bf16.mxu1 %v5599_v32 }
 0x1db   : > { %3705 = vmatpush1.bf16.msra.mxu0 %v5594_v33  ;;  %4033 = vmatpush1.bf16.msra.mxu1 %v5597_v34 }
 0x1dc   : > { %3706 = vmatprep.subr.bf16.mxu0 %v5602_v35  ;;  %4034 = vmatprep.subr.bf16.mxu1 %v5605_v36 }
 0x1df   : > { %3707 = vmatpush1.bf16.msra.mxu0 %v5600_v37  ;;  %4035 = vmatpush1.bf16.msra.mxu1 %v5603_v38 }
 0x1e0   : > { %3708 = vmatprep.subr.bf16.mxu0 %v5608_v39  ;;  %4036 = vmatprep.subr.bf16.mxu1 %v5611_v40 }
 0x1e3   : > { %3709 = vmatpush1.bf16.msra.mxu0 %v5606_v41  ;;  %4037 = vmatpush1.bf16.msra.mxu1 %v5609_v42 }
 0x1e4   : > { %3710 = vmatprep.subr.bf16.mxu0 %v5614_v43  ;;  %4038 = vmatprep.subr.bf16.mxu1 %v5617_v44 }
 0x1e7   : > { %3711 = vmatpush1.bf16.msra.mxu0 %v5612_v45  ;;  %4039 = vmatpush1.bf16.msra.mxu1 %v5615_v46 }
 0x1e8   : > { %3712 = vmatprep.subr.bf16.mxu0 %v5620_v47  ;;  %4040 = vmatprep.subr.bf16.mxu1 %v5623_v48 }
 0x1eb   : > { %3713 = vmatpush1.bf16.msra.mxu0 %v5618_v49  ;;  %4041 = vmatpush1.bf16.msra.mxu1 %v5621_v50 }
 0x1ec   : > { %3714 = vmatprep.subr.bf16.mxu0 %v5626_v51  ;;  %4042 = vmatprep.subr.bf16.mxu1 %v5629_v52 }
 0x1ef   : > { %3715 = vmatpush1.bf16.msra.mxu0 %v5624_v53  ;;  %4043 = vmatpush1.bf16.msra.mxu1 %v5627_v54 }
 0x1f0   : > { %3716 = vmatprep.subr.bf16.mxu0 %v5632_v55  ;;  %4044 = vmatprep.subr.bf16.mxu1 %v5635_v56 }
 0x1f3   : > { %3717 = vmatpush1.bf16.msra.mxu0 %v5630_v57  ;;  %4045 = vmatpush1.bf16.msra.mxu1 %v5633_v58 }
 0x1f4   : > { %3718 = vmatprep.subr.bf16.mxu0 %v5638_v59  ;;  %4046 = vmatprep.subr.bf16.mxu1 %v5641_v60 }
 0x1f7   : > { %3719 = vmatpush1.bf16.msra.mxu0 %v5636_v61  ;;  %4047 = vmatpush1.bf16.msra.mxu1 %v5639_v62 }
 0x1f8   : > { %3720 = vmatprep.subr.bf16.mxu0 %v5644_v63  ;;  %4048 = vmatprep.subr.bf16.mxu1 %v5647_v0 }
 0x1fb   : > { %3721 = vmatpush1.bf16.msra.mxu0 %v5642_v1  ;;  %4049 = vmatpush1.bf16.msra.mxu1 %v5645_v2 }
 0x1fc   : > { %3722 = vmatprep.subr.bf16.mxu0 %v5650_v3  ;;  %4050 = vmatprep.subr.bf16.mxu1 %v5653_v4 }
 0x1ff   : > { %3723 = vmatpush1.bf16.msra.mxu0 %v5648_v5  ;;  %4051 = vmatpush1.bf16.msra.mxu1 %v5651_v6 }
 0x200   : > { %3724 = vmatprep.subr.bf16.mxu0 %v5656_v7  ;;  %4052 = vmatprep.subr.bf16.mxu1 %v5659_v8 }
 0x203   : > { %3725 = vmatpush1.bf16.msra.mxu0 %v5654_v9  ;;  %4053 = vmatpush1.bf16.msra.mxu1 %v5657_v10 }
 0x204   : > { %3726 = vmatprep.subr.bf16.mxu0 %v5662_v12  ;;  %4054 = vmatprep.subr.bf16.mxu1 %v5665_v13 }
 0x207   : > { %3727 = vmatpush1.bf16.msra.mxu0 %v5660_v15  ;;  %4055 = vmatpush1.bf16.msra.mxu1 %v5663_v16 }
 0x208   : > { %3728 = vmatprep.subr.bf16.mxu0 %v5668_v11  ;;  %4056 = vmatprep.subr.bf16.mxu1 %v5671_v19 }
 0x20b   : > { %3729 = vmatpush1.bf16.msra.mxu0 %v5666_v20  ;;  %4057 = vmatpush1.bf16.msra.mxu1 %v5669_v14 }
 0x20c   : > { %3730 = vmatprep.subr.bf16.mxu0 %v5674_v21  ;;  %4058 = vmatprep.subr.bf16.mxu1 %v5677_v23 }
 0x20f   : > { %3731 = vmatpush1.bf16.msra.mxu0 %v5672_v17  ;;  %4059 = vmatpush1.bf16.msra.mxu1 %v5675_v24 }
 0x212   : > { %3733 = vmatmul.mubr.bf16.vlgmr.msra.gmra.mrb[0].mxu0 %v4290_v26  ;;  %4061 = vmatmul.mubr.bf16.vlgmr.msra.gmra.mrb[0].mxu1 %v4290_v26 }
 0x2e2   : > { %4072 = sbr.rel (%p4804_p6) target bundleno = 745 (0x2e9), region = 36 }
 0x2e5   : > { %v3734_v18 = vpop.f32.mrb[0].mxu0  ;;  %v4062_v27 = vpop.f32.mrb[0].mxu1 }
 0x2e6   : > { %v3736_v28 = vpop.f32.mrb[1].mxu0  ;;  %v4064_v29 = vpop.f32.mrb[1].mxu1  ;;  %4073 = vst [vmem:[#allocation2] sm:$0xff] (!%p4804_p6), %v3734_v18  ;;  %4075 = vst [vmem:[#allocation2 + $0x10] sm:$0xff] (!%p4804_p6), %v4062_v27 }
 0x2e7   : > { %v3738_v22 = vpop.f32.mrb[2].mxu0  ;;  %v4066_v30 = vpop.f32.mrb[2].mxu1  ;;  %4074 = vst [vmem:[#allocation2 + $0x8] sm:$0xff] (!%p4804_p6), %v3736_v28  ;;  %4076 = vst [vmem:[#allocation2 + $0x18] sm:$0xff] (!%p4804_p6), %v4064_v29 }
 0x2e8   : > { %v3739_v31 = vpop.f32.mrb[3].mxu0  ;;  %v4067_v32 = vpop.f32.mrb[3].mxu1 }
 0x2e9 PF: > { %p4805_p7 = scmp.le.s32.totalorder %s5694_s12, 0 }
 0x2eb   : > { %4080 = sbr.rel (%p4805_p7) target bundleno = 754 (0x2f2), region = 40 }
 0x2ed   : > { %v4081_v25 = vld [vmem:[#allocation2] sm:$0xff] (!%p4805_p7)  ;;  %v4083_v34 = vld [vmem:[#allocation2 + $0x10] sm:$0xff] (!%p4805_p7) }
 0x2ee   : > { %v4082_v33 = vld [vmem:[#allocation2 + $0x8] sm:$0xff] (!%p4805_p7)  ;;  %v4085_v35 = vadd.f32 (!%p4805_p7), %v4081_v25, %v3734_v18  ;;  %v4087_v37 = vadd.f32 (!%p4805_p7), %v4083_v34, %v4062_v27  ;;  %v4084_v38 = vld [vmem:[#allocation2 + $0x18] sm:$0xff] (!%p4805_p7) }
 0x2ef   : > { %v4086_v36 = vadd.f32 (!%p4805_p7), %v4082_v33, %v3736_v28  ;;  %v4088_v39 = vadd.f32 (!%p4805_p7), %v4084_v38, %v4064_v29 }
 0x2f0   : > { %4089 = vst [vmem:[#allocation2] sm:$0xff] (!%p4805_p7), %v4085_v35  ;;  %4091 = vst [vmem:[#allocation2 + $0x10] sm:$0xff] (!%p4805_p7), %v4087_v37 }
 0x2f1   : > { %4090 = vst [vmem:[#allocation2 + $0x8] sm:$0xff] (!%p4805_p7), %v4086_v36  ;;  %4092 = vst [vmem:[#allocation2 + $0x18] sm:$0xff] (!%p4805_p7), %v4088_v39 }
 0x2f2 PF: > { %p4806_p8 = scmp.ne.s32.totalorder %s5694_s12, 1 }
 0x2f3   : > { %v4103_v40 = vlaneseq (!%p4806_p8)  ;;  %v4101_v42 = vld [vmem:[%s6341_s2] sm:$0xf] (!%p4806_p8) }
 0x2f4   : > { %4096 = sbr.rel (%p4806_p8) target bundleno = 770 (0x302), region = 44 }
 0x2f5   : > { %v4104_v41 = vshrl.u32 (!%p4806_p8), %v4103_v40, 7 }
 0x2f7   : > { %v4097_v43 = vld [vmem:[#allocation2] sm:$0xff] (!%p4806_p8)  ;;  %v4105_v44 = vsub.s32 (!%p4806_p8), 0, %v4104_v41  ;;  %v4109_v45 = vsub.s32 (!%p4806_p8), 1, %v4104_v41  ;;  %v4113_v46 = vsub.s32 (!%p4806_p8), 2, %v4104_v41  ;;  %v4117_v47 = vsub.s32 (!%p4806_p8), 3, %v4104_v41  ;;  %v4099_v49 = vld [vmem:[#allocation2 + $0x10] sm:$0xff] (!%p4806_p8) }
 0x2f8   : > { %v4098_v48 = vld [vmem:[#allocation2 + $0x8] sm:$0xff] (!%p4806_p8)  ;;  %v4100_v50 = vld [vmem:[#allocation2 + $0x18] sm:$0xff] (!%p4806_p8) }
 0x2f9   : > { %v4106_v51 = vrot.slane (!%p4806_p8), %v4101_v42, %v4105_v44  ;;  %v4110_v52 = vrot.slane (!%p4806_p8), %v4101_v42, %v4109_v45  ;;  %v4114_v53 = vrot.slane (!%p4806_p8), %v4101_v42, %v4113_v46  ;;  %v4118_v54 = vrot.slane (!%p4806_p8), %v4101_v42, %v4117_v47 }
 0x2fb   : > { %v4123_v55 = vadd.f32 %v4106_v51, %v4097_v43  ;;  %v4124_v56 = vadd.f32 %v4110_v52, %v4098_v48  ;;  %v4125_v57 = vadd.f32 %v4114_v53, %v4099_v49  ;;  %v4126_v58 = vadd.f32 %v4118_v54, %v4100_v50 }
 0x2fd   : > { %v4127_v59 = vmax.f32 %v4123_v55, 0.0  ;;  %v4128_v60 = vmax.f32 %v4124_v56, 0.0  ;;  %v4129_v61 = vmax.f32 %v4125_v57, 0.0  ;;  %v4130_v62 = vmax.f32 %v4126_v58, 0.0 }
 0x2ff   : > { %v4814_v63 = vpack.c.bf16 %v4128_v60, %v4127_v59  ;;  %v4815_v0 = vpack.c.bf16 %v4130_v62, %v4129_v61 }
 0x301   : > { %4147 = vst [vmem:[%s6342_s3] sm:$0xff] %v4814_v63  ;;  %4148 = vst [vmem:[%s6342_s3 + $0x8] sm:$0xff] %v4815_v0 }
 0x302 PF: > { %s13_s14 = sadd.s32 1, %s5702_s14   ;;  %s6343_s12 = smov %s5698_s13 }
 0x303   : > { %p10_p9 = scmp.ge.s32.totalorder %s13_s14, 4   ;;  %s6344_s13 = smov %s6346_s15 }
 0x305   :  { %12 = sbr.rel (!%p10_p9) target bundleno = 2 (0x2), region = 80 }

// kernel: vae_forward.23
= control target key start
LH: loop header
LB: loop body
LE: loop exit
PB: predicated region body
PF: predicated region fallthrough
CT: control target
= control target key end

     0   :  { %s2351_s1 = inlined_call_operand.vmem [shape: bf16[2048,128], index: 1, kind: input, shape index: {}]   ;;  %s2352_s0 = inlined_call_operand.vmem [shape: bf16[8,2048], index: 0, kind: input, shape index: {}]   ;;  %s2353_s2 = inlined_call_operand.vmem [shape: f32[1,128], index: 2, kind: input, shape index: {}]   ;;  %s2354_s3 = inlined_call_operand.vmem [shape: f32[8,128], index: 3, kind: output, shape index: {}]  }
   0x1   :  { %v1773_v0 = vld [vmem:[%s2351_s1 + $0x40] sm:$0xff]   ;;  %v1777_v4 = vld [vmem:[%s2351_s1 + $0x48] sm:$0xff]   ;;  %v1781_v8 = vld [vmem:[%s2351_s1 + $0x50] sm:$0xff]  }
   0x2   :  { %v1774_v1 = vld [vmem:[%s2351_s1 + $0xc0] sm:$0xff]   ;;  %1597 = vmatprep.subr.bf16.mxu0 %v1773_v0  ;;  %v1778_v5 = vld [vmem:[%s2351_s1 + $0xc8] sm:$0xff]   ;;  %v1782_v9 = vld [vmem:[%s2351_s1 + $0xd0] sm:$0xff]  }
   0x3   :  { %v1775_v2 = vld [vmem:[%s2351_s1] sm:$0xff]   ;;  %1619 = vmatprep.subr.bf16.mxu1 %v1774_v1  ;;  %v1779_v6 = vld [vmem:[%s2351_s1 + $0x8] sm:$0xff]   ;;  %v1783_v10 = vld [vmem:[%s2351_s1 + $0x10] sm:$0xff]  }
   0x4   :  { %v1776_v3 = vld [vmem:[%s2351_s1 + $0x80] sm:$0xff]   ;;  %1598 = vmatpush3.bf16.msra.mxu0 %v1775_v2  ;;  %v1780_v7 = vld [vmem:[%s2351_s1 + $0x88] sm:$0xff]   ;;  %v1784_v11 = vld [vmem:[%s2351_s1 + $0x90] sm:$0xff]  }
   0x5   :  { %1620 = vmatpush3.bf16.msra.mxu1 %v1776_v3  ;;  %1599 = vmatprep.subr.bf16.mxu0 %v1777_v4  ;;  %v1785_v12 = vld [vmem:[%s2351_s1 + $0x58] sm:$0xff]   ;;  %v1789_v16 = vld [vmem:[%s2351_s1 + $0x60] sm:$0xff]   ;;  %v1793_v20 = vld [vmem:[%s2351_s1 + $0x68] sm:$0xff]  }
   0x6   :  { %1621 = vmatprep.subr.bf16.mxu1 %v1778_v5  ;;  %v1786_v13 = vld [vmem:[%s2351_s1 + $0xd8] sm:$0xff]   ;;  %v1790_v17 = vld [vmem:[%s2351_s1 + $0xe0] sm:$0xff]   ;;  %v1794_v21 = vld [vmem:[%s2351_s1 + $0xe8] sm:$0xff]  }
   0x7   :  { %v1787_v14 = vld [vmem:[%s2351_s1 + $0x18] sm:$0xff]   ;;  %v1791_v18 = vld [vmem:[%s2351_s1 + $0x20] sm:$0xff]   ;;  %v1795_v22 = vld [vmem:[%s2351_s1 + $0x28] sm:$0xff]  }
   0x8   :  { %1600 = vmatpush3.bf16.msra.mxu0 %v1779_v6  ;;  %v1788_v15 = vld [vmem:[%s2351_s1 + $0x98] sm:$0xff]   ;;  %v1792_v19 = vld [vmem:[%s2351_s1 + $0xa0] sm:$0xff]   ;;  %v1796_v23 = vld [vmem:[%s2351_s1 + $0xa8] sm:$0xff]  }
   0x9   :  { %1622 = vmatpush3.bf16.msra.mxu1 %v1780_v7  ;;  %1601 = vmatprep.subr.bf16.mxu0 %v1781_v8  ;;  %v1797_v24 = vld [vmem:[%s2351_s1 + $0x70] sm:$0xff]   ;;  %v1801_v28 = vld [vmem:[%s2351_s1 + $0x78] sm:$0xff]   ;;  %v15_v32 = vld [vmem:[%s2352_s0] sm:$0xff] }
   0xa   :  { %1623 = vmatprep.subr.bf16.mxu1 %v1782_v9  ;;  %v1798_v25 = vld [vmem:[%s2351_s1 + $0xf0] sm:$0xff]   ;;  %v1802_v29 = vld [vmem:[%s2351_s1 + $0xf8] sm:$0xff]   ;;  %v16_v33 = vld [vmem:[%s2352_s0 + $0x8] sm:$0xff]  ;;  %v1452_v34 = vcombine.low %v15_v32, %v15_v32  ;;  %v1453_v35 = vcombine.high %v15_v32, %v15_v32 }
   0xb   :  { %v1799_v26 = vld [vmem:[%s2351_s1 + $0x30] sm:$0xff]   ;;  %v1803_v30 = vld [vmem:[%s2351_s1 + $0x38] sm:$0xff]   ;;  %v1454_v36 = vcombine.low %v16_v33, %v16_v33  ;;  %v1455_v37 = vcombine.high %v16_v33, %v16_v33  ;;  %v1809_v38 = vld [vmem:[%s2351_s1 + $0x140] sm:$0xff]  }
   0xc   :  { %1602 = vmatpush3.bf16.msra.mxu0 %v1783_v10  ;;  %v1800_v27 = vld [vmem:[%s2351_s1 + $0xb0] sm:$0xff]   ;;  %v1804_v31 = vld [vmem:[%s2351_s1 + $0xb8] sm:$0xff]   ;;  %v1810_v39 = vld [vmem:[%s2351_s1 + $0x1c0] sm:$0xff]   ;;  %1135 = vmatprep.mubr.bf16.mxu0 %v1453_v35 }
   0xd   :  { %1624 = vmatpush3.bf16.msra.mxu1 %v1784_v11  ;;  %1603 = vmatprep.subr.bf16.mxu0 %v1785_v12  ;;  %v1811_v40 = vld [vmem:[%s2351_s1 + $0x100] sm:$0xff]   ;;  %v1813_v42 = vld [vmem:[%s2351_s1 + $0x148] sm:$0xff]   ;;  %v1817_v46 = vld [vmem:[%s2351_s1 + $0x150] sm:$0xff]  }
   0xe   :  { %1625 = vmatprep.subr.bf16.mxu1 %v1786_v13  ;;  %1175 = vmatprep.mubr.bf16.mxu1 %v1455_v37  ;;  %v1812_v41 = vld [vmem:[%s2351_s1 + $0x180] sm:$0xff]   ;;  %v1814_v43 = vld [vmem:[%s2351_s1 + $0x1c8] sm:$0xff]   ;;  %v1818_v47 = vld [vmem:[%s2351_s1 + $0x1d0] sm:$0xff]  }
   0xf   :  { %v1815_v44 = vld [vmem:[%s2351_s1 + $0x108] sm:$0xff]   ;;  %v1819_v48 = vld [vmem:[%s2351_s1 + $0x110] sm:$0xff]   ;;  %v1821_v50 = vld [vmem:[%s2351_s1 + $0x158] sm:$0xff]  }
  0x10   :  { %1604 = vmatpush3.bf16.msra.mxu0 %v1787_v14  ;;  %v1816_v45 = vld [vmem:[%s2351_s1 + $0x188] sm:$0xff]   ;;  %v1820_v49 = vld [vmem:[%s2351_s1 + $0x190] sm:$0xff]   ;;  %v1822_v51 = vld [vmem:[%s2351_s1 + $0x1d8] sm:$0xff]  }
  0x11   :  { %1626 = vmatpush3.bf16.msra.mxu1 %v1788_v15  ;;  %1605 = vmatprep.subr.bf16.mxu0 %v1789_v16  ;;  %v1823_v52 = vld [vmem:[%s2351_s1 + $0x118] sm:$0xff]   ;;  %v1825_v54 = vld [vmem:[%s2351_s1 + $0x160] sm:$0xff]   ;;  %v1829_v58 = vld [vmem:[%s2351_s1 + $0x168] sm:$0xff]  }
  0x12   :  { %1627 = vmatprep.subr.bf16.mxu1 %v1790_v17  ;;  %v1824_v53 = vld [vmem:[%s2351_s1 + $0x198] sm:$0xff]   ;;  %v1826_v55 = vld [vmem:[%s2351_s1 + $0x1e0] sm:$0xff]   ;;  %v1830_v59 = vld [vmem:[%s2351_s1 + $0x1e8] sm:$0xff]  }
  0x13   :  { %v1827_v56 = vld [vmem:[%s2351_s1 + $0x120] sm:$0xff]   ;;  %v1831_v60 = vld [vmem:[%s2351_s1 + $0x128] sm:$0xff]   ;;  %v1833_v62 = vld [vmem:[%s2351_s1 + $0x170] sm:$0xff]  }
  0x14   :  { %1606 = vmatpush3.bf16.msra.mxu0 %v1791_v18  ;;  %v1828_v57 = vld [vmem:[%s2351_s1 + $0x1a0] sm:$0xff]   ;;  %v1832_v61 = vld [vmem:[%s2351_s1 + $0x1a8] sm:$0xff]   ;;  %v1834_v63 = vld [vmem:[%s2351_s1 + $0x1f0] sm:$0xff]  }
  0x15   :  { %1628 = vmatpush3.bf16.msra.mxu1 %v1792_v19  ;;  %1607 = vmatprep.subr.bf16.mxu0 %v1793_v20  ;;  %v1835_v0 = vld [vmem:[%s2351_s1 + $0x130] sm:$0xff]   ;;  %v1837_v2 = vld [vmem:[%s2351_s1 + $0x178] sm:$0xff]   ;;  %v1845_v12 = vld [vmem:[%s2351_s1 + $0x240] sm:$0xff]  }
  0x16   :  { %1629 = vmatprep.subr.bf16.mxu1 %v1794_v21  ;;  %v1836_v1 = vld [vmem:[%s2351_s1 + $0x1b0] sm:$0xff]   ;;  %v1838_v3 = vld [vmem:[%s2351_s1 + $0x1f8] sm:$0xff]   ;;  %v1846_v13 = vld [vmem:[%s2351_s1 + $0x2c0] sm:$0xff]  }
  0x17   :  { %v1839_v4 = vld [vmem:[%s2351_s1 + $0x138] sm:$0xff]   ;;  %v17_v6 = vld [vmem:[%s2352_s0 + $0x10] sm:$0xff]  ;;  %v1847_v14 = vld [vmem:[%s2351_s1 + $0x200] sm:$0xff]  }
  0x18   :  { %1608 = vmatpush3.bf16.msra.mxu0 %v1795_v22  ;;  %v1840_v5 = vld [vmem:[%s2351_s1 + $0x1b8] sm:$0xff]   ;;  %v1456_v7 = vcombine.low %v17_v6, %v17_v6  ;;  %v1457_v8 = vcombine.high %v17_v6, %v17_v6  ;;  %v1848_v15 = vld [vmem:[%s2351_s1 + $0x280] sm:$0xff]   ;;  %v1849_v16 = vld [vmem:[%s2351_s1 + $0x248] sm:$0xff]  }
  0x19   :  { %1630 = vmatpush3.bf16.msra.mxu1 %v1796_v23  ;;  %1609 = vmatprep.subr.bf16.mxu0 %v1797_v24  ;;  %v18_v9 = vld [vmem:[%s2352_s0 + $0x18] sm:$0xff]  ;;  %v1850_v17 = vld [vmem:[%s2351_s1 + $0x2c8] sm:$0xff]   ;;  %v1853_v20 = vld [vmem:[%s2351_s1 + $0x250] sm:$0xff]  }
  0x1a   :  { %1631 = vmatprep.subr.bf16.mxu1 %v1798_v25  ;;  %v1458_v10 = vcombine.low %v18_v9, %v18_v9  ;;  %v1459_v11 = vcombine.high %v18_v9, %v18_v9  ;;  %v1851_v18 = vld [vmem:[%s2351_s1 + $0x208] sm:$0xff]   ;;  %v1854_v21 = vld [vmem:[%s2351_s1 + $0x2d0] sm:$0xff]   ;;  %v1857_v24 = vld [vmem:[%s2351_s1 + $0x258] sm:$0xff]  }
  0x1b   :  { %v1852_v19 = vld [vmem:[%s2351_s1 + $0x288] sm:$0xff]   ;;  %v1855_v22 = vld [vmem:[%s2351_s1 + $0x210] sm:$0xff]   ;;  %v1858_v25 = vld [vmem:[%s2351_s1 + $0x2d8] sm:$0xff]  }
  0x1c   :  { %1610 = vmatpush3.bf16.msra.mxu0 %v1799_v26  ;;  %v1856_v23 = vld [vmem:[%s2351_s1 + $0x290] sm:$0xff]   ;;  %v1859_v26 = vld [vmem:[%s2351_s1 + $0x218] sm:$0xff]   ;;  %v1865_v32 = vld [vmem:[%s2351_s1 + $0x268] sm:$0xff]  }
  0x1d   :  { %1632 = vmatpush3.bf16.msra.mxu1 %v1800_v27  ;;  %1611 = vmatprep.subr.bf16.mxu0 %v1801_v28  ;;  %v1860_v27 = vld [vmem:[%s2351_s1 + $0x298] sm:$0xff]   ;;  %v1861_v28 = vld [vmem:[%s2351_s1 + $0x260] sm:$0xff]   ;;  %v1866_v33 = vld [vmem:[%s2351_s1 + $0x2e8] sm:$0xff]  }
  0x1e   :  { %1633 = vmatprep.subr.bf16.mxu1 %v1802_v29  ;;  %v1862_v29 = vld [vmem:[%s2351_s1 + $0x2e0] sm:$0xff]   ;;  %v1868_v35 = vld [vmem:[%s2351_s1 + $0x2a8] sm:$0xff]   ;;  %v1870_v37 = vld [vmem:[%s2351_s1 + $0x2f0] sm:$0xff]  }
  0x1f   :  { %v1901_v6 = vld [vmem:[%s2351_s1 + $0x368] sm:$0xff]  }
  0x20   :  { %1612 = vmatpush3.bf16.msra.mxu0 %v1803_v30  ;;  %v1863_v30 = vld [vmem:[%s2351_s1 + $0x220] sm:$0xff]   ;;  %v1904_v9 = vld [vmem:[%s2351_s1 + $0x3a8] sm:$0xff]  }
  0x21   :  { %1634 = vmatpush3.bf16.msra.mxu1 %v1804_v31  ;;  %1641 = vmatprep.subr.bf16.mxu0 %v1809_v38  ;;  %v1864_v31 = vld [vmem:[%s2351_s1 + $0x2a0] sm:$0xff]   ;;  %v1871_v38 = vld [vmem:[%s2351_s1 + $0x230] sm:$0xff]  }
  0x22   :  { %1663 = vmatprep.subr.bf16.mxu1 %v1810_v39  ;;  %v1872_v39 = vld [vmem:[%s2351_s1 + $0x2b0] sm:$0xff]  }
  0x23   :  { %1136 = vmatmul.mubr.bf16.vlgmr.msra.gmra.mrb[0].mxu0 %v1452_v34  ;;  %v1867_v34 = vld [vmem:[%s2351_s1 + $0x228] sm:$0xff]  }
  0x24   :  { %1176 = vmatmul.mubr.bf16.vlgmr.msra.gmra.mrb[0].mxu1 %v1454_v36  ;;  %1642 = vmatpush3.bf16.msra.mxu0 %v1811_v40  ;;  %v1869_v36 = vld [vmem:[%s2351_s1 + $0x270] sm:$0xff]   ;;  %v1873_v40 = vld [vmem:[%s2351_s1 + $0x278] sm:$0xff]  }
  0x25   :  { %1664 = vmatpush3.bf16.msra.mxu1 %v1812_v41  ;;  %1643 = vmatprep.subr.bf16.mxu0 %v1813_v42  ;;  %v1874_v41 = vld [vmem:[%s2351_s1 + $0x2f8] sm:$0xff]  }
  0x26   :  { %1665 = vmatprep.subr.bf16.mxu1 %v1814_v43  ;;  %1215 = vmatprep.mubr.bf16.mxu0 %v1457_v8  ;;  %v1875_v42 = vld [vmem:[%s2351_s1 + $0x238] sm:$0xff]   ;;  %v1903_v8 = vld [vmem:[%s2351_s1 + $0x328] sm:$0xff]  }
  0x27   :  { %1255 = vmatprep.mubr.bf16.mxu1 %v1459_v11  ;;  %v1876_v43 = vld [vmem:[%s2351_s1 + $0x2b8] sm:$0xff]   ;;  %v1906_v11 = vld [vmem:[%s2351_s1 + $0x3f0] sm:$0xff]  }
  0x28   :  { %1644 = vmatpush3.bf16.msra.mxu0 %v1815_v44  ;;  %v19_v44 = vld [vmem:[%s2352_s0 + $0x20] sm:$0xff] }
  0x29   :  { %1666 = vmatpush3.bf16.msra.mxu1 %v1816_v45  ;;  %1645 = vmatprep.subr.bf16.mxu0 %v1817_v46  ;;  %v20_v45 = vld [vmem:[%s2352_s0 + $0x28] sm:$0xff]  ;;  %v1460_v46 = vcombine.low %v19_v44, %v19_v44 }
  0x2a   :  { %1667 = vmatprep.subr.bf16.mxu1 %v1818_v47  ;;  %v1461_v47 = vcombine.high %v19_v44, %v19_v44 }
  0x2c   :  { %1646 = vmatpush3.bf16.msra.mxu0 %v1819_v48  ;;  %v1462_v48 = vcombine.low %v20_v45, %v20_v45 }
  0x2d   :  { %1668 = vmatpush3.bf16.msra.mxu1 %v1820_v49  ;;  %1647 = vmatprep.subr.bf16.mxu0 %v1821_v50  ;;  %v1463_v49 = vcombine.high %v20_v45, %v20_v45  ;;  %v1881_v50 = vld [vmem:[%s2351_s1 + $0x340] sm:$0xff]  }
  0x2e   :  { %1669 = vmatprep.subr.bf16.mxu1 %v1822_v51  ;;  %v1882_v51 = vld [vmem:[%s2351_s1 + $0x3c0] sm:$0xff]  }
  0x30   :  { %1648 = vmatpush3.bf16.msra.mxu0 %v1823_v52  ;;  %v1883_v52 = vld [vmem:[%s2351_s1 + $0x300] sm:$0xff]  }
  0x31   :  { %1670 = vmatpush3.bf16.msra.mxu1 %v1824_v53  ;;  %1649 = vmatprep.subr.bf16.mxu0 %v1825_v54  ;;  %v1884_v53 = vld [vmem:[%s2351_s1 + $0x380] sm:$0xff]   ;;  %v1885_v54 = vld [vmem:[%s2351_s1 + $0x348] sm:$0xff]  }
  0x32   :  { %1671 = vmatprep.subr.bf16.mxu1 %v1826_v55  ;;  %v1886_v55 = vld [vmem:[%s2351_s1 + $0x3c8] sm:$0xff]  }
  0x34   :  { %1650 = vmatpush3.bf16.msra.mxu0 %v1827_v56  ;;  %v1887_v56 = vld [vmem:[%s2351_s1 + $0x308] sm:$0xff]  }
  0x35   :  { %1672 = vmatpush3.bf16.msra.mxu1 %v1828_v57  ;;  %1651 = vmatprep.subr.bf16.mxu0 %v1829_v58  ;;  %v1888_v57 = vld [vmem:[%s2351_s1 + $0x388] sm:$0xff]   ;;  %v1889_v58 = vld [vmem:[%s2351_s1 + $0x350] sm:$0xff]  }
  0x36   :  { %1673 = vmatprep.subr.bf16.mxu1 %v1830_v59  ;;  %v1890_v59 = vld [vmem:[%s2351_s1 + $0x3d0] sm:$0xff]  }
  0x38   :  { %1652 = vmatpush3.bf16.msra.mxu0 %v1831_v60  ;;  %v1891_v60 = vld [vmem:[%s2351_s1 + $0x310] sm:$0xff]  }
  0x39   :  { %1674 = vmatpush3.bf16.msra.mxu1 %v1832_v61  ;;  %1653 = vmatprep.subr.bf16.mxu0 %v1833_v62  ;;  %v1892_v61 = vld [vmem:[%s2351_s1 + $0x390] sm:$0xff]   ;;  %v1893_v62 = vld [vmem:[%s2351_s1 + $0x358] sm:$0xff]  }
  0x3a   :  { %1675 = vmatprep.subr.bf16.mxu1 %v1834_v63  ;;  %v1894_v63 = vld [vmem:[%s2351_s1 + $0x3d8] sm:$0xff]  }
  0x3c   :  { %1654 = vmatpush3.bf16.msra.mxu0 %v1835_v0  ;;  %v1895_v0 = vld [vmem:[%s2351_s1 + $0x318] sm:$0xff]  }
  0x3d   :  { %1676 = vmatpush3.bf16.msra.mxu1 %v1836_v1  ;;  %1655 = vmatprep.subr.bf16.mxu0 %v1837_v2  ;;  %v1896_v1 = vld [vmem:[%s2351_s1 + $0x398] sm:$0xff]   ;;  %v1897_v2 = vld [vmem:[%s2351_s1 + $0x360] sm:$0xff]  }
  0x3e   :  { %1677 = vmatprep.subr.bf16.mxu1 %v1838_v3  ;;  %v1898_v3 = vld [vmem:[%s2351_s1 + $0x3e0] sm:$0xff]  }
  0x40   :  { %1656 = vmatpush3.bf16.msra.mxu0 %v1839_v4  ;;  %v1899_v4 = vld [vmem:[%s2351_s1 + $0x320] sm:$0xff]  }
  0x41   :  { %1678 = vmatpush3.bf16.msra.mxu1 %v1840_v5  ;;  %1685 = vmatprep.subr.bf16.mxu0 %v1845_v12  ;;  %v1900_v5 = vld [vmem:[%s2351_s1 + $0x3a0] sm:$0xff]   ;;  %v1907_v12 = vld [vmem:[%s2351_s1 + $0x330] sm:$0xff]  }
  0x42   :  { %1707 = vmatprep.subr.bf16.mxu1 %v1846_v13  ;;  %v1908_v13 = vld [vmem:[%s2351_s1 + $0x3b0] sm:$0xff]  }
  0x43   :  { %1216 = vmatmul.mubr.bf16.vlgmr.msra.gmra.mrb[4].mxu0 %v1456_v7  ;;  %v1902_v7 = vld [vmem:[%s2351_s1 + $0x3e8] sm:$0xff]  }
  0x44   :  { %1256 = vmatmul.mubr.bf16.vlgmr.msra.gmra.mrb[4].mxu1 %v1458_v10  ;;  %1686 = vmatpush3.bf16.msra.mxu0 %v1847_v14  ;;  %v1905_v10 = vld [vmem:[%s2351_s1 + $0x370] sm:$0xff]   ;;  %v1909_v14 = vld [vmem:[%s2351_s1 + $0x378] sm:$0xff]  }
  0x45   :  { %1708 = vmatpush3.bf16.msra.mxu1 %v1848_v15  ;;  %1687 = vmatprep.subr.bf16.mxu0 %v1849_v16  ;;  %v1910_v15 = vld [vmem:[%s2351_s1 + $0x3f8] sm:$0xff]  }
  0x46   :  { %1709 = vmatprep.subr.bf16.mxu1 %v1850_v17  ;;  %1295 = vmatprep.mubr.bf16.mxu0 %v1461_v47  ;;  %v1911_v16 = vld [vmem:[%s2351_s1 + $0x338] sm:$0xff]  }
  0x47   :  { %1335 = vmatprep.mubr.bf16.mxu1 %v1463_v49  ;;  %v1912_v17 = vld [vmem:[%s2351_s1 + $0x3b8] sm:$0xff]  }
  0x48   :  { %1688 = vmatpush3.bf16.msra.mxu0 %v1851_v18  ;;  %v21_v18 = vld [vmem:[%s2352_s0 + $0x30] sm:$0xff] }
  0x49   :  { %1710 = vmatpush3.bf16.msra.mxu1 %v1852_v19  ;;  %1689 = vmatprep.subr.bf16.mxu0 %v1853_v20  ;;  %v22_v19 = vld [vmem:[%s2352_s0 + $0x38] sm:$0xff]  ;;  %v1464_v20 = vcombine.low %v21_v18, %v21_v18 }
  0x4a   :  { %1711 = vmatprep.subr.bf16.mxu1 %v1854_v21  ;;  %v1465_v21 = vcombine.high %v21_v18, %v21_v18 }
  0x4c   :  { %1690 = vmatpush3.bf16.msra.mxu0 %v1855_v22  ;;  %v1466_v22 = vcombine.low %v22_v19, %v22_v19 }
  0x4d   :  { %1712 = vmatpush3.bf16.msra.mxu1 %v1856_v23  ;;  %1691 = vmatprep.subr.bf16.mxu0 %v1857_v24  ;;  %v1467_v23 = vcombine.high %v22_v19, %v22_v19 }
  0x4e   :  { %1713 = vmatprep.subr.bf16.mxu1 %v1858_v25 }
  0x50   :  { %1692 = vmatpush3.bf16.msra.mxu0 %v1859_v26 }
  0x51   :  { %1714 = vmatpush3.bf16.msra.mxu1 %v1860_v27  ;;  %1693 = vmatprep.subr.bf16.mxu0 %v1861_v28 }
  0x52   :  { %1715 = vmatprep.subr.bf16.mxu1 %v1862_v29 }
  0x54   :  { %1694 = vmatpush3.bf16.msra.mxu0 %v1863_v30 }
  0x55   :  { %1716 = vmatpush3.bf16.msra.mxu1 %v1864_v31  ;;  %1695 = vmatprep.subr.bf16.mxu0 %v1865_v32 }
  0x56   :  { %1717 = vmatprep.subr.bf16.mxu1 %v1866_v33 }
  0x58   :  { %1696 = vmatpush3.bf16.msra.mxu0 %v1867_v34 }
  0x59   :  { %1718 = vmatpush3.bf16.msra.mxu1 %v1868_v35  ;;  %1697 = vmatprep.subr.bf16.mxu0 %v1869_v36 }
  0x5a   :  { %1719 = vmatprep.subr.bf16.mxu1 %v1870_v37 }
  0x5c   :  { %1698 = vmatpush3.bf16.msra.mxu0 %v1871_v38 }
  0x5d   :  { %1720 = vmatpush3.bf16.msra.mxu1 %v1872_v39  ;;  %1699 = vmatprep.subr.bf16.mxu0 %v1873_v40 }
  0x5e   :  { %1721 = vmatprep.subr.bf16.mxu1 %v1874_v41 }
  0x60   :  { %1700 = vmatpush3.bf16.msra.mxu0 %v1875_v42 }
  0x61   :  { %1722 = vmatpush3.bf16.msra.mxu1 %v1876_v43  ;;  %1729 = vmatprep.subr.bf16.mxu0 %v1881_v50 }
  0x62   :  { %1751 = vmatprep.subr.bf16.mxu1 %v1882_v51 }
  0x63   :  { %1296 = vmatmul.mubr.bf16.vlgmr.msra.gmra.mrb[8].mxu0 %v1460_v46 }
  0x64   :  { %1336 = vmatmul.mubr.bf16.vlgmr.msra.gmra.mrb[8].mxu1 %v1462_v48  ;;  %1730 = vmatpush3.bf16.msra.mxu0 %v1883_v52 }
  0x65   :  { %1752 = vmatpush3.bf16.msra.mxu1 %v1884_v53  ;;  %1731 = vmatprep.subr.bf16.mxu0 %v1885_v54 }
  0x66   :  { %1753 = vmatprep.subr.bf16.mxu1 %v1886_v55  ;;  %1375 = vmatprep.mubr.bf16.mxu0 %v1465_v21 }
  0x67   :  { %1415 = vmatprep.mubr.bf16.mxu1 %v1467_v23 }
  0x68   :  { %1732 = vmatpush3.bf16.msra.mxu0 %v1887_v56 }
  0x69   :  { %1754 = vmatpush3.bf16.msra.mxu1 %v1888_v57  ;;  %1733 = vmatprep.subr.bf16.mxu0 %v1889_v58 }
  0x6a   :  { %1755 = vmatprep.subr.bf16.mxu1 %v1890_v59 }
  0x6c   :  { %1734 = vmatpush3.bf16.msra.mxu0 %v1891_v60 }
  0x6d   :  { %1756 = vmatpush3.bf16.msra.mxu1 %v1892_v61  ;;  %1735 = vmatprep.subr.bf16.mxu0 %v1893_v62 }
  0x6e   :  { %1757 = vmatprep.subr.bf16.mxu1 %v1894_v63 }
  0x70   :  { %1736 = vmatpush3.bf16.msra.mxu0 %v1895_v0 }
  0x71   :  { %1758 = vmatpush3.bf16.msra.mxu1 %v1896_v1  ;;  %1737 = vmatprep.subr.bf16.mxu0 %v1897_v2 }
  0x72   :  { %1759 = vmatprep.subr.bf16.mxu1 %v1898_v3 }
  0x74   :  { %1738 = vmatpush3.bf16.msra.mxu0 %v1899_v4 }
  0x75   :  { %1760 = vmatpush3.bf16.msra.mxu1 %v1900_v5  ;;  %1739 = vmatprep.subr.bf16.mxu0 %v1901_v6  ;;  %v1596_v6 = vld [vmem:[%s2353_s2] ss:$0 sm:$0xff] }
  0x76   :  { %1761 = vmatprep.subr.bf16.mxu1 %v1902_v7 }
  0x78   :  { %1740 = vmatpush3.bf16.msra.mxu0 %v1903_v8 }
  0x79   :  { %1762 = vmatpush3.bf16.msra.mxu1 %v1904_v9  ;;  %1741 = vmatprep.subr.bf16.mxu0 %v1905_v10 }
  0x7a   :  { %1763 = vmatprep.subr.bf16.mxu1 %v1906_v11 }
  0x7c   :  { %1742 = vmatpush3.bf16.msra.mxu0 %v1907_v12 }
  0x7d   :  { %1764 = vmatpush3.bf16.msra.mxu1 %v1908_v13  ;;  %1743 = vmatprep.subr.bf16.mxu0 %v1909_v14 }
  0x7e   :  { %1765 = vmatprep.subr.bf16.mxu1 %v1910_v15 }
  0x80   :  { %1744 = vmatpush3.bf16.msra.mxu0 %v1911_v16 }
  0x81   :  { %1766 = vmatpush3.bf16.msra.mxu1 %v1912_v17 }
  0x83   :  { %1376 = vmatmul.mubr.bf16.vlgmr.msra.gmra.mrb[12].mxu0 %v1464_v20 }
  0x84   :  { %1416 = vmatmul.mubr.bf16.vlgmr.msra.gmra.mrb[12].mxu1 %v1466_v22 }
  0xf6   :  { %v1613_v24 = vpop.f32.mrb[0].mxu0 }
  0xf7   :  { %v1635_v25 = vpop.f32.mrb[0].mxu1  ;;  %v1614_v26 = vpop.f32.mrb[1].mxu0 }
  0xf8   :  { %v1636_v27 = vpop.f32.mrb[1].mxu1  ;;  %v1615_v28 = vadd.f32 %v1614_v26, %v1613_v24  ;;  %v1616_v30 = vpop.f32.mrb[2].mxu0 }
  0xf9   :  { %v1637_v29 = vadd.f32 %v1636_v27, %v1635_v25  ;;  %v1638_v31 = vpop.f32.mrb[2].mxu1  ;;  %v1617_v32 = vpop.f32.mrb[3].mxu0 }
  0xfa   :  { %v1639_v33 = vpop.f32.mrb[3].mxu1 }
  0xfb   :  { %v1178_v34 = vadd.f32 %v1637_v29, %v1615_v28 }
 0x116   :  { %v1657_v35 = vpop.f32.mrb[4].mxu0 }
 0x117   :  { %v1679_v36 = vpop.f32.mrb[4].mxu1  ;;  %v1658_v37 = vpop.f32.mrb[5].mxu0 }
 0x118   :  { %v1680_v38 = vpop.f32.mrb[5].mxu1  ;;  %v1659_v39 = vadd.f32 %v1658_v37, %v1657_v35  ;;  %v1660_v41 = vpop.f32.mrb[6].mxu0 }
 0x119   :  { %v1681_v40 = vadd.f32 %v1680_v38, %v1679_v36  ;;  %v1682_v42 = vpop.f32.mrb[6].mxu1  ;;  %v1661_v43 = vpop.f32.mrb[7].mxu0 }
 0x11a   :  { %v1683_v44 = vpop.f32.mrb[7].mxu1  ;;  %v1218_v45 = vadd.f32 %v1659_v39, %v1178_v34 }
 0x11c   :  { %v1258_v46 = vadd.f32 %v1681_v40, %v1218_v45 }
 0x136   :  { %v1701_v47 = vpop.f32.mrb[8].mxu0 }
 0x137   :  { %v1723_v48 = vpop.f32.mrb[8].mxu1  ;;  %v1702_v49 = vpop.f32.mrb[9].mxu0 }
 0x138   :  { %v1703_v50 = vadd.f32 %v1702_v49, %v1701_v47  ;;  %v1724_v51 = vpop.f32.mrb[9].mxu1  ;;  %v1704_v52 = vpop.f32.mrb[10].mxu0 }
 0x139   :  { %v1725_v53 = vadd.f32 %v1724_v51, %v1723_v48  ;;  %v1726_v54 = vpop.f32.mrb[10].mxu1  ;;  %v1705_v55 = vpop.f32.mrb[11].mxu0 }
 0x13a   :  { %v1298_v56 = vadd.f32 %v1703_v50, %v1258_v46  ;;  %v1727_v57 = vpop.f32.mrb[11].mxu1 }
 0x13c   :  { %v1338_v58 = vadd.f32 %v1725_v53, %v1298_v56 }
 0x156   :  { %v1745_v59 = vpop.f32.mrb[12].mxu0 }
 0x157   :  { %v1767_v60 = vpop.f32.mrb[12].mxu1  ;;  %v1746_v61 = vpop.f32.mrb[13].mxu0 }
 0x158   :  { %v1747_v62 = vadd.f32 %v1746_v61, %v1745_v59  ;;  %v1768_v63 = vpop.f32.mrb[13].mxu1  ;;  %v1748_v0 = vpop.f32.mrb[14].mxu0 }
 0x159   :  { %v1769_v1 = vadd.f32 %v1768_v63, %v1767_v60  ;;  %v1770_v2 = vpop.f32.mrb[14].mxu1  ;;  %v1749_v3 = vpop.f32.mrb[15].mxu0 }
 0x15a   :  { %v1378_v4 = vadd.f32 %v1747_v62, %v1338_v58  ;;  %v1771_v5 = vpop.f32.mrb[15].mxu1 }
 0x15c   :  { %v1418_v7 = vadd.f32 %v1769_v1, %v1378_v4 }
 0x15e   :  { %v1446_v8 = vadd.f32 %v1596_v6, %v1418_v7 }
 0x160   :  { %1447 = vst [vmem:[%s2354_s3] sm:$0xff] %v1446_v8 }

// kernel: vae_forward.24
= control target key start
LH: loop header
LB: loop body
LE: loop exit
PB: predicated region body
PF: predicated region fallthrough
CT: control target
= control target key end

     0   :  { %s1014_s12 = smov 0   ;;  %s1016_s13 = smov 0   ;;  %s1191_s0 = inlined_call_operand.vmem [shape: bf16[8,128], index: 0, kind: input, shape index: {}]   ;;  %s1192_s1 = inlined_call_operand.vmem [shape: bf16[128,2048], index: 1, kind: input, shape index: {}]   ;;  %s1193_s2 = inlined_call_operand.vmem [shape: f32[1,2048], index: 2, kind: input, shape index: {}]   ;;  %s1194_s3 = inlined_call_operand.vmem [shape: bf16[8,2048], index: 3, kind: output, shape index: {}]  }
   0x1   :  { %s1018_s14 = smov 0   ;;  %s1020_s15 = smov 0  }
   0x2   :  { %s1022_s16 = smov 0  }
   0x3 LB: > { %s28_s17 = sadd.s32 1, %s987_s15  ;;  %p76_p1 = scmp.ne.s32.totalorder %s979_s13, %s975_s12  ;;  %s991_s16 = sphi %s1022_s16, %s13_s16   ;;  %s987_s15 = sphi %s1020_s15, %s1198_s15   ;;  %s983_s14 = sphi %s1018_s14, %s1197_s14   ;;  %s979_s13 = sphi %s1016_s13, %s1196_s13   ;;  %s975_s12 = sphi %s1014_s12, %s1195_s12  }
   0x4   : > { %p30_p0 = scmp.ge.s32.totalorder %s28_s17, 4  ;;  %p77_p2 = scmp.eq.s32.totalorder %s991_s16, 0 }
   0x5   : > { %s69_s19 = sadd.s32 1, %s979_s13  ;;  %p816_p5 = scmp.ge.s32.totalorder %s991_s16, 4 }
   0x6   : > { %s1200_s17 = smov (%p30_p0, %s28_s17), 0  ;;  %p78_p3 = por %p77_p2, %p76_p1 }
   0x7   : > { %s65_s18 = ssub.s32 %s987_s15, %s1200_s17  ;;  %166 = sbr.rel (%p816_p5) target bundleno = 34 (0x22), region = 20 }
   0x8   : > { %p67_p4 = scmp.eq.s32.totalorder %s65_s18, 0 }
   0xa   : > { %s1049_s20 = scalar_select %p67_p4, %s979_s13, %s69_s19  }
   0xe   : > { %169 = sbr.rel (!%p78_p3) target bundleno = 34 (0x22), region = 24  ;;  %s171_s21 = sand.u32 (%p78_p3), 1, %s979_s13  }
   0xf   : > { %s861_s22 = sshll.u32 (%p78_p3), %s987_s15, 4  ;;  %s817_s23 = sshll.u32 (%p78_p3), %s171_s21, 8 }
  0x10   : > { %s1057_s26 = scalar_lea.vmem (%p78_p3), %s1192_s1, %s861_s22  ;;  %s1062_s27 = scalar_lea.vmem (%p78_p3), [#allocation3], %s817_s23 }
  0x11   : > { %v192_v0 = vld [vmem:[%s1057_s26] sm:$0xff] (%p78_p3)  ;;  %v194_v1 = vld [vmem:[%s1057_s26 + $0x8] sm:$0xff] (%p78_p3) }
  0x12   : > { %v196_v2 = vld [vmem:[%s1057_s26 + $0x40] sm:$0xff] (%p78_p3)  ;;  %193 = vst [vmem:[%s1062_s27] sm:$0xff] (%p78_p3), %v192_v0  ;;  %195 = vst [vmem:[%s1062_s27 + $0x8] sm:$0xff] (%p78_p3), %v194_v1  ;;  %v198_v3 = vld [vmem:[%s1057_s26 + $0x48] sm:$0xff] (%p78_p3) }
  0x13   : > { %197 = vst [vmem:[%s1062_s27 + $0x10] sm:$0xff] (%p78_p3), %v196_v2  ;;  %v200_v4 = vld [vmem:[%s1057_s26 + $0x80] sm:$0xff] (%p78_p3)  ;;  %v202_v5 = vld [vmem:[%s1057_s26 + $0x88] sm:$0xff] (%p78_p3)  ;;  %199 = vst [vmem:[%s1062_s27 + $0x18] sm:$0xff] (%p78_p3), %v198_v3 }
  0x14   : > { %201 = vst [vmem:[%s1062_s27 + $0x20] sm:$0xff] (%p78_p3), %v200_v4  ;;  %203 = vst [vmem:[%s1062_s27 + $0x28] sm:$0xff] (%p78_p3), %v202_v5  ;;  %v204_v6 = vld [vmem:[%s1057_s26 + $0xc0] sm:$0xff] (%p78_p3)  ;;  %v206_v7 = vld [vmem:[%s1057_s26 + $0xc8] sm:$0xff] (%p78_p3) }
  0x15   : > { %v208_v8 = vld [vmem:[%s1057_s26 + $0x100] sm:$0xff]  ;;  %205 = vst [vmem:[%s1062_s27 + $0x30] sm:$0xff] %v204_v6  ;;  %207 = vst [vmem:[%s1062_s27 + $0x38] sm:$0xff] %v206_v7  ;;  %v210_v9 = vld [vmem:[%s1057_s26 + $0x108] sm:$0xff] }
  0x16   : > { %209 = vst [vmem:[%s1062_s27 + $0x40] sm:$0xff] %v208_v8  ;;  %v212_v10 = vld [vmem:[%s1057_s26 + $0x140] sm:$0xff]  ;;  %v214_v11 = vld [vmem:[%s1057_s26 + $0x148] sm:$0xff]  ;;  %211 = vst [vmem:[%s1062_s27 + $0x48] sm:$0xff] %v210_v9 }
  0x17   : > { %213 = vst [vmem:[%s1062_s27 + $0x50] sm:$0xff] %v212_v10  ;;  %215 = vst [vmem:[%s1062_s27 + $0x58] sm:$0xff] %v214_v11  ;;  %v216_v12 = vld [vmem:[%s1057_s26 + $0x180] sm:$0xff]  ;;  %v218_v13 = vld [vmem:[%s1057_s26 + $0x188] sm:$0xff] }
  0x18   : > { %v220_v14 = vld [vmem:[%s1057_s26 + $0x1c0] sm:$0xff]  ;;  %217 = vst [vmem:[%s1062_s27 + $0x60] sm:$0xff] %v216_v12  ;;  %219 = vst [vmem:[%s1062_s27 + $0x68] sm:$0xff] %v218_v13  ;;  %v222_v15 = vld [vmem:[%s1057_s26 + $0x1c8] sm:$0xff] }
  0x19   : > { %221 = vst [vmem:[%s1062_s27 + $0x70] sm:$0xff] %v220_v14  ;;  %v224_v16 = vld [vmem:[%s1057_s26 + $0x200] sm:$0xff]  ;;  %v226_v17 = vld [vmem:[%s1057_s26 + $0x208] sm:$0xff]  ;;  %223 = vst [vmem:[%s1062_s27 + $0x78] sm:$0xff] %v222_v15 }
  0x1a   : > { %225 = vst [vmem:[%s1062_s27 + $0x80] sm:$0xff] %v224_v16  ;;  %227 = vst [vmem:[%s1062_s27 + $0x88] sm:$0xff] %v226_v17  ;;  %v228_v18 = vld [vmem:[%s1057_s26 + $0x240] sm:$0xff]  ;;  %v230_v19 = vld [vmem:[%s1057_s26 + $0x248] sm:$0xff] }
  0x1b   : > { %v232_v20 = vld [vmem:[%s1057_s26 + $0x280] sm:$0xff]  ;;  %229 = vst [vmem:[%s1062_s27 + $0x90] sm:$0xff] %v228_v18  ;;  %231 = vst [vmem:[%s1062_s27 + $0x98] sm:$0xff] %v230_v19  ;;  %v234_v21 = vld [vmem:[%s1057_s26 + $0x288] sm:$0xff] }
  0x1c   : > { %233 = vst [vmem:[%s1062_s27 + $0xa0] sm:$0xff] %v232_v20  ;;  %v236_v22 = vld [vmem:[%s1057_s26 + $0x2c0] sm:$0xff]  ;;  %v238_v23 = vld [vmem:[%s1057_s26 + $0x2c8] sm:$0xff]  ;;  %235 = vst [vmem:[%s1062_s27 + $0xa8] sm:$0xff] %v234_v21 }
  0x1d   : > { %237 = vst [vmem:[%s1062_s27 + $0xb0] sm:$0xff] %v236_v22  ;;  %239 = vst [vmem:[%s1062_s27 + $0xb8] sm:$0xff] %v238_v23  ;;  %v240_v24 = vld [vmem:[%s1057_s26 + $0x300] sm:$0xff]  ;;  %v242_v25 = vld [vmem:[%s1057_s26 + $0x308] sm:$0xff] }
  0x1e   : > { %v244_v26 = vld [vmem:[%s1057_s26 + $0x340] sm:$0xff]  ;;  %241 = vst [vmem:[%s1062_s27 + $0xc0] sm:$0xff] %v240_v24  ;;  %243 = vst [vmem:[%s1062_s27 + $0xc8] sm:$0xff] %v242_v25  ;;  %v246_v27 = vld [vmem:[%s1057_s26 + $0x348] sm:$0xff] }
  0x1f   : > { %245 = vst [vmem:[%s1062_s27 + $0xd0] sm:$0xff] %v244_v26  ;;  %v248_v28 = vld [vmem:[%s1057_s26 + $0x380] sm:$0xff]  ;;  %v250_v29 = vld [vmem:[%s1057_s26 + $0x388] sm:$0xff]  ;;  %247 = vst [vmem:[%s1062_s27 + $0xd8] sm:$0xff] %v246_v27 }
  0x20   : > { %249 = vst [vmem:[%s1062_s27 + $0xe0] sm:$0xff] %v248_v28  ;;  %251 = vst [vmem:[%s1062_s27 + $0xe8] sm:$0xff] %v250_v29  ;;  %v252_v30 = vld [vmem:[%s1057_s26 + $0x3c0] sm:$0xff]  ;;  %v254_v31 = vld [vmem:[%s1057_s26 + $0x3c8] sm:$0xff] }
  0x21   : > { %253 = vst [vmem:[%s1062_s27 + $0xf0] sm:$0xff] %v252_v30  ;;  %255 = vst [vmem:[%s1062_s27 + $0xf8] sm:$0xff] %v254_v31 }
  0x22 PF: > { %p820_p6 = scmp.ge.s32.totalorder %s991_s16, 1  ;;  %p268_p7 = scmp.lt.s32.totalorder %s991_s16, 5 }
  0x24   : > { %p269_p8 = pnand %p820_p6, %p268_p7 }
  0x25   : > { %s275_s28 = sand.u32 (!%p269_p8), 1, %s975_s12   ;;  %v993_v32 = vmov (!%p269_p8), 0   ;;  %v338_v1 = vld [vmem:[%s1191_s0] sm:$0xf] (!%p269_p8)  ;;  %s822_s6 = sshll.u32 (!%p269_p8), %s983_s14, 2  ;;  %v646_v2 = vlaneseq (!%p269_p8) }
  0x26   : > { %272 = sbr.rel (%p269_p8) target bundleno = 293 (0x125), region = 51  ;;  %s821_s29 = sshll.u32 (!%p269_p8), %s275_s28, 8  ;;  %563 = vmatprep.mubr.bf16.mxu0 (!%p269_p8), %v993_v32  ;;  %604 = vmatprep.mubr.bf16.mxu1 (!%p269_p8), %v993_v32 }
  0x27   : > { %s1128_s30 = scalar_lea.vmem (!%p269_p8), [#allocation3], %s821_s29  ;;  %p323_p9 = scmp.lt.s32.totalorder (!%p269_p8), %s822_s6, 15  ;;  %v647_v3 = vshrl.u32 (!%p269_p8), %v646_v2, 7 }
  0x28   : > { %v905_v33 = vld [vmem:[%s1128_s30 + $0x4] ss:$16 sps:$4 sm:$0xff] (!%p269_p8)   ;;  %v907_v34 = vld [vmem:[%s1128_s30 + $0xc] ss:$16 sps:$4 sm:$0xff] (!%p269_p8)   ;;  %v909_v35 = vld [vmem:[%s1128_s30] ss:$16 sps:$4 sm:$0xff] (!%p269_p8)  }
  0x29   : > { %531 = vmatprep.subr.bf16.mxu0 (!%p269_p8), %v905_v33  ;;  %v910_v36 = vld [vmem:[%s1128_s30 + $0x8] ss:$16 sps:$4 sm:$0xff] (!%p269_p8)   ;;  %572 = vmatprep.subr.bf16.mxu1 (!%p269_p8), %v907_v34  ;;  %v911_v37 = vld [vmem:[%s1128_s30 + $0x24] ss:$16 sps:$4 sm:$0xff] (!%p269_p8)   ;;  %v913_v38 = vld [vmem:[%s1128_s30 + $0x2c] ss:$16 sps:$4 sm:$0xff] (!%p269_p8)  }
  0x2a   : > { %532 = vmatpush1.bf16.msra.mxu0 (!%p269_p8), %v909_v35  ;;  %573 = vmatpush1.bf16.msra.mxu1 (!%p269_p8), %v910_v36  ;;  %v915_v39 = vld [vmem:[%s1128_s30 + $0x20] ss:$16 sps:$4 sm:$0xff] (!%p269_p8)   ;;  %v916_v40 = vld [vmem:[%s1128_s30 + $0x28] ss:$16 sps:$4 sm:$0xff] (!%p269_p8)   ;;  %v917_v41 = vld [vmem:[%s1128_s30 + $0x44] ss:$16 sps:$4 sm:$0xff] (!%p269_p8)  }
  0x2b   : > { %533 = vmatprep.subr.bf16.mxu0 (!%p269_p8), %v911_v37  ;;  %574 = vmatprep.subr.bf16.mxu1 (!%p269_p8), %v913_v38  ;;  %v919_v42 = vld [vmem:[%s1128_s30 + $0x4c] ss:$16 sps:$4 sm:$0xff] (!%p269_p8)   ;;  %v921_v43 = vld [vmem:[%s1128_s30 + $0x40] ss:$16 sps:$4 sm:$0xff] (!%p269_p8)   ;;  %v922_v44 = vld [vmem:[%s1128_s30 + $0x48] ss:$16 sps:$4 sm:$0xff] (!%p269_p8)  }
  0x2c   : > { %v923_v45 = vld [vmem:[%s1128_s30 + $0x64] ss:$16 sps:$4 sm:$0xff] (!%p269_p8)   ;;  %v925_v46 = vld [vmem:[%s1128_s30 + $0x6c] ss:$16 sps:$4 sm:$0xff] (!%p269_p8)   ;;  %v927_v47 = vld [vmem:[%s1128_s30 + $0x60] ss:$16 sps:$4 sm:$0xff] (!%p269_p8)  }
  0x2d   : > { %v928_v48 = vld [vmem:[%s1128_s30 + $0x68] ss:$16 sps:$4 sm:$0xff]   ;;  %v929_v49 = vld [vmem:[%s1128_s30 + $0x84] ss:$16 sps:$4 sm:$0xff]   ;;  %v931_v50 = vld [vmem:[%s1128_s30 + $0x8c] ss:$16 sps:$4 sm:$0xff]  }
  0x2e   : > { %534 = vmatpush1.bf16.msra.mxu0 %v915_v39  ;;  %575 = vmatpush1.bf16.msra.mxu1 %v916_v40  ;;  %v933_v51 = vld [vmem:[%s1128_s30 + $0x80] ss:$16 sps:$4 sm:$0xff]   ;;  %v934_v52 = vld [vmem:[%s1128_s30 + $0x88] ss:$16 sps:$4 sm:$0xff]   ;;  %v935_v53 = vld [vmem:[%s1128_s30 + $0xa4] ss:$16 sps:$4 sm:$0xff]  }
  0x2f   : > { %535 = vmatprep.subr.bf16.mxu0 %v917_v41  ;;  %576 = vmatprep.subr.bf16.mxu1 %v919_v42  ;;  %v937_v54 = vld [vmem:[%s1128_s30 + $0xac] ss:$16 sps:$4 sm:$0xff]   ;;  %v939_v55 = vld [vmem:[%s1128_s30 + $0xa0] ss:$16 sps:$4 sm:$0xff]   ;;  %v940_v56 = vld [vmem:[%s1128_s30 + $0xa8] ss:$16 sps:$4 sm:$0xff]  }
  0x30   : > { %v941_v57 = vld [vmem:[%s1128_s30 + $0xc4] ss:$16 sps:$4 sm:$0xff]   ;;  %v943_v58 = vld [vmem:[%s1128_s30 + $0xcc] ss:$16 sps:$4 sm:$0xff]   ;;  %v945_v59 = vld [vmem:[%s1128_s30 + $0xc0] ss:$16 sps:$4 sm:$0xff]  }
  0x31   : > { %v946_v60 = vld [vmem:[%s1128_s30 + $0xc8] ss:$16 sps:$4 sm:$0xff]   ;;  %v947_v61 = vld [vmem:[%s1128_s30 + $0xe4] ss:$16 sps:$4 sm:$0xff]   ;;  %v949_v62 = vld [vmem:[%s1128_s30 + $0xec] ss:$16 sps:$4 sm:$0xff]  }
  0x32   : > { %536 = vmatpush1.bf16.msra.mxu0 %v921_v43  ;;  %577 = vmatpush1.bf16.msra.mxu1 %v922_v44  ;;  %v951_v63 = vld [vmem:[%s1128_s30 + $0xe0] ss:$16 sps:$4 sm:$0xff]   ;;  %v952_v0 = vld [vmem:[%s1128_s30 + $0xe8] ss:$16 sps:$4 sm:$0xff]   ;;  %s1202_s6 = smov (!%p323_p9, %s822_s6), 15  ;;  %v648_v4 = vsub.s32 0, %v647_v3 }
  0x33   : > { %537 = vmatprep.subr.bf16.mxu0 %v923_v45  ;;  %578 = vmatprep.subr.bf16.mxu1 %v925_v46  ;;  %s325_s9 = scalar_lea.vmem %s1193_s2, %s1202_s6  ;;  %v656_v5 = vsub.s32 2, %v647_v3  ;;  %v652_v7 = vsub.s32 1, %v647_v3  ;;  %v660_v8 = vsub.s32 3, %v647_v3  ;;  %s824_s10 = sshll.u32 %s1202_s6, 2 }
  0x34   : > { %v644_v6 = vld [vmem:[%s325_s9] sm:$0xf]  ;;  %s335_s14 = scalar_lea.vmem %s1194_s3, %s824_s10 }
  0x35   : > { %v649_v9 = vrot.slane %v644_v6, %v648_v4  ;;  %v657_v10 = vrot.slane %v644_v6, %v656_v5  ;;  %v653_v11 = vrot.slane %v644_v6, %v652_v7  ;;  %v661_v12 = vrot.slane %v644_v6, %v660_v8 }
  0x36   : > { %538 = vmatpush1.bf16.msra.mxu0 %v927_v47  ;;  %579 = vmatpush1.bf16.msra.mxu1 %v928_v48 }
  0x37   : > { %539 = vmatprep.subr.bf16.mxu0 %v929_v49  ;;  %580 = vmatprep.subr.bf16.mxu1 %v931_v50 }
  0x3a   : > { %540 = vmatpush1.bf16.msra.mxu0 %v933_v51  ;;  %581 = vmatpush1.bf16.msra.mxu1 %v934_v52 }
  0x3b   : > { %541 = vmatprep.subr.bf16.mxu0 %v935_v53  ;;  %582 = vmatprep.subr.bf16.mxu1 %v937_v54 }
  0x3e   : > { %542 = vmatpush1.bf16.msra.mxu0 %v939_v55  ;;  %583 = vmatpush1.bf16.msra.mxu1 %v940_v56 }
  0x3f   : > { %543 = vmatprep.subr.bf16.mxu0 %v941_v57  ;;  %584 = vmatprep.subr.bf16.mxu1 %v943_v58 }
  0x42   : > { %544 = vmatpush1.bf16.msra.mxu0 %v945_v59  ;;  %585 = vmatpush1.bf16.msra.mxu1 %v946_v60 }
  0x43   : > { %545 = vmatprep.subr.bf16.mxu0 %v947_v61  ;;  %586 = vmatprep.subr.bf16.mxu1 %v949_v62 }
  0x46   : > { %546 = vmatpush1.bf16.msra.mxu0 %v951_v63  ;;  %587 = vmatpush1.bf16.msra.mxu1 %v952_v0 }
  0x49   : > { %564 = vmatmul.mubr.bf16.vlgmr.msra.gmra.mrb[0].mxu0 %v338_v1  ;;  %605 = vmatmul.mubr.bf16.vlgmr.msra.gmra.mrb[0].mxu1 %v338_v1 }
 0x11c   : > { %v565_v13 = vpop.f32.mrb[0].mxu0  ;;  %v606_v14 = vpop.f32.mrb[0].mxu1 }
 0x11d   : > { %v666_v15 = vadd.f32 %v649_v9, %v565_v13  ;;  %v668_v16 = vadd.f32 %v657_v10, %v606_v14  ;;  %v567_v17 = vpop.f32.mrb[1].mxu0  ;;  %v608_v18 = vpop.f32.mrb[1].mxu1 }
 0x11e   : > { %v667_v19 = vadd.f32 %v653_v11, %v567_v17  ;;  %v669_v20 = vadd.f32 %v661_v12, %v608_v18  ;;  %v569_v21 = vpop.f32.mrb[2].mxu0  ;;  %v610_v22 = vpop.f32.mrb[2].mxu1 }
 0x11f   : > { %v670_v23 = vmax.f32 %v666_v15, 0.0  ;;  %v672_v24 = vmax.f32 %v668_v16, 0.0  ;;  %v570_v25 = vpop.f32.mrb[3].mxu0  ;;  %v611_v26 = vpop.f32.mrb[3].mxu1 }
 0x120   : > { %v671_v27 = vmax.f32 %v667_v19, 0.0  ;;  %v673_v28 = vmax.f32 %v669_v20, 0.0 }
 0x122   : > { %v862_v29 = vpack.c.bf16 %v671_v27, %v670_v23  ;;  %v863_v30 = vpack.c.bf16 %v673_v28, %v672_v24 }
 0x124   : > { %690 = vst [vmem:[%s335_s14] sm:$0xff] %v862_v29  ;;  %691 = vst [vmem:[%s335_s14 + $0x8] sm:$0xff] %v863_v30 }
 0x125 PF: > { %s13_s16 = sadd.s32 1, %s991_s16   ;;  %s1195_s12 = smov %s979_s13 }
 0x126   : > { %p10_p10 = scmp.ge.s32.totalorder %s13_s16, 6   ;;  %s1196_s13 = smov %s1049_s20 }
 0x127   : > { %s1197_s14 = smov %s987_s15  ;;  %s1198_s15 = smov %s1200_s17 }
 0x128   :  { %12 = sbr.rel (!%p10_p10) target bundleno = 3 (0x3), region = 108 }

// kernel: vae_forward.25
= control target key start
LH: loop header
LB: loop body
LE: loop exit
PB: predicated region body
PF: predicated region fallthrough
CT: control target
= control target key end

     0   :  { %s3520_s1 = inlined_call_operand.vmem [shape: bf16[2048,256], index: 1, kind: input, shape index: {}]   ;;  %s3521_s0 = inlined_call_operand.vmem [shape: bf16[8,2048], index: 0, kind: input, shape index: {}]   ;;  %s3522_s2 = inlined_call_operand.vmem [shape: f32[1,256], index: 2, kind: input, shape index: {}]   ;;  %s3523_s3 = inlined_call_operand.vmem [shape: bf16[8,256], index: 3, kind: output, shape index: {}]  }
   0x1   :  { %v2266_v0 = vld [vmem:[%s3520_s1 + $0x4] ss:$8 sps:$4 sm:$0xff]   ;;  %v2270_v2 = vld [vmem:[%s3520_s1] ss:$8 sps:$4 sm:$0xff]   ;;  %v2272_v4 = vld [vmem:[%s3520_s1 + $0x14] ss:$8 sps:$4 sm:$0xff]  }
   0x2   :  { %v2268_v1 = vld [vmem:[%s3520_s1 + $0x104] ss:$8 sps:$4 sm:$0xff]   ;;  %1614 = vmatprep.subr.bf16.mxu0 %v2266_v0  ;;  %v2271_v3 = vld [vmem:[%s3520_s1 + $0x100] ss:$8 sps:$4 sm:$0xff]   ;;  %v2274_v5 = vld [vmem:[%s3520_s1 + $0x114] ss:$8 sps:$4 sm:$0xff]  }
   0x3   :  { %1655 = vmatprep.subr.bf16.mxu1 %v2268_v1  ;;  %1615 = vmatpush1.bf16.msra.mxu0 %v2270_v2  ;;  %v2276_v6 = vld [vmem:[%s3520_s1 + $0x10] ss:$8 sps:$4 sm:$0xff]   ;;  %v2278_v8 = vld [vmem:[%s3520_s1 + $0x24] ss:$8 sps:$4 sm:$0xff]   ;;  %v2282_v10 = vld [vmem:[%s3520_s1 + $0x20] ss:$8 sps:$4 sm:$0xff]  }
   0x4   :  { %1656 = vmatpush1.bf16.msra.mxu1 %v2271_v3  ;;  %1616 = vmatprep.subr.bf16.mxu0 %v2272_v4  ;;  %v2277_v7 = vld [vmem:[%s3520_s1 + $0x110] ss:$8 sps:$4 sm:$0xff]   ;;  %v2280_v9 = vld [vmem:[%s3520_s1 + $0x124] ss:$8 sps:$4 sm:$0xff]   ;;  %v2283_v11 = vld [vmem:[%s3520_s1 + $0x120] ss:$8 sps:$4 sm:$0xff]  }
   0x5   :  { %1657 = vmatprep.subr.bf16.mxu1 %v2274_v5  ;;  %v2284_v12 = vld [vmem:[%s3520_s1 + $0x34] ss:$8 sps:$4 sm:$0xff]   ;;  %v2288_v14 = vld [vmem:[%s3520_s1 + $0x30] ss:$8 sps:$4 sm:$0xff]   ;;  %v2290_v16 = vld [vmem:[%s3520_s1 + $0x44] ss:$8 sps:$4 sm:$0xff]  }
   0x6   :  { %v2286_v13 = vld [vmem:[%s3520_s1 + $0x134] ss:$8 sps:$4 sm:$0xff]   ;;  %v2289_v15 = vld [vmem:[%s3520_s1 + $0x130] ss:$8 sps:$4 sm:$0xff]   ;;  %v2292_v17 = vld [vmem:[%s3520_s1 + $0x144] ss:$8 sps:$4 sm:$0xff]  }
   0x7   :  { %1617 = vmatpush1.bf16.msra.mxu0 %v2276_v6  ;;  %v2294_v18 = vld [vmem:[%s3520_s1 + $0x40] ss:$8 sps:$4 sm:$0xff]   ;;  %v2296_v20 = vld [vmem:[%s3520_s1 + $0x54] ss:$8 sps:$4 sm:$0xff]   ;;  %v2300_v22 = vld [vmem:[%s3520_s1 + $0x50] ss:$8 sps:$4 sm:$0xff]  }
   0x8   :  { %1658 = vmatpush1.bf16.msra.mxu1 %v2277_v7  ;;  %1618 = vmatprep.subr.bf16.mxu0 %v2278_v8  ;;  %v2295_v19 = vld [vmem:[%s3520_s1 + $0x140] ss:$8 sps:$4 sm:$0xff]   ;;  %v2298_v21 = vld [vmem:[%s3520_s1 + $0x154] ss:$8 sps:$4 sm:$0xff]   ;;  %v2301_v23 = vld [vmem:[%s3520_s1 + $0x150] ss:$8 sps:$4 sm:$0xff]  }
   0x9   :  { %1659 = vmatprep.subr.bf16.mxu1 %v2280_v9  ;;  %v2302_v24 = vld [vmem:[%s3520_s1 + $0x64] ss:$8 sps:$4 sm:$0xff]   ;;  %v2306_v26 = vld [vmem:[%s3520_s1 + $0x60] ss:$8 sps:$4 sm:$0xff]   ;;  %v2308_v28 = vld [vmem:[%s3520_s1 + $0x74] ss:$8 sps:$4 sm:$0xff]  }
   0xa   :  { %v2304_v25 = vld [vmem:[%s3520_s1 + $0x164] ss:$8 sps:$4 sm:$0xff]   ;;  %v2307_v27 = vld [vmem:[%s3520_s1 + $0x160] ss:$8 sps:$4 sm:$0xff]   ;;  %v2310_v29 = vld [vmem:[%s3520_s1 + $0x174] ss:$8 sps:$4 sm:$0xff]  }
   0xb   :  { %1619 = vmatpush1.bf16.msra.mxu0 %v2282_v10  ;;  %v2312_v30 = vld [vmem:[%s3520_s1 + $0x70] ss:$8 sps:$4 sm:$0xff]   ;;  %v2314_v32 = vld [vmem:[%s3520_s1 + $0x84] ss:$8 sps:$4 sm:$0xff]   ;;  %v2318_v34 = vld [vmem:[%s3520_s1 + $0x80] ss:$8 sps:$4 sm:$0xff]  }
   0xc   :  { %1660 = vmatpush1.bf16.msra.mxu1 %v2283_v11  ;;  %1620 = vmatprep.subr.bf16.mxu0 %v2284_v12  ;;  %v2313_v31 = vld [vmem:[%s3520_s1 + $0x170] ss:$8 sps:$4 sm:$0xff]   ;;  %v2316_v33 = vld [vmem:[%s3520_s1 + $0x184] ss:$8 sps:$4 sm:$0xff]   ;;  %v2319_v35 = vld [vmem:[%s3520_s1 + $0x180] ss:$8 sps:$4 sm:$0xff]  }
   0xd   :  { %1661 = vmatprep.subr.bf16.mxu1 %v2286_v13  ;;  %v2320_v36 = vld [vmem:[%s3520_s1 + $0x94] ss:$8 sps:$4 sm:$0xff]   ;;  %v2324_v38 = vld [vmem:[%s3520_s1 + $0x90] ss:$8 sps:$4 sm:$0xff]   ;;  %v2326_v40 = vld [vmem:[%s3520_s1 + $0xa4] ss:$8 sps:$4 sm:$0xff]  }
   0xe   :  { %v2322_v37 = vld [vmem:[%s3520_s1 + $0x194] ss:$8 sps:$4 sm:$0xff]   ;;  %v2325_v39 = vld [vmem:[%s3520_s1 + $0x190] ss:$8 sps:$4 sm:$0xff]   ;;  %v2328_v41 = vld [vmem:[%s3520_s1 + $0x1a4] ss:$8 sps:$4 sm:$0xff]  }
   0xf   :  { %1621 = vmatpush1.bf16.msra.mxu0 %v2288_v14  ;;  %v2330_v42 = vld [vmem:[%s3520_s1 + $0xa0] ss:$8 sps:$4 sm:$0xff]   ;;  %v2332_v44 = vld [vmem:[%s3520_s1 + $0xb4] ss:$8 sps:$4 sm:$0xff]   ;;  %v2336_v49 = vld [vmem:[%s3520_s1 + $0xb0] ss:$8 sps:$4 sm:$0xff]  }
  0x10   :  { %1662 = vmatpush1.bf16.msra.mxu1 %v2289_v15  ;;  %1622 = vmatprep.subr.bf16.mxu0 %v2290_v16  ;;  %v2331_v43 = vld [vmem:[%s3520_s1 + $0x1a0] ss:$8 sps:$4 sm:$0xff]   ;;  %v2334_v45 = vld [vmem:[%s3520_s1 + $0x1b4] ss:$8 sps:$4 sm:$0xff]   ;;  %v2337_v50 = vld [vmem:[%s3520_s1 + $0x1b0] ss:$8 sps:$4 sm:$0xff]  }
  0x11   :  { %1663 = vmatprep.subr.bf16.mxu1 %v2292_v17  ;;  %v14_v46 = vld [vmem:[%s3521_s0] sm:$0xff]  ;;  %v15_v48 = vld [vmem:[%s3521_s0 + $0x8] sm:$0xff]  ;;  %v2344_v56 = vld [vmem:[%s3520_s1 + $0xd4] ss:$8 sps:$4 sm:$0xff]  }
  0x12   :  { %v1993_v47 = vcombine.high %v14_v46, %v14_v46  ;;  %v1995_v51 = vcombine.high %v15_v48, %v15_v48  ;;  %v2338_v52 = vld [vmem:[%s3520_s1 + $0xc4] ss:$8 sps:$4 sm:$0xff]   ;;  %v2342_v54 = vld [vmem:[%s3520_s1 + $0xc0] ss:$8 sps:$4 sm:$0xff]   ;;  %v2346_v57 = vld [vmem:[%s3520_s1 + $0x1d4] ss:$8 sps:$4 sm:$0xff]   ;;  %v1992_v6 = vcombine.low %v14_v46, %v14_v46  ;;  %v1994_v7 = vcombine.low %v15_v48, %v15_v48 }
  0x13   :  { %1623 = vmatpush1.bf16.msra.mxu0 %v2294_v18  ;;  %v2340_v53 = vld [vmem:[%s3520_s1 + $0x1c4] ss:$8 sps:$4 sm:$0xff]   ;;  %v2343_v55 = vld [vmem:[%s3520_s1 + $0x1c0] ss:$8 sps:$4 sm:$0xff]   ;;  %v2348_v58 = vld [vmem:[%s3520_s1 + $0xd0] ss:$8 sps:$4 sm:$0xff]  }
  0x14   :  { %1664 = vmatpush1.bf16.msra.mxu1 %v2295_v19  ;;  %1624 = vmatprep.subr.bf16.mxu0 %v2296_v20  ;;  %v2349_v59 = vld [vmem:[%s3520_s1 + $0x1d0] ss:$8 sps:$4 sm:$0xff]   ;;  %v2350_v60 = vld [vmem:[%s3520_s1 + $0xe4] ss:$8 sps:$4 sm:$0xff]   ;;  %v2354_v62 = vld [vmem:[%s3520_s1 + $0xe0] ss:$8 sps:$4 sm:$0xff]  }
  0x15   :  { %1665 = vmatprep.subr.bf16.mxu1 %v2298_v21  ;;  %1646 = vmatprep.mubr.bf16.mxu0 %v1993_v47  ;;  %v2352_v61 = vld [vmem:[%s3520_s1 + $0x1e4] ss:$8 sps:$4 sm:$0xff]   ;;  %v2355_v63 = vld [vmem:[%s3520_s1 + $0x1e0] ss:$8 sps:$4 sm:$0xff]   ;;  %v2356_v0 = vld [vmem:[%s3520_s1 + $0xf4] ss:$8 sps:$4 sm:$0xff]  }
  0x16   :  { %1687 = vmatprep.mubr.bf16.mxu1 %v1995_v51  ;;  %v2358_v1 = vld [vmem:[%s3520_s1 + $0x1f4] ss:$8 sps:$4 sm:$0xff]   ;;  %v2360_v2 = vld [vmem:[%s3520_s1 + $0xf0] ss:$8 sps:$4 sm:$0xff]   ;;  %v2368_v4 = vld [vmem:[%s3520_s1 + $0x204] ss:$8 sps:$4 sm:$0xff]  }
  0x17   :  { %1625 = vmatpush1.bf16.msra.mxu0 %v2300_v22  ;;  %v2361_v3 = vld [vmem:[%s3520_s1 + $0x1f0] ss:$8 sps:$4 sm:$0xff]   ;;  %v2371_v5 = vld [vmem:[%s3520_s1 + $0x304] ss:$8 sps:$4 sm:$0xff]   ;;  %v2366_v8 = vld [vmem:[%s3520_s1 + $0x200] ss:$8 sps:$4 sm:$0xff]  }
  0x18   :  { %1666 = vmatpush1.bf16.msra.mxu1 %v2301_v23  ;;  %1626 = vmatprep.subr.bf16.mxu0 %v2302_v24  ;;  %v2369_v9 = vld [vmem:[%s3520_s1 + $0x300] ss:$8 sps:$4 sm:$0xff]   ;;  %v2374_v10 = vld [vmem:[%s3520_s1 + $0x214] ss:$8 sps:$4 sm:$0xff]   ;;  %v2372_v12 = vld [vmem:[%s3520_s1 + $0x210] ss:$8 sps:$4 sm:$0xff]  }
  0x19   :  { %1667 = vmatprep.subr.bf16.mxu1 %v2304_v25  ;;  %v2377_v11 = vld [vmem:[%s3520_s1 + $0x314] ss:$8 sps:$4 sm:$0xff]   ;;  %v2375_v13 = vld [vmem:[%s3520_s1 + $0x310] ss:$8 sps:$4 sm:$0xff]   ;;  %v2380_v14 = vld [vmem:[%s3520_s1 + $0x224] ss:$8 sps:$4 sm:$0xff]  }
  0x1a   :  { %v2383_v15 = vld [vmem:[%s3520_s1 + $0x324] ss:$8 sps:$4 sm:$0xff]   ;;  %v2378_v16 = vld [vmem:[%s3520_s1 + $0x220] ss:$8 sps:$4 sm:$0xff]   ;;  %v2386_v18 = vld [vmem:[%s3520_s1 + $0x234] ss:$8 sps:$4 sm:$0xff]  }
  0x1b   :  { %1627 = vmatpush1.bf16.msra.mxu0 %v2306_v26  ;;  %v2381_v17 = vld [vmem:[%s3520_s1 + $0x320] ss:$8 sps:$4 sm:$0xff]   ;;  %v2389_v19 = vld [vmem:[%s3520_s1 + $0x334] ss:$8 sps:$4 sm:$0xff]   ;;  %v2384_v20 = vld [vmem:[%s3520_s1 + $0x230] ss:$8 sps:$4 sm:$0xff]  }
  0x1c   :  { %1668 = vmatpush1.bf16.msra.mxu1 %v2307_v27  ;;  %1628 = vmatprep.subr.bf16.mxu0 %v2308_v28  ;;  %v2387_v21 = vld [vmem:[%s3520_s1 + $0x330] ss:$8 sps:$4 sm:$0xff]   ;;  %v2392_v22 = vld [vmem:[%s3520_s1 + $0x244] ss:$8 sps:$4 sm:$0xff]   ;;  %v2390_v24 = vld [vmem:[%s3520_s1 + $0x240] ss:$8 sps:$4 sm:$0xff]  }
  0x1d   :  { %1669 = vmatprep.subr.bf16.mxu1 %v2310_v29  ;;  %v2395_v23 = vld [vmem:[%s3520_s1 + $0x344] ss:$8 sps:$4 sm:$0xff]   ;;  %v2393_v25 = vld [vmem:[%s3520_s1 + $0x340] ss:$8 sps:$4 sm:$0xff]   ;;  %v2398_v26 = vld [vmem:[%s3520_s1 + $0x254] ss:$8 sps:$4 sm:$0xff]  }
  0x1e   :  { %v2401_v27 = vld [vmem:[%s3520_s1 + $0x354] ss:$8 sps:$4 sm:$0xff]   ;;  %v2396_v28 = vld [vmem:[%s3520_s1 + $0x250] ss:$8 sps:$4 sm:$0xff]   ;;  %v2431_v51 = vld [vmem:[%s3520_s1 + $0x3a4] ss:$8 sps:$4 sm:$0xff]  }
  0x1f   :  { %1629 = vmatpush1.bf16.msra.mxu0 %v2312_v30  ;;  %v2399_v29 = vld [vmem:[%s3520_s1 + $0x350] ss:$8 sps:$4 sm:$0xff]   ;;  %v2404_v30 = vld [vmem:[%s3520_s1 + $0x264] ss:$8 sps:$4 sm:$0xff]   ;;  %v2422_v46 = vld [vmem:[%s3520_s1 + $0x294] ss:$8 sps:$4 sm:$0xff]  }
  0x20   :  { %1670 = vmatpush1.bf16.msra.mxu1 %v2313_v31  ;;  %1630 = vmatprep.subr.bf16.mxu0 %v2314_v32  ;;  %v2407_v31 = vld [vmem:[%s3520_s1 + $0x364] ss:$8 sps:$4 sm:$0xff]   ;;  %v2965_v32 = vld [vmem:[%s3521_s0 + $0x10] sm:$0xff] }
  0x21   :  { %1671 = vmatprep.subr.bf16.mxu1 %v2316_v33  ;;  %v2970_v33 = vld [vmem:[%s3521_s0 + $0x18] sm:$0xff] }
  0x22   :  { %v2425_v47 = vld [vmem:[%s3520_s1 + $0x394] ss:$8 sps:$4 sm:$0xff]   ;;  %v2420_v48 = vld [vmem:[%s3520_s1 + $0x290] ss:$8 sps:$4 sm:$0xff]  }
  0x23   :  { %1631 = vmatpush1.bf16.msra.mxu0 %v2318_v34  ;;  %v2402_v34 = vld [vmem:[%s3520_s1 + $0x260] ss:$8 sps:$4 sm:$0xff]  }
  0x24   :  { %1672 = vmatpush1.bf16.msra.mxu1 %v2319_v35  ;;  %1632 = vmatprep.subr.bf16.mxu0 %v2320_v36  ;;  %v2405_v35 = vld [vmem:[%s3520_s1 + $0x360] ss:$8 sps:$4 sm:$0xff]   ;;  %v1997_v36 = vcombine.high %v2965_v32, %v2965_v32 }
  0x25   :  { %1673 = vmatprep.subr.bf16.mxu1 %v2322_v37  ;;  %v1999_v37 = vcombine.high %v2970_v33, %v2970_v33 }
  0x27   :  { %1633 = vmatpush1.bf16.msra.mxu0 %v2324_v38  ;;  %v2410_v38 = vld [vmem:[%s3520_s1 + $0x274] ss:$8 sps:$4 sm:$0xff]  }
  0x28   :  { %1674 = vmatpush1.bf16.msra.mxu1 %v2325_v39  ;;  %1634 = vmatprep.subr.bf16.mxu0 %v2326_v40  ;;  %v2413_v39 = vld [vmem:[%s3520_s1 + $0x374] ss:$8 sps:$4 sm:$0xff]   ;;  %v2408_v40 = vld [vmem:[%s3520_s1 + $0x270] ss:$8 sps:$4 sm:$0xff]  }
  0x29   :  { %1675 = vmatprep.subr.bf16.mxu1 %v2328_v41  ;;  %v2411_v41 = vld [vmem:[%s3520_s1 + $0x370] ss:$8 sps:$4 sm:$0xff]  }
  0x2b   :  { %1635 = vmatpush1.bf16.msra.mxu0 %v2330_v42  ;;  %v2416_v42 = vld [vmem:[%s3520_s1 + $0x284] ss:$8 sps:$4 sm:$0xff]  }
  0x2c   :  { %1676 = vmatpush1.bf16.msra.mxu1 %v2331_v43  ;;  %1636 = vmatprep.subr.bf16.mxu0 %v2332_v44  ;;  %v2419_v43 = vld [vmem:[%s3520_s1 + $0x384] ss:$8 sps:$4 sm:$0xff]   ;;  %v2414_v44 = vld [vmem:[%s3520_s1 + $0x280] ss:$8 sps:$4 sm:$0xff]  }
  0x2d   :  { %1677 = vmatprep.subr.bf16.mxu1 %v2334_v45  ;;  %v2417_v45 = vld [vmem:[%s3520_s1 + $0x380] ss:$8 sps:$4 sm:$0xff]  }
  0x2f   :  { %1637 = vmatpush1.bf16.msra.mxu0 %v2336_v49  ;;  %v2423_v49 = vld [vmem:[%s3520_s1 + $0x390] ss:$8 sps:$4 sm:$0xff]  }
  0x30   :  { %1678 = vmatpush1.bf16.msra.mxu1 %v2337_v50  ;;  %1638 = vmatprep.subr.bf16.mxu0 %v2338_v52  ;;  %v2428_v50 = vld [vmem:[%s3520_s1 + $0x2a4] ss:$8 sps:$4 sm:$0xff]   ;;  %v2426_v52 = vld [vmem:[%s3520_s1 + $0x2a0] ss:$8 sps:$4 sm:$0xff]  }
  0x31   :  { %1679 = vmatprep.subr.bf16.mxu1 %v2340_v53  ;;  %v2429_v53 = vld [vmem:[%s3520_s1 + $0x3a0] ss:$8 sps:$4 sm:$0xff]  }
  0x33   :  { %1639 = vmatpush1.bf16.msra.mxu0 %v2342_v54  ;;  %v2434_v54 = vld [vmem:[%s3520_s1 + $0x2b4] ss:$8 sps:$4 sm:$0xff]  }
  0x34   :  { %1680 = vmatpush1.bf16.msra.mxu1 %v2343_v55  ;;  %1640 = vmatprep.subr.bf16.mxu0 %v2344_v56  ;;  %v2437_v55 = vld [vmem:[%s3520_s1 + $0x3b4] ss:$8 sps:$4 sm:$0xff]   ;;  %v2432_v56 = vld [vmem:[%s3520_s1 + $0x2b0] ss:$8 sps:$4 sm:$0xff]  }
  0x35   :  { %1681 = vmatprep.subr.bf16.mxu1 %v2346_v57  ;;  %v2435_v57 = vld [vmem:[%s3520_s1 + $0x3b0] ss:$8 sps:$4 sm:$0xff]  }
  0x37   :  { %1641 = vmatpush1.bf16.msra.mxu0 %v2348_v58  ;;  %v2440_v58 = vld [vmem:[%s3520_s1 + $0x2c4] ss:$8 sps:$4 sm:$0xff]  }
  0x38   :  { %1682 = vmatpush1.bf16.msra.mxu1 %v2349_v59  ;;  %1642 = vmatprep.subr.bf16.mxu0 %v2350_v60  ;;  %v2443_v59 = vld [vmem:[%s3520_s1 + $0x3c4] ss:$8 sps:$4 sm:$0xff]   ;;  %v2438_v60 = vld [vmem:[%s3520_s1 + $0x2c0] ss:$8 sps:$4 sm:$0xff]  }
  0x39   :  { %1683 = vmatprep.subr.bf16.mxu1 %v2352_v61  ;;  %v2441_v61 = vld [vmem:[%s3520_s1 + $0x3c0] ss:$8 sps:$4 sm:$0xff]  }
  0x3b   :  { %1643 = vmatpush1.bf16.msra.mxu0 %v2354_v62  ;;  %v2446_v62 = vld [vmem:[%s3520_s1 + $0x2d4] ss:$8 sps:$4 sm:$0xff]  }
  0x3c   :  { %1684 = vmatpush1.bf16.msra.mxu1 %v2355_v63  ;;  %1644 = vmatprep.subr.bf16.mxu0 %v2356_v0  ;;  %v2449_v63 = vld [vmem:[%s3520_s1 + $0x3d4] ss:$8 sps:$4 sm:$0xff]   ;;  %v2444_v0 = vld [vmem:[%s3520_s1 + $0x2d0] ss:$8 sps:$4 sm:$0xff]  }
  0x3d   :  { %1685 = vmatprep.subr.bf16.mxu1 %v2358_v1  ;;  %v2447_v1 = vld [vmem:[%s3520_s1 + $0x3d0] ss:$8 sps:$4 sm:$0xff]  }
  0x3f   :  { %1645 = vmatpush1.bf16.msra.mxu0 %v2360_v2  ;;  %v2452_v2 = vld [vmem:[%s3520_s1 + $0x2e4] ss:$8 sps:$4 sm:$0xff]  }
  0x40   :  { %1686 = vmatpush1.bf16.msra.mxu1 %v2361_v3  ;;  %1696 = vmatprep.subr.bf16.mxu0 %v2368_v4  ;;  %v2455_v3 = vld [vmem:[%s3520_s1 + $0x3e4] ss:$8 sps:$4 sm:$0xff]   ;;  %v2450_v4 = vld [vmem:[%s3520_s1 + $0x2e0] ss:$8 sps:$4 sm:$0xff]  }
  0x41   :  { %1737 = vmatprep.subr.bf16.mxu1 %v2371_v5  ;;  %v2453_v5 = vld [vmem:[%s3520_s1 + $0x3e0] ss:$8 sps:$4 sm:$0xff]  }
  0x42   :  { %1647 = vmatmul.mubr.bf16.vlgmr.msra.gmra.mrb[0].mxu0 %v1992_v6  ;;  %v2458_v6 = vld [vmem:[%s3520_s1 + $0x2f4] ss:$8 sps:$4 sm:$0xff]  }
  0x43   :  { %1688 = vmatmul.mubr.bf16.vlgmr.msra.gmra.mrb[0].mxu1 %v1994_v7  ;;  %1697 = vmatpush1.bf16.msra.mxu0 %v2366_v8  ;;  %v2461_v7 = vld [vmem:[%s3520_s1 + $0x3f4] ss:$8 sps:$4 sm:$0xff]   ;;  %v2456_v8 = vld [vmem:[%s3520_s1 + $0x2f0] ss:$8 sps:$4 sm:$0xff]  }
  0x44   :  { %1738 = vmatpush1.bf16.msra.mxu1 %v2369_v9  ;;  %1698 = vmatprep.subr.bf16.mxu0 %v2374_v10  ;;  %v2459_v9 = vld [vmem:[%s3520_s1 + $0x3f0] ss:$8 sps:$4 sm:$0xff]   ;;  %v2468_v10 = vld [vmem:[%s3520_s1 + $0x404] ss:$8 sps:$4 sm:$0xff]  }
  0x45   :  { %1739 = vmatprep.subr.bf16.mxu1 %v2377_v11  ;;  %1728 = vmatprep.mubr.bf16.mxu0 %v1997_v36  ;;  %v2471_v11 = vld [vmem:[%s3520_s1 + $0x504] ss:$8 sps:$4 sm:$0xff]   ;;  %v2498_v36 = vld [vmem:[%s3520_s1 + $0x454] ss:$8 sps:$4 sm:$0xff]  }
  0x46   :  { %1769 = vmatprep.mubr.bf16.mxu1 %v1999_v37  ;;  %v2501_v37 = vld [vmem:[%s3520_s1 + $0x554] ss:$8 sps:$4 sm:$0xff]  }
  0x47   :  { %1699 = vmatpush1.bf16.msra.mxu0 %v2372_v12  ;;  %v1996_v12 = vcombine.low %v2965_v32, %v2965_v32  ;;  %v2492_v32 = vld [vmem:[%s3520_s1 + $0x444] ss:$8 sps:$4 sm:$0xff]  }
  0x48   :  { %1740 = vmatpush1.bf16.msra.mxu1 %v2375_v13  ;;  %1700 = vmatprep.subr.bf16.mxu0 %v2380_v14  ;;  %v1998_v13 = vcombine.low %v2970_v33, %v2970_v33  ;;  %v2466_v14 = vld [vmem:[%s3520_s1 + $0x400] ss:$8 sps:$4 sm:$0xff]   ;;  %v2495_v33 = vld [vmem:[%s3520_s1 + $0x544] ss:$8 sps:$4 sm:$0xff]  }
  0x49   :  { %1741 = vmatprep.subr.bf16.mxu1 %v2383_v15  ;;  %v2469_v15 = vld [vmem:[%s3520_s1 + $0x500] ss:$8 sps:$4 sm:$0xff]  }
  0x4b   :  { %1701 = vmatpush1.bf16.msra.mxu0 %v2378_v16  ;;  %v2474_v16 = vld [vmem:[%s3520_s1 + $0x414] ss:$8 sps:$4 sm:$0xff]  }
  0x4c   :  { %1742 = vmatpush1.bf16.msra.mxu1 %v2381_v17  ;;  %1702 = vmatprep.subr.bf16.mxu0 %v2386_v18  ;;  %v2477_v17 = vld [vmem:[%s3520_s1 + $0x514] ss:$8 sps:$4 sm:$0xff]   ;;  %v3115_v18 = vld [vmem:[%s3521_s0 + $0x20] sm:$0xff] }
  0x4d   :  { %1743 = vmatprep.subr.bf16.mxu1 %v2389_v19  ;;  %v3120_v19 = vld [vmem:[%s3521_s0 + $0x28] sm:$0xff] }
  0x4f   :  { %1703 = vmatpush1.bf16.msra.mxu0 %v2384_v20  ;;  %v2001_v20 = vcombine.high %v3115_v18, %v3115_v18 }
  0x50   :  { %1744 = vmatpush1.bf16.msra.mxu1 %v2387_v21  ;;  %1704 = vmatprep.subr.bf16.mxu0 %v2392_v22  ;;  %v2003_v21 = vcombine.high %v3120_v19, %v3120_v19  ;;  %v2472_v22 = vld [vmem:[%s3520_s1 + $0x410] ss:$8 sps:$4 sm:$0xff]  }
  0x51   :  { %1745 = vmatprep.subr.bf16.mxu1 %v2395_v23  ;;  %v2475_v23 = vld [vmem:[%s3520_s1 + $0x510] ss:$8 sps:$4 sm:$0xff]  }
  0x53   :  { %1705 = vmatpush1.bf16.msra.mxu0 %v2390_v24  ;;  %v2480_v24 = vld [vmem:[%s3520_s1 + $0x424] ss:$8 sps:$4 sm:$0xff]  }
  0x54   :  { %1746 = vmatpush1.bf16.msra.mxu1 %v2393_v25  ;;  %1706 = vmatprep.subr.bf16.mxu0 %v2398_v26  ;;  %v2483_v25 = vld [vmem:[%s3520_s1 + $0x524] ss:$8 sps:$4 sm:$0xff]   ;;  %v2478_v26 = vld [vmem:[%s3520_s1 + $0x420] ss:$8 sps:$4 sm:$0xff]  }
  0x55   :  { %1747 = vmatprep.subr.bf16.mxu1 %v2401_v27  ;;  %v2481_v27 = vld [vmem:[%s3520_s1 + $0x520] ss:$8 sps:$4 sm:$0xff]  }
  0x57   :  { %1707 = vmatpush1.bf16.msra.mxu0 %v2396_v28  ;;  %v2486_v28 = vld [vmem:[%s3520_s1 + $0x434] ss:$8 sps:$4 sm:$0xff]  }
  0x58   :  { %1748 = vmatpush1.bf16.msra.mxu1 %v2399_v29  ;;  %1708 = vmatprep.subr.bf16.mxu0 %v2404_v30  ;;  %v2489_v29 = vld [vmem:[%s3520_s1 + $0x534] ss:$8 sps:$4 sm:$0xff]   ;;  %v2484_v30 = vld [vmem:[%s3520_s1 + $0x430] ss:$8 sps:$4 sm:$0xff]  }
  0x59   :  { %1749 = vmatprep.subr.bf16.mxu1 %v2407_v31  ;;  %v2487_v31 = vld [vmem:[%s3520_s1 + $0x530] ss:$8 sps:$4 sm:$0xff]  }
  0x5b   :  { %1709 = vmatpush1.bf16.msra.mxu0 %v2402_v34  ;;  %v2490_v34 = vld [vmem:[%s3520_s1 + $0x440] ss:$8 sps:$4 sm:$0xff]  }
  0x5c   :  { %1750 = vmatpush1.bf16.msra.mxu1 %v2405_v35  ;;  %1710 = vmatprep.subr.bf16.mxu0 %v2410_v38  ;;  %v2493_v35 = vld [vmem:[%s3520_s1 + $0x540] ss:$8 sps:$4 sm:$0xff]   ;;  %v2496_v38 = vld [vmem:[%s3520_s1 + $0x450] ss:$8 sps:$4 sm:$0xff]  }
  0x5d   :  { %1751 = vmatprep.subr.bf16.mxu1 %v2413_v39  ;;  %v2499_v39 = vld [vmem:[%s3520_s1 + $0x550] ss:$8 sps:$4 sm:$0xff]  }
  0x5f   :  { %1711 = vmatpush1.bf16.msra.mxu0 %v2408_v40  ;;  %v2504_v40 = vld [vmem:[%s3520_s1 + $0x464] ss:$8 sps:$4 sm:$0xff]  }
  0x60   :  { %1752 = vmatpush1.bf16.msra.mxu1 %v2411_v41  ;;  %1712 = vmatprep.subr.bf16.mxu0 %v2416_v42  ;;  %v2507_v41 = vld [vmem:[%s3520_s1 + $0x564] ss:$8 sps:$4 sm:$0xff]   ;;  %v2502_v42 = vld [vmem:[%s3520_s1 + $0x460] ss:$8 sps:$4 sm:$0xff]  }
  0x61   :  { %1753 = vmatprep.subr.bf16.mxu1 %v2419_v43  ;;  %v2505_v43 = vld [vmem:[%s3520_s1 + $0x560] ss:$8 sps:$4 sm:$0xff]  }
  0x63   :  { %1713 = vmatpush1.bf16.msra.mxu0 %v2414_v44  ;;  %v2510_v44 = vld [vmem:[%s3520_s1 + $0x474] ss:$8 sps:$4 sm:$0xff]  }
  0x64   :  { %1754 = vmatpush1.bf16.msra.mxu1 %v2417_v45  ;;  %1714 = vmatprep.subr.bf16.mxu0 %v2422_v46  ;;  %v2513_v45 = vld [vmem:[%s3520_s1 + $0x574] ss:$8 sps:$4 sm:$0xff]   ;;  %v2508_v46 = vld [vmem:[%s3520_s1 + $0x470] ss:$8 sps:$4 sm:$0xff]  }
  0x65   :  { %1755 = vmatprep.subr.bf16.mxu1 %v2425_v47  ;;  %v2511_v47 = vld [vmem:[%s3520_s1 + $0x570] ss:$8 sps:$4 sm:$0xff]  }
  0x67   :  { %1715 = vmatpush1.bf16.msra.mxu0 %v2420_v48  ;;  %v2516_v48 = vld [vmem:[%s3520_s1 + $0x484] ss:$8 sps:$4 sm:$0xff]  }
  0x68   :  { %1756 = vmatpush1.bf16.msra.mxu1 %v2423_v49  ;;  %1716 = vmatprep.subr.bf16.mxu0 %v2428_v50  ;;  %v2519_v49 = vld [vmem:[%s3520_s1 + $0x584] ss:$8 sps:$4 sm:$0xff]   ;;  %v2514_v50 = vld [vmem:[%s3520_s1 + $0x480] ss:$8 sps:$4 sm:$0xff]  }
  0x69   :  { %1757 = vmatprep.subr.bf16.mxu1 %v2431_v51  ;;  %v2517_v51 = vld [vmem:[%s3520_s1 + $0x580] ss:$8 sps:$4 sm:$0xff]  }
  0x6b   :  { %1717 = vmatpush1.bf16.msra.mxu0 %v2426_v52  ;;  %v2522_v52 = vld [vmem:[%s3520_s1 + $0x494] ss:$8 sps:$4 sm:$0xff]  }
  0x6c   :  { %1758 = vmatpush1.bf16.msra.mxu1 %v2429_v53  ;;  %1718 = vmatprep.subr.bf16.mxu0 %v2434_v54  ;;  %v2525_v53 = vld [vmem:[%s3520_s1 + $0x594] ss:$8 sps:$4 sm:$0xff]   ;;  %v2520_v54 = vld [vmem:[%s3520_s1 + $0x490] ss:$8 sps:$4 sm:$0xff]  }
  0x6d   :  { %1759 = vmatprep.subr.bf16.mxu1 %v2437_v55  ;;  %v2523_v55 = vld [vmem:[%s3520_s1 + $0x590] ss:$8 sps:$4 sm:$0xff]  }
  0x6f   :  { %1719 = vmatpush1.bf16.msra.mxu0 %v2432_v56  ;;  %v2528_v56 = vld [vmem:[%s3520_s1 + $0x4a4] ss:$8 sps:$4 sm:$0xff]  }
  0x70   :  { %1760 = vmatpush1.bf16.msra.mxu1 %v2435_v57  ;;  %1720 = vmatprep.subr.bf16.mxu0 %v2440_v58  ;;  %v2531_v57 = vld [vmem:[%s3520_s1 + $0x5a4] ss:$8 sps:$4 sm:$0xff]   ;;  %v2526_v58 = vld [vmem:[%s3520_s1 + $0x4a0] ss:$8 sps:$4 sm:$0xff]  }
  0x71   :  { %1761 = vmatprep.subr.bf16.mxu1 %v2443_v59  ;;  %v2529_v59 = vld [vmem:[%s3520_s1 + $0x5a0] ss:$8 sps:$4 sm:$0xff]  }
  0x73   :  { %1721 = vmatpush1.bf16.msra.mxu0 %v2438_v60  ;;  %v2534_v60 = vld [vmem:[%s3520_s1 + $0x4b4] ss:$8 sps:$4 sm:$0xff]  }
  0x74   :  { %1762 = vmatpush1.bf16.msra.mxu1 %v2441_v61  ;;  %1722 = vmatprep.subr.bf16.mxu0 %v2446_v62  ;;  %v2537_v61 = vld [vmem:[%s3520_s1 + $0x5b4] ss:$8 sps:$4 sm:$0xff]   ;;  %v2532_v62 = vld [vmem:[%s3520_s1 + $0x4b0] ss:$8 sps:$4 sm:$0xff]  }
  0x75   :  { %1763 = vmatprep.subr.bf16.mxu1 %v2449_v63  ;;  %v2535_v63 = vld [vmem:[%s3520_s1 + $0x5b0] ss:$8 sps:$4 sm:$0xff]  }
  0x77   :  { %1723 = vmatpush1.bf16.msra.mxu0 %v2444_v0  ;;  %v2540_v0 = vld [vmem:[%s3520_s1 + $0x4c4] ss:$8 sps:$4 sm:$0xff]  }
  0x78   :  { %1764 = vmatpush1.bf16.msra.mxu1 %v2447_v1  ;;  %1724 = vmatprep.subr.bf16.mxu0 %v2452_v2  ;;  %v2543_v1 = vld [vmem:[%s3520_s1 + $0x5c4] ss:$8 sps:$4 sm:$0xff]   ;;  %v2538_v2 = vld [vmem:[%s3520_s1 + $0x4c0] ss:$8 sps:$4 sm:$0xff]  }
  0x79   :  { %1765 = vmatprep.subr.bf16.mxu1 %v2455_v3  ;;  %v2541_v3 = vld [vmem:[%s3520_s1 + $0x5c0] ss:$8 sps:$4 sm:$0xff]  }
  0x7b   :  { %1725 = vmatpush1.bf16.msra.mxu0 %v2450_v4  ;;  %v2546_v4 = vld [vmem:[%s3520_s1 + $0x4d4] ss:$8 sps:$4 sm:$0xff]  }
  0x7c   :  { %1766 = vmatpush1.bf16.msra.mxu1 %v2453_v5  ;;  %1726 = vmatprep.subr.bf16.mxu0 %v2458_v6  ;;  %v2549_v5 = vld [vmem:[%s3520_s1 + $0x5d4] ss:$8 sps:$4 sm:$0xff]   ;;  %v2544_v6 = vld [vmem:[%s3520_s1 + $0x4d0] ss:$8 sps:$4 sm:$0xff]  }
  0x7d   :  { %1767 = vmatprep.subr.bf16.mxu1 %v2461_v7  ;;  %v2547_v7 = vld [vmem:[%s3520_s1 + $0x5d0] ss:$8 sps:$4 sm:$0xff]  }
  0x7f   :  { %1727 = vmatpush1.bf16.msra.mxu0 %v2456_v8  ;;  %v2552_v8 = vld [vmem:[%s3520_s1 + $0x4e4] ss:$8 sps:$4 sm:$0xff]  }
  0x80   :  { %1768 = vmatpush1.bf16.msra.mxu1 %v2459_v9  ;;  %1778 = vmatprep.subr.bf16.mxu0 %v2468_v10  ;;  %v2555_v9 = vld [vmem:[%s3520_s1 + $0x5e4] ss:$8 sps:$4 sm:$0xff]   ;;  %v2550_v10 = vld [vmem:[%s3520_s1 + $0x4e0] ss:$8 sps:$4 sm:$0xff]  }
  0x81   :  { %1819 = vmatprep.subr.bf16.mxu1 %v2471_v11  ;;  %v2553_v11 = vld [vmem:[%s3520_s1 + $0x5e0] ss:$8 sps:$4 sm:$0xff]  }
  0x82   :  { %1729 = vmatmul.mubr.bf16.vlgmr.msra.gmra.mrb[4].mxu0 %v1996_v12  ;;  %v2558_v12 = vld [vmem:[%s3520_s1 + $0x4f4] ss:$8 sps:$4 sm:$0xff]  }
  0x83   :  { %1770 = vmatmul.mubr.bf16.vlgmr.msra.gmra.mrb[4].mxu1 %v1998_v13  ;;  %1779 = vmatpush1.bf16.msra.mxu0 %v2466_v14  ;;  %v2561_v13 = vld [vmem:[%s3520_s1 + $0x5f4] ss:$8 sps:$4 sm:$0xff]   ;;  %v2556_v14 = vld [vmem:[%s3520_s1 + $0x4f0] ss:$8 sps:$4 sm:$0xff]  }
  0x84   :  { %1820 = vmatpush1.bf16.msra.mxu1 %v2469_v15  ;;  %1780 = vmatprep.subr.bf16.mxu0 %v2474_v16  ;;  %v2559_v15 = vld [vmem:[%s3520_s1 + $0x5f0] ss:$8 sps:$4 sm:$0xff]   ;;  %v2568_v16 = vld [vmem:[%s3520_s1 + $0x604] ss:$8 sps:$4 sm:$0xff]  }
  0x85   :  { %1821 = vmatprep.subr.bf16.mxu1 %v2477_v17  ;;  %1810 = vmatprep.mubr.bf16.mxu0 %v2001_v20  ;;  %v2571_v17 = vld [vmem:[%s3520_s1 + $0x704] ss:$8 sps:$4 sm:$0xff]   ;;  %v2000_v20 = vcombine.low %v3115_v18, %v3115_v18  ;;  %v2569_v18 = vld [vmem:[%s3520_s1 + $0x700] ss:$8 sps:$4 sm:$0xff]  }
  0x86   :  { %1851 = vmatprep.mubr.bf16.mxu1 %v2003_v21  ;;  %v2002_v21 = vcombine.low %v3120_v19, %v3120_v19  ;;  %v2574_v19 = vld [vmem:[%s3520_s1 + $0x614] ss:$8 sps:$4 sm:$0xff]  }
  0x87   :  { %1781 = vmatpush1.bf16.msra.mxu0 %v2472_v22  ;;  %v3313_v22 = vld [vmem:[%s3521_s0 + $0x30] sm:$0xff] }
  0x88   :  { %1822 = vmatpush1.bf16.msra.mxu1 %v2475_v23  ;;  %1782 = vmatprep.subr.bf16.mxu0 %v2480_v24  ;;  %v3318_v23 = vld [vmem:[%s3521_s0 + $0x38] sm:$0xff]  ;;  %v2566_v24 = vld [vmem:[%s3520_s1 + $0x600] ss:$8 sps:$4 sm:$0xff]  }
  0x89   :  { %1823 = vmatprep.subr.bf16.mxu1 %v2483_v25  ;;  %v2577_v25 = vld [vmem:[%s3520_s1 + $0x714] ss:$8 sps:$4 sm:$0xff]  }
  0x8b   :  { %1783 = vmatpush1.bf16.msra.mxu0 %v2478_v26  ;;  %v2005_v26 = vcombine.high %v3313_v22, %v3313_v22 }
  0x8c   :  { %1824 = vmatpush1.bf16.msra.mxu1 %v2481_v27  ;;  %1784 = vmatprep.subr.bf16.mxu0 %v2486_v28  ;;  %v2007_v27 = vcombine.high %v3318_v23, %v3318_v23  ;;  %v2572_v28 = vld [vmem:[%s3520_s1 + $0x610] ss:$8 sps:$4 sm:$0xff]  }
  0x8d   :  { %1825 = vmatprep.subr.bf16.mxu1 %v2489_v29  ;;  %v2575_v29 = vld [vmem:[%s3520_s1 + $0x710] ss:$8 sps:$4 sm:$0xff]  }
  0x8f   :  { %1785 = vmatpush1.bf16.msra.mxu0 %v2484_v30  ;;  %v2580_v30 = vld [vmem:[%s3520_s1 + $0x624] ss:$8 sps:$4 sm:$0xff]  }
  0x90   :  { %1826 = vmatpush1.bf16.msra.mxu1 %v2487_v31  ;;  %1786 = vmatprep.subr.bf16.mxu0 %v2492_v32  ;;  %v2583_v31 = vld [vmem:[%s3520_s1 + $0x724] ss:$8 sps:$4 sm:$0xff]   ;;  %v2578_v32 = vld [vmem:[%s3520_s1 + $0x620] ss:$8 sps:$4 sm:$0xff]  }
  0x91   :  { %1827 = vmatprep.subr.bf16.mxu1 %v2495_v33  ;;  %v2581_v33 = vld [vmem:[%s3520_s1 + $0x720] ss:$8 sps:$4 sm:$0xff]  }
  0x93   :  { %1787 = vmatpush1.bf16.msra.mxu0 %v2490_v34  ;;  %v2586_v34 = vld [vmem:[%s3520_s1 + $0x634] ss:$8 sps:$4 sm:$0xff]  }
  0x94   :  { %1828 = vmatpush1.bf16.msra.mxu1 %v2493_v35  ;;  %1788 = vmatprep.subr.bf16.mxu0 %v2498_v36  ;;  %v2589_v35 = vld [vmem:[%s3520_s1 + $0x734] ss:$8 sps:$4 sm:$0xff]   ;;  %v2584_v36 = vld [vmem:[%s3520_s1 + $0x630] ss:$8 sps:$4 sm:$0xff]  }
  0x95   :  { %1829 = vmatprep.subr.bf16.mxu1 %v2501_v37  ;;  %v2587_v37 = vld [vmem:[%s3520_s1 + $0x730] ss:$8 sps:$4 sm:$0xff]  }
  0x97   :  { %1789 = vmatpush1.bf16.msra.mxu0 %v2496_v38  ;;  %v2592_v38 = vld [vmem:[%s3520_s1 + $0x644] ss:$8 sps:$4 sm:$0xff]  }
  0x98   :  { %1830 = vmatpush1.bf16.msra.mxu1 %v2499_v39  ;;  %1790 = vmatprep.subr.bf16.mxu0 %v2504_v40  ;;  %v2595_v39 = vld [vmem:[%s3520_s1 + $0x744] ss:$8 sps:$4 sm:$0xff]   ;;  %v2590_v40 = vld [vmem:[%s3520_s1 + $0x640] ss:$8 sps:$4 sm:$0xff]  }
  0x99   :  { %1831 = vmatprep.subr.bf16.mxu1 %v2507_v41  ;;  %v2593_v41 = vld [vmem:[%s3520_s1 + $0x740] ss:$8 sps:$4 sm:$0xff]  }
  0x9b   :  { %1791 = vmatpush1.bf16.msra.mxu0 %v2502_v42  ;;  %v2598_v42 = vld [vmem:[%s3520_s1 + $0x654] ss:$8 sps:$4 sm:$0xff]  }
  0x9c   :  { %1832 = vmatpush1.bf16.msra.mxu1 %v2505_v43  ;;  %1792 = vmatprep.subr.bf16.mxu0 %v2510_v44  ;;  %v2601_v43 = vld [vmem:[%s3520_s1 + $0x754] ss:$8 sps:$4 sm:$0xff]   ;;  %v2596_v44 = vld [vmem:[%s3520_s1 + $0x650] ss:$8 sps:$4 sm:$0xff]  }
  0x9d   :  { %1833 = vmatprep.subr.bf16.mxu1 %v2513_v45  ;;  %v2599_v45 = vld [vmem:[%s3520_s1 + $0x750] ss:$8 sps:$4 sm:$0xff]  }
  0x9f   :  { %1793 = vmatpush1.bf16.msra.mxu0 %v2508_v46  ;;  %v2604_v46 = vld [vmem:[%s3520_s1 + $0x664] ss:$8 sps:$4 sm:$0xff]  }
  0xa0   :  { %1834 = vmatpush1.bf16.msra.mxu1 %v2511_v47  ;;  %1794 = vmatprep.subr.bf16.mxu0 %v2516_v48  ;;  %v2607_v47 = vld [vmem:[%s3520_s1 + $0x764] ss:$8 sps:$4 sm:$0xff]   ;;  %v2602_v48 = vld [vmem:[%s3520_s1 + $0x660] ss:$8 sps:$4 sm:$0xff]  }
  0xa1   :  { %1835 = vmatprep.subr.bf16.mxu1 %v2519_v49  ;;  %v2605_v49 = vld [vmem:[%s3520_s1 + $0x760] ss:$8 sps:$4 sm:$0xff]  }
  0xa3   :  { %1795 = vmatpush1.bf16.msra.mxu0 %v2514_v50  ;;  %v2610_v50 = vld [vmem:[%s3520_s1 + $0x674] ss:$8 sps:$4 sm:$0xff]  }
  0xa4   :  { %1836 = vmatpush1.bf16.msra.mxu1 %v2517_v51  ;;  %1796 = vmatprep.subr.bf16.mxu0 %v2522_v52  ;;  %v2613_v51 = vld [vmem:[%s3520_s1 + $0x774] ss:$8 sps:$4 sm:$0xff]   ;;  %v2608_v52 = vld [vmem:[%s3520_s1 + $0x670] ss:$8 sps:$4 sm:$0xff]  }
  0xa5   :  { %1837 = vmatprep.subr.bf16.mxu1 %v2525_v53  ;;  %v2611_v53 = vld [vmem:[%s3520_s1 + $0x770] ss:$8 sps:$4 sm:$0xff]  }
  0xa7   :  { %1797 = vmatpush1.bf16.msra.mxu0 %v2520_v54  ;;  %v2616_v54 = vld [vmem:[%s3520_s1 + $0x684] ss:$8 sps:$4 sm:$0xff]  }
  0xa8   :  { %1838 = vmatpush1.bf16.msra.mxu1 %v2523_v55  ;;  %1798 = vmatprep.subr.bf16.mxu0 %v2528_v56  ;;  %v2619_v55 = vld [vmem:[%s3520_s1 + $0x784] ss:$8 sps:$4 sm:$0xff]   ;;  %v2614_v56 = vld [vmem:[%s3520_s1 + $0x680] ss:$8 sps:$4 sm:$0xff]  }
  0xa9   :  { %1839 = vmatprep.subr.bf16.mxu1 %v2531_v57  ;;  %v2617_v57 = vld [vmem:[%s3520_s1 + $0x780] ss:$8 sps:$4 sm:$0xff]  }
  0xab   :  { %1799 = vmatpush1.bf16.msra.mxu0 %v2526_v58  ;;  %v2622_v58 = vld [vmem:[%s3520_s1 + $0x694] ss:$8 sps:$4 sm:$0xff]  }
  0xac   :  { %1840 = vmatpush1.bf16.msra.mxu1 %v2529_v59  ;;  %1800 = vmatprep.subr.bf16.mxu0 %v2534_v60  ;;  %v2625_v59 = vld [vmem:[%s3520_s1 + $0x794] ss:$8 sps:$4 sm:$0xff]   ;;  %v2620_v60 = vld [vmem:[%s3520_s1 + $0x690] ss:$8 sps:$4 sm:$0xff]  }
  0xad   :  { %1841 = vmatprep.subr.bf16.mxu1 %v2537_v61  ;;  %v2623_v61 = vld [vmem:[%s3520_s1 + $0x790] ss:$8 sps:$4 sm:$0xff]  }
  0xaf   :  { %1801 = vmatpush1.bf16.msra.mxu0 %v2532_v62  ;;  %v2628_v62 = vld [vmem:[%s3520_s1 + $0x6a4] ss:$8 sps:$4 sm:$0xff]  }
  0xb0   :  { %1842 = vmatpush1.bf16.msra.mxu1 %v2535_v63  ;;  %1802 = vmatprep.subr.bf16.mxu0 %v2540_v0  ;;  %v2631_v63 = vld [vmem:[%s3520_s1 + $0x7a4] ss:$8 sps:$4 sm:$0xff]   ;;  %v2626_v0 = vld [vmem:[%s3520_s1 + $0x6a0] ss:$8 sps:$4 sm:$0xff]  }
  0xb1   :  { %1843 = vmatprep.subr.bf16.mxu1 %v2543_v1  ;;  %v2629_v1 = vld [vmem:[%s3520_s1 + $0x7a0] ss:$8 sps:$4 sm:$0xff]  }
  0xb3   :  { %1803 = vmatpush1.bf16.msra.mxu0 %v2538_v2  ;;  %v2634_v2 = vld [vmem:[%s3520_s1 + $0x6b4] ss:$8 sps:$4 sm:$0xff]  }
  0xb4   :  { %1844 = vmatpush1.bf16.msra.mxu1 %v2541_v3  ;;  %1804 = vmatprep.subr.bf16.mxu0 %v2546_v4  ;;  %v2637_v3 = vld [vmem:[%s3520_s1 + $0x7b4] ss:$8 sps:$4 sm:$0xff]   ;;  %v2632_v4 = vld [vmem:[%s3520_s1 + $0x6b0] ss:$8 sps:$4 sm:$0xff]  }
  0xb5   :  { %1845 = vmatprep.subr.bf16.mxu1 %v2549_v5  ;;  %v2635_v5 = vld [vmem:[%s3520_s1 + $0x7b0] ss:$8 sps:$4 sm:$0xff]  }
  0xb7   :  { %1805 = vmatpush1.bf16.msra.mxu0 %v2544_v6  ;;  %v2640_v6 = vld [vmem:[%s3520_s1 + $0x6c4] ss:$8 sps:$4 sm:$0xff]  }
  0xb8   :  { %1846 = vmatpush1.bf16.msra.mxu1 %v2547_v7  ;;  %1806 = vmatprep.subr.bf16.mxu0 %v2552_v8  ;;  %v2643_v7 = vld [vmem:[%s3520_s1 + $0x7c4] ss:$8 sps:$4 sm:$0xff]   ;;  %v2638_v8 = vld [vmem:[%s3520_s1 + $0x6c0] ss:$8 sps:$4 sm:$0xff]  }
  0xb9   :  { %1847 = vmatprep.subr.bf16.mxu1 %v2555_v9  ;;  %v2641_v9 = vld [vmem:[%s3520_s1 + $0x7c0] ss:$8 sps:$4 sm:$0xff]  }
  0xbb   :  { %1807 = vmatpush1.bf16.msra.mxu0 %v2550_v10  ;;  %v2646_v10 = vld [vmem:[%s3520_s1 + $0x6d4] ss:$8 sps:$4 sm:$0xff]  }
  0xbc   :  { %1848 = vmatpush1.bf16.msra.mxu1 %v2553_v11  ;;  %1808 = vmatprep.subr.bf16.mxu0 %v2558_v12  ;;  %v2649_v11 = vld [vmem:[%s3520_s1 + $0x7d4] ss:$8 sps:$4 sm:$0xff]   ;;  %v2644_v12 = vld [vmem:[%s3520_s1 + $0x6d0] ss:$8 sps:$4 sm:$0xff]  }
  0xbd   :  { %1849 = vmatprep.subr.bf16.mxu1 %v2561_v13  ;;  %v2647_v13 = vld [vmem:[%s3520_s1 + $0x7d0] ss:$8 sps:$4 sm:$0xff]  }
  0xbf   :  { %1809 = vmatpush1.bf16.msra.mxu0 %v2556_v14  ;;  %v2652_v14 = vld [vmem:[%s3520_s1 + $0x6e4] ss:$8 sps:$4 sm:$0xff]  }
  0xc0   :  { %1850 = vmatpush1.bf16.msra.mxu1 %v2559_v15  ;;  %1860 = vmatprep.subr.bf16.mxu0 %v2568_v16  ;;  %v2655_v15 = vld [vmem:[%s3520_s1 + $0x7e4] ss:$8 sps:$4 sm:$0xff]   ;;  %v2650_v16 = vld [vmem:[%s3520_s1 + $0x6e0] ss:$8 sps:$4 sm:$0xff]  }
  0xc1   :  { %1901 = vmatprep.subr.bf16.mxu1 %v2571_v17  ;;  %v2653_v17 = vld [vmem:[%s3520_s1 + $0x7e0] ss:$8 sps:$4 sm:$0xff]  }
  0xc2   :  { %1811 = vmatmul.mubr.bf16.vlgmr.msra.gmra.mrb[8].mxu0 %v2000_v20  ;;  %v2658_v20 = vld [vmem:[%s3520_s1 + $0x6f4] ss:$8 sps:$4 sm:$0xff]  }
  0xc3   :  { %1852 = vmatmul.mubr.bf16.vlgmr.msra.gmra.mrb[8].mxu1 %v2002_v21  ;;  %1861 = vmatpush1.bf16.msra.mxu0 %v2566_v24  ;;  %v2661_v21 = vld [vmem:[%s3520_s1 + $0x7f4] ss:$8 sps:$4 sm:$0xff]   ;;  %v2656_v24 = vld [vmem:[%s3520_s1 + $0x6f0] ss:$8 sps:$4 sm:$0xff]  }
  0xc4   :  { %1902 = vmatpush1.bf16.msra.mxu1 %v2569_v18  ;;  %1862 = vmatprep.subr.bf16.mxu0 %v2574_v19  ;;  %v2659_v18 = vld [vmem:[%s3520_s1 + $0x7f0] ss:$8 sps:$4 sm:$0xff]   ;;  %v2004_v19 = vcombine.low %v3313_v22, %v3313_v22 }
  0xc5   :  { %1903 = vmatprep.subr.bf16.mxu1 %v2577_v25  ;;  %1892 = vmatprep.mubr.bf16.mxu0 %v2005_v26  ;;  %v2006_v25 = vcombine.low %v3318_v23, %v3318_v23 }
  0xc6   :  { %1933 = vmatprep.mubr.bf16.mxu1 %v2007_v27 }
  0xc7   :  { %1863 = vmatpush1.bf16.msra.mxu0 %v2572_v28 }
  0xc8   :  { %1904 = vmatpush1.bf16.msra.mxu1 %v2575_v29  ;;  %1864 = vmatprep.subr.bf16.mxu0 %v2580_v30 }
  0xc9   :  { %1905 = vmatprep.subr.bf16.mxu1 %v2583_v31 }
  0xcb   :  { %1865 = vmatpush1.bf16.msra.mxu0 %v2578_v32 }
  0xcc   :  { %1906 = vmatpush1.bf16.msra.mxu1 %v2581_v33  ;;  %1866 = vmatprep.subr.bf16.mxu0 %v2586_v34 }
  0xcd   :  { %1907 = vmatprep.subr.bf16.mxu1 %v2589_v35 }
  0xcf   :  { %1867 = vmatpush1.bf16.msra.mxu0 %v2584_v36 }
  0xd0   :  { %1908 = vmatpush1.bf16.msra.mxu1 %v2587_v37  ;;  %1868 = vmatprep.subr.bf16.mxu0 %v2592_v38 }
  0xd1   :  { %1909 = vmatprep.subr.bf16.mxu1 %v2595_v39 }
  0xd3   :  { %1869 = vmatpush1.bf16.msra.mxu0 %v2590_v40 }
  0xd4   :  { %1910 = vmatpush1.bf16.msra.mxu1 %v2593_v41  ;;  %1870 = vmatprep.subr.bf16.mxu0 %v2598_v42 }
  0xd5   :  { %1911 = vmatprep.subr.bf16.mxu1 %v2601_v43 }
  0xd7   :  { %1871 = vmatpush1.bf16.msra.mxu0 %v2596_v44 }
  0xd8   :  { %1912 = vmatpush1.bf16.msra.mxu1 %v2599_v45  ;;  %1872 = vmatprep.subr.bf16.mxu0 %v2604_v46 }
  0xd9   :  { %1913 = vmatprep.subr.bf16.mxu1 %v2607_v47 }
  0xdb   :  { %1873 = vmatpush1.bf16.msra.mxu0 %v2602_v48 }
  0xdc   :  { %1914 = vmatpush1.bf16.msra.mxu1 %v2605_v49  ;;  %1874 = vmatprep.subr.bf16.mxu0 %v2610_v50 }
  0xdd   :  { %1915 = vmatprep.subr.bf16.mxu1 %v2613_v51 }
  0xdf   :  { %1875 = vmatpush1.bf16.msra.mxu0 %v2608_v52 }
  0xe0   :  { %1916 = vmatpush1.bf16.msra.mxu1 %v2611_v53  ;;  %1876 = vmatprep.subr.bf16.mxu0 %v2616_v54 }
  0xe1   :  { %1917 = vmatprep.subr.bf16.mxu1 %v2619_v55 }
  0xe3   :  { %1877 = vmatpush1.bf16.msra.mxu0 %v2614_v56 }
  0xe4   :  { %1918 = vmatpush1.bf16.msra.mxu1 %v2617_v57  ;;  %1878 = vmatprep.subr.bf16.mxu0 %v2622_v58  ;;  %v1965_v58 = vlaneseq }
  0xe5   :  { %1919 = vmatprep.subr.bf16.mxu1 %v2625_v59 }
  0xe6   :  { %v1966_v59 = vshrl.u32 %v1965_v58, 7 }
  0xe7   :  { %1879 = vmatpush1.bf16.msra.mxu0 %v2620_v60 }
  0xe8   :  { %1920 = vmatpush1.bf16.msra.mxu1 %v2623_v61  ;;  %1880 = vmatprep.subr.bf16.mxu0 %v2628_v62  ;;  %v1967_v60 = vsub.s32 0, %v1966_v59  ;;  %v1963_v61 = vld [vmem:[%s3522_s2] sm:$0x3]  ;;  %v1971_v62 = vsub.s32 1, %v1966_v59 }
  0xe9   :  { %1921 = vmatprep.subr.bf16.mxu1 %v2631_v63 }
  0xeb   :  { %1881 = vmatpush1.bf16.msra.mxu0 %v2626_v0 }
  0xec   :  { %1922 = vmatpush1.bf16.msra.mxu1 %v2629_v1  ;;  %1882 = vmatprep.subr.bf16.mxu0 %v2634_v2  ;;  %v1968_v2 = vrot.slane %v1963_v61, %v1967_v60 }
  0xed   :  { %1923 = vmatprep.subr.bf16.mxu1 %v2637_v3 }
  0xef   :  { %1883 = vmatpush1.bf16.msra.mxu0 %v2632_v4 }
  0xf0   :  { %1924 = vmatpush1.bf16.msra.mxu1 %v2635_v5  ;;  %1884 = vmatprep.subr.bf16.mxu0 %v2640_v6  ;;  %v1972_v6 = vrot.slane %v1963_v61, %v1971_v62 }
  0xf1   :  { %1925 = vmatprep.subr.bf16.mxu1 %v2643_v7 }
  0xf3   :  { %1885 = vmatpush1.bf16.msra.mxu0 %v2638_v8 }
  0xf4   :  { %1926 = vmatpush1.bf16.msra.mxu1 %v2641_v9  ;;  %1886 = vmatprep.subr.bf16.mxu0 %v2646_v10 }
  0xf5   :  { %1927 = vmatprep.subr.bf16.mxu1 %v2649_v11 }
  0xf7   :  { %1887 = vmatpush1.bf16.msra.mxu0 %v2644_v12 }
  0xf8   :  { %1928 = vmatpush1.bf16.msra.mxu1 %v2647_v13  ;;  %1888 = vmatprep.subr.bf16.mxu0 %v2652_v14 }
  0xf9   :  { %1929 = vmatprep.subr.bf16.mxu1 %v2655_v15 }
  0xfb   :  { %1889 = vmatpush1.bf16.msra.mxu0 %v2650_v16 }
  0xfc   :  { %1930 = vmatpush1.bf16.msra.mxu1 %v2653_v17  ;;  %1890 = vmatprep.subr.bf16.mxu0 %v2658_v20 }
  0xfd   :  { %1931 = vmatprep.subr.bf16.mxu1 %v2661_v21 }
  0xff   :  { %1891 = vmatpush1.bf16.msra.mxu0 %v2656_v24 }
 0x100   :  { %1932 = vmatpush1.bf16.msra.mxu1 %v2659_v18 }
 0x102   :  { %1893 = vmatmul.mubr.bf16.vlgmr.msra.gmra.mrb[12].mxu0 %v2004_v19 }
 0x103   :  { %1934 = vmatmul.mubr.bf16.vlgmr.msra.gmra.mrb[12].mxu1 %v2006_v25 }
 0x115   :  { %v1648_v26 = vpop.f32.mrb[0].mxu0 }
 0x116   :  { %v1689_v27 = vpop.f32.mrb[0].mxu1  ;;  %v1650_v29 = vpop.f32.mrb[1].mxu0 }
 0x117   :  { %v1690_v28 = vadd.f32 %v1689_v27, %v1648_v26  ;;  %v1691_v30 = vpop.f32.mrb[1].mxu1  ;;  %v1652_v32 = vpop.f32.mrb[2].mxu0 }
 0x118   :  { %v1692_v31 = vadd.f32 %v1691_v30, %v1650_v29  ;;  %v1693_v33 = vpop.f32.mrb[2].mxu1  ;;  %v1653_v34 = vpop.f32.mrb[3].mxu0 }
 0x119   :  { %v1694_v35 = vpop.f32.mrb[3].mxu1 }
 0x155   :  { %v1730_v36 = vpop.f32.mrb[4].mxu0 }
 0x156   :  { %v1771_v37 = vpop.f32.mrb[4].mxu1  ;;  %v1731_v22 = vadd.f32 %v1730_v36, %v1690_v28  ;;  %v1732_v38 = vpop.f32.mrb[5].mxu0 }
 0x157   :  { %v1773_v39 = vpop.f32.mrb[5].mxu1  ;;  %v1733_v23 = vadd.f32 %v1732_v38, %v1692_v31  ;;  %v1734_v40 = vpop.f32.mrb[6].mxu0 }
 0x158   :  { %v1775_v41 = vpop.f32.mrb[6].mxu1  ;;  %v1772_v42 = vadd.f32 %v1771_v37, %v1731_v22  ;;  %v1735_v43 = vpop.f32.mrb[7].mxu0 }
 0x159   :  { %v1776_v44 = vpop.f32.mrb[7].mxu1  ;;  %v1774_v45 = vadd.f32 %v1773_v39, %v1733_v23 }
 0x195   :  { %v1812_v46 = vpop.f32.mrb[8].mxu0 }
 0x196   :  { %v1853_v47 = vpop.f32.mrb[8].mxu1  ;;  %v1813_v48 = vadd.f32 %v1812_v46, %v1772_v42  ;;  %v1814_v49 = vpop.f32.mrb[9].mxu0 }
 0x197   :  { %v1855_v50 = vpop.f32.mrb[9].mxu1  ;;  %v1815_v51 = vadd.f32 %v1814_v49, %v1774_v45  ;;  %v1816_v52 = vpop.f32.mrb[10].mxu0 }
 0x198   :  { %v1857_v53 = vpop.f32.mrb[10].mxu1  ;;  %v1854_v54 = vadd.f32 %v1853_v47, %v1813_v48  ;;  %v1817_v55 = vpop.f32.mrb[11].mxu0 }
 0x199   :  { %v1858_v56 = vpop.f32.mrb[11].mxu1  ;;  %v1856_v57 = vadd.f32 %v1855_v50, %v1815_v51 }
 0x1d5   :  { %v1894_v63 = vpop.f32.mrb[12].mxu0 }
 0x1d6   :  { %v1935_v0 = vpop.f32.mrb[12].mxu1  ;;  %v1895_v1 = vadd.f32 %v1894_v63, %v1854_v54  ;;  %v1896_v3 = vpop.f32.mrb[13].mxu0 }
 0x1d7   :  { %v1937_v4 = vpop.f32.mrb[13].mxu1  ;;  %v1897_v5 = vadd.f32 %v1896_v3, %v1856_v57  ;;  %v1898_v7 = vpop.f32.mrb[14].mxu0 }
 0x1d8   :  { %v1939_v8 = vpop.f32.mrb[14].mxu1  ;;  %v1936_v9 = vadd.f32 %v1935_v0, %v1895_v1  ;;  %v1899_v10 = vpop.f32.mrb[15].mxu0 }
 0x1d9   :  { %v1940_v11 = vpop.f32.mrb[15].mxu1  ;;  %v1938_v12 = vadd.f32 %v1937_v4, %v1897_v5 }
 0x1da   :  { %v1975_v13 = vadd.f32 %v1968_v2, %v1936_v9 }
 0x1db   :  { %v1976_v14 = vadd.f32 %v1972_v6, %v1938_v12 }
 0x1dc   :  { %v1977_v15 = vmax.f32 %v1975_v13, 0.0 }
 0x1dd   :  { %v1978_v16 = vmax.f32 %v1976_v14, 0.0 }
 0x1df   :  { %v2265_v17 = vpack.c.bf16 %v1978_v16, %v1977_v15 }
 0x1e1   :  { %1987 = vst [vmem:[%s3523_s3] sm:$0xff] %v2265_v17 }

// kernel: vae_forward.29
= control target key start
LH: loop header
LB: loop body
LE: loop exit
PB: predicated region body
PF: predicated region fallthrough
CT: control target
= control target key end

     0   :  { %s1465_s12 = smov 0   ;;  %s1467_s13 = smov 0   ;;  %s1710_s0 = inlined_call_operand.vmem [shape: bf16[32,1024], index: 0, kind: input, shape index: {}]   ;;  %s1711_s1 = inlined_call_operand.vmem [shape: bf16[1024,128], index: 1, kind: input, shape index: {}]   ;;  %s1712_s2 = inlined_call_operand.vmem [shape: f32[1,128], index: 2, kind: input, shape index: {}]   ;;  %s1713_s3 = inlined_call_operand.vmem [shape: bf16[32,128], index: 3, kind: output, shape index: {}]  }
   0x1   :  { %s1469_s14 = smov 0  }
   0x2 LB: > { %s32_s15 = sadd.s32 1, %s1439_s13  ;;  %p1154_p0 = scmp.ge.s32.totalorder %s1443_s14, 1  ;;  %s1443_s14 = sphi %s1469_s14, %s13_s14   ;;  %s1439_s13 = sphi %s1467_s13, %s1715_s13   ;;  %s1435_s12 = sphi %s1465_s12, %s1714_s12  }
   0x3   : > { %p34_p1 = scmp.ge.s32.totalorder %s32_s15, 2  ;;  %p191_p2 = scmp.lt.s32.totalorder %s1443_s14, 3 }
   0x5   : > { %s1717_s15 = smov (%p34_p1, %s32_s15), 0  ;;  %p192_p3 = pnand %p1154_p0, %p191_p2 }
   0x6   : > { %v1357_v0 = vld [vmem:[%s1711_s1 + $0x40] sm:$0xff] (!%p192_p3)   ;;  %v1361_v4 = vld [vmem:[%s1711_s1 + $0x48] sm:$0xff] (!%p192_p3)   ;;  %v1365_v8 = vld [vmem:[%s1711_s1 + $0x50] sm:$0xff] (!%p192_p3)   ;;  %s1155_s25 = sshll.u32 (!%p192_p3), %s1435_s12, 1 }
   0x7   : > { %195 = sbr.rel (%p192_p3) target bundleno = 300 (0x12c), region = 32  ;;  %v1358_v1 = vld [vmem:[%s1711_s1 + $0xc0] sm:$0xff] (!%p192_p3)   ;;  %1245 = vmatprep.subr.bf16.mxu0 (!%p192_p3), %v1357_v0  ;;  %v1362_v5 = vld [vmem:[%s1711_s1 + $0xc8] sm:$0xff] (!%p192_p3)   ;;  %v1366_v9 = vld [vmem:[%s1711_s1 + $0xd0] sm:$0xff] (!%p192_p3)   ;;  %p236_p4 = scmp.lt.s32.totalorder (!%p192_p3), %s1155_s25, 3 }
   0x8   : > { %v1359_v2 = vld [vmem:[%s1711_s1] sm:$0xff] (!%p192_p3)   ;;  %1267 = vmatprep.subr.bf16.mxu1 (!%p192_p3), %v1358_v1  ;;  %v1363_v6 = vld [vmem:[%s1711_s1 + $0x8] sm:$0xff] (!%p192_p3)   ;;  %v1367_v10 = vld [vmem:[%s1711_s1 + $0x10] sm:$0xff] (!%p192_p3)  }
   0x9   : > { %v1360_v3 = vld [vmem:[%s1711_s1 + $0x80] sm:$0xff] (!%p192_p3)   ;;  %1246 = vmatpush3.bf16.msra.mxu0 (!%p192_p3), %v1359_v2  ;;  %v1364_v7 = vld [vmem:[%s1711_s1 + $0x88] sm:$0xff] (!%p192_p3)   ;;  %v1368_v11 = vld [vmem:[%s1711_s1 + $0x90] sm:$0xff] (!%p192_p3)  }
   0xa   : > { %1268 = vmatpush3.bf16.msra.mxu1 (!%p192_p3), %v1360_v3  ;;  %1247 = vmatprep.subr.bf16.mxu0 (!%p192_p3), %v1361_v4  ;;  %v1369_v12 = vld [vmem:[%s1711_s1 + $0x58] sm:$0xff] (!%p192_p3)   ;;  %v1373_v16 = vld [vmem:[%s1711_s1 + $0x60] sm:$0xff] (!%p192_p3)   ;;  %v1377_v20 = vld [vmem:[%s1711_s1 + $0x68] sm:$0xff] (!%p192_p3)  }
   0xb   : > { %1269 = vmatprep.subr.bf16.mxu1 (!%p192_p3), %v1362_v5  ;;  %v1370_v13 = vld [vmem:[%s1711_s1 + $0xd8] sm:$0xff] (!%p192_p3)   ;;  %v1374_v17 = vld [vmem:[%s1711_s1 + $0xe0] sm:$0xff] (!%p192_p3)   ;;  %v1378_v21 = vld [vmem:[%s1711_s1 + $0xe8] sm:$0xff] (!%p192_p3)  }
   0xc   : > { %v1371_v14 = vld [vmem:[%s1711_s1 + $0x18] sm:$0xff] (!%p192_p3)   ;;  %v1375_v18 = vld [vmem:[%s1711_s1 + $0x20] sm:$0xff] (!%p192_p3)   ;;  %v1379_v22 = vld [vmem:[%s1711_s1 + $0x28] sm:$0xff] (!%p192_p3)  }
   0xd   : > { %1248 = vmatpush3.bf16.msra.mxu0 (!%p192_p3), %v1363_v6  ;;  %v1372_v15 = vld [vmem:[%s1711_s1 + $0x98] sm:$0xff] (!%p192_p3)   ;;  %v1376_v19 = vld [vmem:[%s1711_s1 + $0xa0] sm:$0xff] (!%p192_p3)   ;;  %v1380_v23 = vld [vmem:[%s1711_s1 + $0xa8] sm:$0xff] (!%p192_p3)  }
   0xe   : > { %1270 = vmatpush3.bf16.msra.mxu1 %v1364_v7  ;;  %1249 = vmatprep.subr.bf16.mxu0 %v1365_v8  ;;  %s1719_s25 = smov (!%p236_p4, %s1155_s25), 3  ;;  %v1381_v24 = vld [vmem:[%s1711_s1 + $0x70] sm:$0xff]   ;;  %v1385_v28 = vld [vmem:[%s1711_s1 + $0x78] sm:$0xff]   ;;  %v1389_v40 = vld [vmem:[%s1711_s1 + $0x140] sm:$0xff]  }
   0xf   : > { %1271 = vmatprep.subr.bf16.mxu1 %v1366_v9  ;;  %v1382_v25 = vld [vmem:[%s1711_s1 + $0xf0] sm:$0xff]   ;;  %s1237_s24 = sshll.u32 %s1719_s25, 5  ;;  %v1386_v29 = vld [vmem:[%s1711_s1 + $0xf8] sm:$0xff]   ;;  %v1390_v41 = vld [vmem:[%s1711_s1 + $0x1c0] sm:$0xff]   ;;  %s1159_s10 = sshll.u32 %s1719_s25, 2 }
  0x10   : > { %v1383_v26 = vld [vmem:[%s1711_s1 + $0x30] sm:$0xff]   ;;  %s1582_s12 = scalar_lea.vmem %s1710_s0, %s1237_s24  ;;  %v1387_v30 = vld [vmem:[%s1711_s1 + $0x38] sm:$0xff]   ;;  %v1391_v42 = vld [vmem:[%s1711_s1 + $0x100] sm:$0xff]   ;;  %s265_s17 = scalar_lea.vmem %s1713_s3, %s1159_s10 }
  0x11   : > { %1250 = vmatpush3.bf16.msra.mxu0 %v1367_v10  ;;  %v1384_v27 = vld [vmem:[%s1711_s1 + $0xb0] sm:$0xff]   ;;  %v1388_v31 = vld [vmem:[%s1711_s1 + $0xb8] sm:$0xff]   ;;  %v268_v32 = vld [vmem:[%s1582_s12] sm:$0xff] }
  0x12   : > { %1272 = vmatpush3.bf16.msra.mxu1 %v1368_v11  ;;  %1251 = vmatprep.subr.bf16.mxu0 %v1369_v12  ;;  %v272_v33 = vld [vmem:[%s1582_s12 + $0x20] sm:$0xff]  ;;  %v269_v34 = vld [vmem:[%s1582_s12 + $0x8] sm:$0xff]  ;;  %v1397_v48 = vld [vmem:[%s1711_s1 + $0x150] sm:$0xff]  }
  0x13   : > { %1273 = vmatprep.subr.bf16.mxu1 %v1370_v13  ;;  %v1160_v35 = vcombine.low %v268_v32, %v272_v33  ;;  %v1161_v36 = vcombine.high %v268_v32, %v272_v33  ;;  %v273_v37 = vld [vmem:[%s1582_s12 + $0x28] sm:$0xff]  ;;  %v1392_v43 = vld [vmem:[%s1711_s1 + $0x180] sm:$0xff]   ;;  %v1398_v49 = vld [vmem:[%s1711_s1 + $0x1d0] sm:$0xff]  }
  0x14   : > { %v1162_v38 = vcombine.low %v269_v34, %v273_v37  ;;  %v1163_v39 = vcombine.high %v269_v34, %v273_v37  ;;  %v1393_v44 = vld [vmem:[%s1711_s1 + $0x148] sm:$0xff]   ;;  %v1399_v50 = vld [vmem:[%s1711_s1 + $0x110] sm:$0xff]   ;;  %v1401_v52 = vld [vmem:[%s1711_s1 + $0x158] sm:$0xff]  }
  0x15   : > { %1252 = vmatpush3.bf16.msra.mxu0 %v1371_v14  ;;  %860 = vmatprep.mubr.bf16.mxu0 %v1161_v36  ;;  %v1394_v45 = vld [vmem:[%s1711_s1 + $0x1c8] sm:$0xff]   ;;  %v1400_v51 = vld [vmem:[%s1711_s1 + $0x190] sm:$0xff]   ;;  %v1402_v53 = vld [vmem:[%s1711_s1 + $0x1d8] sm:$0xff]  }
  0x16   : > { %1274 = vmatpush3.bf16.msra.mxu1 %v1372_v15  ;;  %1253 = vmatprep.subr.bf16.mxu0 %v1373_v16  ;;  %v1395_v46 = vld [vmem:[%s1711_s1 + $0x108] sm:$0xff]   ;;  %v1403_v54 = vld [vmem:[%s1711_s1 + $0x118] sm:$0xff]   ;;  %v1405_v56 = vld [vmem:[%s1711_s1 + $0x160] sm:$0xff]  }
  0x17   : > { %1275 = vmatprep.subr.bf16.mxu1 %v1374_v17  ;;  %901 = vmatprep.mubr.bf16.mxu1 %v1163_v39  ;;  %v1396_v47 = vld [vmem:[%s1711_s1 + $0x188] sm:$0xff]   ;;  %v1404_v55 = vld [vmem:[%s1711_s1 + $0x198] sm:$0xff]   ;;  %v1406_v57 = vld [vmem:[%s1711_s1 + $0x1e0] sm:$0xff]  }
  0x18   : > { %v1407_v58 = vld [vmem:[%s1711_s1 + $0x120] sm:$0xff]   ;;  %v1409_v60 = vld [vmem:[%s1711_s1 + $0x168] sm:$0xff]   ;;  %v1413_v0 = vld [vmem:[%s1711_s1 + $0x170] sm:$0xff]  }
  0x19   : > { %1254 = vmatpush3.bf16.msra.mxu0 %v1375_v18  ;;  %v1408_v59 = vld [vmem:[%s1711_s1 + $0x1a0] sm:$0xff]   ;;  %v1410_v61 = vld [vmem:[%s1711_s1 + $0x1e8] sm:$0xff]   ;;  %v1414_v1 = vld [vmem:[%s1711_s1 + $0x1f0] sm:$0xff]  }
  0x1a   : > { %1276 = vmatpush3.bf16.msra.mxu1 %v1376_v19  ;;  %1255 = vmatprep.subr.bf16.mxu0 %v1377_v20  ;;  %v1411_v62 = vld [vmem:[%s1711_s1 + $0x128] sm:$0xff]   ;;  %v1415_v2 = vld [vmem:[%s1711_s1 + $0x130] sm:$0xff]   ;;  %v1417_v4 = vld [vmem:[%s1711_s1 + $0x178] sm:$0xff]  }
  0x1b   : > { %1277 = vmatprep.subr.bf16.mxu1 %v1378_v21  ;;  %v1412_v63 = vld [vmem:[%s1711_s1 + $0x1a8] sm:$0xff]   ;;  %v1416_v3 = vld [vmem:[%s1711_s1 + $0x1b0] sm:$0xff]   ;;  %v1418_v5 = vld [vmem:[%s1711_s1 + $0x1f8] sm:$0xff]  }
  0x1c   : > { %v1419_v6 = vld [vmem:[%s1711_s1 + $0x138] sm:$0xff]   ;;  %v270_v8 = vld [vmem:[%s1582_s12 + $0x10] sm:$0xff] }
  0x1d   : > { %1256 = vmatpush3.bf16.msra.mxu0 %v1379_v22  ;;  %v1420_v7 = vld [vmem:[%s1711_s1 + $0x1b8] sm:$0xff]   ;;  %v274_v9 = vld [vmem:[%s1582_s12 + $0x30] sm:$0xff] }
  0x1e   : > { %1278 = vmatpush3.bf16.msra.mxu1 %v1380_v23  ;;  %1257 = vmatprep.subr.bf16.mxu0 %v1381_v24  ;;  %v1164_v10 = vcombine.low %v270_v8, %v274_v9  ;;  %v1165_v11 = vcombine.high %v270_v8, %v274_v9  ;;  %v271_v12 = vld [vmem:[%s1582_s12 + $0x18] sm:$0xff] }
  0x1f   : > { %1279 = vmatprep.subr.bf16.mxu1 %v1382_v25  ;;  %v275_v13 = vld [vmem:[%s1582_s12 + $0x38] sm:$0xff] }
  0x20   : > { %v1166_v14 = vcombine.low %v271_v12, %v275_v13  ;;  %v1167_v15 = vcombine.high %v271_v12, %v275_v13 }
  0x21   : > { %1258 = vmatpush3.bf16.msra.mxu0 %v1383_v26 }
  0x22   : > { %1280 = vmatpush3.bf16.msra.mxu1 %v1384_v27  ;;  %1259 = vmatprep.subr.bf16.mxu0 %v1385_v28 }
  0x23   : > { %1281 = vmatprep.subr.bf16.mxu1 %v1386_v29 }
  0x25   : > { %1260 = vmatpush3.bf16.msra.mxu0 %v1387_v30 }
  0x26   : > { %1282 = vmatpush3.bf16.msra.mxu1 %v1388_v31  ;;  %1289 = vmatprep.subr.bf16.mxu0 %v1389_v40 }
  0x27   : > { %1311 = vmatprep.subr.bf16.mxu1 %v1390_v41 }
  0x28   : > { %861 = vmatmul.mubr.bf16.vlgmr.msra.gmra.mrb[0].mxu0 %v1160_v35 }
  0x29   : > { %902 = vmatmul.mubr.bf16.vlgmr.msra.gmra.mrb[0].mxu1 %v1162_v38  ;;  %1290 = vmatpush3.bf16.msra.mxu0 %v1391_v42  ;;  %v1232_v42 = vld [vmem:[%s1712_s2] ss:$0 sm:$0xff] }
  0x2a   : > { %1312 = vmatpush3.bf16.msra.mxu1 %v1392_v43  ;;  %1291 = vmatprep.subr.bf16.mxu0 %v1393_v44 }
  0x2b   : > { %1313 = vmatprep.subr.bf16.mxu1 %v1394_v45  ;;  %942 = vmatprep.mubr.bf16.mxu0 %v1165_v11 }
  0x2c   : > { %983 = vmatprep.mubr.bf16.mxu1 %v1167_v15 }
  0x2d   : > { %1292 = vmatpush3.bf16.msra.mxu0 %v1395_v46 }
  0x2e   : > { %1314 = vmatpush3.bf16.msra.mxu1 %v1396_v47  ;;  %1293 = vmatprep.subr.bf16.mxu0 %v1397_v48 }
  0x2f   : > { %1315 = vmatprep.subr.bf16.mxu1 %v1398_v49 }
  0x31   : > { %1294 = vmatpush3.bf16.msra.mxu0 %v1399_v50 }
  0x32   : > { %1316 = vmatpush3.bf16.msra.mxu1 %v1400_v51  ;;  %1295 = vmatprep.subr.bf16.mxu0 %v1401_v52 }
  0x33   : > { %1317 = vmatprep.subr.bf16.mxu1 %v1402_v53 }
  0x35   : > { %1296 = vmatpush3.bf16.msra.mxu0 %v1403_v54 }
  0x36   : > { %1318 = vmatpush3.bf16.msra.mxu1 %v1404_v55  ;;  %1297 = vmatprep.subr.bf16.mxu0 %v1405_v56 }
  0x37   : > { %1319 = vmatprep.subr.bf16.mxu1 %v1406_v57 }
  0x39   : > { %1298 = vmatpush3.bf16.msra.mxu0 %v1407_v58 }
  0x3a   : > { %1320 = vmatpush3.bf16.msra.mxu1 %v1408_v59  ;;  %1299 = vmatprep.subr.bf16.mxu0 %v1409_v60 }
  0x3b   : > { %1321 = vmatprep.subr.bf16.mxu1 %v1410_v61 }
  0x3d   : > { %1300 = vmatpush3.bf16.msra.mxu0 %v1411_v62 }
  0x3e   : > { %1322 = vmatpush3.bf16.msra.mxu1 %v1412_v63  ;;  %1301 = vmatprep.subr.bf16.mxu0 %v1413_v0 }
  0x3f   : > { %1323 = vmatprep.subr.bf16.mxu1 %v1414_v1 }
  0x41   : > { %1302 = vmatpush3.bf16.msra.mxu0 %v1415_v2 }
  0x42   : > { %1324 = vmatpush3.bf16.msra.mxu1 %v1416_v3  ;;  %1303 = vmatprep.subr.bf16.mxu0 %v1417_v4 }
  0x43   : > { %1325 = vmatprep.subr.bf16.mxu1 %v1418_v5 }
  0x45   : > { %1304 = vmatpush3.bf16.msra.mxu0 %v1419_v6 }
  0x46   : > { %1326 = vmatpush3.bf16.msra.mxu1 %v1420_v7 }
  0x48   : > { %943 = vmatmul.mubr.bf16.vlgmr.msra.gmra.mrb[4].mxu0 %v1164_v10 }
  0x49   : > { %984 = vmatmul.mubr.bf16.vlgmr.msra.gmra.mrb[4].mxu1 %v1166_v14 }
  0xfb   : > { %v1261_v16 = vpop.f32.mrb[0].mxu0 }
  0xfc   : > { %v1283_v17 = vpop.f32.mrb[0].mxu1  ;;  %v1262_v18 = vpop.f32.mrb[1].mxu0 }
  0xfd   : > { %v1263_v19 = vadd.f32 %v1262_v18, %v1261_v16  ;;  %v1284_v20 = vpop.f32.mrb[1].mxu1  ;;  %v1264_v21 = vpop.f32.mrb[2].mxu0 }
  0xfe   : > { %v1285_v22 = vadd.f32 %v1284_v20, %v1283_v17  ;;  %v1286_v23 = vpop.f32.mrb[2].mxu1  ;;  %v1265_v24 = vpop.f32.mrb[3].mxu0 }
  0xff   : > { %v1266_v25 = vadd.f32 %v1265_v24, %v1264_v21  ;;  %v1287_v26 = vpop.f32.mrb[3].mxu1 }
 0x100   : > { %v904_v27 = vadd.f32 %v1285_v22, %v1263_v19  ;;  %v1288_v28 = vadd.f32 %v1287_v26, %v1286_v23 }
 0x102   : > { %v907_v29 = vadd.f32 %v1288_v28, %v1266_v25 }
 0x11b   : > { %v1305_v30 = vpop.f32.mrb[4].mxu0 }
 0x11c   : > { %v1327_v31 = vpop.f32.mrb[4].mxu1  ;;  %v1306_v32 = vpop.f32.mrb[5].mxu0 }
 0x11d   : > { %v1307_v33 = vadd.f32 %v1306_v32, %v1305_v30  ;;  %v1328_v34 = vpop.f32.mrb[5].mxu1  ;;  %v1308_v35 = vpop.f32.mrb[6].mxu0 }
 0x11e   : > { %v1329_v36 = vadd.f32 %v1328_v34, %v1327_v31  ;;  %v1330_v37 = vpop.f32.mrb[6].mxu1  ;;  %v1309_v38 = vpop.f32.mrb[7].mxu0 }
 0x11f   : > { %v945_v39 = vadd.f32 %v1307_v33, %v904_v27  ;;  %v1310_v40 = vadd.f32 %v1309_v38, %v1308_v35  ;;  %v1331_v41 = vpop.f32.mrb[7].mxu1 }
 0x120   : > { %v1332_v43 = vadd.f32 %v1331_v41, %v1330_v37 }
 0x121   : > { %v986_v44 = vadd.f32 %v1329_v36, %v945_v39  ;;  %v948_v45 = vadd.f32 %v1310_v40, %v907_v29 }
 0x123   : > { %v1020_v46 = vadd.f32 %v1232_v42, %v986_v44  ;;  %v989_v47 = vadd.f32 %v1332_v43, %v948_v45 }
 0x125   : > { %v1021_v48 = vadd.f32 %v1232_v42, %v989_v47  ;;  %v1022_v49 = vmax.f32 %v1020_v46, 0.0 }
 0x127   : > { %v1023_v50 = vmax.f32 %v1021_v48, 0.0 }
 0x129   : > { %v1243_v51 = vpack.c.bf16 %v1023_v50, %v1022_v49 }
 0x12b   : > { %1244 = vst [vmem:[%s265_s17] sm:$0xff] %v1243_v51  }
 0x12c PF: > { %s13_s14 = sadd.s32 1, %s1443_s14   ;;  %s1714_s12 = smov %s1439_s13 }
 0x12d   : > { %p10_p5 = scmp.ge.s32.totalorder %s13_s14, 4   ;;  %s1715_s13 = smov %s1717_s15 }
 0x12f   :  { %12 = sbr.rel (!%p10_p5) target bundleno = 2 (0x2), region = 80 }

// kernel: vae_forward.33
= control target key start
LH: loop header
LB: loop body
LE: loop exit
PB: predicated region body
PF: predicated region fallthrough
CT: control target
= control target key end

     0   :  { %s1285_s12 = smov 0   ;;  %s1287_s13 = smov 0   ;;  %s1458_s0 = inlined_call_operand.vmem [shape: bf16[128,512], index: 0, kind: input, shape index: {}]   ;;  %s1459_s1 = inlined_call_operand.vmem [shape: bf16[512,128], index: 1, kind: input, shape index: {}]   ;;  %s1460_s2 = inlined_call_operand.vmem [shape: f32[1,128], index: 2, kind: input, shape index: {}]   ;;  %s1461_s3 = inlined_call_operand.vmem [shape: bf16[128,128], index: 3, kind: output, shape index: {}]  }
   0x1   :  { %s1289_s14 = smov 0  }
   0x2 LB: > { %s32_s15 = sadd.s32 1, %s1259_s13  ;;  %p984_p0 = scmp.ge.s32.totalorder %s1263_s14, 1  ;;  %s1263_s14 = sphi %s1289_s14, %s13_s14   ;;  %s1259_s13 = sphi %s1287_s13, %s1463_s13   ;;  %s1255_s12 = sphi %s1285_s12, %s1462_s12  }
   0x3   : > { %p34_p1 = scmp.ge.s32.totalorder %s32_s15, 2  ;;  %p191_p2 = scmp.lt.s32.totalorder %s1263_s14, 3 }
   0x5   : > { %s1465_s15 = smov (%p34_p1, %s32_s15), 0  ;;  %p192_p3 = pnand %p984_p0, %p191_p2 }
   0x6   : > { %v1185_v0 = vld [vmem:[%s1459_s1 + $0x40] sm:$0xff] (!%p192_p3)   ;;  %v1189_v4 = vld [vmem:[%s1459_s1 + $0x48] sm:$0xff] (!%p192_p3)   ;;  %v1193_v8 = vld [vmem:[%s1459_s1 + $0x50] sm:$0xff] (!%p192_p3)   ;;  %s985_s25 = sshll.u32 (!%p192_p3), %s1255_s12, 3 }
   0x7   : > { %195 = sbr.rel (%p192_p3) target bundleno = 291 (0x123), region = 32  ;;  %v1186_v1 = vld [vmem:[%s1459_s1 + $0xc0] sm:$0xff] (!%p192_p3)   ;;  %1081 = vmatprep.subr.bf16.mxu0 (!%p192_p3), %v1185_v0  ;;  %v1190_v5 = vld [vmem:[%s1459_s1 + $0xc8] sm:$0xff] (!%p192_p3)   ;;  %v1194_v9 = vld [vmem:[%s1459_s1 + $0xd0] sm:$0xff] (!%p192_p3)   ;;  %p236_p4 = scmp.lt.s32.totalorder (!%p192_p3), %s985_s25, 15 }
   0x8   : > { %v1187_v2 = vld [vmem:[%s1459_s1] sm:$0xff] (!%p192_p3)   ;;  %1121 = vmatprep.subr.bf16.mxu1 (!%p192_p3), %v1186_v1  ;;  %v1191_v6 = vld [vmem:[%s1459_s1 + $0x8] sm:$0xff] (!%p192_p3)   ;;  %v1195_v10 = vld [vmem:[%s1459_s1 + $0x10] sm:$0xff] (!%p192_p3)  }
   0x9   : > { %v1188_v3 = vld [vmem:[%s1459_s1 + $0x80] sm:$0xff] (!%p192_p3)   ;;  %1082 = vmatpush3.bf16.msra.mxu0 (!%p192_p3), %v1187_v2  ;;  %v1192_v7 = vld [vmem:[%s1459_s1 + $0x88] sm:$0xff] (!%p192_p3)   ;;  %v1196_v11 = vld [vmem:[%s1459_s1 + $0x90] sm:$0xff] (!%p192_p3)  }
   0xa   : > { %1122 = vmatpush3.bf16.msra.mxu1 (!%p192_p3), %v1188_v3  ;;  %1083 = vmatprep.subr.bf16.mxu0 (!%p192_p3), %v1189_v4  ;;  %v1197_v12 = vld [vmem:[%s1459_s1 + $0x58] sm:$0xff] (!%p192_p3)   ;;  %v1201_v16 = vld [vmem:[%s1459_s1 + $0x60] sm:$0xff] (!%p192_p3)   ;;  %v1205_v20 = vld [vmem:[%s1459_s1 + $0x68] sm:$0xff] (!%p192_p3)  }
   0xb   : > { %1123 = vmatprep.subr.bf16.mxu1 (!%p192_p3), %v1190_v5  ;;  %v1198_v13 = vld [vmem:[%s1459_s1 + $0xd8] sm:$0xff] (!%p192_p3)   ;;  %v1202_v17 = vld [vmem:[%s1459_s1 + $0xe0] sm:$0xff] (!%p192_p3)   ;;  %v1206_v21 = vld [vmem:[%s1459_s1 + $0xe8] sm:$0xff] (!%p192_p3)  }
   0xc   : > { %v1199_v14 = vld [vmem:[%s1459_s1 + $0x18] sm:$0xff] (!%p192_p3)   ;;  %v1203_v18 = vld [vmem:[%s1459_s1 + $0x20] sm:$0xff] (!%p192_p3)   ;;  %v1207_v22 = vld [vmem:[%s1459_s1 + $0x28] sm:$0xff] (!%p192_p3)  }
   0xd   : > { %1084 = vmatpush3.bf16.msra.mxu0 (!%p192_p3), %v1191_v6  ;;  %v1200_v15 = vld [vmem:[%s1459_s1 + $0x98] sm:$0xff] (!%p192_p3)   ;;  %v1204_v19 = vld [vmem:[%s1459_s1 + $0xa0] sm:$0xff] (!%p192_p3)   ;;  %v1208_v23 = vld [vmem:[%s1459_s1 + $0xa8] sm:$0xff] (!%p192_p3)  }
   0xe   : > { %1124 = vmatpush3.bf16.msra.mxu1 %v1192_v7  ;;  %1085 = vmatprep.subr.bf16.mxu0 %v1193_v8  ;;  %s1467_s25 = smov (!%p236_p4, %s985_s25), 15  ;;  %v1209_v24 = vld [vmem:[%s1459_s1 + $0x70] sm:$0xff]   ;;  %v1213_v28 = vld [vmem:[%s1459_s1 + $0x78] sm:$0xff]   ;;  %v1429_v57 = vld [vmem:[%s1460_s2] ss:$0 sm:$0xff] }
   0xf   : > { %1125 = vmatprep.subr.bf16.mxu1 %v1194_v9  ;;  %v1210_v25 = vld [vmem:[%s1459_s1 + $0xf0] sm:$0xff]   ;;  %s1049_s24 = sshll.u32 %s1467_s25, 4  ;;  %v1214_v29 = vld [vmem:[%s1459_s1 + $0xf8] sm:$0xff]   ;;  %s989_s17 = sshll.u32 %s1467_s25, 2 }
  0x10   : > { %v1211_v26 = vld [vmem:[%s1459_s1 + $0x30] sm:$0xff]   ;;  %s1402_s12 = scalar_lea.vmem %s1458_s0, %s1049_s24  ;;  %v1215_v30 = vld [vmem:[%s1459_s1 + $0x38] sm:$0xff]   ;;  %s1437_s20 = scalar_lea.vmem %s1461_s3, %s989_s17 }
  0x11   : > { %1086 = vmatpush3.bf16.msra.mxu0 %v1195_v10  ;;  %v1212_v27 = vld [vmem:[%s1459_s1 + $0xb0] sm:$0xff]   ;;  %v1216_v31 = vld [vmem:[%s1459_s1 + $0xb8] sm:$0xff]  }
  0x12   : > { %1126 = vmatpush3.bf16.msra.mxu1 %v1196_v11  ;;  %1087 = vmatprep.subr.bf16.mxu0 %v1197_v12  ;;  %v1217_v32 = vld [vmem:[%s1402_s12] ss:$16 sps:$4 sm:$0xff]   ;;  %v1219_v33 = vld [vmem:[%s1402_s12 + $0x4] ss:$16 sps:$4 sm:$0xff]   ;;  %v1220_v34 = vld [vmem:[%s1402_s12 + $0x8] ss:$16 sps:$4 sm:$0xff]  }
  0x13   : > { %1127 = vmatprep.subr.bf16.mxu1 %v1198_v13  ;;  %v1222_v35 = vld [vmem:[%s1402_s12 + $0xc] ss:$16 sps:$4 sm:$0xff]   ;;  %652 = vmatprep.mubr.bf16.mxu0 %v1219_v33  ;;  %v1223_v36 = vld [vmem:[%s1402_s12 + $0x24] ss:$16 sps:$4 sm:$0xff]   ;;  %v1227_v38 = vld [vmem:[%s1402_s12 + $0x20] ss:$16 sps:$4 sm:$0xff]  }
  0x14   : > { %717 = vmatprep.mubr.bf16.mxu1 %v1222_v35  ;;  %v1225_v37 = vld [vmem:[%s1402_s12 + $0x2c] ss:$16 sps:$4 sm:$0xff]   ;;  %v1228_v39 = vld [vmem:[%s1402_s12 + $0x28] ss:$16 sps:$4 sm:$0xff]   ;;  %v1229_v40 = vld [vmem:[%s1402_s12 + $0x44] ss:$16 sps:$4 sm:$0xff]  }
  0x15   : > { %1088 = vmatpush3.bf16.msra.mxu0 %v1199_v14  ;;  %v1231_v41 = vld [vmem:[%s1402_s12 + $0x4c] ss:$16 sps:$4 sm:$0xff]   ;;  %v1233_v42 = vld [vmem:[%s1402_s12 + $0x40] ss:$16 sps:$4 sm:$0xff]   ;;  %v1234_v43 = vld [vmem:[%s1402_s12 + $0x48] ss:$16 sps:$4 sm:$0xff]  }
  0x16   : > { %1128 = vmatpush3.bf16.msra.mxu1 %v1200_v15  ;;  %1089 = vmatprep.subr.bf16.mxu0 %v1201_v16  ;;  %v1235_v44 = vld [vmem:[%s1402_s12 + $0x64] ss:$16 sps:$4 sm:$0xff]   ;;  %v1237_v45 = vld [vmem:[%s1402_s12 + $0x6c] ss:$16 sps:$4 sm:$0xff]   ;;  %v1239_v46 = vld [vmem:[%s1402_s12 + $0x60] ss:$16 sps:$4 sm:$0xff]  }
  0x17   : > { %1129 = vmatprep.subr.bf16.mxu1 %v1202_v17  ;;  %v1240_v47 = vld [vmem:[%s1402_s12 + $0x68] ss:$16 sps:$4 sm:$0xff]  }
  0x19   : > { %1090 = vmatpush3.bf16.msra.mxu0 %v1203_v18 }
  0x1a   : > { %1130 = vmatpush3.bf16.msra.mxu1 %v1204_v19  ;;  %1091 = vmatprep.subr.bf16.mxu0 %v1205_v20 }
  0x1b   : > { %1131 = vmatprep.subr.bf16.mxu1 %v1206_v21 }
  0x1d   : > { %1092 = vmatpush3.bf16.msra.mxu0 %v1207_v22 }
  0x1e   : > { %1132 = vmatpush3.bf16.msra.mxu1 %v1208_v23  ;;  %1093 = vmatprep.subr.bf16.mxu0 %v1209_v24 }
  0x1f   : > { %1133 = vmatprep.subr.bf16.mxu1 %v1210_v25 }
  0x21   : > { %1094 = vmatpush3.bf16.msra.mxu0 %v1211_v26 }
  0x22   : > { %1134 = vmatpush3.bf16.msra.mxu1 %v1212_v27  ;;  %1095 = vmatprep.subr.bf16.mxu0 %v1213_v28 }
  0x23   : > { %1135 = vmatprep.subr.bf16.mxu1 %v1214_v29 }
  0x25   : > { %1096 = vmatpush3.bf16.msra.mxu0 %v1215_v30 }
  0x26   : > { %1136 = vmatpush3.bf16.msra.mxu1 %v1216_v31 }
  0x28   : > { %653 = vmatmul.mubr.bf16.vlgmr.msra.gmra.mrb[0].mxu0 %v1217_v32 }
  0x29   : > { %718 = vmatmul.mubr.bf16.vlgmr.msra.gmra.mrb[0].mxu1 %v1220_v34  ;;  %660 = vmatprep.mubr.bf16.mxu0 %v1223_v36 }
  0x2a   : > { %725 = vmatprep.mubr.bf16.mxu1 %v1225_v37 }
  0x30   : > { %661 = vmatmul.mubr.bf16.gmra.mrb[4].mxu0 %v1227_v38 }
  0x31   : > { %726 = vmatmul.mubr.bf16.gmra.mrb[4].mxu1 %v1228_v39  ;;  %668 = vmatprep.mubr.bf16.mxu0 %v1229_v40 }
  0x32   : > { %733 = vmatprep.mubr.bf16.mxu1 %v1231_v41 }
  0x38   : > { %669 = vmatmul.mubr.bf16.gmra.mrb[8].mxu0 %v1233_v42 }
  0x39   : > { %734 = vmatmul.mubr.bf16.gmra.mrb[8].mxu1 %v1234_v43  ;;  %676 = vmatprep.mubr.bf16.mxu0 %v1235_v44 }
  0x3a   : > { %741 = vmatprep.mubr.bf16.mxu1 %v1237_v45 }
  0x40   : > { %677 = vmatmul.mubr.bf16.gmra.mrb[12].mxu0 %v1239_v46 }
  0x41   : > { %742 = vmatmul.mubr.bf16.gmra.mrb[12].mxu1 %v1240_v47 }
  0xfb   : > { %v1097_v48 = vpop.f32.mrb[0].mxu0 }
  0xfc   : > { %v1137_v49 = vpop.f32.mrb[0].mxu1  ;;  %v1098_v50 = vpop.f32.mrb[1].mxu0 }
  0xfd   : > { %v1099_v51 = vadd.f32 %v1098_v50, %v1097_v48  ;;  %v1138_v52 = vpop.f32.mrb[1].mxu1  ;;  %v1100_v53 = vpop.f32.mrb[2].mxu0 }
  0xfe   : > { %v1139_v54 = vadd.f32 %v1138_v52, %v1137_v49  ;;  %v1140_v55 = vpop.f32.mrb[2].mxu1  ;;  %v1101_v56 = vpop.f32.mrb[3].mxu0 }
  0xff   : > { %v1102_v58 = vadd.f32 %v1101_v56, %v1100_v53  ;;  %v1141_v59 = vpop.f32.mrb[3].mxu1 }
 0x100   : > { %v720_v60 = vadd.f32 %v1139_v54, %v1099_v51  ;;  %v1142_v61 = vadd.f32 %v1141_v59, %v1140_v55 }
 0x102   : > { %v808_v62 = vadd.f32 %v1429_v57, %v720_v60  ;;  %v723_v63 = vadd.f32 %v1142_v61, %v1102_v58 }
 0x103   : > { %v1103_v0 = vpop.f32.mrb[4].mxu0 }
 0x104   : > { %v809_v1 = vadd.f32 %v1429_v57, %v723_v63  ;;  %v1143_v2 = vpop.f32.mrb[4].mxu1  ;;  %v1104_v3 = vpop.f32.mrb[5].mxu0  ;;  %v816_v7 = vmax.f32 %v808_v62, 0.0 }
 0x105   : > { %v1105_v4 = vadd.f32 %v1104_v3, %v1103_v0  ;;  %v1144_v5 = vpop.f32.mrb[5].mxu1  ;;  %v1106_v6 = vpop.f32.mrb[6].mxu0 }
 0x106   : > { %v817_v8 = vmax.f32 %v809_v1, 0.0  ;;  %v1145_v9 = vadd.f32 %v1144_v5, %v1143_v2  ;;  %v1146_v10 = vpop.f32.mrb[6].mxu1  ;;  %v1107_v11 = vpop.f32.mrb[7].mxu0 }
 0x107   : > { %v1108_v12 = vadd.f32 %v1107_v11, %v1106_v6  ;;  %v1147_v13 = vpop.f32.mrb[7].mxu1 }
 0x108   : > { %v1061_v14 = vpack.c.bf16 %v817_v8, %v816_v7  ;;  %v728_v15 = vadd.f32 %v1145_v9, %v1105_v4  ;;  %v1148_v16 = vadd.f32 %v1147_v13, %v1146_v10 }
 0x10a   : > { %1062 = vst [vmem:[%s1437_s20] sm:$0xff] %v1061_v14   ;;  %v810_v17 = vadd.f32 %v1429_v57, %v728_v15  ;;  %v731_v18 = vadd.f32 %v1148_v16, %v1108_v12 }
 0x10b   : > { %v1109_v19 = vpop.f32.mrb[8].mxu0 }
 0x10c   : > { %v811_v20 = vadd.f32 %v1429_v57, %v731_v18  ;;  %v1149_v21 = vpop.f32.mrb[8].mxu1  ;;  %v1110_v22 = vpop.f32.mrb[9].mxu0  ;;  %v818_v26 = vmax.f32 %v810_v17, 0.0 }
 0x10d   : > { %v1111_v23 = vadd.f32 %v1110_v22, %v1109_v19  ;;  %v1150_v24 = vpop.f32.mrb[9].mxu1  ;;  %v1112_v25 = vpop.f32.mrb[10].mxu0 }
 0x10e   : > { %v819_v27 = vmax.f32 %v811_v20, 0.0  ;;  %v1151_v28 = vadd.f32 %v1150_v24, %v1149_v21  ;;  %v1152_v29 = vpop.f32.mrb[10].mxu1  ;;  %v1113_v30 = vpop.f32.mrb[11].mxu0 }
 0x10f   : > { %v1114_v31 = vadd.f32 %v1113_v30, %v1112_v25  ;;  %v1153_v32 = vpop.f32.mrb[11].mxu1 }
 0x110   : > { %v1066_v33 = vpack.c.bf16 %v819_v27, %v818_v26  ;;  %v736_v34 = vadd.f32 %v1151_v28, %v1111_v23  ;;  %v1154_v35 = vadd.f32 %v1153_v32, %v1152_v29 }
 0x112   : > { %1078 = vst [vmem:[%s1437_s20 + $0x8] sm:$0xff] %v1066_v33   ;;  %v812_v36 = vadd.f32 %v1429_v57, %v736_v34  ;;  %v739_v37 = vadd.f32 %v1154_v35, %v1114_v31 }
 0x113   : > { %v1115_v38 = vpop.f32.mrb[12].mxu0 }
 0x114   : > { %v813_v39 = vadd.f32 %v1429_v57, %v739_v37  ;;  %v1155_v40 = vpop.f32.mrb[12].mxu1  ;;  %v1116_v41 = vpop.f32.mrb[13].mxu0  ;;  %v820_v45 = vmax.f32 %v812_v36, 0.0 }
 0x115   : > { %v1117_v42 = vadd.f32 %v1116_v41, %v1115_v38  ;;  %v1156_v43 = vpop.f32.mrb[13].mxu1  ;;  %v1118_v44 = vpop.f32.mrb[14].mxu0 }
 0x116   : > { %v821_v46 = vmax.f32 %v813_v39, 0.0  ;;  %v1157_v47 = vadd.f32 %v1156_v43, %v1155_v40  ;;  %v1158_v48 = vpop.f32.mrb[14].mxu1  ;;  %v1119_v49 = vpop.f32.mrb[15].mxu0 }
 0x117   : > { %v1120_v50 = vadd.f32 %v1119_v49, %v1118_v44  ;;  %v1159_v51 = vpop.f32.mrb[15].mxu1 }
 0x118   : > { %v1071_v52 = vpack.c.bf16 %v821_v46, %v820_v45  ;;  %v744_v53 = vadd.f32 %v1157_v47, %v1117_v42  ;;  %v1160_v54 = vadd.f32 %v1159_v51, %v1158_v48 }
 0x11a   : > { %1079 = vst [vmem:[%s1437_s20 + $0x10] sm:$0xff] %v1071_v52   ;;  %v814_v55 = vadd.f32 %v1429_v57, %v744_v53  ;;  %v747_v56 = vadd.f32 %v1160_v54, %v1120_v50 }
 0x11c   : > { %v815_v58 = vadd.f32 %v1429_v57, %v747_v56  ;;  %v822_v59 = vmax.f32 %v814_v55, 0.0 }
 0x11e   : > { %v823_v60 = vmax.f32 %v815_v58, 0.0 }
 0x120   : > { %v1076_v61 = vpack.c.bf16 %v823_v60, %v822_v59 }
 0x122   : > { %1080 = vst [vmem:[%s1437_s20 + $0x18] sm:$0xff] %v1076_v61  }
 0x123 PF: > { %s13_s14 = sadd.s32 1, %s1263_s14   ;;  %s1462_s12 = smov %s1259_s13 }
 0x124   : > { %p10_p5 = scmp.ge.s32.totalorder %s13_s14, 4   ;;  %s1463_s13 = smov %s1465_s15 }
 0x126   :  { %12 = sbr.rel (!%p10_p5) target bundleno = 2 (0x2), region = 80 }

// kernel: tile.8
= control target key start
LH: loop header
LB: loop body
LE: loop exit
PB: predicated region body
PF: predicated region fallthrough
CT: control target
= control target key end

     0   :  { %s22_s0 = inlined_call_operand.vmem [shape: f32[3], index: 0, kind: input, shape index: {}]   ;;  %s23_s1 = inlined_call_operand.vmem [shape: f32[4,3], index: 1, kind: output, shape index: {}]  }
   0x1   :  { %v4_v0 = vld [vmem:[%s22_s0] ss:$0 sm:$0xff] }
   0x2   :  { %5 = vst [vmem:[%s23_s1] sm:$0xf] %v4_v0 }

// kernel: tile.9
= control target key start
LH: loop header
LB: loop body
LE: loop exit
PB: predicated region body
PF: predicated region fallthrough
CT: control target
= control target key end

     0   :  { %vm7_vm0 = vcmask 23552   ;;  %s37_s8 = smov 3   ;;  %s38_s9 = smov 6   ;;  %vm13_vm1 = vcmask 97352   ;;  %vm19_vm2 = vcmask 72752   ;;  %vm25_vm3 = vcmask 48152   ;;  %s55_s0 = inlined_call_operand.vmem [shape: f32[4,3], index: 0, kind: input, shape index: {}]   ;;  %s56_s1 = inlined_call_operand.vmem [shape: f32[1,12], index: 1, kind: output, shape index: {}]  }
   0x1   :  { %v4_v0 = vld [vmem:[%s55_s0] sm:$0xf]  ;;  %s36_s0 = smov 9  }
   0x2   :  { %5 = vst [vmem:[#allocation1] sm:$0xf] %v4_v0 }
   0x9   :  { %v10_v1 = vld [vmem:[#allocation1 + $0x3] sm:$0x1]   ;;  %v22_v2 = vld [vmem:[#allocation1 + $0x1] sm:$0x1]   ;;  %v6_v3 = vld [vmem:[#allocation1] sm:$0x1]  }
   0xa   :  { %11 = vrot.lane.b32.xlu0 %v10_v1, %s36_s0  ;;  %23 = vrot.lane.b32.xlu1 %v22_v2, %s37_s8  ;;  %v16_v4 = vld [vmem:[#allocation1 + $0x2] sm:$0x1]   ;;  %8 = vst.msk [vmem:[#allocation0] sm:$0x1] %vm7_vm0, %v6_v3  }
   0xe   :  { %17 = vrot.lane.b32.xlu0 %v16_v4, %s38_s9 }
  0x7c   :  { %v12_v5 = vpop.permute.xlu0 %11   ;;  %v24_v6 = vpop.permute.xlu1 %23  }
  0x7d   :  { %14 = vst.msk [vmem:[#allocation0] sm:$0x1] %vm13_vm1, %v12_v5  }
  0x80   :  { %v18_v7 = vpop.permute.xlu0 %17  }
  0x81   :  { %20 = vst.msk [vmem:[#allocation0] sm:$0x1] %vm19_vm2, %v18_v7  }
  0x82   :  { %26 = vst.msk [vmem:[#allocation0] sm:$0x1] %vm25_vm3, %v24_v6  }
  0x89   :  { %v30_v8 = vld [vmem:[#allocation0] sm:$0x1] }
  0x8a   :  { %32 = vst [vmem:[%s56_s1] sm:$0x1] %v30_v8 }

// kernel: vae_forward.37
= control target key start
LH: loop header
LB: loop body
LE: loop exit
PB: predicated region body
PF: predicated region fallthrough
CT: control target
= control target key end

     0   :  { %s2958_s12 = smov 0   ;;  %s2960_s13 = smov 0   ;;  %s3391_s0 = inlined_call_operand.vmem [shape: bf16[512,640], index: 0, kind: input, shape index: {}]   ;;  %s3392_s1 = inlined_call_operand.vmem [shape: bf16[640,128], index: 1, kind: input, shape index: {}]   ;;  %s3393_s2 = inlined_call_operand.vmem [shape: f32[1,128], index: 2, kind: input, shape index: {}]   ;;  %s3394_s3 = inlined_call_operand.vmem [shape: f32[512,128], index: 3, kind: output, shape index: {}]  }
   0x1   :  { %s2962_s14 = smov 0  }
   0x2 LB: > { %s32_s15 = sadd.s32 1, %s2932_s13  ;;  %p2137_p0 = scmp.ge.s32.totalorder %s2936_s14, 1  ;;  %s2936_s14 = sphi %s2962_s14, %s13_s14   ;;  %s2932_s13 = sphi %s2960_s13, %s3396_s13   ;;  %s2928_s12 = sphi %s2958_s12, %s3395_s12  }
   0x3   : > { %p34_p1 = scmp.ge.s32.totalorder %s32_s15, 2  ;;  %p191_p2 = scmp.lt.s32.totalorder %s2936_s14, 3 }
   0x5   : > { %s3398_s15 = smov (%p34_p1, %s32_s15), 0  ;;  %p192_p3 = pnand %p2137_p0, %p191_p2 }
   0x6   : > { %v2634_v0 = vld [vmem:[%s3392_s1 + $0x40] sm:$0xff] (!%p192_p3)   ;;  %s2138_s18 = sshll.u32 (!%p192_p3), %s2928_s12, 5  ;;  %v2636_v2 = vld [vmem:[%s3392_s1 + $0x48] sm:$0xff] (!%p192_p3)   ;;  %v2638_v4 = vld [vmem:[%s3392_s1 + $0x50] sm:$0xff] (!%p192_p3)  }
   0x7   : > { %195 = sbr.rel (%p192_p3) target bundleno = 444 (0x1bc), region = 32  ;;  %v2635_v1 = vld [vmem:[%s3392_s1] sm:$0xff] (!%p192_p3)   ;;  %2297 = vmatprep.subr.bf16.mxu0 (!%p192_p3), %v2634_v0  ;;  %2593 = vmatprep.subr.bf16.mxu1 (!%p192_p3), %v2634_v0  ;;  %p236_p4 = scmp.lt.s32.totalorder (!%p192_p3), %s2138_s18, 63  ;;  %v2637_v3 = vld [vmem:[%s3392_s1 + $0x8] sm:$0xff] (!%p192_p3)   ;;  %v2639_v5 = vld [vmem:[%s3392_s1 + $0x10] sm:$0xff] (!%p192_p3)  }
   0x8   : > { %2298 = vmatpush3.bf16.msra.mxu0 (!%p192_p3), %v2635_v1  ;;  %2601 = vmatpush3.bf16.msra.mxu1 (!%p192_p3), %v2635_v1  ;;  %v2640_v6 = vld [vmem:[%s3392_s1 + $0x58] sm:$0xff] (!%p192_p3)   ;;  %v2642_v8 = vld [vmem:[%s3392_s1 + $0x60] sm:$0xff] (!%p192_p3)   ;;  %v2644_v10 = vld [vmem:[%s3392_s1 + $0x68] sm:$0xff] (!%p192_p3)  }
   0x9   : > { %2299 = vmatprep.subr.bf16.mxu0 (!%p192_p3), %v2636_v2  ;;  %2594 = vmatprep.subr.bf16.mxu1 (!%p192_p3), %v2636_v2  ;;  %v2641_v7 = vld [vmem:[%s3392_s1 + $0x18] sm:$0xff] (!%p192_p3)   ;;  %v2643_v9 = vld [vmem:[%s3392_s1 + $0x20] sm:$0xff] (!%p192_p3)   ;;  %v2645_v13 = vld [vmem:[%s3392_s1 + $0x28] sm:$0xff] (!%p192_p3)  }
   0xa   : > { %v2646_v14 = vld [vmem:[%s3392_s1 + $0x70] sm:$0xff] (!%p192_p3)   ;;  %v2648_v16 = vld [vmem:[%s3392_s1 + $0x78] sm:$0xff] (!%p192_p3)   ;;  %v2656_v18 = vld [vmem:[%s3392_s1 + $0xc0] sm:$0xff] (!%p192_p3)  }
   0xb   : > { %v2647_v15 = vld [vmem:[%s3392_s1 + $0x30] sm:$0xff] (!%p192_p3)   ;;  %v2649_v17 = vld [vmem:[%s3392_s1 + $0x38] sm:$0xff] (!%p192_p3)   ;;  %v2659_v19 = vld [vmem:[%s3392_s1 + $0x100] sm:$0xff] (!%p192_p3)  }
   0xc   : > { %2300 = vmatpush3.bf16.msra.mxu0 (!%p192_p3), %v2637_v3  ;;  %2602 = vmatpush3.bf16.msra.mxu1 (!%p192_p3), %v2637_v3  ;;  %v2657_v22 = vld [vmem:[%s3392_s1 + $0x80] sm:$0xff] (!%p192_p3)   ;;  %v2658_v23 = vld [vmem:[%s3392_s1 + $0xc8] sm:$0xff] (!%p192_p3)   ;;  %v2667_v29 = vld [vmem:[%s3392_s1 + $0xd0] sm:$0xff] (!%p192_p3)  }
   0xd   : > { %2301 = vmatprep.subr.bf16.mxu0 (!%p192_p3), %v2638_v4  ;;  %2595 = vmatprep.subr.bf16.mxu1 (!%p192_p3), %v2638_v4  ;;  %v2678_v26 = vld [vmem:[%s3392_s1 + $0x108] sm:$0xff] (!%p192_p3)   ;;  %v2668_v31 = vld [vmem:[%s3392_s1 + $0x90] sm:$0xff] (!%p192_p3)   ;;  %v2669_v33 = vld [vmem:[%s3392_s1 + $0xd8] sm:$0xff] (!%p192_p3)  }
   0xe   : > { %s3400_s18 = smov (!%p236_p4, %s2138_s18), 63  ;;  %v2660_v27 = vld [vmem:[%s3392_s1 + $0x88] sm:$0xff]   ;;  %v2670_v35 = vld [vmem:[%s3392_s1 + $0x98] sm:$0xff]   ;;  %v2677_v36 = vld [vmem:[%s3392_s1 + $0xe0] sm:$0xff]  }
   0xf   : > { %s2609_s4 = smul.u32 20, %s3400_s18  ;;  %v2691_v38 = vld [vmem:[%s3392_s1 + $0x110] sm:$0xff]   ;;  %v2679_v40 = vld [vmem:[%s3392_s1 + $0xa0] sm:$0xff]   ;;  %v2680_v41 = vld [vmem:[%s3392_s1 + $0xe8] sm:$0xff]   ;;  %s2141_s8 = sshll.u32 %s3400_s18, 3 }
  0x10   : > { %2302 = vmatpush3.bf16.msra.mxu0 %v2639_v5  ;;  %2603 = vmatpush3.bf16.msra.mxu1 %v2639_v5  ;;  %v2681_v44 = vld [vmem:[%s3392_s1 + $0xa8] sm:$0xff]   ;;  %v2705_v45 = vld [vmem:[%s3392_s1 + $0x118] sm:$0xff]   ;;  %v2688_v48 = vld [vmem:[%s3392_s1 + $0xf0] sm:$0xff]   ;;  %s3303_s10 = scalar_lea.vmem %s3394_s3, %s2141_s8 }
  0x11   : > { %2303 = vmatprep.subr.bf16.mxu0 %v2640_v6  ;;  %2596 = vmatprep.subr.bf16.mxu1 %v2640_v6  ;;  %s3009_s11 = scalar_lea.vmem %s3391_s0, %s2609_s4  ;;  %v2689_v49 = vld [vmem:[%s3392_s1 + $0xb0] sm:$0xff]   ;;  %v2690_v50 = vld [vmem:[%s3392_s1 + $0xf8] sm:$0xff]   ;;  %v2712_v52 = vld [vmem:[%s3392_s1 + $0x120] sm:$0xff]  }
  0x12   : > { %v2652_v11 = vld [vmem:[%s3009_s11 + $0x4] ss:$20 sps:$4 sm:$0xff]   ;;  %v2650_v20 = vld [vmem:[%s3009_s11] ss:$20 sps:$4 sm:$0xff]   ;;  %v2665_v28 = vld [vmem:[%s3009_s11 + $0x28] ss:$20 sps:$4 sm:$0xff]  }
  0x13   : > { %v2655_v12 = vld [vmem:[%s3009_s11 + $0x1e4] ss:$20 sps:$4 sm:$0xff]   ;;  %1132 = vmatprep.mubr.bf16.mxu0 %v2652_v11  ;;  %v2653_v21 = vld [vmem:[%s3009_s11 + $0x1e0] ss:$20 sps:$4 sm:$0xff]   ;;  %v2666_v30 = vld [vmem:[%s3009_s11 + $0x208] ss:$20 sps:$4 sm:$0xff]  }
  0x14   : > { %2304 = vmatpush3.bf16.msra.mxu0 %v2641_v7  ;;  %2604 = vmatpush3.bf16.msra.mxu1 %v2641_v7  ;;  %v2661_v24 = vld [vmem:[%s3009_s11 + $0x2c] ss:$20 sps:$4 sm:$0xff]   ;;  %v2671_v32 = vld [vmem:[%s3009_s11 + $0x54] ss:$20 sps:$4 sm:$0xff]   ;;  %v2675_v37 = vld [vmem:[%s3009_s11 + $0x50] ss:$20 sps:$4 sm:$0xff]  }
  0x15   : > { %2305 = vmatprep.subr.bf16.mxu0 %v2642_v8  ;;  %2597 = vmatprep.subr.bf16.mxu1 %v2642_v8  ;;  %v2663_v25 = vld [vmem:[%s3009_s11 + $0x20c] ss:$20 sps:$4 sm:$0xff]   ;;  %v2673_v34 = vld [vmem:[%s3009_s11 + $0x234] ss:$20 sps:$4 sm:$0xff]   ;;  %v2676_v39 = vld [vmem:[%s3009_s11 + $0x230] ss:$20 sps:$4 sm:$0xff]  }
  0x16   : > { %1228 = vmatprep.mubr.bf16.mxu1 %v2655_v12  ;;  %v2682_v42 = vld [vmem:[%s3009_s11 + $0x7c] ss:$20 sps:$4 sm:$0xff]   ;;  %v2686_v46 = vld [vmem:[%s3009_s11 + $0x78] ss:$20 sps:$4 sm:$0xff]   ;;  %v2698_v56 = vld [vmem:[%s3009_s11 + $0xa0] ss:$20 sps:$4 sm:$0xff]  }
  0x17   : > { %v2684_v43 = vld [vmem:[%s3009_s11 + $0x25c] ss:$20 sps:$4 sm:$0xff]   ;;  %v2687_v47 = vld [vmem:[%s3009_s11 + $0x258] ss:$20 sps:$4 sm:$0xff]   ;;  %v2701_v59 = vld [vmem:[%s3009_s11 + $0x34] ss:$20 sps:$4 sm:$0xff]  }
  0x18   : > { %2306 = vmatpush3.bf16.msra.mxu0 %v2643_v9  ;;  %2605 = vmatpush3.bf16.msra.mxu1 %v2643_v9  ;;  %v2693_v51 = vld [vmem:[%s3009_s11 + $0xa4] ss:$20 sps:$4 sm:$0xff]   ;;  %v2697_v53 = vld [vmem:[%s3009_s11 + $0xc] ss:$20 sps:$4 sm:$0xff]   ;;  %v2695_v55 = vld [vmem:[%s3009_s11 + $0x8] ss:$20 sps:$4 sm:$0xff]  }
  0x19   : > { %2307 = vmatprep.subr.bf16.mxu0 %v2644_v10  ;;  %2598 = vmatprep.subr.bf16.mxu1 %v2644_v10  ;;  %v2692_v54 = vld [vmem:[%s3392_s1 + $0xb8] sm:$0xff]   ;;  %v2725_v57 = vld [vmem:[%s3392_s1 + $0x128] sm:$0xff]   ;;  %v2732_v60 = vld [vmem:[%s3392_s1 + $0x130] sm:$0xff]  }
  0x1a   : > { %v2699_v58 = vld [vmem:[%s3009_s11 + $0xcc] ss:$20 sps:$4 sm:$0xff]   ;;  %v2703_v61 = vld [vmem:[%s3009_s11 + $0xc8] ss:$20 sps:$4 sm:$0xff]   ;;  %v2704_v62 = vld [vmem:[%s3009_s11 + $0x30] ss:$20 sps:$4 sm:$0xff]  }
  0x1b   : > { %v2706_v63 = vld [vmem:[%s3009_s11 + $0xf4] ss:$20 sps:$4 sm:$0xff]   ;;  %v2708_v0 = vld [vmem:[%s3009_s11 + $0x5c] ss:$20 sps:$4 sm:$0xff]   ;;  %v2711_v3 = vld [vmem:[%s3009_s11 + $0x58] ss:$20 sps:$4 sm:$0xff]  }
  0x1c   : > { %2308 = vmatpush3.bf16.msra.mxu0 %v2645_v13  ;;  %2606 = vmatpush3.bf16.msra.mxu1 %v2645_v13  ;;  %v2745_v1 = vld [vmem:[%s3392_s1 + $0x138] sm:$0xff]   ;;  %v2710_v2 = vld [vmem:[%s3009_s11 + $0xf0] ss:$20 sps:$4 sm:$0xff]   ;;  %v2718_v7 = vld [vmem:[%s3009_s11 + $0x80] ss:$20 sps:$4 sm:$0xff]  }
  0x1d   : > { %2309 = vmatprep.subr.bf16.mxu0 %v2646_v14  ;;  %2599 = vmatprep.subr.bf16.mxu1 %v2646_v14  ;;  %v2713_v4 = vld [vmem:[%s3009_s11 + $0x11c] ss:$20 sps:$4 sm:$0xff]   ;;  %v2715_v5 = vld [vmem:[%s3009_s11 + $0x84] ss:$20 sps:$4 sm:$0xff]   ;;  %v2721_v9 = vld [vmem:[%s3009_s11 + $0xac] ss:$20 sps:$4 sm:$0xff]  }
  0x1e   : > { %v2717_v6 = vld [vmem:[%s3009_s11 + $0x118] ss:$20 sps:$4 sm:$0xff]   ;;  %v2723_v10 = vld [vmem:[%s3009_s11 + $0x140] ss:$20 sps:$4 sm:$0xff]   ;;  %v2724_v11 = vld [vmem:[%s3009_s11 + $0xa8] ss:$20 sps:$4 sm:$0xff]  }
  0x1f   : > { %v2719_v8 = vld [vmem:[%s3009_s11 + $0x144] ss:$20 sps:$4 sm:$0xff]   ;;  %v2726_v12 = vld [vmem:[%s3009_s11 + $0x16c] ss:$20 sps:$4 sm:$0xff]   ;;  %v2728_v13 = vld [vmem:[%s3009_s11 + $0xd4] ss:$20 sps:$4 sm:$0xff]  }
  0x20   : > { %2310 = vmatpush3.bf16.msra.mxu0 %v2647_v15  ;;  %2607 = vmatpush3.bf16.msra.mxu1 %v2647_v15  ;;  %v2730_v14 = vld [vmem:[%s3009_s11 + $0x168] ss:$20 sps:$4 sm:$0xff]   ;;  %v2731_v15 = vld [vmem:[%s3009_s11 + $0xd0] ss:$20 sps:$4 sm:$0xff]  }
  0x21   : > { %2311 = vmatprep.subr.bf16.mxu0 %v2648_v16  ;;  %2600 = vmatprep.subr.bf16.mxu1 %v2648_v16  ;;  %v2733_v16 = vld [vmem:[%s3009_s11 + $0x194] ss:$20 sps:$4 sm:$0xff]  }
  0x24   : > { %2312 = vmatpush3.bf16.msra.mxu0 %v2649_v17  ;;  %2608 = vmatpush3.bf16.msra.mxu1 %v2649_v17  ;;  %v2735_v17 = vld [vmem:[%s3009_s11 + $0xfc] ss:$20 sps:$4 sm:$0xff]  }
  0x25   : > { %2409 = vmatprep.subr.bf16.mxu1 %v2656_v18  ;;  %2545 = vmatprep.subr.bf16.mxu0 %v2659_v19  ;;  %v2737_v18 = vld [vmem:[%s3009_s11 + $0x190] ss:$20 sps:$4 sm:$0xff]  }
  0x27   : > { %1133 = vmatmul.mubr.bf16.vlgmr.msra.gmra.mrb[0].mxu0 %v2650_v20  ;;  %1229 = vmatmul.mubr.bf16.vlgmr.msra.gmra.mrb[0].mxu1 %v2653_v21  ;;  %v2739_v20 = vld [vmem:[%s3009_s11 + $0x1bc] ss:$20 sps:$4 sm:$0xff]   ;;  %v2741_v21 = vld [vmem:[%s3009_s11 + $0x124] ss:$20 sps:$4 sm:$0xff]  }
  0x28   : > { %2410 = vmatpush3.bf16.msra.mxu1 %v2657_v22  ;;  %2546 = vmatpush3.bf16.msra.mxu0 %v2659_v19  ;;  %v2738_v19 = vld [vmem:[%s3009_s11 + $0xf8] ss:$20 sps:$4 sm:$0xff]  }
  0x29   : > { %2411 = vmatprep.subr.bf16.mxu1 %v2658_v23  ;;  %1140 = vmatprep.mubr.bf16.mxu0 %v2661_v24  ;;  %v2743_v22 = vld [vmem:[%s3009_s11 + $0x1b8] ss:$20 sps:$4 sm:$0xff]   ;;  %v2744_v23 = vld [vmem:[%s3009_s11 + $0x120] ss:$20 sps:$4 sm:$0xff]  }
  0x2a   : > { %1236 = vmatprep.mubr.bf16.mxu1 %v2663_v25  ;;  %2547 = vmatprep.subr.bf16.mxu0 %v2678_v26  ;;  %v2746_v24 = vld [vmem:[%s3009_s11 + $0x14c] ss:$20 sps:$4 sm:$0xff]   ;;  %v2748_v25 = vld [vmem:[%s3009_s11 + $0x10] ss:$20 sps:$4 sm:$0xff]  }
  0x2c   : > { %2412 = vmatpush3.bf16.msra.mxu1 %v2660_v27  ;;  %2548 = vmatpush3.bf16.msra.mxu0 %v2678_v26  ;;  %v2749_v26 = vld [vmem:[%s3009_s11 + $0x148] ss:$20 sps:$4 sm:$0xff]   ;;  %v2750_v27 = vld [vmem:[%s3009_s11 + $0x38] ss:$20 sps:$4 sm:$0xff]  }
  0x2d   : > { %2413 = vmatprep.subr.bf16.mxu1 %v2667_v29  ;;  %2549 = vmatprep.subr.bf16.mxu0 %v2691_v38  ;;  %v2753_v29 = vld [vmem:[%s3009_s11 + $0x60] ss:$20 sps:$4 sm:$0xff]  }
  0x2f   : > { %1141 = vmatmul.mubr.bf16.gmra.mrb[4].mxu0 %v2665_v28  ;;  %1237 = vmatmul.mubr.bf16.gmra.mrb[4].mxu1 %v2666_v30  ;;  %v2751_v28 = vld [vmem:[%s3009_s11 + $0x174] ss:$20 sps:$4 sm:$0xff]   ;;  %v2754_v30 = vld [vmem:[%s3009_s11 + $0x170] ss:$20 sps:$4 sm:$0xff]  }
  0x30   : > { %2414 = vmatpush3.bf16.msra.mxu1 %v2668_v31  ;;  %1148 = vmatprep.mubr.bf16.mxu0 %v2671_v32  ;;  %v2755_v31 = vld [vmem:[%s3009_s11 + $0x88] ss:$20 sps:$4 sm:$0xff]  }
  0x31   : > { %2415 = vmatprep.subr.bf16.mxu1 %v2669_v33  ;;  %1244 = vmatprep.mubr.bf16.mxu1 %v2673_v34  ;;  %v2756_v32 = vld [vmem:[%s3009_s11 + $0x19c] ss:$20 sps:$4 sm:$0xff]   ;;  %v2759_v34 = vld [vmem:[%s3009_s11 + $0x198] ss:$20 sps:$4 sm:$0xff]  }
  0x32   : > { %2550 = vmatpush3.bf16.msra.mxu0 %v2691_v38  ;;  %v2758_v33 = vld [vmem:[%s3009_s11 + $0xb0] ss:$20 sps:$4 sm:$0xff]   ;;  %v2764_v38 = vld [vmem:[%s3009_s11 + $0x1c0] ss:$20 sps:$4 sm:$0xff]  }
  0x33   : > { %2551 = vmatprep.subr.bf16.mxu0 %v2705_v45 }
  0x34   : > { %2416 = vmatpush3.bf16.msra.mxu1 %v2670_v35  ;;  %v2760_v35 = vld [vmem:[%s3009_s11 + $0xd8] ss:$20 sps:$4 sm:$0xff]  }
  0x35   : > { %2417 = vmatprep.subr.bf16.mxu1 %v2677_v36  ;;  %v2761_v36 = vld [vmem:[%s3009_s11 + $0x1c4] ss:$20 sps:$4 sm:$0xff]  }
  0x36   : > { %2552 = vmatpush3.bf16.msra.mxu0 %v2705_v45  ;;  %v2773_v45 = vld [vmem:[%s3009_s11 + $0x1a0] ss:$20 sps:$4 sm:$0xff]  }
  0x37   : > { %1149 = vmatmul.mubr.bf16.gmra.mrb[8].mxu0 %v2675_v37  ;;  %1245 = vmatmul.mubr.bf16.gmra.mrb[8].mxu1 %v2676_v39  ;;  %v2763_v37 = vld [vmem:[%s3009_s11 + $0x100] ss:$20 sps:$4 sm:$0xff]   ;;  %v2765_v39 = vld [vmem:[%s3009_s11 + $0x128] ss:$20 sps:$4 sm:$0xff]  }
  0x38   : > { %2418 = vmatpush3.bf16.msra.mxu1 %v2679_v40  ;;  %1156 = vmatprep.mubr.bf16.mxu0 %v2682_v42  ;;  %v2766_v40 = vld [vmem:[%s3009_s11 + $0x1ec] ss:$20 sps:$4 sm:$0xff]   ;;  %v2769_v42 = vld [vmem:[%s3009_s11 + $0x1e8] ss:$20 sps:$4 sm:$0xff]  }
  0x39   : > { %2419 = vmatprep.subr.bf16.mxu1 %v2680_v41  ;;  %1252 = vmatprep.mubr.bf16.mxu1 %v2684_v43  ;;  %v2768_v41 = vld [vmem:[%s3009_s11 + $0x150] ss:$20 sps:$4 sm:$0xff]   ;;  %v2770_v43 = vld [vmem:[%s3009_s11 + $0x178] ss:$20 sps:$4 sm:$0xff]  }
  0x3a   : > { %2553 = vmatprep.subr.bf16.mxu0 %v2712_v52 }
  0x3b   : > { %2554 = vmatpush3.bf16.msra.mxu0 %v2712_v52  ;;  %v2781_v52 = vld [vmem:[%s3009_s11 + $0x264] ss:$20 sps:$4 sm:$0xff]  }
  0x3c   : > { %2420 = vmatpush3.bf16.msra.mxu1 %v2681_v44  ;;  %2555 = vmatprep.subr.bf16.mxu0 %v2725_v57  ;;  %v2771_v44 = vld [vmem:[%s3009_s11 + $0x214] ss:$20 sps:$4 sm:$0xff]  }
  0x3d   : > { %2421 = vmatprep.subr.bf16.mxu1 %v2688_v48  ;;  %v2776_v48 = vld [vmem:[%s3009_s11 + $0x23c] ss:$20 sps:$4 sm:$0xff]  }
  0x3f   : > { %1157 = vmatmul.mubr.bf16.gmra.mrb[12].mxu0 %v2686_v46  ;;  %1253 = vmatmul.mubr.bf16.gmra.mrb[12].mxu1 %v2687_v47  ;;  %v2774_v46 = vld [vmem:[%s3009_s11 + $0x210] ss:$20 sps:$4 sm:$0xff]   ;;  %v2775_v47 = vld [vmem:[%s3009_s11 + $0x1c8] ss:$20 sps:$4 sm:$0xff]  }
  0x40   : > { %2422 = vmatpush3.bf16.msra.mxu1 %v2689_v49  ;;  %1164 = vmatprep.mubr.bf16.mxu0 %v2693_v51  ;;  %v2778_v49 = vld [vmem:[%s3009_s11 + $0x1f0] ss:$20 sps:$4 sm:$0xff]   ;;  %v2780_v51 = vld [vmem:[%s3009_s11 + $0x218] ss:$20 sps:$4 sm:$0xff]  }
  0x41   : > { %2423 = vmatprep.subr.bf16.mxu1 %v2690_v50  ;;  %1293 = vmatprep.mubr.bf16.mxu1 %v2697_v53  ;;  %v2779_v50 = vld [vmem:[%s3009_s11 + $0x238] ss:$20 sps:$4 sm:$0xff]   ;;  %v2783_v53 = vld [vmem:[%s3009_s11 + $0x240] ss:$20 sps:$4 sm:$0xff]  }
  0x42   : > { %2556 = vmatpush3.bf16.msra.mxu0 %v2725_v57 }
  0x43   : > { %2557 = vmatprep.subr.bf16.mxu0 %v2732_v60 }
  0x44   : > { %2424 = vmatpush3.bf16.msra.mxu1 %v2692_v54  ;;  %v2784_v54 = vld [vmem:[%s3009_s11 + $0x260] ss:$20 sps:$4 sm:$0xff]  }
  0x46   : > { %2558 = vmatpush3.bf16.msra.mxu0 %v2732_v60 }
  0x47   : > { %1165 = vmatmul.mubr.bf16.gmra.mrb[16].mxu0 %v2698_v56  ;;  %1294 = vmatmul.mubr.bf16.vlgmr.msra.gmra.mrb[16].mxu1 %v2695_v55  ;;  %v2785_v55 = vld [vmem:[%s3009_s11 + $0x268] ss:$20 sps:$4 sm:$0xff]  }
  0x48   : > { %1172 = vmatprep.mubr.bf16.mxu0 %v2699_v58  ;;  %1301 = vmatprep.mubr.bf16.mxu1 %v2701_v59 }
  0x49   : > { %2559 = vmatprep.subr.bf16.mxu0 %v2745_v1 }
  0x4a   : > { %2560 = vmatpush3.bf16.msra.mxu0 %v2745_v1 }
  0x4f   : > { %1173 = vmatmul.mubr.bf16.gmra.mrb[20].mxu0 %v2703_v61  ;;  %1302 = vmatmul.mubr.bf16.gmra.mrb[20].mxu1 %v2704_v62 }
  0x50   : > { %1180 = vmatprep.mubr.bf16.mxu0 %v2706_v63  ;;  %1309 = vmatprep.mubr.bf16.mxu1 %v2708_v0 }
  0x57   : > { %1181 = vmatmul.mubr.bf16.gmra.mrb[24].mxu0 %v2710_v2  ;;  %1310 = vmatmul.mubr.bf16.gmra.mrb[24].mxu1 %v2711_v3 }
  0x58   : > { %1188 = vmatprep.mubr.bf16.mxu0 %v2713_v4  ;;  %1317 = vmatprep.mubr.bf16.mxu1 %v2715_v5 }
  0x5f   : > { %1189 = vmatmul.mubr.bf16.gmra.mrb[28].mxu0 %v2717_v6  ;;  %1318 = vmatmul.mubr.bf16.gmra.mrb[28].mxu1 %v2718_v7 }
  0x60   : > { %1196 = vmatprep.mubr.bf16.mxu0 %v2719_v8  ;;  %1325 = vmatprep.mubr.bf16.mxu1 %v2721_v9 }
  0x67   : > { %1197 = vmatmul.mubr.bf16.gmra.mrb[32].mxu0 %v2723_v10  ;;  %1326 = vmatmul.mubr.bf16.gmra.mrb[32].mxu1 %v2724_v11 }
  0x68   : > { %1204 = vmatprep.mubr.bf16.mxu0 %v2726_v12  ;;  %1333 = vmatprep.mubr.bf16.mxu1 %v2728_v13 }
  0x6f   : > { %1205 = vmatmul.mubr.bf16.gmra.mrb[36].mxu0 %v2730_v14  ;;  %1334 = vmatmul.mubr.bf16.gmra.mrb[36].mxu1 %v2731_v15 }
  0x70   : > { %1212 = vmatprep.mubr.bf16.mxu0 %v2733_v16  ;;  %1341 = vmatprep.mubr.bf16.mxu1 %v2735_v17 }
  0x77   : > { %1213 = vmatmul.mubr.bf16.gmra.mrb[40].mxu0 %v2737_v18  ;;  %1342 = vmatmul.mubr.bf16.gmra.mrb[40].mxu1 %v2738_v19 }
  0x78   : > { %1220 = vmatprep.mubr.bf16.mxu0 %v2739_v20  ;;  %1349 = vmatprep.mubr.bf16.mxu1 %v2741_v21 }
  0x7f   : > { %1221 = vmatmul.mubr.bf16.gmra.mrb[44].mxu0 %v2743_v22  ;;  %1350 = vmatmul.mubr.bf16.gmra.mrb[44].mxu1 %v2744_v23 }
  0x80   : > { %1357 = vmatprep.mubr.bf16.mxu1 %v2746_v24  ;;  %2561 = vmatprep.mubr.bf16.mxu0 %v2748_v25 }
  0x87   : > { %1358 = vmatmul.mubr.bf16.gmra.mrb[48].mxu1 %v2749_v26  ;;  %2562 = vmatmul.mubr.bf16.vlgmr.msra.gmra.mrb[48].mxu0 %v2750_v27 }
  0x88   : > { %1365 = vmatprep.mubr.bf16.mxu1 %v2751_v28  ;;  %2565 = vmatprep.mubr.bf16.mxu0 %v2753_v29 }
  0x8f   : > { %1366 = vmatmul.mubr.bf16.gmra.mrb[52].mxu1 %v2754_v30  ;;  %2566 = vmatmul.mubr.bf16.gmra.mrb[52].mxu0 %v2755_v31 }
  0x90   : > { %1373 = vmatprep.mubr.bf16.mxu1 %v2756_v32  ;;  %2569 = vmatprep.mubr.bf16.mxu0 %v2758_v33 }
  0x97   : > { %1374 = vmatmul.mubr.bf16.gmra.mrb[56].mxu1 %v2759_v34  ;;  %2570 = vmatmul.mubr.bf16.gmra.mrb[56].mxu0 %v2760_v35 }
  0x98   : > { %1381 = vmatprep.mubr.bf16.mxu1 %v2761_v36  ;;  %2573 = vmatprep.mubr.bf16.mxu0 %v2763_v37 }
  0x9f   : > { %1382 = vmatmul.mubr.bf16.gmra.mrb[60].mxu1 %v2764_v38  ;;  %2574 = vmatmul.mubr.bf16.gmra.mrb[60].mxu0 %v2765_v39 }
  0xa0   : > { %1389 = vmatprep.mubr.bf16.mxu1 %v2766_v40  ;;  %2577 = vmatprep.mubr.bf16.mxu0 %v2768_v41 }
  0xa7   : > { %1390 = vmatmul.mubr.bf16.gmra.mrb[64].mxu1 %v2769_v42  ;;  %2578 = vmatmul.mubr.bf16.gmra.mrb[64].mxu0 %v2770_v43 }
  0xa8   : > { %1397 = vmatprep.mubr.bf16.mxu1 %v2771_v44  ;;  %2581 = vmatprep.mubr.bf16.mxu0 %v2773_v45 }
  0xaf   : > { %1398 = vmatmul.mubr.bf16.gmra.mrb[68].mxu1 %v2774_v46  ;;  %2582 = vmatmul.mubr.bf16.gmra.mrb[68].mxu0 %v2775_v47 }
  0xb0   : > { %1405 = vmatprep.mubr.bf16.mxu1 %v2776_v48  ;;  %2585 = vmatprep.mubr.bf16.mxu0 %v2778_v49 }
  0xb7   : > { %1406 = vmatmul.mubr.bf16.gmra.mrb[72].mxu1 %v2779_v50  ;;  %2586 = vmatmul.mubr.bf16.gmra.mrb[72].mxu0 %v2780_v51 }
  0xb8   : > { %1413 = vmatprep.mubr.bf16.mxu1 %v2781_v52  ;;  %2589 = vmatprep.mubr.bf16.mxu0 %v2783_v53 }
  0xbf   : > { %1414 = vmatmul.mubr.bf16.gmra.mrb[76].mxu1 %v2784_v54  ;;  %2590 = vmatmul.mubr.bf16.gmra.mrb[76].mxu0 %v2785_v55 }
  0xfa   : > { %v2385_v56 = vpop.f32.mrb[0].mxu1  ;;  %v2313_v57 = vpop.f32.mrb[0].mxu0 }
  0xfb   : > { %v2386_v58 = vpop.f32.mrb[1].mxu1  ;;  %v2314_v59 = vpop.f32.mrb[1].mxu0 }
  0xfc   : > { %v3184_v60 = vadd.f32 %v2386_v58, %v2385_v56  ;;  %v2388_v61 = vpop.f32.mrb[2].mxu1  ;;  %v2315_v62 = vadd.f32 %v2314_v59, %v2313_v57  ;;  %v2316_v63 = vpop.f32.mrb[2].mxu0 }
  0xfd   : > { %v2389_v0 = vpop.f32.mrb[3].mxu1  ;;  %v2317_v1 = vpop.f32.mrb[3].mxu0 }
  0xfe   : > { %v3186_v2 = vadd.f32 %v2389_v0, %v2388_v61  ;;  %v2318_v3 = vadd.f32 %v2317_v1, %v2316_v63 }
 0x102   : > { %v2391_v4 = vpop.f32.mrb[4].mxu1  ;;  %v2319_v5 = vpop.f32.mrb[4].mxu0 }
 0x103   : > { %v2392_v6 = vpop.f32.mrb[5].mxu1  ;;  %v2320_v7 = vpop.f32.mrb[5].mxu0 }
 0x104   : > { %v3188_v8 = vadd.f32 %v2392_v6, %v2391_v4  ;;  %v2394_v9 = vpop.f32.mrb[6].mxu1  ;;  %v2321_v10 = vadd.f32 %v2320_v7, %v2319_v5  ;;  %v2322_v11 = vpop.f32.mrb[6].mxu0 }
 0x105   : > { %v2395_v12 = vpop.f32.mrb[7].mxu1  ;;  %v2323_v13 = vpop.f32.mrb[7].mxu0 }
 0x106   : > { %v3190_v14 = vadd.f32 %v2395_v12, %v2394_v9  ;;  %v2324_v15 = vadd.f32 %v2323_v13, %v2322_v11 }
 0x10a   : > { %v2397_v16 = vpop.f32.mrb[8].mxu1  ;;  %v2325_v17 = vpop.f32.mrb[8].mxu0 }
 0x10b   : > { %v2398_v18 = vpop.f32.mrb[9].mxu1  ;;  %v2326_v19 = vpop.f32.mrb[9].mxu0 }
 0x10c   : > { %v3192_v20 = vadd.f32 %v2398_v18, %v2397_v16  ;;  %v2400_v21 = vpop.f32.mrb[10].mxu1  ;;  %v2327_v22 = vadd.f32 %v2326_v19, %v2325_v17  ;;  %v2328_v23 = vpop.f32.mrb[10].mxu0 }
 0x10d   : > { %v2401_v24 = vpop.f32.mrb[11].mxu1  ;;  %v2329_v25 = vpop.f32.mrb[11].mxu0 }
 0x10e   : > { %v3194_v26 = vadd.f32 %v2401_v24, %v2400_v21  ;;  %v2330_v27 = vadd.f32 %v2329_v25, %v2328_v23 }
 0x112   : > { %v2403_v28 = vpop.f32.mrb[12].mxu1  ;;  %v2331_v29 = vpop.f32.mrb[12].mxu0 }
 0x113   : > { %v2404_v30 = vpop.f32.mrb[13].mxu1  ;;  %v2332_v31 = vpop.f32.mrb[13].mxu0 }
 0x114   : > { %v3196_v32 = vadd.f32 %v2404_v30, %v2403_v28  ;;  %v2406_v33 = vpop.f32.mrb[14].mxu1  ;;  %v2333_v34 = vadd.f32 %v2332_v31, %v2331_v29  ;;  %v2334_v35 = vpop.f32.mrb[14].mxu0 }
 0x115   : > { %v2407_v36 = vpop.f32.mrb[15].mxu1  ;;  %v2335_v37 = vpop.f32.mrb[15].mxu0 }
 0x116   : > { %v3198_v38 = vadd.f32 %v2407_v36, %v2406_v33  ;;  %v2336_v39 = vadd.f32 %v2335_v37, %v2334_v35 }
 0x11a   : > { %v2425_v40 = vpop.f32.mrb[16].mxu1  ;;  %v2337_v41 = vpop.f32.mrb[16].mxu0 }
 0x11b   : > { %v2426_v42 = vpop.f32.mrb[17].mxu1  ;;  %v2338_v43 = vpop.f32.mrb[17].mxu0 }
 0x11c   : > { %v2427_v44 = vadd.f32 %v2426_v42, %v2425_v40  ;;  %v2428_v45 = vpop.f32.mrb[18].mxu1  ;;  %v2339_v46 = vadd.f32 %v2338_v43, %v2337_v41  ;;  %v2340_v47 = vpop.f32.mrb[18].mxu0 }
 0x11d   : > { %v2429_v48 = vpop.f32.mrb[19].mxu1  ;;  %v2341_v49 = vpop.f32.mrb[19].mxu0 }
 0x11e   : > { %v2430_v50 = vadd.f32 %v2429_v48, %v2428_v45  ;;  %v2342_v51 = vadd.f32 %v2341_v49, %v2340_v47  ;;  %v3200_v52 = vadd.f32 %v2427_v44, %v2315_v62 }
 0x120   : > { %v3202_v53 = vadd.f32 %v2430_v50, %v2318_v3 }
 0x122   : > { %v2431_v54 = vpop.f32.mrb[20].mxu1  ;;  %v2343_v55 = vpop.f32.mrb[20].mxu0 }
 0x123   : > { %v2432_v56 = vpop.f32.mrb[21].mxu1  ;;  %v2344_v57 = vpop.f32.mrb[21].mxu0 }
 0x124   : > { %v2433_v58 = vadd.f32 %v2432_v56, %v2431_v54  ;;  %v2434_v59 = vpop.f32.mrb[22].mxu1  ;;  %v2345_v61 = vadd.f32 %v2344_v57, %v2343_v55  ;;  %v2346_v63 = vpop.f32.mrb[22].mxu0 }
 0x125   : > { %v2435_v0 = vpop.f32.mrb[23].mxu1  ;;  %v2347_v1 = vpop.f32.mrb[23].mxu0 }
 0x126   : > { %v2436_v4 = vadd.f32 %v2435_v0, %v2434_v59  ;;  %v2348_v5 = vadd.f32 %v2347_v1, %v2346_v63  ;;  %v3204_v6 = vadd.f32 %v2433_v58, %v2321_v10 }
 0x128   : > { %v3206_v7 = vadd.f32 %v2436_v4, %v2324_v15 }
 0x12a   : > { %v2437_v62 = vpop.f32.mrb[24].mxu1  ;;  %v2349_v9 = vpop.f32.mrb[24].mxu0 }
 0x12b   : > { %v2438_v3 = vpop.f32.mrb[25].mxu1  ;;  %v2350_v11 = vpop.f32.mrb[25].mxu0 }
 0x12c   : > { %v2439_v12 = vadd.f32 %v2438_v3, %v2437_v62  ;;  %v2440_v13 = vpop.f32.mrb[26].mxu1  ;;  %v2351_v16 = vadd.f32 %v2350_v11, %v2349_v9  ;;  %v2352_v17 = vpop.f32.mrb[26].mxu0 }
 0x12d   : > { %v2441_v18 = vpop.f32.mrb[27].mxu1  ;;  %v2353_v19 = vpop.f32.mrb[27].mxu0 }
 0x12e   : > { %v2442_v21 = vadd.f32 %v2441_v18, %v2440_v13  ;;  %v2354_v23 = vadd.f32 %v2353_v19, %v2352_v17  ;;  %v3208_v24 = vadd.f32 %v2439_v12, %v2327_v22 }
 0x130   : > { %v3210_v25 = vadd.f32 %v2442_v21, %v2330_v27 }
 0x132   : > { %v2443_v10 = vpop.f32.mrb[28].mxu1  ;;  %v2355_v28 = vpop.f32.mrb[28].mxu0 }
 0x133   : > { %v2444_v15 = vpop.f32.mrb[29].mxu1  ;;  %v2356_v29 = vpop.f32.mrb[29].mxu0 }
 0x134   : > { %v2445_v30 = vadd.f32 %v2444_v15, %v2443_v10  ;;  %v2446_v31 = vpop.f32.mrb[30].mxu1  ;;  %v2357_v33 = vadd.f32 %v2356_v29, %v2355_v28  ;;  %v2358_v35 = vpop.f32.mrb[30].mxu0 }
 0x135   : > { %v2447_v36 = vpop.f32.mrb[31].mxu1  ;;  %v2359_v37 = vpop.f32.mrb[31].mxu0 }
 0x136   : > { %v2448_v40 = vadd.f32 %v2447_v36, %v2446_v31  ;;  %v2360_v41 = vadd.f32 %v2359_v37, %v2358_v35  ;;  %v3212_v42 = vadd.f32 %v2445_v30, %v2333_v34 }
 0x138   : > { %v3214_v43 = vadd.f32 %v2448_v40, %v2336_v39 }
 0x13a   : > { %v2449_v22 = vpop.f32.mrb[32].mxu1  ;;  %v2361_v44 = vpop.f32.mrb[32].mxu0 }
 0x13b   : > { %v2450_v27 = vpop.f32.mrb[33].mxu1  ;;  %v2362_v45 = vpop.f32.mrb[33].mxu0 }
 0x13c   : > { %v2451_v47 = vadd.f32 %v2450_v27, %v2449_v22  ;;  %v2452_v48 = vpop.f32.mrb[34].mxu1  ;;  %v3216_v49 = vadd.f32 %v2362_v45, %v2361_v44  ;;  %v2364_v50 = vpop.f32.mrb[34].mxu0 }
 0x13d   : > { %v2453_v54 = vpop.f32.mrb[35].mxu1  ;;  %v2365_v55 = vpop.f32.mrb[35].mxu0 }
 0x13e   : > { %v2454_v56 = vadd.f32 %v2453_v54, %v2452_v48  ;;  %v3218_v57 = vadd.f32 %v2365_v55, %v2364_v50  ;;  %v3220_v58 = vadd.f32 %v2451_v47, %v2339_v46 }
 0x140   : > { %v3222_v34 = vadd.f32 %v2454_v56, %v2342_v51 }
 0x142   : > { %v2455_v39 = vpop.f32.mrb[36].mxu1  ;;  %v2367_v59 = vpop.f32.mrb[36].mxu0 }
 0x143   : > { %v2456_v63 = vpop.f32.mrb[37].mxu1  ;;  %v2368_v0 = vpop.f32.mrb[37].mxu0 }
 0x144   : > { %v2457_v1 = vadd.f32 %v2456_v63, %v2455_v39  ;;  %v2458_v4 = vpop.f32.mrb[38].mxu1  ;;  %v3224_v62 = vadd.f32 %v2368_v0, %v2367_v59  ;;  %v2370_v9 = vpop.f32.mrb[38].mxu0  ;;  %v3251_v63 = vld [vmem:[%s3393_s2] ss:$0 sm:$0xff] }
 0x145   : > { %v2459_v3 = vpop.f32.mrb[39].mxu1  ;;  %v2371_v11 = vpop.f32.mrb[39].mxu0 }
 0x146   : > { %v2460_v12 = vadd.f32 %v2459_v3, %v2458_v4  ;;  %v3226_v13 = vadd.f32 %v2371_v11, %v2370_v9  ;;  %v3228_v17 = vadd.f32 %v2457_v1, %v2345_v61 }
 0x148   : > { %v3230_v46 = vadd.f32 %v2460_v12, %v2348_v5 }
 0x14a   : > { %v2461_v51 = vpop.f32.mrb[40].mxu1  ;;  %v2373_v18 = vpop.f32.mrb[40].mxu0 }
 0x14b   : > { %v2462_v19 = vpop.f32.mrb[41].mxu1  ;;  %v2374_v21 = vpop.f32.mrb[41].mxu0 }
 0x14c   : > { %v2463_v10 = vadd.f32 %v2462_v19, %v2461_v51  ;;  %v2464_v28 = vpop.f32.mrb[42].mxu1  ;;  %v3232_v15 = vadd.f32 %v2374_v21, %v2373_v18  ;;  %v2376_v29 = vpop.f32.mrb[42].mxu0 }
 0x14d   : > { %v2465_v30 = vpop.f32.mrb[43].mxu1  ;;  %v2377_v31 = vpop.f32.mrb[43].mxu0 }
 0x14e   : > { %v2466_v35 = vadd.f32 %v2465_v30, %v2464_v28  ;;  %v3234_v36 = vadd.f32 %v2377_v31, %v2376_v29  ;;  %v3236_v37 = vadd.f32 %v2463_v10, %v2351_v16 }
 0x150   : > { %v3238_v61 = vadd.f32 %v2466_v35, %v2354_v23 }
 0x152   : > { %v2467_v5 = vpop.f32.mrb[44].mxu1  ;;  %v2379_v40 = vpop.f32.mrb[44].mxu0 }
 0x153   : > { %v2468_v22 = vpop.f32.mrb[45].mxu1  ;;  %v2380_v44 = vpop.f32.mrb[45].mxu0 }
 0x154   : > { %v2469_v27 = vadd.f32 %v2468_v22, %v2467_v5  ;;  %v2470_v45 = vpop.f32.mrb[46].mxu1  ;;  %v3240_v47 = vadd.f32 %v2380_v44, %v2379_v40  ;;  %v2382_v48 = vpop.f32.mrb[46].mxu0 }
 0x155   : > { %v2471_v50 = vpop.f32.mrb[47].mxu1  ;;  %v2383_v54 = vpop.f32.mrb[47].mxu0 }
 0x156   : > { %v2472_v55 = vadd.f32 %v2471_v50, %v2470_v45  ;;  %v3242_v56 = vadd.f32 %v2383_v54, %v2382_v48  ;;  %v3244_v39 = vadd.f32 %v2469_v27, %v2357_v33 }
 0x158   : > { %v3246_v16 = vadd.f32 %v2472_v55, %v2360_v41 }
 0x15a   : > { %v2473_v23 = vpop.f32.mrb[48].mxu1  ;;  %v2563_v59 = vpop.f32.mrb[48].mxu0 }
 0x15b   : > { %v1465_v0 = vadd.f32 %v2563_v59, %v3204_v6  ;;  %v2474_v1 = vpop.f32.mrb[49].mxu1  ;;  %v1456_v4 = vpop.f32.mrb[49].mxu0 }
 0x15c   : > { %v2475_v9 = vadd.f32 %v2474_v1, %v2473_v23  ;;  %v1457_v3 = vadd.f32 %v1456_v4, %v3200_v52  ;;  %v2476_v11 = vpop.f32.mrb[50].mxu1  ;;  %v2564_v12 = vpop.f32.mrb[50].mxu0 }
 0x15d   : > { %v1763_v33 = vadd.f32 %v3251_v63, %v1465_v0  ;;  %v1468_v41 = vadd.f32 %v2564_v12, %v3206_v7  ;;  %v2477_v51 = vpop.f32.mrb[51].mxu1  ;;  %v1459_v18 = vpop.f32.mrb[51].mxu0 }
 0x15e   : > { %v1761_v19 = vadd.f32 %v3251_v63, %v1457_v3  ;;  %v2478_v21 = vadd.f32 %v2477_v51, %v2476_v11  ;;  %v1460_v10 = vadd.f32 %v1459_v18, %v3202_v53  ;;  %v3260_v6 = vadd.f32 %v2475_v9, %v3216_v49 }
 0x15f   : > { %v2265_v28 = vmul.f32 -1.442695, %v1763_v33  ;;  %v1764_v29 = vadd.f32 %v3251_v63, %v1468_v41 }
 0x160   : > { %v2263_v52 = vmul.f32 -1.442695, %v1761_v19  ;;  %v1762_v30 = vadd.f32 %v3251_v63, %v1460_v10  ;;  %v3265_v31 = vadd.f32 %v2478_v21, %v3218_v57 }
 0x161   : > { %2786 = vpow2.f32 %v2265_v28  ;;  %v2266_v7 = vmul.f32 -1.442695, %v1764_v29 }
 0x162   : > { %2788 = vpow2.f32 %v2263_v52  ;;  %v2264_v35 = vmul.f32 -1.442695, %v1762_v30  ;;  %v2479_v5 = vpop.f32.mrb[52].mxu1  ;;  %v2567_v40 = vpop.f32.mrb[52].mxu0 }
 0x163   : > { %2790 = vpow2.f32 %v2266_v7  ;;  %v1481_v53 = vadd.f32 %v2567_v40, %v3212_v42  ;;  %v2480_v49 = vpop.f32.mrb[53].mxu1  ;;  %v1472_v22 = vpop.f32.mrb[53].mxu0 }
 0x164   : > { %2792 = vpow2.f32 %v2264_v35  ;;  %v2481_v44 = vadd.f32 %v2480_v49, %v2479_v5  ;;  %v1473_v27 = vadd.f32 %v1472_v22, %v3208_v24  ;;  %v2482_v45 = vpop.f32.mrb[54].mxu1  ;;  %v2568_v48 = vpop.f32.mrb[54].mxu0 }
 0x165   : > { %v1767_v57 = vadd.f32 %v3251_v63, %v1481_v53  ;;  %v1484_v50 = vadd.f32 %v2568_v48, %v3214_v43  ;;  %v2483_v54 = vpop.f32.mrb[55].mxu1  ;;  %v1475_v55 = vpop.f32.mrb[55].mxu0 }
 0x166   : > { %v1765_v23 = vadd.f32 %v3251_v63, %v1473_v27  ;;  %v2484_v59 = vadd.f32 %v2483_v54, %v2482_v45  ;;  %v1476_v0 = vadd.f32 %v1475_v55, %v3210_v25  ;;  %v3274_v42 = vadd.f32 %v2481_v44, %v3224_v62 }
 0x167   : > { %v2269_v1 = vmul.f32 -1.442695, %v1767_v57  ;;  %v1768_v4 = vadd.f32 %v3251_v63, %v1484_v50 }
 0x168   : > { %v2267_v24 = vmul.f32 -1.442695, %v1765_v23  ;;  %v1766_v9 = vadd.f32 %v3251_v63, %v1476_v0  ;;  %v3279_v3 = vadd.f32 %v2484_v59, %v3226_v13 }
 0x169   : > { %2794 = vpow2.f32 %v2269_v1  ;;  %v2270_v43 = vmul.f32 -1.442695, %v1768_v4 }
 0x16a   : > { %2796 = vpow2.f32 %v2267_v24  ;;  %v2268_v11 = vmul.f32 -1.442695, %v1766_v9  ;;  %v2485_v12 = vpop.f32.mrb[56].mxu1  ;;  %v2571_v33 = vpop.f32.mrb[56].mxu0 }
 0x16b   : > { %v2787_v41 = vpop.eup %2786  ;;  %2798 = vpow2.f32 %v2270_v43  ;;  %v1497_v25 = vadd.f32 %v2571_v33, %v3228_v17  ;;  %v2486_v62 = vpop.f32.mrb[57].mxu1 }
 0x16c   : > { %v1488_v51 = vpop.f32.mrb[57].mxu0  ;;  %v2789_v18 = vpop.eup %2788  ;;  %v1891_v19 = vadd.f32 1.0, %v2787_v41  ;;  %2800 = vpow2.f32 %v2268_v11  ;;  %v2487_v21 = vadd.f32 %v2486_v62, %v2485_v12 }
 0x16d   : > { %v1489_v10 = vadd.f32 %v1488_v51, %v3220_v58  ;;  %v2488_v13 = vpop.f32.mrb[58].mxu1  ;;  %v2572_v28 = vpop.f32.mrb[58].mxu0  ;;  %v1889_v52 = vadd.f32 1.0, %v2789_v18  ;;  %v1771_v30 = vadd.f32 %v3251_v63, %v1497_v25 }
 0x16e   : > { %v2791_v29 = vpop.eup %2790  ;;  %v1500_v7 = vadd.f32 %v2572_v28, %v3230_v46  ;;  %v2489_v35 = vpop.f32.mrb[59].mxu1  ;;  %2802 = vrcp.f32 %v1891_v19  ;;  %v3289_v46 = vadd.f32 %v2487_v21, %v3232_v15 }
 0x16f   : > { %v1491_v5 = vpop.f32.mrb[59].mxu0  ;;  %v2793_v40 = vpop.eup %2792  ;;  %v1892_v17 = vadd.f32 1.0, %v2791_v29  ;;  %v1769_v53 = vadd.f32 %v3251_v63, %v1489_v10  ;;  %v2490_v49 = vadd.f32 %v2489_v35, %v2488_v13  ;;  %2804 = vrcp.f32 %v1889_v52 }
 0x170   : > { %v1890_v22 = vadd.f32 1.0, %v2793_v40  ;;  %v2273_v58 = vmul.f32 -1.442695, %v1771_v30  ;;  %v1772_v44 = vadd.f32 %v3251_v63, %v1500_v7  ;;  %v1492_v45 = vadd.f32 %v1491_v5, %v3222_v34 }
 0x171   : > { %2806 = vrcp.f32 %v1892_v17  ;;  %v2271_v27 = vmul.f32 -1.442695, %v1769_v53  ;;  %v3292_v57 = vadd.f32 %v2490_v49, %v3234_v36 }
 0x172   : > { %2808 = vrcp.f32 %v1890_v22  ;;  %v2274_v48 = vmul.f32 -1.442695, %v1772_v44  ;;  %v1770_v50 = vadd.f32 %v3251_v63, %v1492_v45  ;;  %v2491_v54 = vpop.f32.mrb[60].mxu1  ;;  %v2575_v55 = vpop.f32.mrb[60].mxu0 }
 0x173   : > { %2810 = vpow2.f32 %v2273_v58  ;;  %v2795_v23 = vpop.eup %2794  ;;  %v1513_v59 = vadd.f32 %v2575_v55, %v3244_v39  ;;  %v2492_v0 = vpop.f32.mrb[61].mxu1 }
 0x174   : > { %2812 = vpow2.f32 %v2271_v27  ;;  %v1504_v34 = vpop.f32.mrb[61].mxu0  ;;  %v2797_v1 = vpop.eup %2796  ;;  %v1895_v15 = vadd.f32 1.0, %v2795_v23  ;;  %v2272_v4 = vmul.f32 -1.442695, %v1770_v50  ;;  %v2493_v24 = vadd.f32 %v2492_v0, %v2491_v54 }
 0x175   : > { %2814 = vpow2.f32 %v2274_v48  ;;  %v2494_v9 = vpop.f32.mrb[62].mxu1  ;;  %v2576_v36 = vpop.f32.mrb[62].mxu0  ;;  %v1893_v11 = vadd.f32 1.0, %v2797_v1  ;;  %v1775_v12 = vadd.f32 %v3251_v63, %v1513_v59  ;;  %v1505_v33 = vadd.f32 %v1504_v34, %v3236_v37 }
 0x176   : > { %v2799_v43 = vpop.eup %2798  ;;  %v1516_v41 = vadd.f32 %v2576_v36, %v3246_v16  ;;  %v2495_v25 = vpop.f32.mrb[63].mxu1  ;;  %2816 = vrcp.f32 %v1895_v15  ;;  %v1384_v29 = vadd.f32 %v2493_v24, %v3240_v47 }
 0x177   : > { %v1507_v62 = vpop.f32.mrb[63].mxu0  ;;  %v2801_v39 = vpop.eup %2800  ;;  %v1896_v51 = vadd.f32 1.0, %v2799_v43  ;;  %v2496_v18 = vadd.f32 %v2495_v25, %v2494_v9  ;;  %2818 = vrcp.f32 %v1893_v11  ;;  %v2277_v37 = vmul.f32 -1.442695, %v1775_v12 }
 0x178   : > { %v1508_v19 = vadd.f32 %v1507_v62, %v3238_v61  ;;  %v1894_v21 = vadd.f32 1.0, %v2801_v39  ;;  %v1773_v16 = vadd.f32 %v3251_v63, %v1505_v33  ;;  %v2803_v10 = vpop.eup %2802  ;;  %v1776_v13 = vadd.f32 %v3251_v63, %v1516_v41 }
 0x179   : > { %2820 = vrcp.f32 %v1896_v51  ;;  %v2805_v52 = vpop.eup %2804  ;;  %1987 = vst [vmem:[%s3303_s10 + $0x10] sm:$0xff] %v2803_v10  ;;  %v3312_v61 = vadd.f32 %v2496_v18, %v3242_v56 }
 0x17a   : > { %v1774_v28 = vadd.f32 %v3251_v63, %v1508_v19  ;;  %2822 = vrcp.f32 %v1894_v21  ;;  %v2275_v30 = vmul.f32 -1.442695, %v1773_v16  ;;  %1985 = vst [vmem:[%s3303_s10] sm:$0xff] %v2805_v52  ;;  %v2278_v35 = vmul.f32 -1.442695, %v1776_v13  ;;  %v2497_v40 = vpop.f32.mrb[64].mxu1  ;;  %v2579_v17 = vpop.f32.mrb[64].mxu0 }
 0x17b   : > { %v2807_v7 = vpop.eup %2806  ;;  %2824 = vpow2.f32 %v2272_v4  ;;  %v1529_v47 = vadd.f32 %v2579_v17, %v3274_v42  ;;  %v2498_v49 = vpop.f32.mrb[65].mxu1 }
 0x17c   : > { %v2276_v5 = vmul.f32 -1.442695, %v1774_v28  ;;  %v2809_v53 = vpop.eup %2808  ;;  %1988 = vst [vmem:[%s3303_s10 + $0x18] sm:$0xff] %v2807_v7  ;;  %2826 = vpow2.f32 %v2277_v37  ;;  %v1520_v22 = vpop.f32.mrb[65].mxu0  ;;  %v2499_v44 = vadd.f32 %v2498_v49, %v2497_v40 }
 0x17d   : > { %v2811_v58 = vpop.eup %2810  ;;  %1986 = vst [vmem:[%s3303_s10 + $0x8] sm:$0xff] %v2809_v53  ;;  %2828 = vpow2.f32 %v2275_v30  ;;  %v1521_v56 = vadd.f32 %v1520_v22, %v3260_v6  ;;  %v2500_v27 = vpop.f32.mrb[66].mxu1  ;;  %v1779_v54 = vadd.f32 %v3251_v63, %v1529_v47 }
 0x17e   : > { %v2580_v45 = vpop.f32.mrb[66].mxu0  ;;  %v2813_v48 = vpop.eup %2812  ;;  %v1899_v50 = vadd.f32 1.0, %v2811_v58  ;;  %2830 = vpow2.f32 %v2278_v35  ;;  %v3325_v36 = vadd.f32 %v2499_v44, %v3184_v60 }
 0x17f   : > { %v1532_v55 = vadd.f32 %v2580_v45, %v3279_v3  ;;  %v2501_v23 = vpop.f32.mrb[67].mxu1  ;;  %v1523_v59 = vpop.f32.mrb[67].mxu0  ;;  %v1897_v0 = vadd.f32 1.0, %v2813_v48  ;;  %2832 = vpow2.f32 %v2276_v5  ;;  %v1777_v34 = vadd.f32 %v3251_v63, %v1521_v56 }
 0x180   : > { %v2815_v42 = vpop.eup %2814  ;;  %v2502_v1 = vadd.f32 %v2501_v23, %v2500_v27  ;;  %2834 = vrcp.f32 %v1899_v50  ;;  %v2281_v15 = vmul.f32 -1.442695, %v1779_v54  ;;  %v1524_v3 = vadd.f32 %v1523_v59, %v3265_v31 }
 0x181   : > { %v1900_v6 = vadd.f32 1.0, %v2815_v42  ;;  %v1780_v4 = vadd.f32 %v3251_v63, %v1532_v55  ;;  %v2817_v24 = vpop.eup %2816  ;;  %2836 = vrcp.f32 %v1897_v0  ;;  %v2279_v9 = vmul.f32 -1.442695, %v1777_v34 }
 0x182   : > { %v2819_v43 = vpop.eup %2818  ;;  %1991 = vst [vmem:[%s3303_s10 + $0x30] sm:$0xff] %v2817_v24  ;;  %v3329_v12 = vadd.f32 %v2502_v1, %v3186_v2  ;;  %v1778_v41 = vadd.f32 %v3251_v63, %v1524_v3  ;;  %v2503_v25 = vpop.f32.mrb[68].mxu1 }
 0x183   : > { %2838 = vrcp.f32 %v1900_v6  ;;  %v2282_v11 = vmul.f32 -1.442695, %v1780_v4  ;;  %v2821_v33 = vpop.eup %2820  ;;  %1989 = vst [vmem:[%s3303_s10 + $0x20] sm:$0xff] %v2819_v43  ;;  %v2583_v62 = vpop.f32.mrb[68].mxu0 }
 0x184   : > { %2840 = vpow2.f32 %v2281_v15  ;;  %v2823_v39 = vpop.eup %2822  ;;  %1992 = vst [vmem:[%s3303_s10 + $0x38] sm:$0xff] %v2821_v33  ;;  %v1545_v60 = vadd.f32 %v2583_v62, %v1384_v29  ;;  %v2504_v31 = vpop.f32.mrb[69].mxu1  ;;  %v2280_v19 = vmul.f32 -1.442695, %v1778_v41 }
 0x185   : > { %2842 = vpow2.f32 %v2279_v9  ;;  %v1536_v51 = vpop.f32.mrb[69].mxu0  ;;  %v2825_v18 = vpop.eup %2824  ;;  %1990 = vst [vmem:[%s3303_s10 + $0x28] sm:$0xff] %v2823_v39  ;;  %v2505_v21 = vadd.f32 %v2504_v31, %v2503_v25 }
 0x186   : > { %2844 = vpow2.f32 %v2282_v11  ;;  %v1537_v2 = vadd.f32 %v1536_v51, %v3289_v46  ;;  %v2506_v37 = vpop.f32.mrb[70].mxu1  ;;  %v2584_v16 = vpop.f32.mrb[70].mxu0  ;;  %v1898_v13 = vadd.f32 1.0, %v2825_v18  ;;  %v1783_v28 = vadd.f32 %v3251_v63, %v1545_v60 }
 0x187   : > { %v2827_v10 = vpop.eup %2826  ;;  %v1548_v52 = vadd.f32 %v2584_v16, %v3312_v61  ;;  %v2507_v30 = vpop.f32.mrb[71].mxu1  ;;  %2846 = vpow2.f32 %v2280_v19  ;;  %v1400_v27 = vadd.f32 %v2505_v21, %v3188_v8 }
 0x188   : > { %v1539_v7 = vpop.f32.mrb[71].mxu0  ;;  %v2829_v29 = vpop.eup %2828  ;;  %v1903_v35 = vadd.f32 1.0, %v2827_v10  ;;  %v1781_v5 = vadd.f32 %v3251_v63, %v1537_v2  ;;  %v2508_v40 = vadd.f32 %v2507_v30, %v2506_v37  ;;  %2848 = vrcp.f32 %v1898_v13 }
 0x189   : > { %v2831_v17 = vpop.eup %2830  ;;  %v1901_v46 = vadd.f32 1.0, %v2829_v29  ;;  %v1784_v53 = vadd.f32 %v3251_v63, %v1548_v52  ;;  %v2285_v22 = vmul.f32 -1.442695, %v1783_v28  ;;  %v1540_v61 = vadd.f32 %v1539_v7, %v3292_v57 }
 0x18a   : > { %v2833_v47 = vpop.eup %2832  ;;  %2850 = vrcp.f32 %v1903_v35  ;;  %v1904_v49 = vadd.f32 1.0, %v2831_v17  ;;  %v2283_v56 = vmul.f32 -1.442695, %v1781_v5  ;;  %v2509_v54 = vpop.f32.mrb[72].mxu1  ;;  %v1403_v23 = vadd.f32 %v2508_v40, %v3190_v14 }
 0x18b   : > { %v2835_v58 = vpop.eup %2834  ;;  %2852 = vrcp.f32 %v1901_v46  ;;  %v1902_v44 = vadd.f32 1.0, %v2833_v47  ;;  %v2286_v48 = vmul.f32 -1.442695, %v1784_v53  ;;  %v1782_v50 = vadd.f32 %v3251_v63, %v1540_v61  ;;  %v2587_v55 = vpop.f32.mrb[72].mxu0 }
 0x18c   : > { %v2837_v45 = vpop.eup %2836  ;;  %1995 = vst [vmem:[%s3303_s10 + $0x50] sm:$0xff] %v2835_v58  ;;  %2854 = vrcp.f32 %v1904_v49  ;;  %v1561_v57 = vadd.f32 %v2587_v55, %v1400_v27  ;;  %v2510_v42 = vpop.f32.mrb[73].mxu1 }
 0x18d   : > { %v2839_v59 = vpop.eup %2838  ;;  %1993 = vst [vmem:[%s3303_s10 + $0x40] sm:$0xff] %v2837_v45  ;;  %2856 = vrcp.f32 %v1902_v44  ;;  %v1552_v0 = vpop.f32.mrb[73].mxu0  ;;  %v2284_v8 = vmul.f32 -1.442695, %v1782_v50  ;;  %v2511_v1 = vadd.f32 %v2510_v42, %v2509_v54 }
 0x18e   : > { %v2841_v34 = vpop.eup %2840  ;;  %1996 = vst [vmem:[%s3303_s10 + $0x58] sm:$0xff] %v2839_v59  ;;  %2858 = vpow2.f32 %v2285_v22  ;;  %v1553_v6 = vadd.f32 %v1552_v0, %v3325_v36  ;;  %v2512_v15 = vpop.f32.mrb[74].mxu1  ;;  %v1787_v14 = vadd.f32 %v3251_v63, %v1561_v57 }
 0x18f   : > { %v2588_v4 = vpop.f32.mrb[74].mxu0  ;;  %v2843_v24 = vpop.eup %2842  ;;  %v1907_v9 = vadd.f32 1.0, %v2841_v34  ;;  %2860 = vpow2.f32 %v2283_v56  ;;  %v1408_v18 = vadd.f32 %v2511_v1, %v3192_v20 }
 0x190   : > { %v1564_v3 = vadd.f32 %v2588_v4, %v1403_v23  ;;  %v2513_v43 = vpop.f32.mrb[75].mxu1  ;;  %v1555_v11 = vpop.f32.mrb[75].mxu0  ;;  %v1905_v41 = vadd.f32 1.0, %v2843_v24  ;;  %2862 = vpow2.f32 %v2286_v48  ;;  %v1785_v25 = vadd.f32 %v3251_v63, %v1553_v6 }
 0x191   : > { %v2845_v33 = vpop.eup %2844  ;;  %v2514_v62 = vadd.f32 %v2513_v43, %v2512_v15  ;;  %2864 = vrcp.f32 %v1907_v9  ;;  %v2289_v31 = vmul.f32 -1.442695, %v1787_v14  ;;  %v1556_v51 = vadd.f32 %v1555_v11, %v3329_v12 }
 0x192   : > { %v1908_v39 = vadd.f32 1.0, %v2845_v33  ;;  %v1788_v36 = vadd.f32 %v3251_v63, %v1564_v3  ;;  %v2847_v60 = vpop.eup %2846  ;;  %2866 = vrcp.f32 %v1905_v41  ;;  %v2287_v2 = vmul.f32 -1.442695, %v1785_v25  ;;  %v2515_v28 = vpop.f32.mrb[76].mxu1 }
 0x193   : > { %v2849_v19 = vpop.eup %2848  ;;  %v1906_v21 = vadd.f32 1.0, %v2847_v60  ;;  %v1411_v37 = vadd.f32 %v2514_v62, %v3194_v26  ;;  %v1786_v13 = vadd.f32 %v3251_v63, %v1556_v51  ;;  %v2591_v52 = vpop.f32.mrb[76].mxu0 }
 0x194   : > { %2868 = vrcp.f32 %v1908_v39  ;;  %v2851_v16 = vpop.eup %2850  ;;  %1994 = vst [vmem:[%s3303_s10 + $0x48] sm:$0xff] %v2849_v19  ;;  %v2290_v10 = vmul.f32 -1.442695, %v1788_v36  ;;  %v2516_v20 = vpop.f32.mrb[77].mxu1 }
 0x195   : > { %2870 = vpow2.f32 %v2284_v8  ;;  %v2853_v30 = vpop.eup %2852  ;;  %1999 = vst [vmem:[%s3303_s10 + $0x70] sm:$0xff] %v2851_v16  ;;  %v1568_v12 = vpop.f32.mrb[77].mxu0  ;;  %v2288_v29 = vmul.f32 -1.442695, %v1786_v13  ;;  %v2517_v26 = vadd.f32 %v2516_v20, %v2515_v28 }
 0x196   : > { %2872 = vrcp.f32 %v1906_v21  ;;  %v2855_v7 = vpop.eup %2854  ;;  %1997 = vst [vmem:[%s3303_s10 + $0x60] sm:$0xff] %v2853_v30  ;;  %v1569_v35 = vadd.f32 %v1568_v12, %v1408_v18  ;;  %v2518_v5 = vpop.f32.mrb[78].mxu1 }
 0x197   : > { %2874 = vpow2.f32 %v2289_v31  ;;  %v2592_v40 = vpop.f32.mrb[78].mxu0  ;;  %v2857_v17 = vpop.eup %2856  ;;  %2000 = vst [vmem:[%s3303_s10 + $0x78] sm:$0xff] %v2855_v7  ;;  %v1416_v49 = vadd.f32 %v2517_v26, %v3196_v32 }
 0x198   : > { %2876 = vpow2.f32 %v2287_v2  ;;  %v2519_v46 = vpop.f32.mrb[79].mxu1  ;;  %v1571_v53 = vpop.f32.mrb[79].mxu0  ;;  %1998 = vst [vmem:[%s3303_s10 + $0x68] sm:$0xff] %v2857_v17  ;;  %v1789_v22 = vadd.f32 %v3251_v63, %v1569_v35 }
 0x199   : > { %v2859_v47 = vpop.eup %2858  ;;  %2878 = vpow2.f32 %v2290_v10  ;;  %v2520_v61 = vadd.f32 %v2519_v46, %v2518_v5  ;;  %v1572_v56 = vadd.f32 %v1571_v53, %v1411_v37  ;;  %v1577_v48 = vadd.f32 %v2591_v52, %v1416_v49 }
 0x19a   : > { %v2861_v58 = vpop.eup %2860  ;;  %v1911_v44 = vadd.f32 1.0, %v2859_v47  ;;  %2880 = vpow2.f32 %v2288_v29  ;;  %v2291_v50 = vmul.f32 -1.442695, %v1789_v22 }
 0x19b   : > { %v2863_v27 = vpop.eup %2862  ;;  %v1909_v45 = vadd.f32 1.0, %v2861_v58  ;;  %v1419_v54 = vadd.f32 %v2520_v61, %v3198_v38  ;;  %v1790_v32 = vadd.f32 %v3251_v63, %v1572_v56  ;;  %v1791_v57 = vadd.f32 %v3251_v63, %v1577_v48 }
 0x19c   : > { %v2865_v55 = vpop.eup %2864  ;;  %2882 = vrcp.f32 %v1911_v44  ;;  %v1912_v23 = vadd.f32 1.0, %v2863_v27 }
 0x19d   : > { %v2867_v59 = vpop.eup %2866  ;;  %2003 = vst [vmem:[%s3303_s10 + $0x90] sm:$0xff] %v2865_v55  ;;  %2884 = vrcp.f32 %v1909_v45  ;;  %v1580_v42 = vadd.f32 %v2592_v40, %v1419_v54  ;;  %v2292_v34 = vmul.f32 -1.442695, %v1790_v32  ;;  %v2293_v1 = vmul.f32 -1.442695, %v1791_v57 }
 0x19e   : > { %v2869_v0 = vpop.eup %2868  ;;  %2001 = vst [vmem:[%s3303_s10 + $0x80] sm:$0xff] %v2867_v59  ;;  %2886 = vrcp.f32 %v1912_v23 }
 0x19f   : > { %v2871_v8 = vpop.eup %2870  ;;  %2004 = vst [vmem:[%s3303_s10 + $0x98] sm:$0xff] %v2869_v0  ;;  %2888 = vpow2.f32 %v2291_v50  ;;  %v1792_v38 = vadd.f32 %v3251_v63, %v1580_v42 }
 0x1a0   : > { %v2873_v6 = vpop.eup %2872  ;;  %v1910_v15 = vadd.f32 1.0, %v2871_v8  ;;  %2890 = vpow2.f32 %v2292_v34 }
 0x1a1   : > { %v2875_v4 = vpop.eup %2874  ;;  %2002 = vst [vmem:[%s3303_s10 + $0x88] sm:$0xff] %v2873_v6  ;;  %2892 = vpow2.f32 %v2293_v1  ;;  %v2294_v24 = vmul.f32 -1.442695, %v1792_v38 }
 0x1a2   : > { %v2877_v9 = vpop.eup %2876  ;;  %2894 = vrcp.f32 %v1910_v15  ;;  %v1915_v14 = vadd.f32 1.0, %v2875_v4 }
 0x1a3   : > { %v2879_v3 = vpop.eup %2878  ;;  %v1913_v43 = vadd.f32 1.0, %v2877_v9  ;;  %2896 = vpow2.f32 %v2294_v24 }
 0x1a4   : > { %v2881_v11 = vpop.eup %2880  ;;  %2898 = vrcp.f32 %v1915_v14  ;;  %v1916_v33 = vadd.f32 1.0, %v2879_v3 }
 0x1a5   : > { %2900 = vrcp.f32 %v1913_v43  ;;  %v1914_v63 = vadd.f32 1.0, %v2881_v11 }
 0x1a6   : > { %v2883_v41 = vpop.eup %2882  ;;  %2902 = vrcp.f32 %v1916_v33 }
 0x1a7   : > { %v2885_v25 = vpop.eup %2884  ;;  %2007 = vst [vmem:[%s3303_s10 + $0xb0] sm:$0xff] %v2883_v41  ;;  %2904 = vrcp.f32 %v1914_v63 }
 0x1a8   : > { %v2887_v62 = vpop.eup %2886  ;;  %2005 = vst [vmem:[%s3303_s10 + $0xa0] sm:$0xff] %v2885_v25 }
 0x1a9   : > { %v2889_v39 = vpop.eup %2888  ;;  %2008 = vst [vmem:[%s3303_s10 + $0xb8] sm:$0xff] %v2887_v62 }
 0x1aa   : > { %v2891_v36 = vpop.eup %2890  ;;  %v1917_v60 = vadd.f32 1.0, %v2889_v39 }
 0x1ab   : > { %v2893_v31 = vpop.eup %2892  ;;  %v1918_v51 = vadd.f32 1.0, %v2891_v36 }
 0x1ac   : > { %v2895_v18 = vpop.eup %2894  ;;  %v1919_v19 = vadd.f32 1.0, %v2893_v31  ;;  %2906 = vrcp.f32 %v1917_v60 }
 0x1ad   : > { %v2897_v21 = vpop.eup %2896  ;;  %2006 = vst [vmem:[%s3303_s10 + $0xa8] sm:$0xff] %v2895_v18  ;;  %2908 = vrcp.f32 %v1918_v51 }
 0x1ae   : > { %v2899_v2 = vpop.eup %2898  ;;  %2910 = vrcp.f32 %v1919_v19  ;;  %v1920_v37 = vadd.f32 1.0, %v2897_v21 }
 0x1af   : > { %v2901_v16 = vpop.eup %2900  ;;  %2011 = vst [vmem:[%s3303_s10 + $0xd0] sm:$0xff] %v2899_v2 }
 0x1b0   : > { %v2903_v10 = vpop.eup %2902  ;;  %2009 = vst [vmem:[%s3303_s10 + $0xc0] sm:$0xff] %v2901_v16  ;;  %2912 = vrcp.f32 %v1920_v37 }
 0x1b1   : > { %v2905_v13 = vpop.eup %2904  ;;  %2012 = vst [vmem:[%s3303_s10 + $0xd8] sm:$0xff] %v2903_v10 }
 0x1b2   : > { %2010 = vst [vmem:[%s3303_s10 + $0xc8] sm:$0xff] %v2905_v13 }
 0x1b6   : > { %v2907_v28 = vpop.eup %2906 }
 0x1b7   : > { %v2909_v52 = vpop.eup %2908  ;;  %2013 = vst [vmem:[%s3303_s10 + $0xe0] sm:$0xff] %v2907_v28 }
 0x1b8   : > { %v2911_v30 = vpop.eup %2910  ;;  %2014 = vst [vmem:[%s3303_s10 + $0xe8] sm:$0xff] %v2909_v52 }
 0x1b9   : > { %2015 = vst [vmem:[%s3303_s10 + $0xf0] sm:$0xff] %v2911_v30 }
 0x1ba   : > { %v2913_v20 = vpop.eup %2912 }
 0x1bb   : > { %2016 = vst [vmem:[%s3303_s10 + $0xf8] sm:$0xff] %v2913_v20 }
 0x1bc PF: > { %s13_s14 = sadd.s32 1, %s2936_s14   ;;  %s3395_s12 = smov %s2932_s13 }
 0x1bd   : > { %p10_p5 = scmp.ge.s32.totalorder %s13_s14, 4   ;;  %s3396_s13 = smov %s3398_s15 }
 0x1bf   :  { %12 = sbr.rel (!%p10_p5) target bundleno = 2 (0x2), region = 80 }

</bundles_post_ra>
